<compile_context>
chip_gen: v5e
topology: v5e:2x2
jax: 0.10.0
libtpu: 0.0.40
codegen_flags: <defaults>
</compile_context>

<pallas_src>
import jax
import jax.numpy as jnp
from jax import lax
from jax.experimental import pallas as pl
from jax.experimental.pallas import tpu as pltpu

HIDDEN = 128
N_LAYERS = 2
NUM_FEATS = 3
EMB_OUT = 20
INPUT_SIZE = 1 + NUM_FEATS + EMB_OUT  # 24


def rnn_kernel(gi0_ref, h0_ref, wfused_ref,
               bhh0n_ref, b1c_ref, bhh1n_ref,
               wout_ref, bout_ref,
               y_ref, hout_ref,
               h1hist_ref):
    # gi0_ref:   (T, B, 3H) bf16  precomputed layer-0 input projection (+ combined biases)
    # h0_ref:    (2, B, H)  f32   initial hidden states
    # wfused_ref:(2H, 9H)   bf16  block-structured [[whh0^T, wih1^T, 0], [0, 0, whh1^T]]
    # bhh0n/bhh1n: (1, H)   f32   hidden-bias of the n gate (must stay inside r*(...))
    # b1c:       (1, 3H)    f32   layer-1 input bias with hh r/z biases folded in
    # wout: (1, H) f32, bout: (1, 1) f32
    # y_ref: (1, T*B) f32, hout_ref: (2, B, H) f32
    # h1hist_ref: VMEM scratch (T, B, H) f32, lane-dense per-step h1 history
    T, B, _ = gi0_ref.shape
    H = HIDDEN
    f32 = jnp.float32
    bf16 = jnp.bfloat16

    wfused = wfused_ref[...]                                    # (2H, 9H) bf16, resident

    # Hoist + pre-broadcast biases once (JAX does not CSE broadcast_in_dim per iteration).
    bhh0n = jnp.broadcast_to(bhh0n_ref[...], (B, H))
    bhh1n = jnp.broadcast_to(bhh1n_ref[...], (B, H))
    b1c = jnp.broadcast_to(b1c_ref[...], (B, 3 * H))

    h0_init = h0_ref[0]
    h1_init = h0_ref[1]

    # Prologue: layer-0 recurrent projection for step 0 (whh0^T occupies wfused[:H, :3H]).
    gh0_init = jnp.dot(h0_init.astype(bf16), wfused[:H, :3 * H],
                       preferred_element_type=f32)              # (B, 3H)

    def body(t, carry):
        h0, h1, gh0 = carry                                     # f32 (B,H),(B,H),(B,3H)

        # ---- layer 0 (input proj hoisted; recurrent proj gh0 carried from prev step) ----
        gi0 = gi0_ref[t].astype(f32)                            # (B, 3H)
        rz0 = jax.nn.sigmoid(gi0[:, :2 * H] + gh0[:, :2 * H])
        r0 = rz0[:, :H]
        z0 = rz0[:, H:]
        n0 = jnp.tanh(gi0[:, 2 * H:] + r0 * (gh0[:, 2 * H:] + bhh0n))
        h0n = n0 + z0 * (h0 - n0)
        # TODO(synk): nn.GRU inter-layer dropout(0.2) is a training-mode op; eval semantics used.

        # ---- single fused recurrent matmul: [gh0(t+1) | gi1(t) | gh1(t)] ----
        lhs = jnp.concatenate([h0n, h1], axis=-1).astype(bf16)   # (B, 2H)
        fused = jnp.dot(lhs, wfused, preferred_element_type=f32)  # (B, 9H)
        gh0n = fused[:, :3 * H]
        gi1 = fused[:, 3 * H:6 * H] + b1c
        gh1 = fused[:, 6 * H:]

        # ---- layer 1 ----
        rz1 = jax.nn.sigmoid(gi1[:, :2 * H] + gh1[:, :2 * H])
        r1 = rz1[:, :H]
        z1 = rz1[:, H:]
        n1 = jnp.tanh(gi1[:, 2 * H:] + r1 * (gh1[:, 2 * H:] + bhh1n))
        h1n = n1 + z1 * (h1 - n1)

        h1hist_ref[t] = h1n                                      # lane-dense (B, 128) store
        return (h0n, h1n, gh0n)

    unroll = True if T <= 16 else 4
    h0f, h1f, _ = lax.fori_loop(0, T, body, (h0_init, h1_init, gh0_init),
                                unroll=unroll)
    hout_ref[0] = h0f
    hout_ref[1] = h1f

    # Lane-dense output projection (Linear(128,1)): y^T = wout_row @ hist^T + bout -> (1, T*B).
    hist = h1hist_ref[...].reshape(T * B, H)                     # (T*B, 128)
    yT = lax.dot_general(wout_ref[...], hist,
                         dimension_numbers=(((1,), (1,)), ((), ())),
                         preferred_element_type=f32) + bout_ref[...]
    y_ref[...] = yT                                              # (1, T*B)


def init_params(key):
    """Deterministic synthetic params matching torch.nn.GRU / nn.Linear shapes."""
    k = 1.0 / jnp.sqrt(jnp.float32(HIDDEN))
    keys = jax.random.split(key, 10)

    def u(kk, shape):
        return jax.random.uniform(kk, shape, jnp.float32, -k, k)

    return dict(
        wih0=u(keys[0], (3 * HIDDEN, INPUT_SIZE)),   # GRU layer 0 weight_ih_l0
        whh0=u(keys[1], (3 * HIDDEN, HIDDEN)),       # weight_hh_l0
        bih0=u(keys[2], (3 * HIDDEN,)),              # bias_ih_l0
        bhh0=u(keys[3], (3 * HIDDEN,)),              # bias_hh_l0
        wih1=u(keys[4], (3 * HIDDEN, HIDDEN)),       # weight_ih_l1
        whh1=u(keys[5], (3 * HIDDEN, HIDDEN)),       # weight_hh_l1
        bih1=u(keys[6], (3 * HIDDEN,)),              # bias_ih_l1
        bhh1=u(keys[7], (3 * HIDDEN,)),              # bias_hh_l1
        wout=u(keys[8], (1, HIDDEN)),                # nn.Linear(128, 1).weight
        bout=u(keys[9], (1,)),                       # nn.Linear(128, 1).bias
    )


@jax.jit
def rnn_forward(x, h0, params):
    """x: (B, T, 24) float32, h0: (2, B, 128) float32 -> (y (B,T,1), h_state (2,B,128))."""
    B, T, _ = x.shape
    H = HIDDEN
    x = x.astype(jnp.float32)
    h0 = h0.astype(jnp.float32)

    # Pad batch to the f32 sublane height (8): full vreg rows / MXU M rows, sliced back below.
    Bp = ((B + 7) // 8) * 8
    if Bp != B:
        x = jnp.pad(x, ((0, Bp - B), (0, 0), (0, 0)))
        h0 = jnp.pad(h0, ((0, 0), (0, Bp - B), (0, 0)))

    # Combined biases: fold bih+bhh for the r/z gates, keep only bhh_n separate.
    def combine(bih, bhh):
        return jnp.concatenate([bih[:2 * H] + bhh[:2 * H], bih[2 * H:]])

    b0c = combine(params['bih0'], params['bhh0'])                    # (3H,)
    b1c = combine(params['bih1'], params['bhh1'])                    # (3H,)

    # Hoisted layer-0 input projection, fused with the (B,T,D)->(T,B,D) transpose.
    # Stored bf16 to halve the only O(T*B) operand; gate math stays f32 in the kernel.
    gi0 = (jnp.einsum('btd,gd->tbg', x, params['wih0'])
           + b0c[None, None, :]).astype(jnp.bfloat16)                # (T, Bp, 3H)

    # Block-structured fused recurrent weight (built once): one MXU matmul per step
    # computes [gh0(t+1) | gi1(t) | gh1(t)] from LHS = [h0n(t), h1(t-1)] (K=256).
    bf16 = jnp.bfloat16
    wfused = jnp.zeros((2 * H, 9 * H), jnp.float32)
    wfused = wfused.at[:H, :3 * H].set(params['whh0'].T)             # gh0 block
    wfused = wfused.at[:H, 3 * H:6 * H].set(params['wih1'].T)        # gi1 block
    wfused = wfused.at[H:, 6 * H:].set(params['whh1'].T)             # gh1 block
    wfused = wfused.astype(bf16)

    args = (
        gi0, h0, wfused,
        params['bhh0'][2 * H:].reshape(1, H),
        b1c.reshape(1, 3 * H),
        params['bhh1'][2 * H:].reshape(1, H),
        params['wout'].reshape(1, H),
        params['bout'].reshape(1, 1),
    )
    vmem = pl.BlockSpec(memory_space=pltpu.MemorySpace.VMEM)

    y_row, h_out = pl.pallas_call(
        rnn_kernel,
        out_shape=(jax.ShapeDtypeStruct((1, T * Bp), jnp.float32),
                   jax.ShapeDtypeStruct((N_LAYERS, Bp, H), jnp.float32)),
        in_specs=[vmem] * len(args),
        out_specs=(vmem, vmem),
        scratch_shapes=[pltpu.VMEM((T, Bp, H), jnp.float32)],
        compiler_params=pltpu.CompilerParams(
            vmem_limit_bytes=64 * 1024 * 1024),
    )(*args)

    y = jnp.transpose(y_row.reshape(T, Bp)[:, :B], (1, 0))[:, :, None]   # (B, T, 1) batch_first
    return y, h_out[:, :B]


if __name__ == "__main__":
    key = jax.random.PRNGKey(0)
    pkey, xkey = jax.random.split(key)
    params = init_params(pkey)

    B, T = 2, 8
    x = jax.random.normal(xkey, (B, T, INPUT_SIZE), jnp.float32)
    h0 = jnp.zeros((N_LAYERS, B, HIDDEN), jnp.float32)

    y, h_state = rnn_forward(x, h0, params)
    jax.block_until_ready((y, h_state))

    assert y.shape == (B, T, 1), y.shape
    assert h_state.shape == (N_LAYERS, B, HIDDEN), h_state.shape
    assert bool(jnp.all(jnp.isfinite(y))) and bool(jnp.all(jnp.isfinite(h_state)))
    print("KERNEL_OK")
</pallas_src>

<mosaic_0001>
module attributes {stable_mosaic.version = 11 : i64} {
  func.func @rnn_kernel(%arg0: memref<8x8x384xbf16, #tpu.memory_space<vmem>>, %arg1: memref<2x8x128xf32, #tpu.memory_space<vmem>>, %arg2: memref<256x1152xbf16, #tpu.memory_space<vmem>>, %arg3: memref<1x128xf32, #tpu.memory_space<vmem>>, %arg4: memref<1x384xf32, #tpu.memory_space<vmem>>, %arg5: memref<1x128xf32, #tpu.memory_space<vmem>>, %arg6: memref<1x128xf32, #tpu.memory_space<vmem>>, %arg7: memref<1x1xf32, #tpu.memory_space<vmem>>, %arg8: memref<1x64xf32, #tpu.memory_space<vmem>>, %arg9: memref<2x8x128xf32, #tpu.memory_space<vmem>>, %arg10: memref<8x8x128xf32, #tpu.memory_space<vmem>>) attributes {dimension_semantics = [], scalar_prefetch = 0 : i64, scratch_operands = 1 : i64, tpu.core_type = #tpu.core_type<tc>} {
    %c0 = arith.constant 0 : index
    %c0_0 = arith.constant 0 : index
    %0 = vector.load %arg2[%c0, %c0_0] : memref<256x1152xbf16, #tpu.memory_space<vmem>>, vector<256x1152xbf16>
    %c0_1 = arith.constant 0 : index
    %c0_2 = arith.constant 0 : index
    %1 = vector.load %arg3[%c0_1, %c0_2] : memref<1x128xf32, #tpu.memory_space<vmem>>, vector<1x128xf32>
    %2 = vector.shape_cast %1 : vector<1x128xf32> to vector<1x128xf32>
    %3 = vector.broadcast %2 : vector<1x128xf32> to vector<8x128xf32>
    %c0_3 = arith.constant 0 : index
    %c0_4 = arith.constant 0 : index
    %4 = vector.load %arg5[%c0_3, %c0_4] : memref<1x128xf32, #tpu.memory_space<vmem>>, vector<1x128xf32>
    %5 = vector.shape_cast %4 : vector<1x128xf32> to vector<1x128xf32>
    %6 = vector.broadcast %5 : vector<1x128xf32> to vector<8x128xf32>
    %c0_5 = arith.constant 0 : index
    %c0_6 = arith.constant 0 : index
    %7 = vector.load %arg4[%c0_5, %c0_6] : memref<1x384xf32, #tpu.memory_space<vmem>>, vector<1x384xf32>
    %8 = vector.shape_cast %7 : vector<1x384xf32> to vector<1x384xf32>
    %9 = vector.broadcast %8 : vector<1x384xf32> to vector<8x384xf32>
    %c0_7 = arith.constant 0 : index
    %c0_8 = arith.constant 0 : index
    %c0_9 = arith.constant 0 : index
    %10 = vector.load %arg1[%c0_7, %c0_8, %c0_9] : memref<2x8x128xf32, #tpu.memory_space<vmem>>, vector<1x8x128xf32>
    %11 = vector.shape_cast %10 : vector<1x8x128xf32> to vector<8x128xf32>
    %c1 = arith.constant 1 : index
    %c0_10 = arith.constant 0 : index
    %c0_11 = arith.constant 0 : index
    %12 = vector.load %arg1[%c1, %c0_10, %c0_11] : memref<2x8x128xf32, #tpu.memory_space<vmem>>, vector<1x8x128xf32>
    %13 = vector.shape_cast %12 : vector<1x8x128xf32> to vector<8x128xf32>
    %14 = arith.truncf %11 : vector<8x128xf32> to vector<8x128xbf16>
    %15 = vector.extract_strided_slice %0 {offsets = [0, 0], sizes = [128, 384], strides = [1, 1]} : vector<256x1152xbf16> to vector<128x384xbf16>
    %cst = arith.constant dense<0.000000e+00> : vector<8x384xf32>
    %16 = tpu.matmul %14, %15, %cst {dimension_numbers = #tpu.dot_dimension_numbers<[1], [0], [0], [1], [0, 0, 1, 1], [], []>} : vector<8x128xbf16>, vector<128x384xbf16>, vector<8x384xf32> -> vector<8x384xf32>
    %c0_i32 = arith.constant 0 : i32
    %17 = arith.index_cast %c0_i32 : i32 to index
    %c0_12 = arith.constant 0 : index
    %c0_13 = arith.constant 0 : index
    %18 = vector.load %arg0[%17, %c0_12, %c0_13] : memref<8x8x384xbf16, #tpu.memory_space<vmem>>, vector<1x8x384xbf16>
    %19 = vector.shape_cast %18 : vector<1x8x384xbf16> to vector<8x384xbf16>
    %20 = arith.extf %19 : vector<8x384xbf16> to vector<8x384xf32>
    %21 = vector.extract_strided_slice %20 {offsets = [0, 0], sizes = [8, 256], strides = [1, 1]} : vector<8x384xf32> to vector<8x256xf32>
    %22 = vector.extract_strided_slice %16 {offsets = [0, 0], sizes = [8, 256], strides = [1, 1]} : vector<8x384xf32> to vector<8x256xf32>
    %23 = arith.addf %21, %22 : vector<8x256xf32>
    %24 = arith.negf %23 : vector<8x256xf32>
    %25 = math.exp %24 : vector<8x256xf32>
    %cst_14 = arith.constant 1.000000e+00 : f32
    %26 = vector.broadcast %cst_14 : f32 to vector<8x256xf32>
    %27 = arith.addf %26, %25 : vector<8x256xf32>
    %28 = arith.divf %26, %27 : vector<8x256xf32>
    %29 = vector.extract_strided_slice %28 {offsets = [0, 0], sizes = [8, 128], strides = [1, 1]} : vector<8x256xf32> to vector<8x128xf32>
    %30 = vector.extract_strided_slice %28 {offsets = [0, 128], sizes = [8, 128], strides = [1, 1]} : vector<8x256xf32> to vector<8x128xf32>
    %31 = vector.extract_strided_slice %20 {offsets = [0, 256], sizes = [8, 128], strides = [1, 1]} : vector<8x384xf32> to vector<8x128xf32>
    %32 = vector.extract_strided_slice %16 {offsets = [0, 256], sizes = [8, 128], strides = [1, 1]} : vector<8x384xf32> to vector<8x128xf32>
    %33 = arith.addf %32, %3 : vector<8x128xf32>
    %34 = arith.mulf %29, %33 : vector<8x128xf32>
    %35 = arith.addf %31, %34 : vector<8x128xf32>
    %36 = math.tanh %35 : vector<8x128xf32>
    %37 = arith.subf %11, %36 : vector<8x128xf32>
    %38 = arith.mulf %30, %37 : vector<8x128xf32>
    %39 = arith.addf %36, %38 : vector<8x128xf32>
    %40 = tpu.concatenate %39, %13 in 1 : vector<8x128xf32>, vector<8x128xf32> -> vector<8x256xf32>
    %41 = arith.truncf %40 : vector<8x256xf32> to vector<8x256xbf16>
    %cst_15 = arith.constant dense<0.000000e+00> : vector<8x1152xf32>
    %42 = tpu.matmul %41, %0, %cst_15 {dimension_numbers = #tpu.dot_dimension_numbers<[1], [0], [0], [1], [0, 0, 1, 1], [], []>} : vector<8x256xbf16>, vector<256x1152xbf16>, vector<8x1152xf32> -> vector<8x1152xf32>
    %43 = vector.extract_strided_slice %42 {offsets = [0, 0], sizes = [8, 384], strides = [1, 1]} : vector<8x1152xf32> to vector<8x384xf32>
    %44 = vector.extract_strided_slice %42 {offsets = [0, 384], sizes = [8, 384], strides = [1, 1]} : vector<8x1152xf32> to vector<8x384xf32>
    %45 = arith.addf %44, %9 : vector<8x384xf32>
    %46 = vector.extract_strided_slice %42 {offsets = [0, 768], sizes = [8, 384], strides = [1, 1]} : vector<8x1152xf32> to vector<8x384xf32>
    %47 = vector.extract_strided_slice %45 {offsets = [0, 0], sizes = [8, 256], strides = [1, 1]} : vector<8x384xf32> to vector<8x256xf32>
    %48 = vector.extract_strided_slice %46 {offsets = [0, 0], sizes = [8, 256], strides = [1, 1]} : vector<8x384xf32> to vector<8x256xf32>
    %49 = arith.addf %47, %48 : vector<8x256xf32>
    %50 = arith.negf %49 : vector<8x256xf32>
    %51 = math.exp %50 : vector<8x256xf32>
    %cst_16 = arith.constant 1.000000e+00 : f32
    %52 = vector.broadcast %cst_16 : f32 to vector<8x256xf32>
    %53 = arith.addf %52, %51 : vector<8x256xf32>
    %54 = arith.divf %52, %53 : vector<8x256xf32>
    %55 = vector.extract_strided_slice %54 {offsets = [0, 0], sizes = [8, 128], strides = [1, 1]} : vector<8x256xf32> to vector<8x128xf32>
    %56 = vector.extract_strided_slice %54 {offsets = [0, 128], sizes = [8, 128], strides = [1, 1]} : vector<8x256xf32> to vector<8x128xf32>
    %57 = vector.extract_strided_slice %45 {offsets = [0, 256], sizes = [8, 128], strides = [1, 1]} : vector<8x384xf32> to vector<8x128xf32>
    %58 = vector.extract_strided_slice %46 {offsets = [0, 256], sizes = [8, 128], strides = [1, 1]} : vector<8x384xf32> to vector<8x128xf32>
    %59 = arith.addf %58, %6 : vector<8x128xf32>
    %60 = arith.mulf %55, %59 : vector<8x128xf32>
    %61 = arith.addf %57, %60 : vector<8x128xf32>
    %62 = math.tanh %61 : vector<8x128xf32>
    %63 = arith.subf %13, %62 : vector<8x128xf32>
    %64 = arith.mulf %56, %63 : vector<8x128xf32>
    %65 = arith.addf %62, %64 : vector<8x128xf32>
    %66 = arith.index_cast %c0_i32 : i32 to index
    %c0_17 = arith.constant 0 : index
    %c0_18 = arith.constant 0 : index
    %67 = vector.load %arg10[%66, %c0_17, %c0_18] : memref<8x8x128xf32, #tpu.memory_space<vmem>>, vector<1x8x128xf32>
    %68 = vector.shape_cast %67 : vector<1x8x128xf32> to vector<8x128xf32>
    %69 = vector.shape_cast %65 : vector<8x128xf32> to vector<1x8x128xf32>
    tpu.vector_store %arg10[%66, %c0_17, %c0_18], %69 {strides = array<i32>} : memref<8x8x128xf32, #tpu.memory_space<vmem>>, vector<1x8x128xf32>,
    %c1_i32 = arith.constant 1 : i32
    %70 = arith.index_cast %c1_i32 : i32 to index
    %c0_19 = arith.constant 0 : index
    %c0_20 = arith.constant 0 : index
    %71 = vector.load %arg0[%70, %c0_19, %c0_20] : memref<8x8x384xbf16, #tpu.memory_space<vmem>>, vector<1x8x384xbf16>
    %72 = vector.shape_cast %71 : vector<1x8x384xbf16> to vector<8x384xbf16>
    %73 = arith.extf %72 : vector<8x384xbf16> to vector<8x384xf32>
    %74 = vector.extract_strided_slice %73 {offsets = [0, 0], sizes = [8, 256], strides = [1, 1]} : vector<8x384xf32> to vector<8x256xf32>
    %75 = vector.extract_strided_slice %43 {offsets = [0, 0], sizes = [8, 256], strides = [1, 1]} : vector<8x384xf32> to vector<8x256xf32>
    %76 = arith.addf %74, %75 : vector<8x256xf32>
    %77 = arith.negf %76 : vector<8x256xf32>
    %78 = math.exp %77 : vector<8x256xf32>
    %cst_21 = arith.constant 1.000000e+00 : f32
    %79 = vector.broadcast %cst_21 : f32 to vector<8x256xf32>
    %80 = arith.addf %79, %78 : vector<8x256xf32>
    %81 = arith.divf %79, %80 : vector<8x256xf32>
    %82 = vector.extract_strided_slice %81 {offsets = [0, 0], sizes = [8, 128], strides = [1, 1]} : vector<8x256xf32> to vector<8x128xf32>
    %83 = vector.extract_strided_slice %81 {offsets = [0, 128], sizes = [8, 128], strides = [1, 1]} : vector<8x256xf32> to vector<8x128xf32>
    %84 = vector.extract_strided_slice %73 {offsets = [0, 256], sizes = [8, 128], strides = [1, 1]} : vector<8x384xf32> to vector<8x128xf32>
    %85 = vector.extract_strided_slice %43 {offsets = [0, 256], sizes = [8, 128], strides = [1, 1]} : vector<8x384xf32> to vector<8x128xf32>
    %86 = arith.addf %85, %3 : vector<8x128xf32>
    %87 = arith.mulf %82, %86 : vector<8x128xf32>
    %88 = arith.addf %84, %87 : vector<8x128xf32>
    %89 = math.tanh %88 : vector<8x128xf32>
    %90 = arith.subf %39, %89 : vector<8x128xf32>
    %91 = arith.mulf %83, %90 : vector<8x128xf32>
    %92 = arith.addf %89, %91 : vector<8x128xf32>
    %93 = tpu.concatenate %92, %65 in 1 : vector<8x128xf32>, vector<8x128xf32> -> vector<8x256xf32>
    %94 = arith.truncf %93 : vector<8x256xf32> to vector<8x256xbf16>
    %cst_22 = arith.constant dense<0.000000e+00> : vector<8x1152xf32>
    %95 = tpu.matmul %94, %0, %cst_22 {dimension_numbers = #tpu.dot_dimension_numbers<[1], [0], [0], [1], [0, 0, 1, 1], [], []>} : vector<8x256xbf16>, vector<256x1152xbf16>, vector<8x1152xf32> -> vector<8x1152xf32>
    %96 = vector.extract_strided_slice %95 {offsets = [0, 0], sizes = [8, 384], strides = [1, 1]} : vector<8x1152xf32> to vector<8x384xf32>
    %97 = vector.extract_strided_slice %95 {offsets = [0, 384], sizes = [8, 384], strides = [1, 1]} : vector<8x1152xf32> to vector<8x384xf32>
    %98 = arith.addf %97, %9 : vector<8x384xf32>
    %99 = vector.extract_strided_slice %95 {offsets = [0, 768], sizes = [8, 384], strides = [1, 1]} : vector<8x1152xf32> to vector<8x384xf32>
    %100 = vector.extract_strided_slice %98 {offsets = [0, 0], sizes = [8, 256], strides = [1, 1]} : vector<8x384xf32> to vector<8x256xf32>
    %101 = vector.extract_strided_slice %99 {offsets = [0, 0], sizes = [8, 256], strides = [1, 1]} : vector<8x384xf32> to vector<8x256xf32>
    %102 = arith.addf %100, %101 : vector<8x256xf32>
    %103 = arith.negf %102 : vector<8x256xf32>
    %104 = math.exp %103 : vector<8x256xf32>
    %cst_23 = arith.constant 1.000000e+00 : f32
    %105 = vector.broadcast %cst_23 : f32 to vector<8x256xf32>
    %106 = arith.addf %105, %104 : vector<8x256xf32>
    %107 = arith.divf %105, %106 : vector<8x256xf32>
    %108 = vector.extract_strided_slice %107 {offsets = [0, 0], sizes = [8, 128], strides = [1, 1]} : vector<8x256xf32> to vector<8x128xf32>
    %109 = vector.extract_strided_slice %107 {offsets = [0, 128], sizes = [8, 128], strides = [1, 1]} : vector<8x256xf32> to vector<8x128xf32>
    %110 = vector.extract_strided_slice %98 {offsets = [0, 256], sizes = [8, 128], strides = [1, 1]} : vector<8x384xf32> to vector<8x128xf32>
    %111 = vector.extract_strided_slice %99 {offsets = [0, 256], sizes = [8, 128], strides = [1, 1]} : vector<8x384xf32> to vector<8x128xf32>
    %112 = arith.addf %111, %6 : vector<8x128xf32>
    %113 = arith.mulf %108, %112 : vector<8x128xf32>
    %114 = arith.addf %110, %113 : vector<8x128xf32>
    %115 = math.tanh %114 : vector<8x128xf32>
    %116 = arith.subf %65, %115 : vector<8x128xf32>
    %117 = arith.mulf %109, %116 : vector<8x128xf32>
    %118 = arith.addf %115, %117 : vector<8x128xf32>
    %119 = arith.index_cast %c1_i32 : i32 to index
    %c0_24 = arith.constant 0 : index
    %c0_25 = arith.constant 0 : index
    %120 = vector.load %arg10[%119, %c0_24, %c0_25] : memref<8x8x128xf32, #tpu.memory_space<vmem>>, vector<1x8x128xf32>
    %121 = vector.shape_cast %120 : vector<1x8x128xf32> to vector<8x128xf32>
    %122 = vector.shape_cast %118 : vector<8x128xf32> to vector<1x8x128xf32>
    tpu.vector_store %arg10[%119, %c0_24, %c0_25], %122 {strides = array<i32>} : memref<8x8x128xf32, #tpu.memory_space<vmem>>, vector<1x8x128xf32>,
    %c2_i32 = arith.constant 2 : i32
    %123 = arith.index_cast %c2_i32 : i32 to index
    %c0_26 = arith.constant 0 : index
    %c0_27 = arith.constant 0 : index
    %124 = vector.load %arg0[%123, %c0_26, %c0_27] : memref<8x8x384xbf16, #tpu.memory_space<vmem>>, vector<1x8x384xbf16>
    %125 = vector.shape_cast %124 : vector<1x8x384xbf16> to vector<8x384xbf16>
    %126 = arith.extf %125 : vector<8x384xbf16> to vector<8x384xf32>
    %127 = vector.extract_strided_slice %126 {offsets = [0, 0], sizes = [8, 256], strides = [1, 1]} : vector<8x384xf32> to vector<8x256xf32>
    %128 = vector.extract_strided_slice %96 {offsets = [0, 0], sizes = [8, 256], strides = [1, 1]} : vector<8x384xf32> to vector<8x256xf32>
    %129 = arith.addf %127, %128 : vector<8x256xf32>
    %130 = arith.negf %129 : vector<8x256xf32>
    %131 = math.exp %130 : vector<8x256xf32>
    %cst_28 = arith.constant 1.000000e+00 : f32
    %132 = vector.broadcast %cst_28 : f32 to vector<8x256xf32>
    %133 = arith.addf %132, %131 : vector<8x256xf32>
    %134 = arith.divf %132, %133 : vector<8x256xf32>
    %135 = vector.extract_strided_slice %134 {offsets = [0, 0], sizes = [8, 128], strides = [1, 1]} : vector<8x256xf32> to vector<8x128xf32>
    %136 = vector.extract_strided_slice %134 {offsets = [0, 128], sizes = [8, 128], strides = [1, 1]} : vector<8x256xf32> to vector<8x128xf32>
    %137 = vector.extract_strided_slice %126 {offsets = [0, 256], sizes = [8, 128], strides = [1, 1]} : vector<8x384xf32> to vector<8x128xf32>
    %138 = vector.extract_strided_slice %96 {offsets = [0, 256], sizes = [8, 128], strides = [1, 1]} : vector<8x384xf32> to vector<8x128xf32>
    %139 = arith.addf %138, %3 : vector<8x128xf32>
    %140 = arith.mulf %135, %139 : vector<8x128xf32>
    %141 = arith.addf %137, %140 : vector<8x128xf32>
    %142 = math.tanh %141 : vector<8x128xf32>
    %143 = arith.subf %92, %142 : vector<8x128xf32>
    %144 = arith.mulf %136, %143 : vector<8x128xf32>
    %145 = arith.addf %142, %144 : vector<8x128xf32>
    %146 = tpu.concatenate %145, %118 in 1 : vector<8x128xf32>, vector<8x128xf32> -> vector<8x256xf32>
    %147 = arith.truncf %146 : vector<8x256xf32> to vector<8x256xbf16>
    %cst_29 = arith.constant dense<0.000000e+00> : vector<8x1152xf32>
    %148 = tpu.matmul %147, %0, %cst_29 {dimension_numbers = #tpu.dot_dimension_numbers<[1], [0], [0], [1], [0, 0, 1, 1], [], []>} : vector<8x256xbf16>, vector<256x1152xbf16>, vector<8x1152xf32> -> vector<8x1152xf32>
    %149 = vector.extract_strided_slice %148 {offsets = [0, 0], sizes = [8, 384], strides = [1, 1]} : vector<8x1152xf32> to vector<8x384xf32>
    %150 = vector.extract_strided_slice %148 {offsets = [0, 384], sizes = [8, 384], strides = [1, 1]} : vector<8x1152xf32> to vector<8x384xf32>
    %151 = arith.addf %150, %9 : vector<8x384xf32>
    %152 = vector.extract_strided_slice %148 {offsets = [0, 768], sizes = [8, 384], strides = [1, 1]} : vector<8x1152xf32> to vector<8x384xf32>
    %153 = vector.extract_strided_slice %151 {offsets = [0, 0], sizes = [8, 256], strides = [1, 1]} : vector<8x384xf32> to vector<8x256xf32>
    %154 = vector.extract_strided_slice %152 {offsets = [0, 0], sizes = [8, 256], strides = [1, 1]} : vector<8x384xf32> to vector<8x256xf32>
    %155 = arith.addf %153, %154 : vector<8x256xf32>
    %156 = arith.negf %155 : vector<8x256xf32>
    %157 = math.exp %156 : vector<8x256xf32>
    %cst_30 = arith.constant 1.000000e+00 : f32
    %158 = vector.broadcast %cst_30 : f32 to vector<8x256xf32>
    %159 = arith.addf %158, %157 : vector<8x256xf32>
    %160 = arith.divf %158, %159 : vector<8x256xf32>
    %161 = vector.extract_strided_slice %160 {offsets = [0, 0], sizes = [8, 128], strides = [1, 1]} : vector<8x256xf32> to vector<8x128xf32>
    %162 = vector.extract_strided_slice %160 {offsets = [0, 128], sizes = [8, 128], strides = [1, 1]} : vector<8x256xf32> to vector<8x128xf32>
    %163 = vector.extract_strided_slice %151 {offsets = [0, 256], sizes = [8, 128], strides = [1, 1]} : vector<8x384xf32> to vector<8x128xf32>
    %164 = vector.extract_strided_slice %152 {offsets = [0, 256], sizes = [8, 128], strides = [1, 1]} : vector<8x384xf32> to vector<8x128xf32>
    %165 = arith.addf %164, %6 : vector<8x128xf32>
    %166 = arith.mulf %161, %165 : vector<8x128xf32>
    %167 = arith.addf %163, %166 : vector<8x128xf32>
    %168 = math.tanh %167 : vector<8x128xf32>
    %169 = arith.subf %118, %168 : vector<8x128xf32>
    %170 = arith.mulf %162, %169 : vector<8x128xf32>
    %171 = arith.addf %168, %170 : vector<8x128xf32>
    %172 = arith.index_cast %c2_i32 : i32 to index
    %c0_31 = arith.constant 0 : index
    %c0_32 = arith.constant 0 : index
    %173 = vector.load %arg10[%172, %c0_31, %c0_32] : memref<8x8x128xf32, #tpu.memory_space<vmem>>, vector<1x8x128xf32>
    %174 = vector.shape_cast %173 : vector<1x8x128xf32> to vector<8x128xf32>
    %175 = vector.shape_cast %171 : vector<8x128xf32> to vector<1x8x128xf32>
    tpu.vector_store %arg10[%172, %c0_31, %c0_32], %175 {strides = array<i32>} : memref<8x8x128xf32, #tpu.memory_space<vmem>>, vector<1x8x128xf32>,
    %c3_i32 = arith.constant 3 : i32
    %176 = arith.index_cast %c3_i32 : i32 to index
    %c0_33 = arith.constant 0 : index
    %c0_34 = arith.constant 0 : index
    %177 = vector.load %arg0[%176, %c0_33, %c0_34] : memref<8x8x384xbf16, #tpu.memory_space<vmem>>, vector<1x8x384xbf16>
    %178 = vector.shape_cast %177 : vector<1x8x384xbf16> to vector<8x384xbf16>
    %179 = arith.extf %178 : vector<8x384xbf16> to vector<8x384xf32>
    %180 = vector.extract_strided_slice %179 {offsets = [0, 0], sizes = [8, 256], strides = [1, 1]} : vector<8x384xf32> to vector<8x256xf32>
    %181 = vector.extract_strided_slice %149 {offsets = [0, 0], sizes = [8, 256], strides = [1, 1]} : vector<8x384xf32> to vector<8x256xf32>
    %182 = arith.addf %180, %181 : vector<8x256xf32>
    %183 = arith.negf %182 : vector<8x256xf32>
    %184 = math.exp %183 : vector<8x256xf32>
    %cst_35 = arith.constant 1.000000e+00 : f32
    %185 = vector.broadcast %cst_35 : f32 to vector<8x256xf32>
    %186 = arith.addf %185, %184 : vector<8x256xf32>
    %187 = arith.divf %185, %186 : vector<8x256xf32>
    %188 = vector.extract_strided_slice %187 {offsets = [0, 0], sizes = [8, 128], strides = [1, 1]} : vector<8x256xf32> to vector<8x128xf32>
    %189 = vector.extract_strided_slice %187 {offsets = [0, 128], sizes = [8, 128], strides = [1, 1]} : vector<8x256xf32> to vector<8x128xf32>
    %190 = vector.extract_strided_slice %179 {offsets = [0, 256], sizes = [8, 128], strides = [1, 1]} : vector<8x384xf32> to vector<8x128xf32>
    %191 = vector.extract_strided_slice %149 {offsets = [0, 256], sizes = [8, 128], strides = [1, 1]} : vector<8x384xf32> to vector<8x128xf32>
    %192 = arith.addf %191, %3 : vector<8x128xf32>
    %193 = arith.mulf %188, %192 : vector<8x128xf32>
    %194 = arith.addf %190, %193 : vector<8x128xf32>
    %195 = math.tanh %194 : vector<8x128xf32>
    %196 = arith.subf %145, %195 : vector<8x128xf32>
    %197 = arith.mulf %189, %196 : vector<8x128xf32>
    %198 = arith.addf %195, %197 : vector<8x128xf32>
    %199 = tpu.concatenate %198, %171 in 1 : vector<8x128xf32>, vector<8x128xf32> -> vector<8x256xf32>
    %200 = arith.truncf %199 : vector<8x256xf32> to vector<8x256xbf16>
    %cst_36 = arith.constant dense<0.000000e+00> : vector<8x1152xf32>
    %201 = tpu.matmul %200, %0, %cst_36 {dimension_numbers = #tpu.dot_dimension_numbers<[1], [0], [0], [1], [0, 0, 1, 1], [], []>} : vector<8x256xbf16>, vector<256x1152xbf16>, vector<8x1152xf32> -> vector<8x1152xf32>
    %202 = vector.extract_strided_slice %201 {offsets = [0, 0], sizes = [8, 384], strides = [1, 1]} : vector<8x1152xf32> to vector<8x384xf32>
    %203 = vector.extract_strided_slice %201 {offsets = [0, 384], sizes = [8, 384], strides = [1, 1]} : vector<8x1152xf32> to vector<8x384xf32>
    %204 = arith.addf %203, %9 : vector<8x384xf32>
    %205 = vector.extract_strided_slice %201 {offsets = [0, 768], sizes = [8, 384], strides = [1, 1]} : vector<8x1152xf32> to vector<8x384xf32>
    %206 = vector.extract_strided_slice %204 {offsets = [0, 0], sizes = [8, 256], strides = [1, 1]} : vector<8x384xf32> to vector<8x256xf32>
    %207 = vector.extract_strided_slice %205 {offsets = [0, 0], sizes = [8, 256], strides = [1, 1]} : vector<8x384xf32> to vector<8x256xf32>
    %208 = arith.addf %206, %207 : vector<8x256xf32>
    %209 = arith.negf %208 : vector<8x256xf32>
    %210 = math.exp %209 : vector<8x256xf32>
    %cst_37 = arith.constant 1.000000e+00 : f32
    %211 = vector.broadcast %cst_37 : f32 to vector<8x256xf32>
    %212 = arith.addf %211, %210 : vector<8x256xf32>
    %213 = arith.divf %211, %212 : vector<8x256xf32>
    %214 = vector.extract_strided_slice %213 {offsets = [0, 0], sizes = [8, 128], strides = [1, 1]} : vector<8x256xf32> to vector<8x128xf32>
    %215 = vector.extract_strided_slice %213 {offsets = [0, 128], sizes = [8, 128], strides = [1, 1]} : vector<8x256xf32> to vector<8x128xf32>
    %216 = vector.extract_strided_slice %204 {offsets = [0, 256], sizes = [8, 128], strides = [1, 1]} : vector<8x384xf32> to vector<8x128xf32>
    %217 = vector.extract_strided_slice %205 {offsets = [0, 256], sizes = [8, 128], strides = [1, 1]} : vector<8x384xf32> to vector<8x128xf32>
    %218 = arith.addf %217, %6 : vector<8x128xf32>
    %219 = arith.mulf %214, %218 : vector<8x128xf32>
    %220 = arith.addf %216, %219 : vector<8x128xf32>
    %221 = math.tanh %220 : vector<8x128xf32>
    %222 = arith.subf %171, %221 : vector<8x128xf32>
    %223 = arith.mulf %215, %222 : vector<8x128xf32>
    %224 = arith.addf %221, %223 : vector<8x128xf32>
    %225 = arith.index_cast %c3_i32 : i32 to index
    %c0_38 = arith.constant 0 : index
    %c0_39 = arith.constant 0 : index
    %226 = vector.load %arg10[%225, %c0_38, %c0_39] : memref<8x8x128xf32, #tpu.memory_space<vmem>>, vector<1x8x128xf32>
    %227 = vector.shape_cast %226 : vector<1x8x128xf32> to vector<8x128xf32>
    %228 = vector.shape_cast %224 : vector<8x128xf32> to vector<1x8x128xf32>
    tpu.vector_store %arg10[%225, %c0_38, %c0_39], %228 {strides = array<i32>} : memref<8x8x128xf32, #tpu.memory_space<vmem>>, vector<1x8x128xf32>,
    %c4_i32 = arith.constant 4 : i32
    %229 = arith.index_cast %c4_i32 : i32 to index
    %c0_40 = arith.constant 0 : index
    %c0_41 = arith.constant 0 : index
    %230 = vector.load %arg0[%229, %c0_40, %c0_41] : memref<8x8x384xbf16, #tpu.memory_space<vmem>>, vector<1x8x384xbf16>
    %231 = vector.shape_cast %230 : vector<1x8x384xbf16> to vector<8x384xbf16>
    %232 = arith.extf %231 : vector<8x384xbf16> to vector<8x384xf32>
    %233 = vector.extract_strided_slice %232 {offsets = [0, 0], sizes = [8, 256], strides = [1, 1]} : vector<8x384xf32> to vector<8x256xf32>
    %234 = vector.extract_strided_slice %202 {offsets = [0, 0], sizes = [8, 256], strides = [1, 1]} : vector<8x384xf32> to vector<8x256xf32>
    %235 = arith.addf %233, %234 : vector<8x256xf32>
    %236 = arith.negf %235 : vector<8x256xf32>
    %237 = math.exp %236 : vector<8x256xf32>
    %cst_42 = arith.constant 1.000000e+00 : f32
    %238 = vector.broadcast %cst_42 : f32 to vector<8x256xf32>
    %239 = arith.addf %238, %237 : vector<8x256xf32>
    %240 = arith.divf %238, %239 : vector<8x256xf32>
    %241 = vector.extract_strided_slice %240 {offsets = [0, 0], sizes = [8, 128], strides = [1, 1]} : vector<8x256xf32> to vector<8x128xf32>
    %242 = vector.extract_strided_slice %240 {offsets = [0, 128], sizes = [8, 128], strides = [1, 1]} : vector<8x256xf32> to vector<8x128xf32>
    %243 = vector.extract_strided_slice %232 {offsets = [0, 256], sizes = [8, 128], strides = [1, 1]} : vector<8x384xf32> to vector<8x128xf32>
    %244 = vector.extract_strided_slice %202 {offsets = [0, 256], sizes = [8, 128], strides = [1, 1]} : vector<8x384xf32> to vector<8x128xf32>
    %245 = arith.addf %244, %3 : vector<8x128xf32>
    %246 = arith.mulf %241, %245 : vector<8x128xf32>
    %247 = arith.addf %243, %246 : vector<8x128xf32>
    %248 = math.tanh %247 : vector<8x128xf32>
    %249 = arith.subf %198, %248 : vector<8x128xf32>
    %250 = arith.mulf %242, %249 : vector<8x128xf32>
    %251 = arith.addf %248, %250 : vector<8x128xf32>
    %252 = tpu.concatenate %251, %224 in 1 : vector<8x128xf32>, vector<8x128xf32> -> vector<8x256xf32>
    %253 = arith.truncf %252 : vector<8x256xf32> to vector<8x256xbf16>
    %cst_43 = arith.constant dense<0.000000e+00> : vector<8x1152xf32>
    %254 = tpu.matmul %253, %0, %cst_43 {dimension_numbers = #tpu.dot_dimension_numbers<[1], [0], [0], [1], [0, 0, 1, 1], [], []>} : vector<8x256xbf16>, vector<256x1152xbf16>, vector<8x1152xf32> -> vector<8x1152xf32>
    %255 = vector.extract_strided_slice %254 {offsets = [0, 0], sizes = [8, 384], strides = [1, 1]} : vector<8x1152xf32> to vector<8x384xf32>
    %256 = vector.extract_strided_slice %254 {offsets = [0, 384], sizes = [8, 384], strides = [1, 1]} : vector<8x1152xf32> to vector<8x384xf32>
    %257 = arith.addf %256, %9 : vector<8x384xf32>
    %258 = vector.extract_strided_slice %254 {offsets = [0, 768], sizes = [8, 384], strides = [1, 1]} : vector<8x1152xf32> to vector<8x384xf32>
    %259 = vector.extract_strided_slice %257 {offsets = [0, 0], sizes = [8, 256], strides = [1, 1]} : vector<8x384xf32> to vector<8x256xf32>
    %260 = vector.extract_strided_slice %258 {offsets = [0, 0], sizes = [8, 256], strides = [1, 1]} : vector<8x384xf32> to vector<8x256xf32>
    %261 = arith.addf %259, %260 : vector<8x256xf32>
    %262 = arith.negf %261 : vector<8x256xf32>
    %263 = math.exp %262 : vector<8x256xf32>
    %cst_44 = arith.constant 1.000000e+00 : f32
    %264 = vector.broadcast %cst_44 : f32 to vector<8x256xf32>
    %265 = arith.addf %264, %263 : vector<8x256xf32>
    %266 = arith.divf %264, %265 : vector<8x256xf32>
    %267 = vector.extract_strided_slice %266 {offsets = [0, 0], sizes = [8, 128], strides = [1, 1]} : vector<8x256xf32> to vector<8x128xf32>
    %268 = vector.extract_strided_slice %266 {offsets = [0, 128], sizes = [8, 128], strides = [1, 1]} : vector<8x256xf32> to vector<8x128xf32>
    %269 = vector.extract_strided_slice %257 {offsets = [0, 256], sizes = [8, 128], strides = [1, 1]} : vector<8x384xf32> to vector<8x128xf32>
    %270 = vector.extract_strided_slice %258 {offsets = [0, 256], sizes = [8, 128], strides = [1, 1]} : vector<8x384xf32> to vector<8x128xf32>
    %271 = arith.addf %270, %6 : vector<8x128xf32>
    %272 = arith.mulf %267, %271 : vector<8x128xf32>
    %273 = arith.addf %269, %272 : vector<8x128xf32>
    %274 = math.tanh %273 : vector<8x128xf32>
    %275 = arith.subf %224, %274 : vector<8x128xf32>
    %276 = arith.mulf %268, %275 : vector<8x128xf32>
    %277 = arith.addf %274, %276 : vector<8x128xf32>
    %278 = arith.index_cast %c4_i32 : i32 to index
    %c0_45 = arith.constant 0 : index
    %c0_46 = arith.constant 0 : index
    %279 = vector.load %arg10[%278, %c0_45, %c0_46] : memref<8x8x128xf32, #tpu.memory_space<vmem>>, vector<1x8x128xf32>
    %280 = vector.shape_cast %279 : vector<1x8x128xf32> to vector<8x128xf32>
    %281 = vector.shape_cast %277 : vector<8x128xf32> to vector<1x8x128xf32>
    tpu.vector_store %arg10[%278, %c0_45, %c0_46], %281 {strides = array<i32>} : memref<8x8x128xf32, #tpu.memory_space<vmem>>, vector<1x8x128xf32>,
    %c5_i32 = arith.constant 5 : i32
    %282 = arith.index_cast %c5_i32 : i32 to index
    %c0_47 = arith.constant 0 : index
    %c0_48 = arith.constant 0 : index
    %283 = vector.load %arg0[%282, %c0_47, %c0_48] : memref<8x8x384xbf16, #tpu.memory_space<vmem>>, vector<1x8x384xbf16>
    %284 = vector.shape_cast %283 : vector<1x8x384xbf16> to vector<8x384xbf16>
    %285 = arith.extf %284 : vector<8x384xbf16> to vector<8x384xf32>
    %286 = vector.extract_strided_slice %285 {offsets = [0, 0], sizes = [8, 256], strides = [1, 1]} : vector<8x384xf32> to vector<8x256xf32>
    %287 = vector.extract_strided_slice %255 {offsets = [0, 0], sizes = [8, 256], strides = [1, 1]} : vector<8x384xf32> to vector<8x256xf32>
    %288 = arith.addf %286, %287 : vector<8x256xf32>
    %289 = arith.negf %288 : vector<8x256xf32>
    %290 = math.exp %289 : vector<8x256xf32>
    %cst_49 = arith.constant 1.000000e+00 : f32
    %291 = vector.broadcast %cst_49 : f32 to vector<8x256xf32>
    %292 = arith.addf %291, %290 : vector<8x256xf32>
    %293 = arith.divf %291, %292 : vector<8x256xf32>
    %294 = vector.extract_strided_slice %293 {offsets = [0, 0], sizes = [8, 128], strides = [1, 1]} : vector<8x256xf32> to vector<8x128xf32>
    %295 = vector.extract_strided_slice %293 {offsets = [0, 128], sizes = [8, 128], strides = [1, 1]} : vector<8x256xf32> to vector<8x128xf32>
    %296 = vector.extract_strided_slice %285 {offsets = [0, 256], sizes = [8, 128], strides = [1, 1]} : vector<8x384xf32> to vector<8x128xf32>
    %297 = vector.extract_strided_slice %255 {offsets = [0, 256], sizes = [8, 128], strides = [1, 1]} : vector<8x384xf32> to vector<8x128xf32>
    %298 = arith.addf %297, %3 : vector<8x128xf32>
    %299 = arith.mulf %294, %298 : vector<8x128xf32>
    %300 = arith.addf %296, %299 : vector<8x128xf32>
    %301 = math.tanh %300 : vector<8x128xf32>
    %302 = arith.subf %251, %301 : vector<8x128xf32>
    %303 = arith.mulf %295, %302 : vector<8x128xf32>
    %304 = arith.addf %301, %303 : vector<8x128xf32>
    %305 = tpu.concatenate %304, %277 in 1 : vector<8x128xf32>, vector<8x128xf32> -> vector<8x256xf32>
    %306 = arith.truncf %305 : vector<8x256xf32> to vector<8x256xbf16>
    %cst_50 = arith.constant dense<0.000000e+00> : vector<8x1152xf32>
    %307 = tpu.matmul %306, %0, %cst_50 {dimension_numbers = #tpu.dot_dimension_numbers<[1], [0], [0], [1], [0, 0, 1, 1], [], []>} : vector<8x256xbf16>, vector<256x1152xbf16>, vector<8x1152xf32> -> vector<8x1152xf32>
    %308 = vector.extract_strided_slice %307 {offsets = [0, 0], sizes = [8, 384], strides = [1, 1]} : vector<8x1152xf32> to vector<8x384xf32>
    %309 = vector.extract_strided_slice %307 {offsets = [0, 384], sizes = [8, 384], strides = [1, 1]} : vector<8x1152xf32> to vector<8x384xf32>
    %310 = arith.addf %309, %9 : vector<8x384xf32>
    %311 = vector.extract_strided_slice %307 {offsets = [0, 768], sizes = [8, 384], strides = [1, 1]} : vector<8x1152xf32> to vector<8x384xf32>
    %312 = vector.extract_strided_slice %310 {offsets = [0, 0], sizes = [8, 256], strides = [1, 1]} : vector<8x384xf32> to vector<8x256xf32>
    %313 = vector.extract_strided_slice %311 {offsets = [0, 0], sizes = [8, 256], strides = [1, 1]} : vector<8x384xf32> to vector<8x256xf32>
    %314 = arith.addf %312, %313 : vector<8x256xf32>
    %315 = arith.negf %314 : vector<8x256xf32>
    %316 = math.exp %315 : vector<8x256xf32>
    %cst_51 = arith.constant 1.000000e+00 : f32
    %317 = vector.broadcast %cst_51 : f32 to vector<8x256xf32>
    %318 = arith.addf %317, %316 : vector<8x256xf32>
    %319 = arith.divf %317, %318 : vector<8x256xf32>
    %320 = vector.extract_strided_slice %319 {offsets = [0, 0], sizes = [8, 128], strides = [1, 1]} : vector<8x256xf32> to vector<8x128xf32>
    %321 = vector.extract_strided_slice %319 {offsets = [0, 128], sizes = [8, 128], strides = [1, 1]} : vector<8x256xf32> to vector<8x128xf32>
    %322 = vector.extract_strided_slice %310 {offsets = [0, 256], sizes = [8, 128], strides = [1, 1]} : vector<8x384xf32> to vector<8x128xf32>
    %323 = vector.extract_strided_slice %311 {offsets = [0, 256], sizes = [8, 128], strides = [1, 1]} : vector<8x384xf32> to vector<8x128xf32>
    %324 = arith.addf %323, %6 : vector<8x128xf32>
    %325 = arith.mulf %320, %324 : vector<8x128xf32>
    %326 = arith.addf %322, %325 : vector<8x128xf32>
    %327 = math.tanh %326 : vector<8x128xf32>
    %328 = arith.subf %277, %327 : vector<8x128xf32>
    %329 = arith.mulf %321, %328 : vector<8x128xf32>
    %330 = arith.addf %327, %329 : vector<8x128xf32>
    %331 = arith.index_cast %c5_i32 : i32 to index
    %c0_52 = arith.constant 0 : index
    %c0_53 = arith.constant 0 : index
    %332 = vector.load %arg10[%331, %c0_52, %c0_53] : memref<8x8x128xf32, #tpu.memory_space<vmem>>, vector<1x8x128xf32>
    %333 = vector.shape_cast %332 : vector<1x8x128xf32> to vector<8x128xf32>
    %334 = vector.shape_cast %330 : vector<8x128xf32> to vector<1x8x128xf32>
    tpu.vector_store %arg10[%331, %c0_52, %c0_53], %334 {strides = array<i32>} : memref<8x8x128xf32, #tpu.memory_space<vmem>>, vector<1x8x128xf32>,
    %c6_i32 = arith.constant 6 : i32
    %335 = arith.index_cast %c6_i32 : i32 to index
    %c0_54 = arith.constant 0 : index
    %c0_55 = arith.constant 0 : index
    %336 = vector.load %arg0[%335, %c0_54, %c0_55] : memref<8x8x384xbf16, #tpu.memory_space<vmem>>, vector<1x8x384xbf16>
    %337 = vector.shape_cast %336 : vector<1x8x384xbf16> to vector<8x384xbf16>
    %338 = arith.extf %337 : vector<8x384xbf16> to vector<8x384xf32>
    %339 = vector.extract_strided_slice %338 {offsets = [0, 0], sizes = [8, 256], strides = [1, 1]} : vector<8x384xf32> to vector<8x256xf32>
    %340 = vector.extract_strided_slice %308 {offsets = [0, 0], sizes = [8, 256], strides = [1, 1]} : vector<8x384xf32> to vector<8x256xf32>
    %341 = arith.addf %339, %340 : vector<8x256xf32>
    %342 = arith.negf %341 : vector<8x256xf32>
    %343 = math.exp %342 : vector<8x256xf32>
    %cst_56 = arith.constant 1.000000e+00 : f32
    %344 = vector.broadcast %cst_56 : f32 to vector<8x256xf32>
    %345 = arith.addf %344, %343 : vector<8x256xf32>
    %346 = arith.divf %344, %345 : vector<8x256xf32>
    %347 = vector.extract_strided_slice %346 {offsets = [0, 0], sizes = [8, 128], strides = [1, 1]} : vector<8x256xf32> to vector<8x128xf32>
    %348 = vector.extract_strided_slice %346 {offsets = [0, 128], sizes = [8, 128], strides = [1, 1]} : vector<8x256xf32> to vector<8x128xf32>
    %349 = vector.extract_strided_slice %338 {offsets = [0, 256], sizes = [8, 128], strides = [1, 1]} : vector<8x384xf32> to vector<8x128xf32>
    %350 = vector.extract_strided_slice %308 {offsets = [0, 256], sizes = [8, 128], strides = [1, 1]} : vector<8x384xf32> to vector<8x128xf32>
    %351 = arith.addf %350, %3 : vector<8x128xf32>
    %352 = arith.mulf %347, %351 : vector<8x128xf32>
    %353 = arith.addf %349, %352 : vector<8x128xf32>
    %354 = math.tanh %353 : vector<8x128xf32>
    %355 = arith.subf %304, %354 : vector<8x128xf32>
    %356 = arith.mulf %348, %355 : vector<8x128xf32>
    %357 = arith.addf %354, %356 : vector<8x128xf32>
    %358 = tpu.concatenate %357, %330 in 1 : vector<8x128xf32>, vector<8x128xf32> -> vector<8x256xf32>
    %359 = arith.truncf %358 : vector<8x256xf32> to vector<8x256xbf16>
    %cst_57 = arith.constant dense<0.000000e+00> : vector<8x1152xf32>
    %360 = tpu.matmul %359, %0, %cst_57 {dimension_numbers = #tpu.dot_dimension_numbers<[1], [0], [0], [1], [0, 0, 1, 1], [], []>} : vector<8x256xbf16>, vector<256x1152xbf16>, vector<8x1152xf32> -> vector<8x1152xf32>
    %361 = vector.extract_strided_slice %360 {offsets = [0, 0], sizes = [8, 384], strides = [1, 1]} : vector<8x1152xf32> to vector<8x384xf32>
    %362 = vector.extract_strided_slice %360 {offsets = [0, 384], sizes = [8, 384], strides = [1, 1]} : vector<8x1152xf32> to vector<8x384xf32>
    %363 = arith.addf %362, %9 : vector<8x384xf32>
    %364 = vector.extract_strided_slice %360 {offsets = [0, 768], sizes = [8, 384], strides = [1, 1]} : vector<8x1152xf32> to vector<8x384xf32>
    %365 = vector.extract_strided_slice %363 {offsets = [0, 0], sizes = [8, 256], strides = [1, 1]} : vector<8x384xf32> to vector<8x256xf32>
    %366 = vector.extract_strided_slice %364 {offsets = [0, 0], sizes = [8, 256], strides = [1, 1]} : vector<8x384xf32> to vector<8x256xf32>
    %367 = arith.addf %365, %366 : vector<8x256xf32>
    %368 = arith.negf %367 : vector<8x256xf32>
    %369 = math.exp %368 : vector<8x256xf32>
    %cst_58 = arith.constant 1.000000e+00 : f32
    %370 = vector.broadcast %cst_58 : f32 to vector<8x256xf32>
    %371 = arith.addf %370, %369 : vector<8x256xf32>
    %372 = arith.divf %370, %371 : vector<8x256xf32>
    %373 = vector.extract_strided_slice %372 {offsets = [0, 0], sizes = [8, 128], strides = [1, 1]} : vector<8x256xf32> to vector<8x128xf32>
    %374 = vector.extract_strided_slice %372 {offsets = [0, 128], sizes = [8, 128], strides = [1, 1]} : vector<8x256xf32> to vector<8x128xf32>
    %375 = vector.extract_strided_slice %363 {offsets = [0, 256], sizes = [8, 128], strides = [1, 1]} : vector<8x384xf32> to vector<8x128xf32>
    %376 = vector.extract_strided_slice %364 {offsets = [0, 256], sizes = [8, 128], strides = [1, 1]} : vector<8x384xf32> to vector<8x128xf32>
    %377 = arith.addf %376, %6 : vector<8x128xf32>
    %378 = arith.mulf %373, %377 : vector<8x128xf32>
    %379 = arith.addf %375, %378 : vector<8x128xf32>
    %380 = math.tanh %379 : vector<8x128xf32>
    %381 = arith.subf %330, %380 : vector<8x128xf32>
    %382 = arith.mulf %374, %381 : vector<8x128xf32>
    %383 = arith.addf %380, %382 : vector<8x128xf32>
    %384 = arith.index_cast %c6_i32 : i32 to index
    %c0_59 = arith.constant 0 : index
    %c0_60 = arith.constant 0 : index
    %385 = vector.load %arg10[%384, %c0_59, %c0_60] : memref<8x8x128xf32, #tpu.memory_space<vmem>>, vector<1x8x128xf32>
    %386 = vector.shape_cast %385 : vector<1x8x128xf32> to vector<8x128xf32>
    %387 = vector.shape_cast %383 : vector<8x128xf32> to vector<1x8x128xf32>
    tpu.vector_store %arg10[%384, %c0_59, %c0_60], %387 {strides = array<i32>} : memref<8x8x128xf32, #tpu.memory_space<vmem>>, vector<1x8x128xf32>,
    %c7_i32 = arith.constant 7 : i32
    %388 = arith.index_cast %c7_i32 : i32 to index
    %c0_61 = arith.constant 0 : index
    %c0_62 = arith.constant 0 : index
    %389 = vector.load %arg0[%388, %c0_61, %c0_62] : memref<8x8x384xbf16, #tpu.memory_space<vmem>>, vector<1x8x384xbf16>
    %390 = vector.shape_cast %389 : vector<1x8x384xbf16> to vector<8x384xbf16>
    %391 = arith.extf %390 : vector<8x384xbf16> to vector<8x384xf32>
    %392 = vector.extract_strided_slice %391 {offsets = [0, 0], sizes = [8, 256], strides = [1, 1]} : vector<8x384xf32> to vector<8x256xf32>
    %393 = vector.extract_strided_slice %361 {offsets = [0, 0], sizes = [8, 256], strides = [1, 1]} : vector<8x384xf32> to vector<8x256xf32>
    %394 = arith.addf %392, %393 : vector<8x256xf32>
    %395 = arith.negf %394 : vector<8x256xf32>
    %396 = math.exp %395 : vector<8x256xf32>
    %cst_63 = arith.constant 1.000000e+00 : f32
    %397 = vector.broadcast %cst_63 : f32 to vector<8x256xf32>
    %398 = arith.addf %397, %396 : vector<8x256xf32>
    %399 = arith.divf %397, %398 : vector<8x256xf32>
    %400 = vector.extract_strided_slice %399 {offsets = [0, 0], sizes = [8, 128], strides = [1, 1]} : vector<8x256xf32> to vector<8x128xf32>
    %401 = vector.extract_strided_slice %399 {offsets = [0, 128], sizes = [8, 128], strides = [1, 1]} : vector<8x256xf32> to vector<8x128xf32>
    %402 = vector.extract_strided_slice %391 {offsets = [0, 256], sizes = [8, 128], strides = [1, 1]} : vector<8x384xf32> to vector<8x128xf32>
    %403 = vector.extract_strided_slice %361 {offsets = [0, 256], sizes = [8, 128], strides = [1, 1]} : vector<8x384xf32> to vector<8x128xf32>
    %404 = arith.addf %403, %3 : vector<8x128xf32>
    %405 = arith.mulf %400, %404 : vector<8x128xf32>
    %406 = arith.addf %402, %405 : vector<8x128xf32>
    %407 = math.tanh %406 : vector<8x128xf32>
    %408 = arith.subf %357, %407 : vector<8x128xf32>
    %409 = arith.mulf %401, %408 : vector<8x128xf32>
    %410 = arith.addf %407, %409 : vector<8x128xf32>
    %411 = tpu.concatenate %410, %383 in 1 : vector<8x128xf32>, vector<8x128xf32> -> vector<8x256xf32>
    %412 = arith.truncf %411 : vector<8x256xf32> to vector<8x256xbf16>
    %cst_64 = arith.constant dense<0.000000e+00> : vector<8x1152xf32>
    %413 = tpu.matmul %412, %0, %cst_64 {dimension_numbers = #tpu.dot_dimension_numbers<[1], [0], [0], [1], [0, 0, 1, 1], [], []>} : vector<8x256xbf16>, vector<256x1152xbf16>, vector<8x1152xf32> -> vector<8x1152xf32>
    %414 = vector.extract_strided_slice %413 {offsets = [0, 0], sizes = [8, 384], strides = [1, 1]} : vector<8x1152xf32> to vector<8x384xf32>
    %415 = vector.extract_strided_slice %413 {offsets = [0, 384], sizes = [8, 384], strides = [1, 1]} : vector<8x1152xf32> to vector<8x384xf32>
    %416 = arith.addf %415, %9 : vector<8x384xf32>
    %417 = vector.extract_strided_slice %413 {offsets = [0, 768], sizes = [8, 384], strides = [1, 1]} : vector<8x1152xf32> to vector<8x384xf32>
    %418 = vector.extract_strided_slice %416 {offsets = [0, 0], sizes = [8, 256], strides = [1, 1]} : vector<8x384xf32> to vector<8x256xf32>
    %419 = vector.extract_strided_slice %417 {offsets = [0, 0], sizes = [8, 256], strides = [1, 1]} : vector<8x384xf32> to vector<8x256xf32>
    %420 = arith.addf %418, %419 : vector<8x256xf32>
    %421 = arith.negf %420 : vector<8x256xf32>
    %422 = math.exp %421 : vector<8x256xf32>
    %cst_65 = arith.constant 1.000000e+00 : f32
    %423 = vector.broadcast %cst_65 : f32 to vector<8x256xf32>
    %424 = arith.addf %423, %422 : vector<8x256xf32>
    %425 = arith.divf %423, %424 : vector<8x256xf32>
    %426 = vector.extract_strided_slice %425 {offsets = [0, 0], sizes = [8, 128], strides = [1, 1]} : vector<8x256xf32> to vector<8x128xf32>
    %427 = vector.extract_strided_slice %425 {offsets = [0, 128], sizes = [8, 128], strides = [1, 1]} : vector<8x256xf32> to vector<8x128xf32>
    %428 = vector.extract_strided_slice %416 {offsets = [0, 256], sizes = [8, 128], strides = [1, 1]} : vector<8x384xf32> to vector<8x128xf32>
    %429 = vector.extract_strided_slice %417 {offsets = [0, 256], sizes = [8, 128], strides = [1, 1]} : vector<8x384xf32> to vector<8x128xf32>
    %430 = arith.addf %429, %6 : vector<8x128xf32>
    %431 = arith.mulf %426, %430 : vector<8x128xf32>
    %432 = arith.addf %428, %431 : vector<8x128xf32>
    %433 = math.tanh %432 : vector<8x128xf32>
    %434 = arith.subf %383, %433 : vector<8x128xf32>
    %435 = arith.mulf %427, %434 : vector<8x128xf32>
    %436 = arith.addf %433, %435 : vector<8x128xf32>
    %437 = arith.index_cast %c7_i32 : i32 to index
    %c0_66 = arith.constant 0 : index
    %c0_67 = arith.constant 0 : index
    %438 = vector.load %arg10[%437, %c0_66, %c0_67] : memref<8x8x128xf32, #tpu.memory_space<vmem>>, vector<1x8x128xf32>
    %439 = vector.shape_cast %438 : vector<1x8x128xf32> to vector<8x128xf32>
    %440 = vector.shape_cast %436 : vector<8x128xf32> to vector<1x8x128xf32>
    tpu.vector_store %arg10[%437, %c0_66, %c0_67], %440 {strides = array<i32>} : memref<8x8x128xf32, #tpu.memory_space<vmem>>, vector<1x8x128xf32>,
    %c8_i32 = arith.constant 8 : i32
    %c0_68 = arith.constant 0 : index
    %c0_69 = arith.constant 0 : index
    %c0_70 = arith.constant 0 : index
    %441 = vector.load %arg9[%c0_68, %c0_69, %c0_70] : memref<2x8x128xf32, #tpu.memory_space<vmem>>, vector<1x8x128xf32>
    %442 = vector.shape_cast %441 : vector<1x8x128xf32> to vector<8x128xf32>
    %443 = vector.shape_cast %410 : vector<8x128xf32> to vector<1x8x128xf32>
    tpu.vector_store %arg9[%c0_68, %c0_69, %c0_70], %443 {strides = array<i32>} : memref<2x8x128xf32, #tpu.memory_space<vmem>>, vector<1x8x128xf32>,
    %c1_71 = arith.constant 1 : index
    %c0_72 = arith.constant 0 : index
    %c0_73 = arith.constant 0 : index
    %444 = vector.load %arg9[%c1_71, %c0_72, %c0_73] : memref<2x8x128xf32, #tpu.memory_space<vmem>>, vector<1x8x128xf32>
    %445 = vector.shape_cast %444 : vector<1x8x128xf32> to vector<8x128xf32>
    %446 = vector.shape_cast %436 : vector<8x128xf32> to vector<1x8x128xf32>
    tpu.vector_store %arg9[%c1_71, %c0_72, %c0_73], %446 {strides = array<i32>} : memref<2x8x128xf32, #tpu.memory_space<vmem>>, vector<1x8x128xf32>,
    %c0_74 = arith.constant 0 : index
    %c0_75 = arith.constant 0 : index
    %c0_76 = arith.constant 0 : index
    %447 = vector.load %arg10[%c0_74, %c0_75, %c0_76] : memref<8x8x128xf32, #tpu.memory_space<vmem>>, vector<8x8x128xf32>
    %448 = vector.shape_cast %447 : vector<8x8x128xf32> to vector<64x128xf32>
    %c0_77 = arith.constant 0 : index
    %c0_78 = arith.constant 0 : index
    %449 = vector.load %arg6[%c0_77, %c0_78] : memref<1x128xf32, #tpu.memory_space<vmem>>, vector<1x128xf32>
    %cst_79 = arith.constant dense<0.000000e+00> : vector<1x64xf32>
    %450 = tpu.matmul %449, %448, %cst_79 {dimension_numbers = #tpu.dot_dimension_numbers<[1], [1], [0], [0], [0, 0, 1, 0], [], []>} : vector<1x128xf32>, vector<64x128xf32>, vector<1x64xf32> -> vector<1x64xf32>
    %c0_80 = arith.constant 0 : index
    %c0_81 = arith.constant 0 : index
    %451 = vector.load %arg7[%c0_80, %c0_81] : memref<1x1xf32, #tpu.memory_space<vmem>>, vector<1x1xf32>
    %452 = vector.broadcast %451 : vector<1x1xf32> to vector<1x64xf32>
    %453 = arith.addf %450, %452 : vector<1x64xf32>
    %c0_82 = arith.constant 0 : index
    %c0_83 = arith.constant 0 : index
    %454 = vector.load %arg8[%c0_82, %c0_83] : memref<1x64xf32, #tpu.memory_space<vmem>>, vector<1x64xf32>
    tpu.vector_store %arg8[%c0_82, %c0_83], %453 {strides = array<i32>} : memref<1x64xf32, #tpu.memory_space<vmem>>, vector<1x64xf32>,
    return
  }
}

</mosaic_0001>

<bundles_post_ra>
// kernel: rnn_forward.1
= control target key start
LH: loop header
LB: loop body
LE: loop exit
PB: predicated region body
PF: predicated region fallthrough
CT: control target
= control target key end

     0   :  { %s7558_s2 = inlined_call_operand.vmem [shape: bf16[256,1152], index: 2, kind: input, shape index: {}]   ;;  %s7559_s1 = inlined_call_operand.vmem [shape: f32[2,8,128], index: 1, kind: input, shape index: {}]   ;;  %s7560_s3 = inlined_call_operand.vmem [shape: f32[1,128], index: 3, kind: input, shape index: {}]   ;;  %s7561_s0 = inlined_call_operand.vmem [shape: bf16[8,8,384], index: 0, kind: input, shape index: {}]   ;;  %s7562_s5 = inlined_call_operand.vmem [shape: f32[1,128], index: 5, kind: input, shape index: {}]   ;;  %s7563_s4 = inlined_call_operand.vmem [shape: f32[1,384], index: 4, kind: input, shape index: {}]   ;;  %s7564_s9 = inlined_call_operand.vmem [shape: f32[2,8,128], index: 9, kind: output, shape index: {1}]   ;;  %s7565_s7 = inlined_call_operand.<no memory space> [shape: f32[1,1], index: 7, kind: input, shape index: {}]   ;;  %s7566_s6 = inlined_call_operand.vmem [shape: f32[1,128], index: 6, kind: input, shape index: {}]   ;;  %s7567_s8 = inlined_call_operand.vmem [shape: f32[1,64], index: 8, kind: output, shape index: {0}]  }
   0x1   :  { %v3772_v0 = vld [vmem:[%s7558_s2 + $0x1f8] sm:$0xf]  ;;  %v4376_v1 = vld [vmem:[%s7558_s2 + $0x218] sm:$0xf0]  ;;  %v3774_v4 = vld [vmem:[%s7558_s2 + $0x21c] sm:$0xf0] }
   0x2   :  { %v4372_v2 = vld [vmem:[%s7558_s2 + $0x1fc] sm:$0xf]  ;;  %v4684_v3 = vor.u32 %v4376_v1, %v3772_v0  ;;  %v3760_v5 = vld [vmem:[%s7558_s2 + $0x1b0] sm:$0xf]  ;;  %v4367_v6 = vld [vmem:[%s7558_s2 + $0x1d0] sm:$0xf0] }
   0x3   :  { %v4695_v7 = vor.u32 %v4372_v2, %v3774_v4  ;;  %v4363_v8 = vld [vmem:[%s7558_s2 + $0x1b4] sm:$0xf]  ;;  %v3762_v9 = vld [vmem:[%s7558_s2 + $0x1d4] sm:$0xf0]  ;;  %v4704_v10 = vor.u32 %v4367_v6, %v3760_v5  ;;  %v3748_v12 = vld [vmem:[%s7558_s2 + $0x168] sm:$0xf] }
   0x4   :  { %7845 = vst [vmem:[#allocation4_spill] sm:$0xff] %v4684_v3  ;;  %341 = vmatpush.bf16.msra.mxu0 %v4684_v3  ;;  %1042 = vmatpush.bf16.msra.mxu3 %v4684_v3  ;;  %v4708_v11 = vor.u32 %v4363_v8, %v3762_v9  ;;  %v4358_v13 = vld [vmem:[%s7558_s2 + $0x188] sm:$0xf0]  ;;  %v3750_v15 = vld [vmem:[%s7558_s2 + $0x18c] sm:$0xf0]  ;;  %v4888_v6 = vld [vmem:[%s7559_s1] sm:$0xff] }
   0x5   :  { %7846 = vst [vmem:[#allocation5_spill] sm:$0xff] %v4695_v7  ;;  %354 = vmatpush.bf16.msra.mxu1 %v4695_v7  ;;  %v4354_v14 = vld [vmem:[%s7558_s2 + $0x16c] sm:$0xf]  ;;  %v3780_v16 = vld [vmem:[%s7558_s2 + $0x200] sm:$0xf]  ;;  %v4731_v19 = vor.u32 %v4358_v13, %v3748_v12 }
   0x6   :  { %7847 = vst [vmem:[#allocation6_spill] sm:$0xff] %v4704_v10  ;;  %v4377_v17 = vld [vmem:[%s7558_s2 + $0x220] sm:$0xf0]  ;;  %v3768_v20 = vld [vmem:[%s7558_s2 + $0x1b8] sm:$0xf]  ;;  %v4741_v22 = vor.u32 %v4354_v14, %v3750_v15 }
   0x7   :  { %7848 = vst [vmem:[#allocation7_spill] sm:$0xff] %v4708_v11  ;;  %v4728_v18 = vor.u32 %v4377_v17, %v3780_v16  ;;  %v4368_v21 = vld [vmem:[%s7558_s2 + $0x1d8] sm:$0xf0]  ;;  %v3736_v23 = vld [vmem:[%s7558_s2 + $0x120] sm:$0xf]  ;;  %v212_v16 = vpack.c.bf16 %v4888_v6, %v4888_v6 }
   0x8   :  { %342 = vmatpush.bf16.msra.mxu0 %v4704_v10  ;;  %7850 = vst [vmem:[#allocation9_spill] sm:$0xff] %v4731_v19  ;;  %1043 = vmatpush.bf16.msra.mxu3 %v4704_v10  ;;  %v4349_v24 = vld [vmem:[%s7558_s2 + $0x140] sm:$0xf0]  ;;  %v4753_v26 = vor.u32 %v4368_v21, %v3768_v20  ;;  %v3738_v27 = vld [vmem:[%s7558_s2 + $0x144] sm:$0xf0] }
   0x9   :  { %7849 = vst [vmem:[#allocation8_spill] sm:$0xff] %v4728_v18  ;;  %355 = vmatpush.bf16.msra.mxu1 %v4708_v11  ;;  %v4345_v25 = vld [vmem:[%s7558_s2 + $0x124] sm:$0xf]  ;;  %367 = vmatpush.bf16.msra.mxu2 %v4728_v18  ;;  %v3756_v28 = vld [vmem:[%s7558_s2 + $0x170] sm:$0xf]  ;;  %v4765_v30 = vor.u32 %v4349_v24, %v3736_v23 }
   0xa   :  { %7851 = vst [vmem:[#allocation10_spill] sm:$0xff] %v4741_v22  ;;  %v4359_v29 = vld [vmem:[%s7558_s2 + $0x190] sm:$0xf0]  ;;  %v4769_v31 = vor.u32 %v4345_v25, %v3738_v27  ;;  %v3724_v32 = vld [vmem:[%s7558_s2 + $0xd8] sm:$0xf] }
   0xb   :  { %7852 = vst [vmem:[#allocation11_spill] sm:$0xff] %v4753_v26  ;;  %v4340_v33 = vld [vmem:[%s7558_s2 + $0xf8] sm:$0xf0]  ;;  %v4781_v35 = vor.u32 %v4359_v29, %v3756_v28  ;;  %v3726_v36 = vld [vmem:[%s7558_s2 + $0xfc] sm:$0xf0] }
   0xc   :  { %343 = vmatpush.bf16.msra.mxu0 %v4731_v19  ;;  %7853 = vst [vmem:[#allocation12_spill] sm:$0xff] %v4765_v30  ;;  %1044 = vmatpush.bf16.msra.mxu3 %v4731_v19  ;;  %v4336_v34 = vld [vmem:[%s7558_s2 + $0xdc] sm:$0xf]  ;;  %v3744_v37 = vld [vmem:[%s7558_s2 + $0x128] sm:$0xf]  ;;  %v4793_v39 = vor.u32 %v4340_v33, %v3724_v32 }
   0xd   :  { %356 = vmatpush.bf16.msra.mxu1 %v4741_v22  ;;  %7854 = vst [vmem:[#allocation13_spill] sm:$0xff] %v4769_v31  ;;  %368 = vmatpush.bf16.msra.mxu2 %v4753_v26  ;;  %v4350_v38 = vld [vmem:[%s7558_s2 + $0x148] sm:$0xf0]  ;;  %v4797_v40 = vor.u32 %v4336_v34, %v3726_v36  ;;  %v3712_v41 = vld [vmem:[%s7558_s2 + $0x90] sm:$0xf] }
   0xe   :  { %7855 = vst [vmem:[#allocation14_spill] sm:$0xff] %v4781_v35  ;;  %v4331_v42 = vld [vmem:[%s7558_s2 + $0xb0] sm:$0xf0]  ;;  %v4809_v44 = vor.u32 %v4350_v38, %v3744_v37  ;;  %v3714_v45 = vld [vmem:[%s7558_s2 + $0xb4] sm:$0xf0] }
   0xf   :  { %7856 = vst [vmem:[#allocation15_spill] sm:$0xff] %v4793_v39  ;;  %v4327_v43 = vld [vmem:[%s7558_s2 + $0x94] sm:$0xf]  ;;  %v3732_v46 = vld [vmem:[%s7558_s2 + $0xe0] sm:$0xf]  ;;  %v4821_v48 = vor.u32 %v4331_v42, %v3712_v41 }
  0x10   :  { %344 = vmatpush.bf16.msra.mxu0 %v4765_v30  ;;  %1045 = vmatpush.bf16.msra.mxu3 %v4765_v30  ;;  %7857 = vst [vmem:[#allocation16_spill] sm:$0xff] %v4797_v40  ;;  %v4341_v47 = vld [vmem:[%s7558_s2 + $0x100] sm:$0xf0]  ;;  %v4825_v49 = vor.u32 %v4327_v43, %v3714_v45  ;;  %v3700_v50 = vld [vmem:[%s7558_s2 + $0x48] sm:$0xf] }
  0x11   :  { %357 = vmatpush.bf16.msra.mxu1 %v4769_v31  ;;  %369 = vmatpush.bf16.msra.mxu2 %v4781_v35  ;;  %7858 = vst [vmem:[#allocation17_spill] sm:$0xff] %v4809_v44  ;;  %v4322_v51 = vld [vmem:[%s7558_s2 + $0x68] sm:$0xf0]  ;;  %v4837_v53 = vor.u32 %v4341_v47, %v3732_v46  ;;  %v3702_v54 = vld [vmem:[%s7558_s2 + $0x6c] sm:$0xf0] }
  0x12   :  { %7859 = vst [vmem:[#allocation18_spill] sm:$0xff] %v4821_v48  ;;  %v4318_v52 = vld [vmem:[%s7558_s2 + $0x4c] sm:$0xf]  ;;  %v3720_v55 = vld [vmem:[%s7558_s2 + $0x98] sm:$0xf]  ;;  %v4849_v57 = vor.u32 %v4322_v51, %v3700_v50 }
  0x13   :  { %7860 = vst [vmem:[#allocation19_spill] sm:$0xff] %v4825_v49  ;;  %v4332_v56 = vld [vmem:[%s7558_s2 + $0xb8] sm:$0xf0]  ;;  %v4853_v58 = vor.u32 %v4318_v52, %v3702_v54  ;;  %v3688_v59 = vld [vmem:[%s7558_s2] sm:$0xf] }
  0x14   :  { %345 = vmatpush.bf16.msra.mxu0 %v4793_v39  ;;  %1046 = vmatpush.bf16.msra.mxu3 %v4793_v39  ;;  %7861 = vst [vmem:[#allocation20_spill] sm:$0xff] %v4837_v53  ;;  %v4313_v60 = vld [vmem:[%s7558_s2 + $0x20] sm:$0xf0]  ;;  %v4865_v62 = vor.u32 %v4332_v56, %v3720_v55  ;;  %v3690_v63 = vld [vmem:[%s7558_s2 + $0x24] sm:$0xf0] }
  0x15   :  { %358 = vmatpush.bf16.msra.mxu1 %v4797_v40  ;;  %370 = vmatpush.bf16.msra.mxu2 %v4809_v44  ;;  %7862 = vst [vmem:[#allocation21_spill] sm:$0xff] %v4849_v57  ;;  %v4309_v61 = vld [vmem:[%s7558_s2 + $0x4] sm:$0xf]  ;;  %v3708_v0 = vld [vmem:[%s7558_s2 + $0x50] sm:$0xf]  ;;  %v4883_v5 = vor.u32 %v4313_v60, %v3688_v59 }
  0x16   :  { %7863 = vst [vmem:[#allocation22_spill] sm:$0xff] %v4853_v58  ;;  %v4323_v1 = vld [vmem:[%s7558_s2 + $0x70] sm:$0xf0]  ;;  %v4230_v2 = vld [vmem:[%s7558_s2 + $0x438] sm:$0xf]  ;;  %v4892_v8 = vor.u32 %v4309_v61, %v3690_v63 }
  0x17   :  { %7864 = vst [vmem:[#allocation23_spill] sm:$0xff] %v4865_v62  ;;  %v4448_v4 = vld [vmem:[%s7558_s2 + $0x458] sm:$0xf0]  ;;  %v4895_v9 = vor.u32 %v4323_v1, %v3708_v0  ;;  %v3696_v12 = vld [vmem:[%s7558_s2 + $0x8] sm:$0xf] }
  0x18   :  { %346 = vmatpush.bf16.msra.mxu0 %v4821_v48  ;;  %1047 = vmatpush.bf16.msra.mxu3 %v4821_v48  ;;  %7865 = vst [vmem:[#allocation24_spill] sm:$0xff] %v4883_v5  ;;  %v4314_v13 = vld [vmem:[%s7558_s2 + $0x28] sm:$0xf0]  ;;  %v4444_v14 = vld [vmem:[%s7558_s2 + $0x43c] sm:$0xf]  ;;  %v4906_v15 = vor.u32 %v4448_v4, %v4230_v2 }
  0x19   :  { %359 = vmatpush.bf16.msra.mxu1 %v4825_v49  ;;  %371 = vmatpush.bf16.msra.mxu2 %v4837_v53  ;;  %7866 = vst [vmem:[#allocation25_spill] sm:$0xff] %v4892_v8  ;;  %v4232_v17 = vld [vmem:[%s7558_s2 + $0x45c] sm:$0xf0]  ;;  %v4194_v20 = vld [vmem:[%s7558_s2 + $0x3f0] sm:$0xf]  ;;  %v4923_v23 = vor.u32 %v4314_v13, %v3696_v12  ;;  %v3685_v13 = vld [vmem:[%s7559_s1 + $0x8] sm:$0xff] }
  0x1a   :  { %7867 = vst [vmem:[#allocation26_spill] sm:$0xff] %v4895_v9  ;;  %v4439_v21 = vld [vmem:[%s7558_s2 + $0x410] sm:$0xf0]  ;;  %v4925_v24 = vor.u32 %v4444_v14, %v4232_v17  ;;  %v4196_v28 = vld [vmem:[%s7558_s2 + $0x414] sm:$0xf0] }
  0x1b   :  { %7868 = vst [vmem:[#allocation27_spill] sm:$0xff] %v4906_v15  ;;  %v4435_v25 = vld [vmem:[%s7558_s2 + $0x3f4] sm:$0xf]  ;;  %v4932_v27 = vor.u32 %v4439_v21, %v4194_v20  ;;  %v4158_v29 = vld [vmem:[%s7558_s2 + $0x3a8] sm:$0xf] }
  0x1c   :  { %347 = vmatpush.bf16.msra.mxu0 %v4849_v57  ;;  %1048 = vmatpush.bf16.msra.mxu3 %v4849_v57  ;;  %7869 = vst [vmem:[#allocation28_spill] sm:$0xff] %v4923_v23  ;;  %v4430_v32 = vld [vmem:[%s7558_s2 + $0x3c8] sm:$0xf0]  ;;  %v4946_v33 = vor.u32 %v4435_v25, %v4196_v28  ;;  %v4160_v37 = vld [vmem:[%s7558_s2 + $0x3cc] sm:$0xf0] }
  0x1d   :  { %360 = vmatpush.bf16.msra.mxu1 %v4853_v58  ;;  %372 = vmatpush.bf16.msra.mxu2 %v4865_v62  ;;  %7870 = vst [vmem:[#allocation29_spill] sm:$0xff] %v4925_v24  ;;  %v4949_v34 = vor.u32 %v4430_v32, %v4158_v29  ;;  %v4426_v36 = vld [vmem:[%s7558_s2 + $0x3ac] sm:$0xf]  ;;  %v4417_v41 = vld [vmem:[%s7558_s2 + $0x364] sm:$0xf] }
  0x1e   :  { %7871 = vst [vmem:[#allocation30_spill] sm:$0xff] %v4932_v27  ;;  %v4960_v38 = vor.u32 %v4426_v36, %v4160_v37  ;;  %v4124_v42 = vld [vmem:[%s7558_s2 + $0x384] sm:$0xf0]  ;;  %v4122_v45 = vld [vmem:[%s7558_s2 + $0x360] sm:$0xf]  ;;  %v5066_v36 = vpack.c.bf16 %v3685_v13, %v3685_v13 }
  0x1f   :  { %7872 = vst [vmem:[#allocation31_spill] sm:$0xff] %v4946_v33  ;;  %v4972_v43 = vor.u32 %v4417_v41, %v4124_v42  ;;  %v4421_v46 = vld [vmem:[%s7558_s2 + $0x380] sm:$0xf0]  ;;  %v4408_v47 = vld [vmem:[%s7558_s2 + $0x31c] sm:$0xf] }
  0x20   :  { %348 = vmatpush.bf16.msra.mxu0 %v4883_v5  ;;  %1049 = vmatpush.bf16.msra.mxu3 %v4883_v5  ;;  %7873 = vst [vmem:[#allocation32_spill] sm:$0xff] %v4949_v34  ;;  %v4994_v50 = vor.u32 %v4421_v46, %v4122_v45  ;;  %v4088_v51 = vld [vmem:[%s7558_s2 + $0x33c] sm:$0xf0]  ;;  %v4086_v54 = vld [vmem:[%s7558_s2 + $0x318] sm:$0xf] }
  0x21   :  { %361 = vmatpush.bf16.msra.mxu1 %v4892_v8  ;;  %373 = vmatpush.bf16.msra.mxu2 %v4895_v9  ;;  %7874 = vst [vmem:[#allocation33_spill] sm:$0xff] %v4960_v38  ;;  %v4999_v52 = vor.u32 %v4408_v47, %v4088_v51  ;;  %v4412_v55 = vld [vmem:[%s7558_s2 + $0x338] sm:$0xf0]  ;;  %v4399_v56 = vld [vmem:[%s7558_s2 + $0x2d4] sm:$0xf] }
  0x22   :  { %7875 = vst [vmem:[#allocation34_spill] sm:$0xff] %v4972_v43  ;;  %v5012_v59 = vor.u32 %v4412_v55, %v4086_v54  ;;  %v4052_v60 = vld [vmem:[%s7558_s2 + $0x2f4] sm:$0xf0]  ;;  %v4050_v63 = vld [vmem:[%s7558_s2 + $0x2d0] sm:$0xf] }
  0x23   :  { %349 = vmatmul.bf16.vlgmr.msra.gmra.mxu0 %v212_v16  ;;  %7876 = vst [vmem:[#allocation35_spill] sm:$0xff] %v4994_v50  ;;  %v5017_v61 = vor.u32 %v4399_v56, %v4052_v60  ;;  %v4403_v0 = vld [vmem:[%s7558_s2 + $0x2f0] sm:$0xf0]  ;;  %v4390_v1 = vld [vmem:[%s7558_s2 + $0x28c] sm:$0xf] }
  0x24   :  { %1055 = vmatpush.bf16.msrb.mxu0 %v4906_v15  ;;  %1094 = vmatpush.bf16.msrb.mxu3 %v4728_v18  ;;  %7877 = vst [vmem:[#allocation36_spill] sm:$0xff] %v4999_v52  ;;  %v5030_v2 = vor.u32 %v4403_v0, %v4050_v63  ;;  %v4016_v4 = vld [vmem:[%s7558_s2 + $0x2ac] sm:$0xf0]  ;;  %v4014_v14 = vld [vmem:[%s7558_s2 + $0x288] sm:$0xf] }
  0x25   :  { %1068 = vmatpush.bf16.msrb.mxu1 %v4695_v7  ;;  %374 = vmatpush.bf16.msra.mxu2 %v4923_v23  ;;  %7878 = vst [vmem:[#allocation37_spill] sm:$0xff] %v5012_v59  ;;  %v5035_v12 = vor.u32 %v4390_v1, %v4016_v4  ;;  %v4381_v17 = vld [vmem:[%s7558_s2 + $0x244] sm:$0xf]  ;;  %v3980_v21 = vld [vmem:[%s7558_s2 + $0x264] sm:$0xf0] }
  0x26   :  { %362 = vmatmul.bf16.vlgmr.msra.gmra.mxu1 %v212_v16  ;;  %7879 = vst [vmem:[#allocation38_spill] sm:$0xff] %v5017_v61  ;;  %v4445_v25 = vld [vmem:[%s7558_s2 + $0x444] sm:$0xf]  ;;  %v4240_v28 = vld [vmem:[%s7558_s2 + $0x464] sm:$0xf0]  ;;  %v5062_v29 = vor.u32 %v4381_v17, %v3980_v21 }
  0x27   :  { %7880 = vst [vmem:[#allocation39_spill] sm:$0xff] %v5030_v2  ;;  %v5064_v32 = vor.u32 %v4445_v25, %v4240_v28  ;;  %v3978_v37 = vld [vmem:[%s7558_s2 + $0x240] sm:$0xf]  ;;  %v4385_v41 = vld [vmem:[%s7558_s2 + $0x260] sm:$0xf0] }
  0x28   :  { %1056 = vmatpush.bf16.msrb.mxu0 %v4932_v27  ;;  %1095 = vmatpush.bf16.msrb.mxu3 %v4753_v26  ;;  %7881 = vst [vmem:[#allocation40_spill] sm:$0xff] %v5035_v12  ;;  %v5077_v42 = vor.u32 %v4385_v41, %v3978_v37  ;;  %v4238_v45 = vld [vmem:[%s7558_s2 + $0x440] sm:$0xf]  ;;  %v4449_v46 = vld [vmem:[%s7558_s2 + $0x460] sm:$0xf0] }
  0x29   :  { %1081 = vmatpush.bf16.msrb.mxu2 %v4925_v24  ;;  %1069 = vmatpush.bf16.msrb.mxu1 %v4708_v11  ;;  %7883 = vst [vmem:[#allocation42_spill] sm:$0xff] %v5062_v29  ;;  %v4436_v47 = vld [vmem:[%s7558_s2 + $0x3fc] sm:$0xf]  ;;  %v5088_v51 = vor.u32 %v4449_v46, %v4238_v45  ;;  %v4204_v54 = vld [vmem:[%s7558_s2 + $0x41c] sm:$0xf0] }
  0x2a   :  { %375 = vmatmul.bf16.vlgmr.msra.gmra.mxu2 %v212_v16  ;;  %v4394_v16 = vld [vmem:[%s7558_s2 + $0x2a8] sm:$0xf0]  ;;  %7884 = vst [vmem:[#allocation43_spill] sm:$0xff] %v5064_v32  ;;  %v5094_v55 = vor.u32 %v4436_v47, %v4204_v54  ;;  %v4373_v56 = vld [vmem:[%s7558_s2 + $0x204] sm:$0xf] }
  0x2b   :  { %v5051_v20 = vor.u32 %v4394_v16, %v4014_v14  ;;  %7885 = vst [vmem:[#allocation44_spill] sm:$0xff] %v5077_v42  ;;  %v3952_v60 = vld [vmem:[%s7558_s2 + $0x224] sm:$0xf0]  ;;  %v4202_v0 = vld [vmem:[%s7558_s2 + $0x3f8] sm:$0xf]  ;;  %v380_v45 = vld [vmem:[%s7561_s0] sm:$0xff] }
  0x2c   :  { %1057 = vmatpush.bf16.msrb.mxu0 %v4949_v34  ;;  %1096 = vmatpush.bf16.msrb.mxu3 %v4781_v35  ;;  %7886 = vst [vmem:[#allocation45_spill] sm:$0xff] %v5088_v51  ;;  %v5104_v63 = vor.u32 %v4373_v56, %v3952_v60  ;;  %v4440_v1 = vld [vmem:[%s7558_s2 + $0x418] sm:$0xf0]  ;;  %v4427_v4 = vld [vmem:[%s7558_s2 + $0x3b4] sm:$0xf] }
  0x2d   :  { %1082 = vmatpush.bf16.msrb.mxu2 %v4946_v33  ;;  %1070 = vmatpush.bf16.msrb.mxu1 %v4741_v22  ;;  %7882 = vst [vmem:[#allocation41_spill] sm:$0xff] %v5051_v20  ;;  %v5117_v13 = vor.u32 %v4440_v1, %v4202_v0  ;;  %v4168_v14 = vld [vmem:[%s7558_s2 + $0x3d4] sm:$0xf0]  ;;  %v4364_v17 = vld [vmem:[%s7558_s2 + $0x1bc] sm:$0xf]  ;;  %v382_v1 = vunpack.c.l.bf16 %v380_v45 }
  0x2e   :  { %7887 = vst [vmem:[#allocation46_spill] sm:$0xff] %v5094_v55  ;;  %v5123_v16 = vor.u32 %v4427_v4, %v4168_v14  ;;  %v3928_v21 = vld [vmem:[%s7558_s2 + $0x1dc] sm:$0xf0]  ;;  %v4166_v28 = vld [vmem:[%s7558_s2 + $0x3b0] sm:$0xf] }
  0x2f   :  { %7888 = vst [vmem:[#allocation47_spill] sm:$0xff] %v5104_v63  ;;  %v5132_v25 = vor.u32 %v4364_v17, %v3928_v21  ;;  %v4431_v37 = vld [vmem:[%s7558_s2 + $0x3d0] sm:$0xf0]  ;;  %v4418_v41 = vld [vmem:[%s7558_s2 + $0x36c] sm:$0xf]  ;;  %v383_v21 = vunpack.c.h.bf16 %v380_v45 }
  0x30   :  { %1097 = vmatpush.bf16.msrb.mxu3 %v4809_v44  ;;  %1058 = vmatpush.bf16.msrb.mxu0 %v4994_v50  ;;  %7889 = vst [vmem:[#allocation48_spill] sm:$0xff] %v5117_v13  ;;  %v5148_v46 = vor.u32 %v4431_v37, %v4166_v28  ;;  %v4132_v47 = vld [vmem:[%s7558_s2 + $0x38c] sm:$0xf0]  ;;  %v4355_v56 = vld [vmem:[%s7558_s2 + $0x174] sm:$0xf] }
  0x31   :  { %1083 = vmatpush.bf16.msrb.mxu2 %v4960_v38  ;;  %1071 = vmatpush.bf16.msrb.mxu1 %v4769_v31  ;;  %7890 = vst [vmem:[#allocation49_spill] sm:$0xff] %v5123_v16  ;;  %v5153_v54 = vor.u32 %v4418_v41, %v4132_v47  ;;  %v3904_v60 = vld [vmem:[%s7558_s2 + $0x194] sm:$0xf0]  ;;  %v4130_v4 = vld [vmem:[%s7558_s2 + $0x368] sm:$0xf] }
  0x32   :  { %7891 = vst [vmem:[#allocation50_spill] sm:$0xff] %v5132_v25  ;;  %v5162_v0 = vor.u32 %v4355_v56, %v3904_v60  ;;  %v4422_v14 = vld [vmem:[%s7558_s2 + $0x388] sm:$0xf0]  ;;  %v4409_v17 = vld [vmem:[%s7558_s2 + $0x324] sm:$0xf] }
  0x33   :  { %7892 = vst [vmem:[#allocation51_spill] sm:$0xff] %v5148_v46  ;;  %v5175_v28 = vor.u32 %v4422_v14, %v4130_v4  ;;  %v4096_v37 = vld [vmem:[%s7558_s2 + $0x344] sm:$0xf0]  ;;  %v4346_v47 = vld [vmem:[%s7558_s2 + $0x12c] sm:$0xf] }
  0x34   :  { %1098 = vmatpush.bf16.msrb.mxu3 %v4837_v53  ;;  %1059 = vmatpush.bf16.msrb.mxu0 %v5012_v59  ;;  %7893 = vst [vmem:[#allocation52_spill] sm:$0xff] %v5153_v54  ;;  %v5180_v41 = vor.u32 %v4409_v17, %v4096_v37  ;;  %v3880_v56 = vld [vmem:[%s7558_s2 + $0x14c] sm:$0xf0]  ;;  %v4094_v17 = vld [vmem:[%s7558_s2 + $0x320] sm:$0xf] }
  0x35   :  { %1084 = vmatpush.bf16.msrb.mxu2 %v4972_v43  ;;  %1072 = vmatpush.bf16.msrb.mxu1 %v4797_v40  ;;  %7894 = vst [vmem:[#allocation53_spill] sm:$0xff] %v5162_v0  ;;  %v5189_v45 = vor.u32 %v4346_v47, %v3880_v56  ;;  %v4413_v37 = vld [vmem:[%s7558_s2 + $0x340] sm:$0xf0]  ;;  %v4423_v40 = vld [vmem:[%s7558_s2 + $0x390] sm:$0xf0] }
  0x36   :  { %7895 = vst [vmem:[#allocation54_spill] sm:$0xff] %v5175_v28  ;;  %v5202_v47 = vor.u32 %v4413_v37, %v4094_v17  ;;  %v4391_v17 = vld [vmem:[%s7558_s2 + $0x294] sm:$0xf]  ;;  %v4328_v37 = vld [vmem:[%s7558_s2 + $0x9c] sm:$0xf] }
  0x37   :  { %7896 = vst [vmem:[#allocation55_spill] sm:$0xff] %v5180_v41  ;;  %v4104_v44 = vld [vmem:[%s7558_s2 + $0x34c] sm:$0xf0] }
  0x38   :  { %1099 = vmatpush.bf16.msrb.mxu3 %v4865_v62  ;;  %1060 = vmatpush.bf16.msrb.mxu0 %v5030_v2  ;;  %7897 = vst [vmem:[#allocation56_spill] sm:$0xff] %v5189_v45 }
  0x39   :  { %1073 = vmatpush.bf16.msrb.mxu1 %v4825_v49  ;;  %1085 = vmatpush.bf16.msrb.mxu2 %v4999_v52  ;;  %7898 = vst [vmem:[#allocation57_spill] sm:$0xff] %v5202_v47  ;;  %v4140_v49 = vld [vmem:[%s7558_s2 + $0x394] sm:$0xf0] }
  0x3c   :  { %1100 = vmatpush.bf16.msrb.mxu3 %v4895_v9  ;;  %1061 = vmatpush.bf16.msrb.mxu0 %v5051_v20 }
  0x3d   :  { %1074 = vmatpush.bf16.msrb.mxu1 %v4853_v58  ;;  %1086 = vmatpush.bf16.msrb.mxu2 %v5017_v61 }
  0x40   :  { %1101 = vmatpush.bf16.msrb.mxu3 %v4923_v23  ;;  %1062 = vmatpush.bf16.msrb.mxu0 %v5077_v42  ;;  %v3856_v23 = vld [vmem:[%s7558_s2 + $0x104] sm:$0xf0] }
  0x41   :  { %1075 = vmatpush.bf16.msrb.mxu1 %v4892_v8  ;;  %1087 = vmatpush.bf16.msrb.mxu2 %v5035_v12 }
  0x43   :  { %1063 = vmatmul.bf16.vlgmr.msrb.gmra.mxu0 %v5066_v36 }
  0x44   :  { %1107 = vmatpush.bf16.msra.mxu0 %v5088_v51 }
  0x45   :  { %1088 = vmatpush.bf16.msrb.mxu2 %v5062_v29  ;;  %1120 = vmatpush.bf16.msra.mxu1 %v5104_v63  ;;  %v4337_v63 = vld [vmem:[%s7558_s2 + $0xe4] sm:$0xf] }
  0x48   :  { %1089 = vmatmul.bf16.vlgmr.msrb.gmra.mxu2 %v5066_v36  ;;  %1108 = vmatpush.bf16.msra.mxu0 %v5117_v13 }
  0x49   :  { %1133 = vmatpush.bf16.msra.mxu2 %v5064_v32  ;;  %1121 = vmatpush.bf16.msra.mxu1 %v5132_v25 }
  0x4c   :  { %1109 = vmatpush.bf16.msra.mxu0 %v5148_v46 }
  0x4d   :  { %1134 = vmatpush.bf16.msra.mxu2 %v5094_v55  ;;  %1122 = vmatpush.bf16.msra.mxu1 %v5162_v0  ;;  %v4400_v0 = vld [vmem:[%s7558_s2 + $0x2dc] sm:$0xf] }
  0x50   :  { %1110 = vmatpush.bf16.msra.mxu0 %v5175_v28 }
  0x51   :  { %1135 = vmatpush.bf16.msra.mxu2 %v5123_v16  ;;  %1123 = vmatpush.bf16.msra.mxu1 %v5189_v45 }
  0x54   :  { %1111 = vmatpush.bf16.msra.mxu0 %v5202_v47 }
  0x55   :  { %1136 = vmatpush.bf16.msra.mxu2 %v5153_v54 }
  0x59   :  { %1137 = vmatpush.bf16.msra.mxu2 %v5180_v41 }
  0xa0   :  { %v350_v60 = vpop.f32.mrf.mxu0 }
  0xa1   :  { %v385_v4 = vadd.f32 %v382_v1, %v350_v60  ;;  %v4060_v1 = vld [vmem:[%s7558_s2 + $0x2fc] sm:$0xf0] }
  0xa2   :  { %v5207_v60 = vor.u32 %v4400_v0, %v4060_v1  ;;  %v4058_v0 = vld [vmem:[%s7558_s2 + $0x2d8] sm:$0xf]  ;;  %v3832_v1 = vld [vmem:[%s7558_s2 + $0xbc] sm:$0xf0] }
  0xa3   :  { %v363_v14 = vpop.f32.mrf.mxu1  ;;  %v3782_v56 = vmul.f32 -1.442695, %v385_v4  ;;  %v4404_v4 = vld [vmem:[%s7558_s2 + $0x2f8] sm:$0xf0] }
  0xa4   :  { %v386_v25 = vadd.f32 %v383_v21, %v363_v14  ;;  %7899 = vst [vmem:[#allocation58_spill] sm:$0xff] %v5207_v60  ;;  %v5216_v14 = vor.u32 %v4337_v63, %v3856_v23  ;;  %1138 = vmatpush.bf16.msra.mxu2 %v5207_v60  ;;  %v5229_v23 = vor.u32 %v4404_v4, %v4058_v0  ;;  %v4024_v63 = vld [vmem:[%s7558_s2 + $0x2b4] sm:$0xf0]  ;;  %v4022_v4 = vld [vmem:[%s7558_s2 + $0x290] sm:$0xf] }
  0xa5   :  { %4457 = vpow2.f32 %v3782_v56 }
  0xa6   :  { %v3783_v21 = vmul.f32 -1.442695, %v386_v25  ;;  %7900 = vst [vmem:[#allocation59_spill] sm:$0xff] %v5216_v14  ;;  %1124 = vmatpush.bf16.msra.mxu1 %v5216_v14  ;;  %v5234_v25 = vor.u32 %v4391_v17, %v4024_v63  ;;  %1112 = vmatpush.bf16.msra.mxu0 %v5229_v23  ;;  %v4395_v17 = vld [vmem:[%s7558_s2 + $0x2b0] sm:$0xf0] }
  0xa7   :  { %7901 = vst [vmem:[#allocation60_spill] sm:$0xff] %v5229_v23  ;;  %v4382_v63 = vld [vmem:[%s7558_s2 + $0x24c] sm:$0xf] }
  0xa8   :  { %4459 = vpow2.f32 %v3783_v21  ;;  %7902 = vst [vmem:[#allocation61_spill] sm:$0xff] %v5234_v25  ;;  %v352_v56 = vpop.f32.mrf.mxu0  ;;  %v5243_v21 = vor.u32 %v4328_v37, %v3832_v1  ;;  %1139 = vmatpush.bf16.msra.mxu2 %v5234_v25  ;;  %v3988_v37 = vld [vmem:[%s7558_s2 + $0x26c] sm:$0xf0]  ;;  %v4446_v1 = vld [vmem:[%s7558_s2 + $0x44c] sm:$0xf] }
  0xa9   :  { %v5256_v56 = vor.u32 %v4395_v17, %v4022_v4  ;;  %v5269_v8 = vor.u32 %v4382_v63, %v3988_v37  ;;  %v4319_v4 = vld [vmem:[%s7558_s2 + $0x54] sm:$0xf]  ;;  %v3808_v17 = vld [vmem:[%s7558_s2 + $0x74] sm:$0xf0]  ;;  %v3986_v63 = vld [vmem:[%s7558_s2 + $0x248] sm:$0xf] }
  0xaa   :  { %7903 = vst [vmem:[#allocation62_spill] sm:$0xff] %v5243_v21  ;;  %1125 = vmatpush.bf16.msra.mxu1 %v5243_v21  ;;  %v5282_v58 = vor.u32 %v4319_v4, %v3808_v17  ;;  %v4386_v37 = vld [vmem:[%s7558_s2 + $0x268] sm:$0xf0]  ;;  %v4437_v4 = vld [vmem:[%s7558_s2 + $0x404] sm:$0xf] }
  0xab   :  { %v365_v0 = vpop.f32.mrf.mxu1  ;;  %7904 = vst [vmem:[#allocation63_spill] sm:$0xff] %v5256_v56  ;;  %v4458_v14 = vpop.eup %4457  ;;  %1113 = vmatpush.bf16.msra.mxu0 %v5256_v56  ;;  %v4212_v17 = vld [vmem:[%s7558_s2 + $0x424] sm:$0xf0] }
  0xac   :  { %v4248_v0 = vld [vmem:[%s7558_s2 + $0x46c] sm:$0xf0]  ;;  %7905 = vst [vmem:[#allocation64_spill] sm:$0xff] %v5269_v8  ;;  %v5279_v9 = vadd.f32 1.0, %v4458_v14  ;;  %1140 = vmatpush.bf16.msra.mxu2 %v5269_v8  ;;  %v4246_v14 = vld [vmem:[%s7558_s2 + $0x448] sm:$0xf] }
  0xad   :  { %v5267_v45 = vpop.f32.mrf.mxu2  ;;  %v5271_v21 = vor.u32 %v4446_v1, %v4248_v0  ;;  %7907 = vst [vmem:[#allocation66_spill] sm:$0xff] %v5282_v58  ;;  %v5303_v1 = vor.u32 %v4386_v37, %v3986_v63  ;;  %v3784_v63 = vld [vmem:[%s7558_s2 + $0x2c] sm:$0xf0] }
  0xae   :  { %v4460_v25 = vpop.eup %4459  ;;  %4461 = vrcp.f32 %v5279_v9  ;;  %1126 = vmatpush.bf16.msra.mxu1 %v5282_v58  ;;  %v4310_v58 = vld [vmem:[%s7558_s2 + $0xc] sm:$0xf]  ;;  %v406_v53 = vand.u32 2147483648, %v5279_v9  ;;  %vm400_vm1 = vweird.f32 %v5279_v9 }
  0xaf   :  { %7906 = vst [vmem:[#allocation65_spill] sm:$0xff] %v5271_v21  ;;  %v5284_v60 = vadd.f32 1.0, %v4460_v25  ;;  %v4450_v25 = vld [vmem:[%s7558_s2 + $0x468] sm:$0xf0]  ;;  %1141 = vmatmul.bf16.vlgmr.msra.gmra.mxu2 %v5066_v36  ;;  %1114 = vmatpush.bf16.msra.mxu0 %v5303_v1  ;;  %v5323_v37 = vor.u32 %v4310_v58, %v3784_v63  ;;  %v4428_v58 = vld [vmem:[%s7558_s2 + $0x3bc] sm:$0xf] }
  0xb0   :  { %1185 = vmatpush.bf16.msrb.mxu2 %v5271_v21  ;;  %7908 = vst [vmem:[#allocation67_spill] sm:$0xff] %v5303_v1  ;;  %v5305_v0 = vor.u32 %v4450_v25, %v4246_v14  ;;  %v5314_v21 = vor.u32 %v4437_v4, %v4212_v17  ;;  %v4210_v25 = vld [vmem:[%s7558_s2 + $0x400] sm:$0xf]  ;;  %v4441_v4 = vld [vmem:[%s7558_s2 + $0x420] sm:$0xf0]  ;;  %v407_v16 = vor.u32 1.1754944e-38, %v406_v53 }
  0xb1   :  { %4463 = vrcp.f32 %v5284_v60  ;;  %7911 = vst [vmem:[#allocation70_spill] sm:$0xff] %v5323_v37  ;;  %v5334_v8 = vor.u32 %v4441_v4, %v4210_v25  ;;  %v4176_v63 = vld [vmem:[%s7558_s2 + $0x3dc] sm:$0xf0]  ;;  %v4174_v4 = vld [vmem:[%s7558_s2 + $0x3b8] sm:$0xf]  ;;  %vm415_vm4 = vweird.f32 %v5284_v60 }
  0xb2   :  { %7909 = vst [vmem:[#allocation68_spill] sm:$0xff] %v5305_v0  ;;  %1127 = vmatpush.bf16.msra.mxu1 %v5323_v37  ;;  %1115 = vmatmul.bf16.vlgmr.msra.gmra.mxu0 %v5066_v36  ;;  %v5351_v25 = vld [vmem:[%s7560_s3] ss:$0 sm:$0xff]  ;;  %v4432_v37 = vld [vmem:[%s7558_s2 + $0x3d8] sm:$0xf0] }
  0xb3   :  { %7910 = vst [vmem:[#allocation69_spill] sm:$0xff] %v5314_v21  ;;  %1159 = vmatpush.bf16.msrb.mxu0 %v5305_v0  ;;  %v5345_v0 = vor.u32 %v4428_v58, %v4176_v63  ;;  %v5361_v58 = vor.u32 %v4432_v37, %v4174_v4  ;;  %v4419_v63 = vld [vmem:[%s7558_s2 + $0x374] sm:$0xf]  ;;  %v381_v37 = vld [vmem:[%s7561_s0 + $0x8] sm:$0xf] }
  0xb4   :  { %1186 = vmatpush.bf16.msrb.mxu2 %v5314_v21  ;;  %v4462_v17 = vpop.eup %4461  ;;  %7912 = vst [vmem:[#allocation71_spill] sm:$0xff] %v5334_v8  ;;  %v4068_v53 = vld [vmem:[%s7558_s2 + $0x304] sm:$0xf0] }
  0xb5   :  { %v378_v14 = vpop.f32.mrf.mxu2  ;;  %v396_v21 = vmul.f32 %v4462_v17, %v5279_v9  ;;  %7913 = vst [vmem:[#allocation72_spill] sm:$0xff] %v5345_v0  ;;  %vm401_vm0 = vweird.f32 %v4462_v17 }
  0xb6   :  { %7914 = vst [vmem:[#allocation73_spill] sm:$0xff] %v5361_v58  ;;  %vm402_vm2 = vmor %vm400_vm1, %vm401_vm0 }
  0xb7   :  { %v5342_v14 = vpop.eup %4463  ;;  %v397_v62 = vsub.f32 1.0, %v396_v21  ;;  %1160 = vmatpush.bf16.msrb.mxu0 %v5334_v8  ;;  %v5372_v21 = vor.u32 %v4419_v63, %v4140_v49  ;;  %v4138_v8 = vld [vmem:[%s7558_s2 + $0x370] sm:$0xf]  ;;  %v4410_v49 = vld [vmem:[%s7558_s2 + $0x32c] sm:$0xf] }
  0xb8   :  { %1187 = vmatpush.bf16.msrb.mxu2 %v5345_v0  ;;  %v411_v41 = vmul.f32 %v5342_v14, %v5284_v60  ;;  %v404_v0 = vand.u32 2147483647, %v5279_v9  ;;  %v5392_v54 = vor.u32 %v4423_v40, %v4138_v8  ;;  %v5397_v35 = vor.u32 %v4410_v49, %v4104_v44  ;;  %v4414_v40 = vld [vmem:[%s7558_s2 + $0x348] sm:$0xf0]  ;;  %v4401_v8 = vld [vmem:[%s7558_s2 + $0x2e4] sm:$0xf] }
  0xb9   :  { %7915 = vst [vmem:[#allocation74_spill] sm:$0xff] %v5372_v21  ;;  %v398_v4 = vmul.f32 %v4462_v17, %v397_v62  ;;  %v425_v62 = vadd.f32 %v5351_v25, %v5267_v45  ;;  %v4102_v45 = vld [vmem:[%s7558_s2 + $0x328] sm:$0xf]  ;;  %vm416_vm5 = vweird.f32 %v5342_v14  ;;  %v4405_v49 = vld [vmem:[%s7558_s2 + $0x300] sm:$0xf0] }
  0xba   :  { %7916 = vst [vmem:[#allocation75_spill] sm:$0xff] %v5392_v54  ;;  %v412_v31 = vsub.f32 1.0, %v411_v41  ;;  %vm405_vm3 = vcmp.eq.f32.partialorder %v404_v0, 8.507059e+37  ;;  %v5410_v44 = vor.u32 %v4414_v40, %v4102_v45  ;;  %v5416_v0 = vor.u32 %v4401_v8, %v4068_v53  ;;  %vm5441_vm6 = vmor %vm415_vm4, %vm416_vm5  ;;  %v4396_v53 = vld [vmem:[%s7558_s2 + $0x2b8] sm:$0xf0] }
  0xbb   :  { %v399_v63 = vadd.f32 %v4462_v17, %v398_v4  ;;  %1161 = vmatpush.bf16.msrb.mxu0 %v5361_v58  ;;  %7917 = vst [vmem:[#allocation76_spill] sm:$0xff] %v5397_v35  ;;  %v384_v4 = vunpack.c.l.bf16 %v381_v37  ;;  %v4254_v40 = vld [vmem:[%s7558_s2 + $0x450] sm:$0xf]  ;;  %v4333_v58 = vld [vmem:[%s7558_s2 + $0xc0] sm:$0xf0] }
  0xbc   :  { %1188 = vmatpush.bf16.msrb.mxu2 %v5372_v21  ;;  %7918 = vst [vmem:[#allocation77_spill] sm:$0xff] %v5410_v44  ;;  %v4342_v21 = vld [vmem:[%s7558_s2 + $0x108] sm:$0xf0] }
  0xbd   :  { %v403_v9 = vsel %vm402_vm2, %v4462_v17, %v399_v63  ;;  %7919 = vst [vmem:[#allocation78_spill] sm:$0xff] %v5416_v0  ;;  %v421_v17 = vand.u32 2147483648, %v5284_v60 }
  0xbe   :  { %v408_v22 = vsel %vm405_vm3, %v407_v16, %v403_v9  ;;  %v413_v16 = vmul.f32 %v5342_v14, %v412_v31  ;;  %v4392_v31 = vld [vmem:[%s7558_s2 + $0x29c] sm:$0xf]  ;;  %v419_v9 = vand.u32 2147483647, %v5284_v60 }
  0xbf   :  { %v426_v41 = vmul.f32 %v425_v62, %v408_v22  ;;  %1162 = vmatpush.bf16.msrb.mxu0 %v5392_v54  ;;  %v4066_v22 = vld [vmem:[%s7558_s2 + $0x2e0] sm:$0xf]  ;;  %v422_v8 = vor.u32 1.1754944e-38, %v421_v17  ;;  %v3996_v17 = vld [vmem:[%s7558_s2 + $0x274] sm:$0xf0] }
  0xc0   :  { %1189 = vmatpush.bf16.msrb.mxu2 %v5397_v35  ;;  %v5432_v63 = vor.u32 %v4405_v49, %v4066_v22  ;;  %v4032_v62 = vld [vmem:[%s7558_s2 + $0x2bc] sm:$0xf0]  ;;  %v4256_v22 = vld [vmem:[%s7558_s2 + $0x474] sm:$0xf0]  ;;  %vm420_vm7 = vcmp.eq.f32.partialorder %v419_v9, 8.507059e+37 }
  0xc1   :  { %v427_v37 = vadd.f32 %v426_v41, %v384_v4  ;;  %v414_v4 = vadd.f32 %v5342_v14, %v413_v16  ;;  %v5439_v45 = vor.u32 %v4392_v31, %v4032_v62  ;;  %v4030_v41 = vld [vmem:[%s7558_s2 + $0x298] sm:$0xf]  ;;  %v4383_v16 = vld [vmem:[%s7558_s2 + $0x254] sm:$0xf]  ;;  %v3994_v9 = vld [vmem:[%s7558_s2 + $0x250] sm:$0xf] }
  0xc2   :  { %7920 = vst [vmem:[#allocation79_spill] sm:$0xff] %v5432_v63  ;;  %v5456_v60 = vor.u32 %v4396_v53, %v4030_v41  ;;  %v5470_v31 = vor.u32 %v4383_v16, %v3996_v17  ;;  %v4451_v16 = vld [vmem:[%s7558_s2 + $0x470] sm:$0xf0]  ;;  %v4438_v17 = vld [vmem:[%s7558_s2 + $0x40c] sm:$0xf] }
  0xc3   :  { %4465 = vtanh.f32 %v427_v37  ;;  %1163 = vmatpush.bf16.msrb.mxu0 %v5410_v44  ;;  %7921 = vst [vmem:[#allocation80_spill] sm:$0xff] %v5439_v45  ;;  %v4447_v37 = vld [vmem:[%s7558_s2 + $0x454] sm:$0xf]  ;;  %v418_v49 = vsel %vm5441_vm6, %v5342_v14, %v414_v4  ;;  %v3862_v44 = vld [vmem:[%s7558_s2 + $0xe8] sm:$0xf] }
  0xc4   :  { %1190 = vmatpush.bf16.msrb.mxu2 %v5416_v0  ;;  %7924 = vst [vmem:[#allocation81_spill] sm:$0xff] %v5456_v60  ;;  %v5472_v62 = vor.u32 %v4447_v37, %v4256_v22  ;;  %v4378_v0 = vld [vmem:[%s7558_s2 + $0x228] sm:$0xf0]  ;;  %v4387_v14 = vld [vmem:[%s7558_s2 + $0x270] sm:$0xf0]  ;;  %v423_v4 = vsel %vm420_vm7, %v422_v8, %v418_v49  ;;  %v5507_v49 = vor.u32 %v4451_v16, %v4254_v40 }
  0xc5   :  { %7925 = vst [vmem:[#allocation82_spill] sm:$0xff] %v5470_v31  ;;  %v4374_v8 = vld [vmem:[%s7558_s2 + $0x20c] sm:$0xf]  ;;  %v3960_v22 = vld [vmem:[%s7558_s2 + $0x22c] sm:$0xf0] }
  0xc6   :  { %7926 = vst [vmem:[#allocation83_spill] sm:$0xff] %v5472_v62  ;;  %v5525_v16 = vor.u32 %v4374_v8, %v3960_v22  ;;  %v3936_v8 = vld [vmem:[%s7558_s2 + $0x1e4] sm:$0xf0]  ;;  %v4347_v35 = vld [vmem:[%s7558_s2 + $0x134] sm:$0xf] }
  0xc7   :  { %1164 = vmatpush.bf16.msrb.mxu0 %v5432_v63  ;;  %7928 = vst [vmem:[#allocation85_spill] sm:$0xff] %v5507_v49  ;;  %v3886_v63 = vld [vmem:[%s7558_s2 + $0x130] sm:$0xf]  ;;  %v3838_v54 = vld [vmem:[%s7558_s2 + $0xa0] sm:$0xf] }
  0xc8   :  { %1191 = vmatpush.bf16.msrb.mxu2 %v5439_v45  ;;  %v3958_v45 = vld [vmem:[%s7558_s2 + $0x208] sm:$0xf] }
  0xc9   :  { %v4466_v41 = vpop.eup %4465  ;;  %v5523_v40 = vor.u32 %v4378_v0, %v3958_v45  ;;  %v4365_v45 = vld [vmem:[%s7558_s2 + $0x1c4] sm:$0xf] }
  0xca   :  { %v429_v53 = vsub.f32 %v4888_v6, %v4466_v41  ;;  %v5489_v6 = vor.u32 %v4387_v14, %v3994_v9  ;;  %v4220_v9 = vld [vmem:[%s7558_s2 + $0x42c] sm:$0xf0] }
  0xcb   :  { %1165 = vmatpush.bf16.msrb.mxu0 %v5456_v60  ;;  %v5512_v14 = vor.u32 %v4438_v17, %v4220_v9  ;;  %v4442_v17 = vld [vmem:[%s7558_s2 + $0x428] sm:$0xf0]  ;;  %v4184_v9 = vld [vmem:[%s7558_s2 + $0x3e4] sm:$0xf0]  ;;  %v4356_v60 = vld [vmem:[%s7558_s2 + $0x17c] sm:$0xf] }
  0xcc   :  { %1192 = vmatpush.bf16.msrb.mxu2 %v5470_v31  ;;  %7927 = vst [vmem:[#allocation84_spill] sm:$0xff] %v5489_v6  ;;  %v430_v37 = vmul.f32 %v429_v53, %v423_v4  ;;  %v3934_v53 = vld [vmem:[%s7558_s2 + $0x1c0] sm:$0xf]  ;;  %v4369_v4 = vld [vmem:[%s7558_s2 + $0x1e0] sm:$0xf0] }
  0xcd   :  { %7929 = vst [vmem:[#allocation86_spill] sm:$0xff] %v5512_v14 }
  0xce   :  { %v5514_v31 = vadd.f32 %v4466_v41, %v430_v37  ;;  %v4218_v41 = vld [vmem:[%s7558_s2 + $0x408] sm:$0xf]  ;;  %v4429_v37 = vld [vmem:[%s7558_s2 + $0x3c4] sm:$0xf] }
  0xcf   :  { %1193 = vmatmul.bf16.vlgmr.msrb.gmra.mxu2 %v5066_v36  ;;  %1166 = vmatpush.bf16.msrb.mxu0 %v5489_v6  ;;  %v5549_v22 = vor.u32 %v4442_v17, %v4218_v41  ;;  %v3910_v6 = vld [vmem:[%s7558_s2 + $0x178] sm:$0xf]  ;;  %v5566_v41 = vor.u32 %v4369_v4, %v3934_v53  ;;  %v5568_v17 = vor.u32 %v4365_v45, %v3936_v8  ;;  %v3912_v53 = vld [vmem:[%s7558_s2 + $0x19c] sm:$0xf0] }
  0xd0   :  { %1237 = vmatpush.bf16.msra.mxu2 %v5472_v62  ;;  %v5539_v0 = vpack.c.bf16 %v5514_v31, %v5514_v31  ;;  %v5554_v62 = vor.u32 %v4429_v37, %v4184_v9  ;;  %v4182_v37 = vld [vmem:[%s7558_s2 + $0x3c0] sm:$0xf]  ;;  %v4433_v9 = vld [vmem:[%s7558_s2 + $0x3e0] sm:$0xf0] }
  0xd1   :  { %7930 = vst [vmem:[#allocation87_spill] sm:$0xff] %v5549_v22  ;;  %v5587_v4 = vor.u32 %v4433_v9, %v4182_v37  ;;  %v4148_v45 = vld [vmem:[%s7558_s2 + $0x39c] sm:$0xf0]  ;;  %v5605_v9 = vor.u32 %v4356_v60, %v3912_v53  ;;  %v3888_v60 = vld [vmem:[%s7558_s2 + $0x154] sm:$0xf0] }
  0xd2   :  { %7931 = vst [vmem:[#allocation88_spill] sm:$0xff] %v5554_v62  ;;  %1050 = vmatmul.bf16.vlgmr.msra.gmra.mxu3 %v5539_v0  ;;  %1076 = vmatmul.bf16.vlgmr.msrb.gmra.mxu1 %v5539_v0 }
  0xd3   :  { %1211 = vmatpush.bf16.msra.mxu0 %v5507_v49  ;;  %1146 = vmatpush.bf16.msra.mxu3 %v5523_v40  ;;  %7932 = vst [vmem:[#allocation89_spill] sm:$0xff] %v5568_v17  ;;  %v4420_v49 = vld [vmem:[%s7558_s2 + $0x37c] sm:$0xf] }
  0xd4   :  { %1238 = vmatpush.bf16.msra.mxu2 %v5512_v14  ;;  %v4360_v14 = vld [vmem:[%s7558_s2 + $0x198] sm:$0xf0]  ;;  %1172 = vmatpush.bf16.msrb.mxu1 %v5525_v16  ;;  %7933 = vst [vmem:[#allocation90_spill] sm:$0xff] %v5587_v4  ;;  %v5592_v8 = vor.u32 %v4420_v49, %v4148_v45  ;;  %v4146_v49 = vld [vmem:[%s7558_s2 + $0x378] sm:$0xf] }
  0xd5   :  { %1167 = vmatmul.bf16.vlgmr.msrb.gmra.mxu0 %v5066_v36  ;;  %v5603_v37 = vor.u32 %v4360_v14, %v3910_v6  ;;  %7936 = vst [vmem:[#allocation93_spill] sm:$0xff] %v5605_v9  ;;  %v4424_v45 = vld [vmem:[%s7558_s2 + $0x398] sm:$0xf0]  ;;  %v4112_v14 = vld [vmem:[%s7558_s2 + $0x354] sm:$0xf0] }
  0xd6   :  { %7934 = vst [vmem:[#allocation91_spill] sm:$0xff] %v5592_v8  ;;  %v5624_v6 = vor.u32 %v4424_v45, %v4146_v49  ;;  %v5641_v45 = vor.u32 %v4347_v35, %v3888_v60  ;;  %v3864_v35 = vld [vmem:[%s7558_s2 + $0x10c] sm:$0xf0] }
  0xd7   :  { %1212 = vmatpush.bf16.msra.mxu0 %v5549_v22  ;;  %v4351_v22 = vld [vmem:[%s7558_s2 + $0x150] sm:$0xf0]  ;;  %1147 = vmatpush.bf16.msra.mxu3 %v5566_v41  ;;  %7935 = vst [vmem:[#allocation92_spill] sm:$0xff] %v5603_v37 }
  0xd8   :  { %1239 = vmatpush.bf16.msra.mxu2 %v5554_v62  ;;  %1173 = vmatpush.bf16.msrb.mxu1 %v5568_v17  ;;  %v4411_v62 = vld [vmem:[%s7558_s2 + $0x334] sm:$0xf]  ;;  %7937 = vst [vmem:[#allocation94_spill] sm:$0xff] %v5624_v6  ;;  %v5639_v49 = vor.u32 %v4351_v22, %v3886_v63  ;;  %v4076_v22 = vld [vmem:[%s7558_s2 + $0x30c] sm:$0xf0] }
  0xd9   :  { %v5629_v53 = vor.u32 %v4411_v62, %v4112_v14  ;;  %7940 = vst [vmem:[#allocation97_spill] sm:$0xff] %v5641_v45  ;;  %v4110_v62 = vld [vmem:[%s7558_s2 + $0x330] sm:$0xf]  ;;  %v4415_v14 = vld [vmem:[%s7558_s2 + $0x350] sm:$0xf0] }
  0xda   :  { %7939 = vst [vmem:[#allocation96_spill] sm:$0xff] %v5639_v49  ;;  %v5660_v63 = vor.u32 %v4415_v14, %v4110_v62  ;;  %v5675_v62 = vor.u32 %v4342_v21, %v3862_v44  ;;  %v3840_v21 = vld [vmem:[%s7558_s2 + $0xc4] sm:$0xf0] }
  0xdb   :  { %1213 = vmatpush.bf16.msra.mxu0 %v5587_v4  ;;  %7938 = vst [vmem:[#allocation95_spill] sm:$0xff] %v5629_v53  ;;  %1148 = vmatpush.bf16.msra.mxu3 %v5603_v37  ;;  %v4338_v4 = vld [vmem:[%s7558_s2 + $0xec] sm:$0xf]  ;;  %v3942_v17 = vld [vmem:[%s7558_s2 + $0x1c8] sm:$0xf] }
  0xdc   :  { %1240 = vmatpush.bf16.msra.mxu2 %v5592_v8  ;;  %1174 = vmatpush.bf16.msrb.mxu1 %v5605_v9  ;;  %v4402_v8 = vld [vmem:[%s7558_s2 + $0x2ec] sm:$0xf]  ;;  %7941 = vst [vmem:[#allocation98_spill] sm:$0xff] %v5660_v63  ;;  %v5677_v14 = vor.u32 %v4338_v4, %v3864_v35  ;;  %v4040_v4 = vld [vmem:[%s7558_s2 + $0x2c4] sm:$0xf0] }
  0xdd   :  { %v5665_v60 = vor.u32 %v4402_v8, %v4076_v22  ;;  %7943 = vst [vmem:[#allocation100_spill] sm:$0xff] %v5675_v62  ;;  %v4074_v8 = vld [vmem:[%s7558_s2 + $0x2e8] sm:$0xf]  ;;  %v4406_v22 = vld [vmem:[%s7558_s2 + $0x308] sm:$0xf0] }
  0xde   :  { %7944 = vst [vmem:[#allocation101_spill] sm:$0xff] %v5677_v14  ;;  %v5696_v44 = vor.u32 %v4406_v22, %v4074_v8  ;;  %v5713_v8 = vor.u32 %v4333_v58, %v3838_v54  ;;  %v4038_v22 = vld [vmem:[%s7558_s2 + $0x2a0] sm:$0xf] }
  0xdf   :  { %1214 = vmatpush.bf16.msra.mxu0 %v5624_v6  ;;  %7942 = vst [vmem:[#allocation99_spill] sm:$0xff] %v5665_v60  ;;  %1149 = vmatpush.bf16.msra.mxu3 %v5639_v49  ;;  %v4329_v6 = vld [vmem:[%s7558_s2 + $0xa4] sm:$0xf]  ;;  %v3816_v54 = vld [vmem:[%s7558_s2 + $0x7c] sm:$0xf0] }
  0xe0   :  { %1241 = vmatpush.bf16.msra.mxu2 %v5629_v53  ;;  %1175 = vmatpush.bf16.msrb.mxu1 %v5641_v45  ;;  %v4393_v53 = vld [vmem:[%s7558_s2 + $0x2a4] sm:$0xf]  ;;  %7945 = vst [vmem:[#allocation102_spill] sm:$0xff] %v5696_v44  ;;  %v3814_v45 = vld [vmem:[%s7558_s2 + $0x58] sm:$0xf] }
  0xe1   :  { %v5701_v35 = vor.u32 %v4393_v53, %v4040_v4  ;;  %7947 = vst [vmem:[#allocation104_spill] sm:$0xff] %v5713_v8  ;;  %v5715_v53 = vor.u32 %v4329_v6, %v3840_v21  ;;  %v4397_v4 = vld [vmem:[%s7558_s2 + $0x2c0] sm:$0xf0]  ;;  %v4004_v6 = vld [vmem:[%s7558_s2 + $0x27c] sm:$0xf0] }
  0xe2   :  { %1102 = vmatmul.bf16.vlgmr.msrb.gmra.mxu3 %v5539_v0  ;;  %1128 = vmatmul.bf16.vlgmr.msra.gmra.mxu1 %v5539_v0  ;;  %v5734_v58 = vor.u32 %v4397_v4, %v4038_v22  ;;  %v4315_v49 = vld [vmem:[%s7558_s2 + $0x30] sm:$0xf0]  ;;  %v3792_v4 = vld [vmem:[%s7558_s2 + $0x34] sm:$0xf0] }
  0xe3   :  { %1215 = vmatpush.bf16.msra.mxu0 %v5660_v63  ;;  %7946 = vst [vmem:[#allocation103_spill] sm:$0xff] %v5701_v35  ;;  %1150 = vmatpush.bf16.msra.mxu3 %v5675_v62  ;;  %v4384_v63 = vld [vmem:[%s7558_s2 + $0x25c] sm:$0xf]  ;;  %v3790_v62 = vld [vmem:[%s7558_s2 + $0x10] sm:$0xf] }
  0xe4   :  { %1242 = vmatpush.bf16.msra.mxu2 %v5665_v60  ;;  %v4324_v60 = vld [vmem:[%s7558_s2 + $0x78] sm:$0xf0]  ;;  %1176 = vmatpush.bf16.msrb.mxu1 %v5677_v14  ;;  %7948 = vst [vmem:[#allocation105_spill] sm:$0xff] %v5715_v53  ;;  %v5739_v21 = vor.u32 %v4384_v63, %v4004_v6  ;;  %v4002_v6 = vld [vmem:[%s7558_s2 + $0x258] sm:$0xf] }
  0xe5   :  { %v4320_v14 = vld [vmem:[%s7558_s2 + $0x5c] sm:$0xf]  ;;  %7949 = vst [vmem:[#allocation106_spill] sm:$0xff] %v5734_v58  ;;  %v5752_v22 = vor.u32 %v4324_v60, %v3814_v45  ;;  %v4262_v60 = vld [vmem:[%s7558_s2 + $0x458] sm:$0xf] }
  0xe6   :  { %7950 = vst [vmem:[#allocation107_spill] sm:$0xff] %v5739_v21  ;;  %v5754_v63 = vor.u32 %v4320_v14, %v3816_v54  ;;  %v4452_v14 = vld [vmem:[%s7558_s2 + $0x478] sm:$0xf0]  ;;  %v4379_v54 = vld [vmem:[%s7558_s2 + $0x230] sm:$0xf0] }
  0xe7   :  { %1216 = vmatpush.bf16.msra.mxu0 %v5696_v44  ;;  %1151 = vmatpush.bf16.msra.mxu3 %v5713_v8  ;;  %v4388_v44 = vld [vmem:[%s7558_s2 + $0x278] sm:$0xf0] }
  0xe8   :  { %1243 = vmatpush.bf16.msra.mxu2 %v5701_v35  ;;  %v4311_v35 = vld [vmem:[%s7558_s2 + $0x14] sm:$0xf]  ;;  %1177 = vmatpush.bf16.msrb.mxu1 %v5715_v53  ;;  %v3966_v53 = vld [vmem:[%s7558_s2 + $0x210] sm:$0xf]  ;;  %v5770_v45 = vor.u32 %v4388_v44, %v4002_v6  ;;  %v3968_v44 = vld [vmem:[%s7558_s2 + $0x234] sm:$0xf0]  ;;  %v5787_v6 = vor.u32 %v4452_v14, %v4262_v60 }
  0xe9   :  { %v5794_v8 = vor.u32 %v4311_v35, %v3792_v4  ;;  %v5796_v9 = vor.u32 %v4379_v54, %v3966_v53  ;;  %v4226_v60 = vld [vmem:[%s7558_s2 + $0x410] sm:$0xf]  ;;  %v4366_v35 = vld [vmem:[%s7558_s2 + $0x1cc] sm:$0xf]  ;;  %v3918_v54 = vld [vmem:[%s7558_s2 + $0x180] sm:$0xf] }
  0xea   :  { %7951 = vst [vmem:[#allocation108_spill] sm:$0xff] %v5770_v45  ;;  %v3944_v53 = vld [vmem:[%s7558_s2 + $0x1ec] sm:$0xf0] }
  0xeb   :  { %1217 = vmatpush.bf16.msra.mxu0 %v5734_v58  ;;  %v4375_v58 = vld [vmem:[%s7558_s2 + $0x214] sm:$0xf]  ;;  %7952 = vst [vmem:[#allocation109_spill] sm:$0xff] %v5787_v6  ;;  %1152 = vmatpush.bf16.msra.mxu3 %v5752_v22  ;;  %v5830_v14 = vor.u32 %v4366_v35, %v3944_v53 }
  0xec   :  { %1244 = vmatpush.bf16.msra.mxu2 %v5739_v21  ;;  %1178 = vmatpush.bf16.msrb.mxu1 %v5754_v63  ;;  %v5792_v21 = vor.u32 %v4315_v49, %v3790_v62  ;;  %v5798_v37 = vor.u32 %v4375_v58, %v3968_v44  ;;  %v4443_v49 = vld [vmem:[%s7558_s2 + $0x430] sm:$0xf0]  ;;  %v4370_v62 = vld [vmem:[%s7558_s2 + $0x1e8] sm:$0xf0]  ;;  %v4190_v44 = vld [vmem:[%s7558_s2 + $0x3c8] sm:$0xf] }
  0xed   :  { %v5824_v58 = vor.u32 %v4443_v49, %v4226_v60  ;;  %v5828_v4 = vor.u32 %v4370_v62, %v3942_v17  ;;  %7955 = vst [vmem:[#allocation112_spill] sm:$0xff] %v5830_v14  ;;  %v4434_v60 = vld [vmem:[%s7558_s2 + $0x3e8] sm:$0xf0]  ;;  %v4361_v49 = vld [vmem:[%s7558_s2 + $0x1a0] sm:$0xf0] }
  0xee   :  { %v4357_v17 = vld [vmem:[%s7558_s2 + $0x184] sm:$0xf]  ;;  %v3920_v62 = vld [vmem:[%s7558_s2 + $0x1a4] sm:$0xf0]  ;;  %v5855_v35 = vor.u32 %v4434_v60, %v4190_v44  ;;  %v5859_v53 = vor.u32 %v4361_v49, %v3918_v54  ;;  %v4352_v60 = vld [vmem:[%s7558_s2 + $0x158] sm:$0xf0] }
  0xef   :  { %1245 = vmatmul.bf16.vlgmr.msra.gmra.mxu2 %v5066_v36  ;;  %1218 = vmatpush.bf16.msra.mxu0 %v5770_v45  ;;  %7953 = vst [vmem:[#allocation110_spill] sm:$0xff] %v5824_v58  ;;  %v4425_v44 = vld [vmem:[%s7558_s2 + $0x3a0] sm:$0xf0]  ;;  %v4348_v54 = vld [vmem:[%s7558_s2 + $0x13c] sm:$0xf] }
  0xf0   :  { %1395 = vmatpush.bf16.msrb.mxu2 %v4906_v15  ;;  %1153 = vmatpush.bf16.msra.mxu3 %v5792_v21  ;;  %7954 = vst [vmem:[#allocation111_spill] sm:$0xff] %v5828_v4  ;;  %v4154_v15 = vld [vmem:[%s7558_s2 + $0x380] sm:$0xf]  ;;  %v3846_v45 = vld [vmem:[%s7558_s2 + $0xa8] sm:$0xf] }
  0xf1   :  { %1179 = vmatpush.bf16.msrb.mxu1 %v5794_v8  ;;  %7956 = vst [vmem:[#allocation113_spill] sm:$0xff] %v5855_v35  ;;  %v3896_v49 = vld [vmem:[%s7558_s2 + $0x15c] sm:$0xf0] }
  0xf2   :  { %1219 = vmatmul.bf16.vlgmr.msra.gmra.mxu0 %v5066_v36  ;;  %7957 = vst [vmem:[#allocation114_spill] sm:$0xff] %v5859_v53 }
  0xf3   :  { %1263 = vmatpush.bf16.msrb.mxu0 %v5787_v6  ;;  %1154 = vmatmul.bf16.vlgmr.msra.gmra.mxu3 %v5539_v0  ;;  %v3870_v6 = vld [vmem:[%s7558_s2 + $0xf0] sm:$0xf] }
  0xf4   :  { %1396 = vmatpush.bf16.msrb.mxu2 %v4932_v27  ;;  %1198 = vmatpush.bf16.msrb.mxu3 %v5796_v9  ;;  %v5861_v27 = vor.u32 %v4357_v17, %v3920_v62  ;;  %v5883_v17 = vor.u32 %v4425_v44, %v4154_v15  ;;  %v4416_v15 = vld [vmem:[%s7558_s2 + $0x358] sm:$0xf0]  ;;  %v4343_v44 = vld [vmem:[%s7558_s2 + $0x110] sm:$0xf0] }
  0xf5   :  { %1224 = vmatpush.bf16.msra.mxu1 %v5798_v37 }
  0xf6   :  { %1180 = vmatmul.bf16.vlgmr.msrb.gmra.mxu1 %v5539_v0  ;;  %7958 = vst [vmem:[#allocation115_spill] sm:$0xff] %v5861_v27 }
  0xf7   :  { %1264 = vmatpush.bf16.msrb.mxu0 %v5824_v58  ;;  %7959 = vst [vmem:[#allocation116_spill] sm:$0xff] %v5883_v17  ;;  %v5889_v58 = vor.u32 %v4348_v54, %v3896_v49  ;;  %v5915_v49 = vor.u32 %v4343_v44, %v3870_v6  ;;  %v4330_v6 = vld [vmem:[%s7558_s2 + $0xac] sm:$0xf]  ;;  %v3848_v44 = vld [vmem:[%s7558_s2 + $0xcc] sm:$0xf0] }
  0xf8   :  { %1397 = vmatpush.bf16.msrb.mxu2 %v4949_v34  ;;  %1199 = vmatpush.bf16.msrb.mxu3 %v5828_v4  ;;  %v3894_v34 = vld [vmem:[%s7558_s2 + $0x138] sm:$0xf] }
  0xf9   :  { %1225 = vmatpush.bf16.msra.mxu1 %v5830_v14  ;;  %v5887_v62 = vor.u32 %v4352_v60, %v3894_v34  ;;  %7960 = vst [vmem:[#allocation117_spill] sm:$0xff] %v5889_v58  ;;  %v4339_v34 = vld [vmem:[%s7558_s2 + $0xf4] sm:$0xf]  ;;  %v3872_v60 = vld [vmem:[%s7558_s2 + $0x114] sm:$0xf0] }
  0xfa   :  { %7962 = vst [vmem:[#allocation119_spill] sm:$0xff] %v5915_v49 }
  0xfb   :  { %1265 = vmatpush.bf16.msrb.mxu0 %v5855_v35  ;;  %v5917_v35 = vor.u32 %v4339_v34, %v3872_v60 }
  0xfc   :  { %1398 = vmatpush.bf16.msrb.mxu2 %v4994_v50  ;;  %1200 = vmatpush.bf16.msrb.mxu3 %v5859_v53  ;;  %v4118_v50 = vld [vmem:[%s7558_s2 + $0x338] sm:$0xf] }
  0xfd   :  { %1226 = vmatpush.bf16.msra.mxu1 %v5861_v27  ;;  %v5911_v54 = vor.u32 %v4416_v15, %v4118_v50  ;;  %7963 = vst [vmem:[#allocation120_spill] sm:$0xff] %v5917_v35  ;;  %v4407_v50 = vld [vmem:[%s7558_s2 + $0x310] sm:$0xf0]  ;;  %v4334_v15 = vld [vmem:[%s7558_s2 + $0xc8] sm:$0xf0] }
  0xfe   :  { %v5943_v60 = vor.u32 %v4334_v15, %v3846_v45  ;;  %v4321_v45 = vld [vmem:[%s7558_s2 + $0x64] sm:$0xf]  ;;  %v3824_v15 = vld [vmem:[%s7558_s2 + $0x84] sm:$0xf0] }
  0xff   :  { %1266 = vmatpush.bf16.msrb.mxu0 %v5883_v17  ;;  %7961 = vst [vmem:[#allocation118_spill] sm:$0xff] %v5911_v54  ;;  %v5945_v17 = vor.u32 %v4330_v6, %v3848_v44 }
 0x100   :  { %1399 = vmatpush.bf16.msrb.mxu2 %v5012_v59  ;;  %1201 = vmatpush.bf16.msrb.mxu3 %v5887_v62  ;;  %v4082_v59 = vld [vmem:[%s7558_s2 + $0x2f0] sm:$0xf]  ;;  %7965 = vst [vmem:[#allocation122_spill] sm:$0xff] %v5943_v60 }
 0x101   :  { %1227 = vmatpush.bf16.msra.mxu1 %v5889_v58  ;;  %v5939_v34 = vor.u32 %v4407_v50, %v4082_v59  ;;  %7966 = vst [vmem:[#allocation123_spill] sm:$0xff] %v5945_v17  ;;  %v3822_v58 = vld [vmem:[%s7558_s2 + $0x60] sm:$0xf]  ;;  %v4398_v59 = vld [vmem:[%s7558_s2 + $0x2c8] sm:$0xf0] }
 0x102   :  { %v4325_v50 = vld [vmem:[%s7558_s2 + $0x80] sm:$0xf0] }
 0x103   :  { %1267 = vmatpush.bf16.msrb.mxu0 %v5911_v54  ;;  %7964 = vst [vmem:[#allocation121_spill] sm:$0xff] %v5939_v34  ;;  %v5971_v44 = vor.u32 %v4325_v50, %v3822_v58  ;;  %v5973_v54 = vor.u32 %v4321_v45, %v3824_v15  ;;  %v4312_v58 = vld [vmem:[%s7558_s2 + $0x1c] sm:$0xf]  ;;  %v3800_v50 = vld [vmem:[%s7558_s2 + $0x3c] sm:$0xf0] }
 0x104   :  { %1400 = vmatpush.bf16.msrb.mxu2 %v5030_v2  ;;  %1202 = vmatpush.bf16.msrb.mxu3 %v5915_v49  ;;  %v4046_v2 = vld [vmem:[%s7558_s2 + $0x2a8] sm:$0xf]  ;;  %v3974_v45 = vld [vmem:[%s7558_s2 + $0x218] sm:$0xf]  ;;  %v4380_v15 = vld [vmem:[%s7558_s2 + $0x238] sm:$0xf0] }
 0x105   :  { %1228 = vmatpush.bf16.msra.mxu1 %v5917_v35  ;;  %v5967_v6 = vor.u32 %v4398_v59, %v4046_v2  ;;  %7968 = vst [vmem:[#allocation125_spill] sm:$0xff] %v5971_v44  ;;  %v3798_v35 = vld [vmem:[%s7558_s2 + $0x18] sm:$0xf]  ;;  %v4389_v2 = vld [vmem:[%s7558_s2 + $0x280] sm:$0xf0] }
 0x106   :  { %7969 = vst [vmem:[#allocation126_spill] sm:$0xff] %v5973_v54  ;;  %v4316_v59 = vld [vmem:[%s7558_s2 + $0x38] sm:$0xf0]  ;;  %v3950_v49 = vld [vmem:[%s7558_s2 + $0x1d0] sm:$0xf] }
 0x107   :  { %1268 = vmatpush.bf16.msrb.mxu0 %v5939_v34  ;;  %7967 = vst [vmem:[#allocation124_spill] sm:$0xff] %v5967_v6 }
 0x108   :  { %1401 = vmatpush.bf16.msrb.mxu2 %v5051_v20  ;;  %1203 = vmatpush.bf16.msrb.mxu3 %v5943_v60  ;;  %v4010_v20 = vld [vmem:[%s7558_s2 + $0x260] sm:$0xf]  ;;  %v6010_v60 = vor.u32 %v4380_v15, %v3974_v45  ;;  %v4344_v45 = vld [vmem:[%s7558_s2 + $0x118] sm:$0xf0] }
 0x109   :  { %1229 = vmatpush.bf16.msra.mxu1 %v5945_v17  ;;  %v6002_v34 = vor.u32 %v4389_v2, %v4010_v20  ;;  %v6006_v17 = vor.u32 %v4316_v59, %v3798_v35  ;;  %v3926_v35 = vld [vmem:[%s7558_s2 + $0x188] sm:$0xf]  ;;  %v4362_v2 = vld [vmem:[%s7558_s2 + $0x1a8] sm:$0xf0]  ;;  %v6048_v59 = vpop.f32.mrf.mxu0 }
 0x10a   :  { %7973 = vst [vmem:[#allocation130_spill] sm:$0xff] %v6010_v60 }
 0x10b   :  { %1269 = vmatpush.bf16.msrb.mxu0 %v5967_v6  ;;  %7970 = vst [vmem:[#allocation127_spill] sm:$0xff] %v6002_v34 }
 0x10c   :  { %1402 = vmatpush.bf16.msrb.mxu2 %v5077_v42  ;;  %1204 = vmatpush.bf16.msrb.mxu3 %v5971_v44  ;;  %7971 = vst [vmem:[#allocation128_spill] sm:$0xff] %v6006_v17  ;;  %v6008_v42 = vor.u32 %v4312_v58, %v3800_v50  ;;  %v3878_v50 = vld [vmem:[%s7558_s2 + $0xf8] sm:$0xf] }
 0x10d   :  { %1230 = vmatpush.bf16.msra.mxu1 %v5973_v54  ;;  %v6064_v15 = vor.u32 %v4344_v45, %v3878_v50  ;;  %v3830_v50 = vld [vmem:[%s7558_s2 + $0x68] sm:$0xf]  ;;  %v4326_v45 = vld [vmem:[%s7558_s2 + $0x88] sm:$0xf0] }
 0x10e   :  { %7972 = vst [vmem:[#allocation129_spill] sm:$0xff] %v6008_v42 }
 0x10f   :  { %1270 = vmatpush.bf16.msrb.mxu0 %v6002_v34  ;;  %7977 = vst [vmem:[#allocation134_spill] sm:$0xff] %v6064_v15 }
 0x110   :  { %1447 = vmatpush.bf16.msra.mxu2 %v5088_v51  ;;  %v4371_v51 = vld [vmem:[%s7558_s2 + $0x1f0] sm:$0xf0]  ;;  %1205 = vmatpush.bf16.msrb.mxu3 %v6006_v17 }
 0x111   :  { %1231 = vmatpush.bf16.msra.mxu1 %v6008_v42  ;;  %v6023_v20 = vor.u32 %v4371_v51, %v3950_v49  ;;  %v6038_v51 = vor.u32 %v4362_v2, %v3926_v35  ;;  %v3902_v49 = vld [vmem:[%s7558_s2 + $0x140] sm:$0xf]  ;;  %v3854_v35 = vld [vmem:[%s7558_s2 + $0xb0] sm:$0xf]  ;;  %v4335_v2 = vld [vmem:[%s7558_s2 + $0xd0] sm:$0xf0] }
 0x112   :  { %1271 = vmatmul.bf16.vlgmr.msrb.gmra.mxu0 %v5066_v36  ;;  %v4353_v36 = vld [vmem:[%s7558_s2 + $0x160] sm:$0xf0] }
 0x113   :  { %7974 = vst [vmem:[#allocation131_spill] sm:$0xff] %v6023_v20  ;;  %1206 = vmatmul.bf16.vlgmr.msrb.gmra.mxu3 %v5539_v0  ;;  %1421 = vmatpush.bf16.msra.mxu0 %v4925_v24  ;;  %v6052_v58 = vor.u32 %v4353_v36, %v3902_v49  ;;  %v1066_v49 = vpop.f32.mrf.mxu0  ;;  %v6076_v36 = vor.u32 %v4335_v2, %v3854_v35  ;;  %v3806_v35 = vld [vmem:[%s7558_s2 + $0x20] sm:$0xf]  ;;  %v4317_v2 = vld [vmem:[%s7558_s2 + $0x40] sm:$0xf0]  ;;  %v8000_v24 = vld [vmem:[#allocation50_spill] sm:$0xff] }
 0x114   :  { %1448 = vmatpush.bf16.msra.mxu2 %v5117_v13  ;;  %1250 = vmatpush.bf16.msra.mxu3 %v6010_v60  ;;  %7975 = vst [vmem:[#allocation132_spill] sm:$0xff] %v6038_v51  ;;  %v6088_v49 = vor.u32 %v4326_v45, %v3830_v50  ;;  %v1090_v50 = vpop.f32.mrf.mxu2  ;;  %v7981_v45 = vld [vmem:[#allocation10_spill] sm:$0xff] }
 0x115   :  { %1382 = vmatpush.bf16.msrb.mxu1 %v4684_v3  ;;  %7976 = vst [vmem:[#allocation133_spill] sm:$0xff] %v6052_v58 }
 0x116   :  { %1232 = vmatmul.bf16.vlgmr.msra.gmra.mxu1 %v5539_v0  ;;  %7978 = vst [vmem:[#allocation135_spill] sm:$0xff] %v6076_v36 }
 0x117   :  { %1422 = vmatpush.bf16.msra.mxu0 %v4946_v33  ;;  %7979 = vst [vmem:[#allocation136_spill] sm:$0xff] %v6088_v49  ;;  %v7999_v33 = vld [vmem:[#allocation64_spill] sm:$0xff] }
 0x118   :  { %1449 = vmatpush.bf16.msra.mxu2 %v5148_v46  ;;  %1251 = vmatpush.bf16.msra.mxu3 %v6023_v20  ;;  %v7996_v46 = vld [vmem:[#allocation25_spill] sm:$0xff] }
 0x119   :  { %1383 = vmatpush.bf16.msrb.mxu1 %v4704_v10 }
 0x11b   :  { %1423 = vmatpush.bf16.msra.mxu0 %v4960_v38  ;;  %v7997_v38 = vld [vmem:[#allocation28_spill] sm:$0xff] }
 0x11c   :  { %1450 = vmatpush.bf16.msra.mxu2 %v5175_v28  ;;  %1252 = vmatpush.bf16.msra.mxu3 %v6038_v51  ;;  %v7993_v28 = vld [vmem:[#allocation22_spill] sm:$0xff] }
 0x11d   :  { %1384 = vmatpush.bf16.msrb.mxu1 %v4731_v19 }
 0x11f   :  { %1424 = vmatpush.bf16.msra.mxu0 %v4972_v43  ;;  %v7994_v43 = vld [vmem:[#allocation26_spill] sm:$0xff] }
 0x120   :  { %1451 = vmatpush.bf16.msra.mxu2 %v5202_v47  ;;  %1253 = vmatpush.bf16.msra.mxu3 %v6052_v58  ;;  %v7991_v47 = vld [vmem:[#allocation23_spill] sm:$0xff] }
 0x121   :  { %1385 = vmatpush.bf16.msrb.mxu1 %v4765_v30 }
 0x123   :  { %1425 = vmatpush.bf16.msra.mxu0 %v4999_v52 }
 0x124   :  { %1452 = vmatpush.bf16.msra.mxu2 %v5229_v23  ;;  %1254 = vmatpush.bf16.msra.mxu3 %v6064_v15  ;;  %v7988_v23 = vld [vmem:[#allocation20_spill] sm:$0xff] }
 0x125   :  { %1386 = vmatpush.bf16.msrb.mxu1 %v4793_v39 }
 0x127   :  { %1426 = vmatpush.bf16.msra.mxu0 %v5017_v61  ;;  %v7989_v61 = vld [vmem:[#allocation55_spill] sm:$0xff] }
 0x128   :  { %1453 = vmatpush.bf16.msra.mxu2 %v5256_v56  ;;  %1255 = vmatpush.bf16.msra.mxu3 %v6076_v36  ;;  %v6100_v56 = vor.u32 %v4317_v2, %v3806_v35  ;;  %v7982_v35 = vld [vmem:[#allocation14_spill] sm:$0xff]  ;;  %v7983_v2 = vld [vmem:[#allocation49_spill] sm:$0xff] }
 0x129   :  { %1387 = vmatpush.bf16.msrb.mxu1 %v4821_v48 }
 0x12a   :  { %7980 = vst [vmem:[#allocation137_spill] sm:$0xff] %v6100_v56 }
 0x12b   :  { %1427 = vmatpush.bf16.msra.mxu0 %v5035_v12  ;;  %v7986_v12 = vld [vmem:[#allocation52_spill] sm:$0xff] }
 0x12c   :  { %1454 = vmatpush.bf16.msra.mxu2 %v5303_v1  ;;  %1256 = vmatpush.bf16.msra.mxu3 %v6088_v49  ;;  %v7984_v1 = vld [vmem:[#allocation13_spill] sm:$0xff] }
 0x12d   :  { %1388 = vmatpush.bf16.msrb.mxu1 %v4849_v57 }
 0x12f   :  { %1428 = vmatpush.bf16.msra.mxu0 %v5062_v29  ;;  %v1092_v29 = vpop.f32.mrf.mxu2 }
 0x130   :  { %1257 = vmatpush.bf16.msra.mxu3 %v6100_v56  ;;  %v7995_v29 = vld [vmem:[#allocation61_spill] sm:$0xff] }
 0x131   :  { %1389 = vmatpush.bf16.msrb.mxu1 %v4883_v5 }
 0x133   :  { %1258 = vmatmul.bf16.vlgmr.msra.gmra.mxu3 %v5539_v0  ;;  %1473 = vmatpush.bf16.msrb.mxu0 %v5064_v32  ;;  %v7985_v0 = vld [vmem:[#allocation17_spill] sm:$0xff]  ;;  %v7987_v32 = vld [vmem:[#allocation16_spill] sm:$0xff] }
 0x134   :  { %1408 = vmatpush.bf16.msrb.mxu3 %v4695_v7 }
 0x135   :  { %1434 = vmatpush.bf16.msra.mxu1 %v4728_v18 }
 0x137   :  { %1474 = vmatpush.bf16.msrb.mxu0 %v5094_v55  ;;  %v7990_v55 = vld [vmem:[#allocation19_spill] sm:$0xff]  ;;  %v6125_v52 = vpop.f32.mrf.mxu2 }
 0x138   :  { %1409 = vmatpush.bf16.msrb.mxu3 %v4708_v11 }
 0x139   :  { %1435 = vmatpush.bf16.msra.mxu1 %v4753_v26 }
 0x13b   :  { %1475 = vmatpush.bf16.msrb.mxu0 %v7983_v2  ;;  %v7992_v2 = vld [vmem:[#allocation58_spill] sm:$0xff] }
 0x13c   :  { %1410 = vmatpush.bf16.msrb.mxu3 %v7981_v45 }
 0x13d   :  { %1436 = vmatpush.bf16.msra.mxu1 %v7982_v35 }
 0x13f   :  { %1476 = vmatpush.bf16.msrb.mxu0 %v7986_v12  ;;  %v1116_v12 = vpop.f32.mrf.mxu0  ;;  %v1144_v13 = vpop.f32.mrf.mxu2 }
 0x140   :  { %1411 = vmatpush.bf16.msrb.mxu3 %v7984_v1 }
 0x141   :  { %1437 = vmatpush.bf16.msra.mxu1 %v7985_v0  ;;  %v8003_v0 = vld [vmem:[#allocation59_spill] sm:$0xff] }
 0x143   :  { %1477 = vmatpush.bf16.msrb.mxu0 %v7989_v61  ;;  %v7998_v61 = vld [vmem:[#allocation47_spill] sm:$0xff] }
 0x144   :  { %1412 = vmatpush.bf16.msrb.mxu3 %v7987_v32 }
 0x145   :  { %1438 = vmatpush.bf16.msra.mxu1 %v7988_v23 }
 0x147   :  { %1478 = vmatpush.bf16.msrb.mxu0 %v7992_v2  ;;  %v4266_v2 = vld [vmem:[%s7561_s0 + $0xc] sm:$0xff]  ;;  %v1118_v6 = vpop.f32.mrf.mxu0 }
 0x148   :  { %1413 = vmatpush.bf16.msrb.mxu3 %v7990_v55  ;;  %v1331_v34 = vunpack.c.h.bf16 %v4266_v2 }
 0x149   :  { %1439 = vmatpush.bf16.msra.mxu1 %v7991_v47 }
 0x14b   :  { %1479 = vmatpush.bf16.msrb.mxu0 %v7995_v29  ;;  %v8001_v29 = vld [vmem:[#allocation53_spill] sm:$0xff] }
 0x14c   :  { %1414 = vmatpush.bf16.msrb.mxu3 %v7993_v28 }
 0x14d   :  { %1440 = vmatpush.bf16.msra.mxu1 %v7994_v43 }
 0x14f   :  { %1480 = vmatpush.bf16.msrb.mxu0 %v7999_v33  ;;  %v1077_v43 = vpop.f32.mrf.mxu1 }
 0x150   :  { %1415 = vmatpush.bf16.msrb.mxu3 %v7996_v46  ;;  %v1091_v28 = vadd.f32 %v1090_v50, %v1077_v43 }
 0x151   :  { %1441 = vmatpush.bf16.msra.mxu1 %v7997_v38  ;;  %v8002_v38 = vld [vmem:[#allocation56_spill] sm:$0xff] }
 0x152   :  { %v1194_v46 = vpop.f32.mrf.mxu2  ;;  %v1334_v47 = vadd.f32 %v1331_v34, %v1091_v28  ;;  %v6142_v23 = vpop.f32.mrf.mxu0 }
 0x154   :  { %1460 = vmatpush.bf16.msra.mxu3 %v7998_v61  ;;  %v1330_v61 = vunpack.c.l.bf16 %v4266_v2  ;;  %v4269_v13 = vmul.f32 -1.442695, %v1334_v47  ;;  %v8005_v47 = vld [vmem:[#allocation66_spill] sm:$0xff] }
 0x155   :  { %v1051_v55 = vpop.f32.mrf.mxu3 }
 0x156   :  { %v1065_v33 = vadd.f32 %v6048_v59, %v1051_v55  ;;  %4467 = vpow2.f32 %v4269_v13 }
 0x157   :  { %v1079_v32 = vpop.f32.mrf.mxu1 }
 0x158   :  { %1461 = vmatpush.bf16.msra.mxu3 %v8000_v24  ;;  %v1333_v24 = vadd.f32 %v1330_v61, %v1065_v33  ;;  %v8006_v32 = vld [vmem:[#allocation70_spill] sm:$0xff] }
 0x15a   :  { %v1196_v6 = vpop.f32.mrf.mxu2  ;;  %v4268_v1 = vmul.f32 -1.442695, %v1333_v24  ;;  %v1170_v28 = vpop.f32.mrf.mxu0 }
 0x15c   :  { %1462 = vmatpush.bf16.msra.mxu3 %v8001_v29  ;;  %v8004_v29 = vld [vmem:[#allocation62_spill] sm:$0xff]  ;;  %4469 = vpow2.f32 %v4268_v1  ;;  %v4468_v34 = vpop.eup %4467 }
 0x15d   :  { %v1053_v43 = vpop.f32.mrf.mxu3  ;;  %v1342_v59 = vadd.f32 1.0, %v4468_v34 }
 0x15f   :  { %v6146_v50 = vpop.f32.mrf.mxu1  ;;  %vm1363_vm13 = vweird.f32 %v1342_v59 }
 0x160   :  { %1463 = vmatpush.bf16.msra.mxu3 %v8002_v38 }
 0x162   :  { %v4470_v55 = vpop.eup %4469 }
 0x163   :  { %v1341_v2 = vadd.f32 1.0, %v4470_v55 }
 0x164   :  { %1464 = vmatpush.bf16.msra.mxu3 %v8003_v0 }
 0x165   :  { %4471 = vrcp.f32 %v1341_v2  ;;  %v1103_v33 = vpop.f32.mrf.mxu3  ;;  %v1352_v0 = vand.u32 2147483647, %v1341_v2  ;;  %v1354_v38 = vand.u32 2147483648, %v1341_v2  ;;  %vm1348_vm9 = vweird.f32 %v1341_v2 }
 0x166   :  { %4473 = vrcp.f32 %v1342_v59  ;;  %v1117_v34 = vadd.f32 %v1116_v12, %v1103_v33 }
 0x167   :  { %v1131_v61 = vpop.f32.mrf.mxu1  ;;  %vm1353_vm11 = vcmp.eq.f32.partialorder %v1352_v0, 8.507059e+37 }
 0x168   :  { %1465 = vmatpush.bf16.msra.mxu3 %v8004_v29  ;;  %v4267_v61 = vld [vmem:[%s7561_s0 + $0x14] sm:$0xf]  ;;  %v1373_v18 = vadd.f32 %v5351_v25, %v1117_v34 }
 0x169   :  { %v1332_v26 = vunpack.c.l.bf16 %v4267_v61 }
 0x16b   :  { %v4472_v24 = vpop.eup %4471 }
 0x16c   :  { %1466 = vmatpush.bf16.msra.mxu3 %v8005_v47  ;;  %v4474_v13 = vpop.eup %4473  ;;  %v1344_v6 = vmul.f32 %v4472_v24, %v1341_v2  ;;  %vm1349_vm8 = vweird.f32 %v4472_v24  ;;  %v1369_v2 = vand.u32 2147483648, %v1342_v59 }
 0x16d   :  { %v1105_v1 = vpop.f32.mrf.mxu3  ;;  %v1359_v29 = vmul.f32 %v4474_v13, %v1342_v59  ;;  %vm1350_vm10 = vmor %vm1348_vm9, %vm1349_vm8  ;;  %vm1364_vm12 = vweird.f32 %v4474_v13 }
 0x16e   :  { %v1345_v43 = vsub.f32 1.0, %v1344_v6  ;;  %v1355_v6 = vor.u32 1.1754944e-38, %v1354_v38  ;;  %vm1365_vm14 = vmor %vm1363_vm13, %vm1364_vm12 }
 0x16f   :  { %v6150_v28 = vpop.f32.mrf.mxu0  ;;  %v1360_v1 = vsub.f32 1.0, %v1359_v29  ;;  %v1367_v29 = vand.u32 2147483647, %v1342_v59 }
 0x170   :  { %1467 = vmatpush.bf16.msra.mxu3 %v8006_v32  ;;  %v1346_v55 = vmul.f32 %v4472_v24, %v1345_v43 }
 0x171   :  { %vm1368_vm15 = vcmp.eq.f32.partialorder %v1367_v29, 8.507059e+37 }
 0x172   :  { %v1246_v35 = vpop.f32.mrf.mxu2  ;;  %v1347_v45 = vadd.f32 %v4472_v24, %v1346_v55  ;;  %v8007_v55 = vld [vmem:[#allocation89_spill] sm:$0xff] }
 0x173   :  { %v1181_v47 = vpop.f32.mrf.mxu1 }
 0x174   :  { %v6152_v32 = vadd.f32 %v1194_v46, %v1181_v47  ;;  %v1351_v11 = vsel %vm1350_vm10, %v4472_v24, %v1347_v45  ;;  %v1361_v46 = vmul.f32 %v4474_v13, %v1360_v1  ;;  %v1370_v24 = vor.u32 1.1754944e-38, %v1369_v2 }
 0x175   :  { %v1356_v7 = vsel %vm1353_vm11, %v1355_v6, %v1351_v11 }
 0x176   :  { %v1155_v12 = vpop.f32.mrf.mxu3  ;;  %v1374_v33 = vmul.f32 %v1373_v18, %v1356_v7  ;;  %v1362_v57 = vadd.f32 %v4474_v13, %v1361_v46 }
 0x177   :  { %v1222_v43 = vpop.f32.mrf.mxu0 }
 0x178   :  { %v1375_v56 = vadd.f32 %v1374_v33, %v1332_v26  ;;  %v1366_v45 = vsel %vm1365_vm14, %v4474_v13, %v1362_v57  ;;  %v8009_v33 = vld [vmem:[#allocation93_spill] sm:$0xff] }
 0x179   :  { %v1371_v7 = vsel %vm1368_vm15, %v1370_v24, %v1366_v45  ;;  %v8011_v45 = vld [vmem:[#allocation97_spill] sm:$0xff] }
 0x17a   :  { %v1248_v5 = vpop.f32.mrf.mxu2  ;;  %4475 = vtanh.f32 %v1375_v56  ;;  %v1169_v56 = vadd.f32 %v6142_v23, %v1155_v12  ;;  %v1143_v23 = vadd.f32 %v6125_v52, %v6146_v50  ;;  %v8008_v12 = vld [vmem:[#allocation92_spill] sm:$0xff]  ;;  %v8013_v24 = vld [vmem:[#allocation101_spill] sm:$0xff] }
 0x17b   :  { %v1183_v47 = vpop.f32.mrf.mxu1  ;;  %v6168_v5 = vld [vmem:[%s7563_s4] sm:$0x7] }
 0x17c   :  { %v6171_v57 = vperm.slane %v6168_v5, 1  ;;  %v6182_v61 = vperm.slane %v6168_v5, 0 }
 0x17e   :  { %v1157_v38 = vpop.f32.mrf.mxu3  ;;  %v1277_v13 = vadd.f32 %v1169_v56, %v6171_v57  ;;  %v1276_v43 = vadd.f32 %v1143_v23, %v6182_v61 }
 0x17f   :  { %v8010_v38 = vld [vmem:[#allocation96_spill] sm:$0xff] }
 0x180   :  { %v4476_v0 = vpop.eup %4475 }
 0x181   :  { %v1377_v11 = vsub.f32 %v5514_v31, %v4476_v0 }
 0x183   :  { %v1378_v18 = vmul.f32 %v1377_v11, %v1371_v7  ;;  %v8014_v11 = vld [vmem:[#allocation104_spill] sm:$0xff]  ;;  %v8015_v7 = vld [vmem:[#allocation105_spill] sm:$0xff] }
 0x185   :  { %v6159_v25 = vadd.f32 %v4476_v0, %v1378_v18  ;;  %v8012_v0 = vld [vmem:[#allocation100_spill] sm:$0xff] }
 0x187   :  { %v6163_v26 = vpack.c.bf16 %v6159_v25, %v6159_v25 }
 0x189   :  { %1390 = vmatmul.bf16.vlgmr.msrb.gmra.mxu1 %v6163_v26  ;;  %1416 = vmatmul.bf16.vlgmr.msrb.gmra.mxu3 %v6163_v26 }
 0x18a   :  { %1486 = vmatpush.bf16.msrb.mxu1 %v5523_v40  ;;  %1512 = vmatpush.bf16.msrb.mxu3 %v5525_v16 }
 0x18e   :  { %1487 = vmatpush.bf16.msrb.mxu1 %v5566_v41  ;;  %1513 = vmatpush.bf16.msrb.mxu3 %v8007_v55 }
 0x18f   :  { %v1272_v31 = vpop.f32.mrf.mxu0 }
 0x192   :  { %1488 = vmatpush.bf16.msrb.mxu1 %v8008_v12  ;;  %1514 = vmatpush.bf16.msrb.mxu3 %v8009_v33 }
 0x193   :  { %v1233_v59 = vpop.f32.mrf.mxu1 }
 0x194   :  { %v1247_v34 = vadd.f32 %v1246_v35, %v1233_v59 }
 0x196   :  { %v1280_v1 = vadd.f32 %v1277_v13, %v1247_v34  ;;  %v1207_v6 = vpop.f32.mrf.mxu3  ;;  %1489 = vmatpush.bf16.msrb.mxu1 %v8010_v38  ;;  %1515 = vmatpush.bf16.msrb.mxu3 %v8011_v45 }
 0x197   :  { %v1221_v35 = vadd.f32 %v6150_v28, %v1207_v6  ;;  %v1274_v47 = vpop.f32.mrf.mxu0 }
 0x198   :  { %v4265_v46 = vmul.f32 -1.442695, %v1280_v1  ;;  %v6211_v47 = vld [vmem:[%s7562_s5] ss:$0 sm:$0xff] }
 0x199   :  { %v1279_v29 = vadd.f32 %v1276_v43, %v1221_v35  ;;  %1442 = vmatmul.bf16.vlgmr.msra.gmra.mxu1 %v6163_v26  ;;  %1468 = vmatmul.bf16.vlgmr.msra.gmra.mxu3 %v6163_v26 }
 0x19a   :  { %4477 = vpow2.f32 %v4265_v46  ;;  %1490 = vmatpush.bf16.msrb.mxu1 %v8012_v0  ;;  %1516 = vmatpush.bf16.msrb.mxu3 %v8013_v24 }
 0x19b   :  { %v1235_v2 = vpop.f32.mrf.mxu1  ;;  %v4264_v52 = vmul.f32 -1.442695, %v1279_v29 }
 0x19d   :  { %4479 = vpow2.f32 %v4264_v52  ;;  %v6216_v52 = vperm.slane %v6168_v5, 2 }
 0x19e   :  { %v1209_v50 = vpop.f32.mrf.mxu3  ;;  %1491 = vmatpush.bf16.msrb.mxu1 %v8014_v11  ;;  %1517 = vmatpush.bf16.msrb.mxu3 %v8015_v7 }
 0x19f   :  { %8016 = vst [vmem:[#allocation89_spill] sm:$0xff] %v6216_v52 }
 0x1a0   :  { %v4478_v28 = vpop.eup %4477 }
 0x1a1   :  { %v1288_v56 = vadd.f32 1.0, %v4478_v28 }
 0x1a2   :  { %1492 = vmatpush.bf16.msrb.mxu1 %v5752_v22  ;;  %1518 = vmatpush.bf16.msrb.mxu3 %v5754_v63 }
 0x1a3   :  { %v4480_v18 = vpop.eup %4479  ;;  %vm1309_vm5 = vweird.f32 %v1288_v56 }
 0x1a4   :  { %v1287_v59 = vadd.f32 1.0, %v4480_v18 }
 0x1a6   :  { %4481 = vrcp.f32 %v1287_v59  ;;  %1493 = vmatpush.bf16.msrb.mxu1 %v5792_v21  ;;  %1519 = vmatpush.bf16.msrb.mxu3 %v5794_v8  ;;  %v1300_v6 = vand.u32 2147483648, %v1287_v59  ;;  %v1298_v35 = vand.u32 2147483647, %v1287_v59  ;;  %vm1294_vm1 = vweird.f32 %v1287_v59 }
 0x1a7   :  { %4483 = vrcp.f32 %v1288_v56 }
 0x1a8   :  { %v1301_v28 = vor.u32 1.1754944e-38, %v1300_v6  ;;  %vm1299_vm3 = vcmp.eq.f32.partialorder %v1298_v35, 8.507059e+37  ;;  %v8019_v6 = vld [vmem:[#allocation120_spill] sm:$0xff]  ;;  %v1313_v35 = vand.u32 2147483647, %v1288_v56 }
 0x1a9   :  { %1494 = vmatmul.bf16.vlgmr.msrb.gmra.mxu1 %v6163_v26  ;;  %1520 = vmatmul.bf16.vlgmr.msrb.gmra.mxu3 %v6163_v26 }
 0x1aa   :  { %1538 = vmatpush.bf16.msra.mxu1 %v5796_v9  ;;  %1564 = vmatpush.bf16.msra.mxu3 %v5798_v37  ;;  %vm1314_vm7 = vcmp.eq.f32.partialorder %v1313_v35, 8.507059e+37  ;;  %v8030_v35 = vld [vmem:[#allocation74_spill] sm:$0xff] }
 0x1ac   :  { %v4482_v13 = vpop.eup %4481 }
 0x1ad   :  { %v1290_v34 = vmul.f32 %v4482_v13, %v1287_v59  ;;  %v4484_v23 = vpop.eup %4483  ;;  %vm1295_vm0 = vweird.f32 %v4482_v13  ;;  %v1278_v59 = vadd.f32 %v6152_v32, %v6216_v52 }
 0x1ae   :  { %1539 = vmatpush.bf16.msra.mxu1 %v5828_v4  ;;  %1565 = vmatpush.bf16.msra.mxu3 %v5830_v14  ;;  %v1305_v43 = vmul.f32 %v4484_v23, %v1288_v56  ;;  %vm1296_vm2 = vmor %vm1294_vm1, %vm1295_vm0  ;;  %vm1310_vm4 = vweird.f32 %v4484_v23 }
 0x1af   :  { %v1291_v1 = vsub.f32 1.0, %v1290_v34  ;;  %vm1311_vm6 = vmor %vm1309_vm5, %vm1310_vm4 }
 0x1b0   :  { %v1306_v18 = vsub.f32 1.0, %v1305_v43  ;;  %v1315_v43 = vand.u32 2147483648, %v1288_v56 }
 0x1b1   :  { %v1292_v46 = vmul.f32 %v4482_v13, %v1291_v1 }
 0x1b2   :  { %1540 = vmatpush.bf16.msra.mxu1 %v5859_v53  ;;  %1566 = vmatpush.bf16.msra.mxu3 %v5861_v27  ;;  %v1307_v53 = vmul.f32 %v4484_v23, %v1306_v18  ;;  %v8023_v18 = vld [vmem:[#allocation68_spill] sm:$0xff] }
 0x1b3   :  { %v1293_v29 = vadd.f32 %v4482_v13, %v1292_v46  ;;  %v8017_v46 = vld [vmem:[#allocation117_spill] sm:$0xff] }
 0x1b5   :  { %v1297_v34 = vsel %vm1296_vm2, %v4482_v13, %v1293_v29  ;;  %v1308_v13 = vadd.f32 %v4484_v23, %v1307_v53  ;;  %v8021_v29 = vld [vmem:[#allocation123_spill] sm:$0xff] }
 0x1b6   :  { %v1259_v2 = vpop.f32.mrf.mxu3  ;;  %v1302_v1 = vsel %vm1299_vm3, %v1301_v28, %v1297_v34  ;;  %1541 = vmatpush.bf16.msra.mxu1 %v5887_v62  ;;  %1567 = vmatpush.bf16.msra.mxu3 %v8017_v46  ;;  %v8024_v34 = vld [vmem:[#allocation65_spill] sm:$0xff] }
 0x1b7   :  { %v1273_v50 = vadd.f32 %v1272_v31, %v1259_v2  ;;  %v8018_v31 = vld [vmem:[#allocation119_spill] sm:$0xff]  ;;  %v8020_v2 = vld [vmem:[#allocation122_spill] sm:$0xff]  ;;  %v1312_v32 = vsel %vm1311_vm6, %v4484_v23, %v1308_v13  ;;  %v8028_v13 = vld [vmem:[#allocation72_spill] sm:$0xff] }
 0x1b9   :  { %v1319_v14 = vadd.f32 %v6211_v47, %v1273_v50  ;;  %v1316_v50 = vor.u32 1.1754944e-38, %v1315_v43  ;;  %v8029_v43 = vld [vmem:[#allocation75_spill] sm:$0xff] }
 0x1ba   :  { %1542 = vmatpush.bf16.msra.mxu1 %v8018_v31  ;;  %1568 = vmatpush.bf16.msra.mxu3 %v8019_v6 }
 0x1bb   :  { %v1320_v27 = vmul.f32 %v1319_v14, %v1302_v1  ;;  %v1317_v53 = vsel %vm1314_vm7, %v1316_v50, %v1312_v32  ;;  %v8025_v1 = vld [vmem:[#allocation71_spill] sm:$0xff]  ;;  %v8031_v32 = vld [vmem:[#allocation77_spill] sm:$0xff] }
 0x1bc   :  { %v8033_v50 = vld [vmem:[#allocation79_spill] sm:$0xff] }
 0x1bd   :  { %v1321_v5 = vadd.f32 %v1320_v27, %v1278_v59  ;;  %v4617_v27 = vld [vmem:[%s7559_s1 + $0x8] sm:$0xff] }
 0x1be   :  { %v1261_v4 = vpop.f32.mrf.mxu3  ;;  %1543 = vmatpush.bf16.msra.mxu1 %v8020_v2  ;;  %1569 = vmatpush.bf16.msra.mxu3 %v8021_v29  ;;  %v8026_v59 = vld [vmem:[#allocation69_spill] sm:$0xff] }
 0x1bf   :  { %4485 = vtanh.f32 %v1321_v5  ;;  %v8027_v5 = vld [vmem:[#allocation73_spill] sm:$0xff] }
 0x1c2   :  { %1544 = vmatpush.bf16.msra.mxu1 %v5971_v44  ;;  %1570 = vmatpush.bf16.msra.mxu3 %v5973_v54 }
 0x1c5   :  { %v4486_v14 = vpop.eup %4485 }
 0x1c6   :  { %v1323_v4 = vsub.f32 %v4617_v27, %v4486_v14  ;;  %1545 = vmatpush.bf16.msra.mxu1 %v6006_v17  ;;  %1571 = vmatpush.bf16.msra.mxu3 %v6008_v42  ;;  %v8034_v27 = vld [vmem:[#allocation78_spill] sm:$0xff] }
 0x1c8   :  { %v1324_v56 = vmul.f32 %v1323_v4, %v1317_v53  ;;  %v8035_v4 = vld [vmem:[#allocation21_spill] sm:$0xff] }
 0x1c9   :  { %1546 = vmatmul.bf16.vlgmr.msra.gmra.mxu1 %v6163_v26  ;;  %1572 = vmatmul.bf16.vlgmr.msra.gmra.mxu3 %v6163_v26  ;;  %v8036_v53 = vld [vmem:[#allocation81_spill] sm:$0xff] }
 0x1ca   :  { %v6232_v28 = vadd.f32 %v4486_v14, %v1324_v56  ;;  %1590 = vmatpush.bf16.msrb.mxu1 %v6010_v60  ;;  %1723 = vmatpush.bf16.msrb.mxu3 %v4684_v3  ;;  %v8032_v14 = vld [vmem:[#allocation76_spill] sm:$0xff] }
 0x1cb   :  { %v8037_v56 = vld [vmem:[#allocation80_spill] sm:$0xff] }
 0x1cc   :  { %8022 = vst [vmem:[#allocation92_spill] sm:$0xff] %v6232_v28  ;;  %v6240_v23 = vpack.c.bf16 %v6232_v28, %v6232_v28 }
 0x1ce   :  { %1403 = vmatmul.bf16.vlgmr.msrb.gmra.mxu2 %v6240_v23  ;;  %1429 = vmatmul.bf16.vlgmr.msra.gmra.mxu0 %v6240_v23 }
 0x1cf   :  { %1499 = vmatpush.bf16.msrb.mxu2 %v8023_v18  ;;  %1525 = vmatpush.bf16.msra.mxu0 %v8024_v34 }
 0x1d0   :  { %1591 = vmatpush.bf16.msrb.mxu1 %v6023_v20  ;;  %1724 = vmatpush.bf16.msrb.mxu3 %v4704_v10  ;;  %v8119_v10 = vld [vmem:[#allocation58_spill] sm:$0xff] }
 0x1d3   :  { %1500 = vmatpush.bf16.msrb.mxu2 %v8025_v1  ;;  %1526 = vmatpush.bf16.msra.mxu0 %v8026_v59  ;;  %v8118_v59 = vld [vmem:[#allocation55_spill] sm:$0xff] }
 0x1d4   :  { %1592 = vmatpush.bf16.msrb.mxu1 %v6038_v51  ;;  %1725 = vmatpush.bf16.msrb.mxu3 %v4731_v19 }
 0x1d7   :  { %1501 = vmatpush.bf16.msrb.mxu2 %v8027_v5  ;;  %1527 = vmatpush.bf16.msra.mxu0 %v8028_v13 }
 0x1d8   :  { %1593 = vmatpush.bf16.msrb.mxu1 %v6052_v58  ;;  %1726 = vmatpush.bf16.msrb.mxu3 %v4765_v30  ;;  %v8110_v30 = vld [vmem:[#allocation40_spill] sm:$0xff]  ;;  %v8114_v58 = vld [vmem:[#allocation67_spill] sm:$0xff] }
 0x1db   :  { %1502 = vmatpush.bf16.msrb.mxu2 %v8029_v43  ;;  %1528 = vmatpush.bf16.msra.mxu0 %v8030_v35  ;;  %v8092_v35 = vld [vmem:[#allocation39_spill] sm:$0xff] }
 0x1dc   :  { %1594 = vmatpush.bf16.msrb.mxu1 %v6064_v15  ;;  %1727 = vmatpush.bf16.msrb.mxu3 %v4793_v39  ;;  %v8038_v39 = vld [vmem:[#allocation137_spill] sm:$0xff]  ;;  %v8088_v15 = vld [vmem:[#allocation62_spill] sm:$0xff]  ;;  %v8103_v43 = vld [vmem:[#allocation51_spill] sm:$0xff] }
 0x1de   :  { %1455 = vmatmul.bf16.vlgmr.msra.gmra.mxu2 %v6240_v23  ;;  %1481 = vmatmul.bf16.vlgmr.msrb.gmra.mxu0 %v6240_v23 }
 0x1df   :  { %1503 = vmatpush.bf16.msrb.mxu2 %v8031_v32  ;;  %1529 = vmatpush.bf16.msra.mxu0 %v8032_v14  ;;  %v8039_v32 = vld [vmem:[#allocation24_spill] sm:$0xff]  ;;  %v8040_v14 = vld [vmem:[#allocation5_spill] sm:$0xff] }
 0x1e0   :  { %1595 = vmatpush.bf16.msrb.mxu1 %v6076_v36  ;;  %1728 = vmatpush.bf16.msrb.mxu3 %v4821_v48  ;;  %v8041_v36 = vld [vmem:[#allocation8_spill] sm:$0xff] }
 0x1e1   :  { %v8042_v48 = vld [vmem:[#allocation84_spill] sm:$0xff] }
 0x1e3   :  { %1504 = vmatpush.bf16.msrb.mxu2 %v8033_v50  ;;  %1530 = vmatpush.bf16.msra.mxu0 %v8034_v27  ;;  %v8043_v50 = vld [vmem:[#allocation82_spill] sm:$0xff]  ;;  %v8086_v27 = vld [vmem:[#allocation35_spill] sm:$0xff] }
 0x1e4   :  { %1596 = vmatpush.bf16.msrb.mxu1 %v6088_v49  ;;  %1729 = vmatpush.bf16.msrb.mxu3 %v8035_v4  ;;  %v8044_v49 = vld [vmem:[#allocation85_spill] sm:$0xff]  ;;  %v8045_v4 = vld [vmem:[#allocation83_spill] sm:$0xff] }
 0x1e7   :  { %1505 = vmatpush.bf16.msrb.mxu2 %v8036_v53  ;;  %1531 = vmatpush.bf16.msra.mxu0 %v8037_v56  ;;  %v8046_v53 = vld [vmem:[#allocation7_spill] sm:$0xff] }
 0x1e8   :  { %1597 = vmatpush.bf16.msrb.mxu1 %v8038_v39  ;;  %1730 = vmatpush.bf16.msrb.mxu3 %v8039_v32  ;;  %v8047_v32 = vld [vmem:[#allocation11_spill] sm:$0xff]  ;;  %v8056_v39 = vld [vmem:[#allocation94_spill] sm:$0xff] }
 0x1e9   :  { %v8057_v56 = vld [vmem:[#allocation91_spill] sm:$0xff] }
 0x1eb   :  { %1506 = vmatpush.bf16.msrb.mxu2 %v8042_v48  ;;  %1532 = vmatpush.bf16.msra.mxu0 %v8043_v50  ;;  %v8050_v48 = vld [vmem:[#allocation10_spill] sm:$0xff] }
 0x1ec   :  { %1749 = vmatpush.bf16.msra.mxu1 %v8040_v14  ;;  %1775 = vmatpush.bf16.msra.mxu3 %v8041_v36  ;;  %v8048_v14 = vld [vmem:[#allocation87_spill] sm:$0xff]  ;;  %v8049_v36 = vld [vmem:[#allocation86_spill] sm:$0xff] }
 0x1ed   :  { %1598 = vmatmul.bf16.vlgmr.msrb.gmra.mxu1 %v6163_v26  ;;  %v8051_v50 = vld [vmem:[#allocation14_spill] sm:$0xff] }
 0x1ee   :  { %1507 = vmatmul.bf16.vlgmr.msrb.gmra.mxu2 %v6240_v23  ;;  %1533 = vmatmul.bf16.vlgmr.msra.gmra.mxu0 %v6240_v23  ;;  %v8052_v26 = vld [vmem:[#allocation90_spill] sm:$0xff] }
 0x1ef   :  { %1551 = vmatpush.bf16.msra.mxu2 %v8044_v49  ;;  %1577 = vmatpush.bf16.msrb.mxu0 %v8045_v4  ;;  %v8053_v49 = vld [vmem:[#allocation88_spill] sm:$0xff]  ;;  %v8054_v4 = vld [vmem:[#allocation13_spill] sm:$0xff] }
 0x1f0   :  { %1750 = vmatpush.bf16.msra.mxu1 %v8046_v53  ;;  %1776 = vmatpush.bf16.msra.mxu3 %v8047_v32  ;;  %v8055_v53 = vld [vmem:[#allocation17_spill] sm:$0xff]  ;;  %v8058_v32 = vld [vmem:[#allocation16_spill] sm:$0xff] }
 0x1f3   :  { %1552 = vmatpush.bf16.msra.mxu2 %v8048_v14  ;;  %1578 = vmatpush.bf16.msrb.mxu0 %v8049_v36  ;;  %v8059_v14 = vld [vmem:[#allocation20_spill] sm:$0xff]  ;;  %v8060_v36 = vld [vmem:[#allocation98_spill] sm:$0xff] }
 0x1f4   :  { %1751 = vmatpush.bf16.msra.mxu1 %v8050_v48  ;;  %1777 = vmatpush.bf16.msra.mxu3 %v8051_v50  ;;  %v8061_v48 = vld [vmem:[#allocation95_spill] sm:$0xff] }
 0x1f5   :  { %v8062_v50 = vld [vmem:[#allocation19_spill] sm:$0xff] }
 0x1f7   :  { %1553 = vmatpush.bf16.msra.mxu2 %v8052_v26  ;;  %1579 = vmatpush.bf16.msrb.mxu0 %v8053_v49  ;;  %v8063_v26 = vld [vmem:[#allocation23_spill] sm:$0xff]  ;;  %v8064_v49 = vld [vmem:[#allocation102_spill] sm:$0xff] }
 0x1f8   :  { %1752 = vmatpush.bf16.msra.mxu1 %v8054_v4  ;;  %1778 = vmatpush.bf16.msra.mxu3 %v8055_v53  ;;  %v8065_v4 = vld [vmem:[#allocation99_spill] sm:$0xff]  ;;  %v8066_v53 = vld [vmem:[#allocation22_spill] sm:$0xff] }
 0x1fb   :  { %1554 = vmatpush.bf16.msra.mxu2 %v8056_v39  ;;  %1580 = vmatpush.bf16.msrb.mxu0 %v8057_v56  ;;  %v8067_v39 = vld [vmem:[#allocation26_spill] sm:$0xff] }
 0x1fc   :  { %1753 = vmatpush.bf16.msra.mxu1 %v8058_v32  ;;  %1779 = vmatpush.bf16.msra.mxu3 %v8059_v14  ;;  %v8068_v56 = vld [vmem:[#allocation106_spill] sm:$0xff]  ;;  %v8069_v32 = vld [vmem:[#allocation103_spill] sm:$0xff]  ;;  %v8070_v14 = vld [vmem:[#allocation25_spill] sm:$0xff] }
 0x1ff   :  { %1555 = vmatpush.bf16.msra.mxu2 %v8060_v36  ;;  %1581 = vmatpush.bf16.msrb.mxu0 %v8061_v48  ;;  %v8071_v36 = vld [vmem:[#allocation47_spill] sm:$0xff]  ;;  %v8072_v48 = vld [vmem:[#allocation28_spill] sm:$0xff] }
 0x200   :  { %1754 = vmatpush.bf16.msra.mxu1 %v8062_v50  ;;  %1780 = vmatpush.bf16.msra.mxu3 %v8063_v26  ;;  %v8073_v50 = vld [vmem:[#allocation108_spill] sm:$0xff]  ;;  %v8074_v26 = vld [vmem:[#allocation107_spill] sm:$0xff] }
 0x203   :  { %1556 = vmatpush.bf16.msra.mxu2 %v8064_v49  ;;  %1582 = vmatpush.bf16.msrb.mxu0 %v8065_v4  ;;  %v8075_v49 = vld [vmem:[#allocation109_spill] sm:$0xff]  ;;  %v8076_v4 = vld [vmem:[#allocation50_spill] sm:$0xff] }
 0x204   :  { %1755 = vmatpush.bf16.msra.mxu1 %v8066_v53  ;;  %1781 = vmatpush.bf16.msra.mxu3 %v8067_v39  ;;  %v8077_v53 = vld [vmem:[#allocation27_spill] sm:$0xff] }
 0x205   :  { %v8085_v39 = vld [vmem:[#allocation59_spill] sm:$0xff] }
 0x207   :  { %1557 = vmatpush.bf16.msra.mxu2 %v8068_v56  ;;  %1583 = vmatpush.bf16.msrb.mxu0 %v8069_v32  ;;  %v8078_v32 = vld [vmem:[#allocation110_spill] sm:$0xff]  ;;  %v8084_v56 = vld [vmem:[#allocation116_spill] sm:$0xff] }
 0x208   :  { %1756 = vmatpush.bf16.msra.mxu1 %v8070_v14  ;;  %1782 = vmatpush.bf16.msra.mxu3 %v8072_v48  ;;  %v1391_v14 = vpop.f32.mrf.mxu1  ;;  %v8080_v48 = vld [vmem:[#allocation30_spill] sm:$0xff] }
 0x20b   :  { %1558 = vmatpush.bf16.msra.mxu2 %v8073_v50  ;;  %1584 = vmatpush.bf16.msrb.mxu0 %v8074_v26  ;;  %v8081_v50 = vld [vmem:[#allocation113_spill] sm:$0xff]  ;;  %v8082_v26 = vld [vmem:[#allocation56_spill] sm:$0xff] }
 0x20c   :  { %1801 = vmatpush.bf16.msrb.mxu1 %v8071_v36  ;;  %v8079_v36 = vld [vmem:[#allocation53_spill] sm:$0xff] }
 0x20e   :  { %1559 = vmatmul.bf16.vlgmr.msra.gmra.mxu2 %v6240_v23  ;;  %1585 = vmatmul.bf16.vlgmr.msrb.gmra.mxu0 %v6240_v23 }
 0x20f   :  { %1603 = vmatpush.bf16.msrb.mxu2 %v8075_v49  ;;  %1736 = vmatpush.bf16.msra.mxu0 %v8077_v53  ;;  %v8083_v49 = vld [vmem:[#allocation32_spill] sm:$0xff] }
 0x210   :  { %1802 = vmatpush.bf16.msrb.mxu1 %v8076_v4  ;;  %v1417_v4 = vpop.f32.mrf.mxu3  ;;  %v1393_v53 = vpop.f32.mrf.mxu1 }
 0x211   :  { %v8093_v53 = vld [vmem:[#allocation124_spill] sm:$0xff] }
 0x213   :  { %1604 = vmatpush.bf16.msrb.mxu2 %v8078_v32  ;;  %1737 = vmatpush.bf16.msra.mxu0 %v8080_v48  ;;  %v8087_v32 = vld [vmem:[#allocation118_spill] sm:$0xff] }
 0x214   :  { %1803 = vmatpush.bf16.msrb.mxu1 %v8079_v36  ;;  %v8089_v36 = vld [vmem:[#allocation37_spill] sm:$0xff] }
 0x217   :  { %1605 = vmatpush.bf16.msrb.mxu2 %v8081_v50  ;;  %1738 = vmatpush.bf16.msra.mxu0 %v8083_v49  ;;  %v8090_v50 = vld [vmem:[#allocation121_spill] sm:$0xff]  ;;  %v8091_v49 = vld [vmem:[#allocation66_spill] sm:$0xff] }
 0x218   :  { %1804 = vmatpush.bf16.msrb.mxu1 %v8082_v26  ;;  %v1419_v48 = vpop.f32.mrf.mxu3  ;;  %v6332_v26 = vpop.f32.mrf.mxu1 }
 0x219   :  { %v8097_v48 = vld [vmem:[#allocation29_spill] sm:$0xff] }
 0x21b   :  { %1606 = vmatpush.bf16.msrb.mxu2 %v8084_v56  ;;  %1739 = vmatpush.bf16.msra.mxu0 %v8086_v27  ;;  %v8095_v27 = vld [vmem:[#allocation41_spill] sm:$0xff] }
 0x21c   :  { %1805 = vmatpush.bf16.msrb.mxu1 %v8085_v39  ;;  %v8094_v39 = vld [vmem:[#allocation70_spill] sm:$0xff]  ;;  %v8099_v56 = vld [vmem:[#allocation45_spill] sm:$0xff] }
 0x21f   :  { %1607 = vmatpush.bf16.msrb.mxu2 %v8087_v32  ;;  %1740 = vmatpush.bf16.msra.mxu0 %v8089_v36 }
 0x220   :  { %1806 = vmatpush.bf16.msrb.mxu1 %v8088_v15  ;;  %v6339_v32 = vpop.f32.mrf.mxu3  ;;  %v8096_v15 = vld [vmem:[#allocation127_spill] sm:$0xff]  ;;  %v1445_v36 = vpop.f32.mrf.mxu1 }
 0x221   :  { %v8104_v36 = vld [vmem:[#allocation34_spill] sm:$0xff] }
 0x223   :  { %1608 = vmatpush.bf16.msrb.mxu2 %v8090_v50  ;;  %1741 = vmatpush.bf16.msra.mxu0 %v8092_v35  ;;  %v8098_v50 = vld [vmem:[#allocation44_spill] sm:$0xff]  ;;  %v8100_v35 = vld [vmem:[#allocation31_spill] sm:$0xff] }
 0x224   :  { %1807 = vmatpush.bf16.msrb.mxu1 %v8091_v49  ;;  %v8101_v49 = vld [vmem:[#allocation48_spill] sm:$0xff] }
 0x227   :  { %1609 = vmatpush.bf16.msrb.mxu2 %v8093_v53  ;;  %1742 = vmatpush.bf16.msra.mxu0 %v8095_v27  ;;  %v8102_v27 = vld [vmem:[#allocation33_spill] sm:$0xff] }
 0x228   :  { %1808 = vmatpush.bf16.msrb.mxu1 %v8094_v39  ;;  %v1471_v53 = vpop.f32.mrf.mxu3  ;;  %v6348_v39 = vpop.f32.mrf.mxu1 }
 0x22b   :  { %1610 = vmatpush.bf16.msrb.mxu2 %v8096_v15  ;;  %1743 = vmatpush.bf16.msra.mxu0 %v8098_v50  ;;  %v8105_v15 = vld [vmem:[#allocation54_spill] sm:$0xff] }
 0x22e   :  { %1611 = vmatmul.bf16.vlgmr.msrb.gmra.mxu2 %v6240_v23  ;;  %v8107_v23 = vld [vmem:[#allocation57_spill] sm:$0xff] }
 0x22f   :  { %1762 = vmatpush.bf16.msra.mxu2 %v8097_v48  ;;  %1788 = vmatpush.bf16.msrb.mxu0 %v8099_v56  ;;  %v8106_v56 = vld [vmem:[#allocation36_spill] sm:$0xff] }
 0x230   :  { %v1521_v48 = vpop.f32.mrf.mxu3  ;;  %v1497_v50 = vpop.f32.mrf.mxu1 }
 0x231   :  { %v4272_v50 = vld [vmem:[%s7561_s0 + $0x18] sm:$0xff] }
 0x233   :  { %1763 = vmatpush.bf16.msra.mxu2 %v8100_v35  ;;  %1789 = vmatpush.bf16.msrb.mxu0 %v8101_v49  ;;  %v8108_v35 = vld [vmem:[#allocation38_spill] sm:$0xff]  ;;  %v8109_v49 = vld [vmem:[#allocation60_spill] sm:$0xff] }
 0x237   :  { %1764 = vmatpush.bf16.msra.mxu2 %v8102_v27  ;;  %1790 = vmatpush.bf16.msrb.mxu0 %v8103_v43  ;;  %v8111_v27 = vld [vmem:[#allocation63_spill] sm:$0xff]  ;;  %v8112_v43 = vld [vmem:[#allocation42_spill] sm:$0xff] }
 0x238   :  { %v1523_v53 = vpop.f32.mrf.mxu3 }
 0x239   :  { %v1672_v53 = vunpack.c.h.bf16 %v4272_v50 }
 0x23b   :  { %1765 = vmatpush.bf16.msra.mxu2 %v8104_v36  ;;  %1791 = vmatpush.bf16.msrb.mxu0 %v8105_v15  ;;  %v8113_v36 = vld [vmem:[#allocation43_spill] sm:$0xff]  ;;  %v8117_v15 = vld [vmem:[#allocation52_spill] sm:$0xff] }
 0x23f   :  { %1766 = vmatpush.bf16.msra.mxu2 %v8106_v56  ;;  %1792 = vmatpush.bf16.msrb.mxu0 %v8107_v23  ;;  %v8115_v23 = vld [vmem:[#allocation46_spill] sm:$0xff]  ;;  %v8116_v56 = vld [vmem:[#allocation49_spill] sm:$0xff] }
 0x243   :  { %1767 = vmatpush.bf16.msra.mxu2 %v8108_v35  ;;  %1793 = vmatpush.bf16.msrb.mxu0 %v8109_v49 }
 0x246   :  { %v6367_v35 = vpop.f32.mrf.mxu1 }
 0x247   :  { %1768 = vmatpush.bf16.msra.mxu2 %v8110_v30  ;;  %1794 = vmatpush.bf16.msrb.mxu0 %v8111_v27 }
 0x24b   :  { %1769 = vmatpush.bf16.msra.mxu2 %v8112_v43  ;;  %1795 = vmatpush.bf16.msrb.mxu0 %v8114_v58  ;;  %v1430_v49 = vpop.f32.mrf.mxu0 }
 0x24c   :  { %v1431_v30 = vadd.f32 %v1430_v49, %v1417_v4  ;;  %v6371_v43 = vpop.f32.mrf.mxu3 }
 0x24e   :  { %v1675_v27 = vadd.f32 %v1672_v53, %v1431_v30  ;;  %v1549_v19 = vpop.f32.mrf.mxu1 }
 0x24f   :  { %1814 = vmatpush.bf16.msrb.mxu2 %v8113_v36  ;;  %v1671_v36 = vunpack.c.l.bf16 %v4272_v50  ;;  %v8121_v19 = vld [vmem:[#allocation64_spill] sm:$0xff] }
 0x250   :  { %v4275_v58 = vmul.f32 -1.442695, %v1675_v27 }
 0x251   :  { %v1404_v13 = vpop.f32.mrf.mxu2 }
 0x252   :  { %v1405_v5 = vadd.f32 %v1404_v13, %v1391_v14  ;;  %4487 = vpow2.f32 %v4275_v58 }
 0x253   :  { %1815 = vmatpush.bf16.msrb.mxu2 %v8115_v23  ;;  %v1432_v51 = vpop.f32.mrf.mxu0 }
 0x254   :  { %v1674_v23 = vadd.f32 %v1671_v36, %v1405_v5  ;;  %v1575_v49 = vpop.f32.mrf.mxu3 }
 0x256   :  { %v4274_v1 = vmul.f32 -1.442695, %v1674_v23 }
 0x257   :  { %1816 = vmatpush.bf16.msrb.mxu2 %v8116_v56 }
 0x258   :  { %4489 = vpow2.f32 %v4274_v1  ;;  %v4488_v4 = vpop.eup %4487 }
 0x259   :  { %v1406_v30 = vpop.f32.mrf.mxu2  ;;  %v1683_v50 = vadd.f32 1.0, %v4488_v4 }
 0x25b   :  { %1817 = vmatpush.bf16.msrb.mxu2 %v8117_v15  ;;  %v6375_v53 = vpop.f32.mrf.mxu0  ;;  %v8120_v15 = vld [vmem:[#allocation61_spill] sm:$0xff]  ;;  %vm1704_vm13 = vweird.f32 %v1683_v50 }
 0x25e   :  { %v4490_v27 = vpop.eup %4489 }
 0x25f   :  { %1818 = vmatpush.bf16.msrb.mxu2 %v8118_v59  ;;  %v1682_v13 = vadd.f32 1.0, %v4490_v27 }
 0x261   :  { %4491 = vrcp.f32 %v1682_v13  ;;  %v1456_v51 = vpop.f32.mrf.mxu2  ;;  %v1695_v59 = vand.u32 2147483648, %v1682_v13  ;;  %vm1689_vm9 = vweird.f32 %v1682_v13 }
 0x262   :  { %4493 = vrcp.f32 %v1683_v50  ;;  %v1457_v4 = vadd.f32 %v1456_v51, %v6332_v26  ;;  %v6390_v26 = vld [vmem:[%s7560_s3] ss:$0 sm:$0xff] }
 0x263   :  { %1819 = vmatpush.bf16.msrb.mxu2 %v8119_v10  ;;  %v1484_v58 = vpop.f32.mrf.mxu0  ;;  %v1693_v10 = vand.u32 2147483647, %v1682_v13 }
 0x264   :  { %v4273_v58 = vld [vmem:[%s7561_s0 + $0x20] sm:$0xf] }
 0x265   :  { %vm1694_vm11 = vcmp.eq.f32.partialorder %v1693_v10, 8.507059e+37  ;;  %v1708_v10 = vand.u32 2147483647, %v1683_v50 }
 0x267   :  { %1820 = vmatpush.bf16.msrb.mxu2 %v8120_v15  ;;  %v4492_v5 = vpop.eup %4491  ;;  %vm1709_vm15 = vcmp.eq.f32.partialorder %v1708_v10, 8.507059e+37 }
 0x268   :  { %v4494_v14 = vpop.eup %4493  ;;  %v1685_v36 = vmul.f32 %v4492_v5, %v1682_v13  ;;  %vm1690_vm8 = vweird.f32 %v4492_v5 }
 0x269   :  { %v1458_v23 = vpop.f32.mrf.mxu2  ;;  %v1700_v30 = vmul.f32 %v4494_v14, %v1683_v50  ;;  %vm1691_vm10 = vmor %vm1689_vm9, %vm1690_vm8  ;;  %vm1705_vm12 = vweird.f32 %v4494_v14 }
 0x26a   :  { %v6379_v1 = vpop.f32.mrf.mxu1  ;;  %v1686_v49 = vsub.f32 1.0, %v1685_v36  ;;  %v1696_v23 = vor.u32 1.1754944e-38, %v1695_v59  ;;  %v1673_v36 = vunpack.c.l.bf16 %v4273_v58  ;;  %v1710_v59 = vand.u32 2147483648, %v1683_v50  ;;  %vm1706_vm14 = vmor %vm1704_vm13, %vm1705_vm12 }
 0x26b   :  { %1821 = vmatpush.bf16.msrb.mxu2 %v8121_v19  ;;  %v1534_v15 = vpop.f32.mrf.mxu0  ;;  %v1701_v20 = vsub.f32 1.0, %v1700_v30  ;;  %v1483_v50 = vadd.f32 %v6375_v53, %v6339_v32 }
 0x26c   :  { %v1687_v27 = vmul.f32 %v4492_v5, %v1686_v49  ;;  %v6382_v19 = vadd.f32 %v1534_v15, %v1521_v48  ;;  %v1714_v15 = vadd.f32 %v6390_v26, %v1457_v4  ;;  %v1711_v60 = vor.u32 1.1754944e-38, %v1710_v59 }
 0x26d   :  { %v1702_v3 = vmul.f32 %v4494_v14, %v1701_v20 }
 0x26e   :  { %v1688_v56 = vadd.f32 %v4492_v5, %v1687_v27 }
 0x26f   :  { %v1703_v30 = vadd.f32 %v4494_v14, %v1702_v3 }
 0x270   :  { %v1692_v34 = vsel %vm1691_vm10, %v4492_v5, %v1688_v56 }
 0x271   :  { %v1697_v48 = vsel %vm1694_vm11, %v1696_v23, %v1692_v34  ;;  %v1508_v49 = vpop.f32.mrf.mxu2  ;;  %v1707_v5 = vsel %vm1706_vm14, %v4494_v14, %v1703_v30 }
 0x272   :  { %v1601_v51 = vpop.f32.mrf.mxu1  ;;  %v1715_v18 = vmul.f32 %v1714_v15, %v1697_v48  ;;  %v1712_v4 = vsel %vm1709_vm15, %v1711_v60, %v1707_v5  ;;  %v1509_v3 = vadd.f32 %v1508_v49, %v6348_v39  ;;  %v1616_v39 = vadd.f32 %v1483_v50, %v6182_v61  ;;  %v8122_v5 = vld [vmem:[#allocation111_spill] sm:$0xff]  ;;  %v8124_v50 = vld [vmem:[#allocation114_spill] sm:$0xff] }
 0x273   :  { %v1536_v27 = vpop.f32.mrf.mxu0 }
 0x274   :  { %v1716_v13 = vadd.f32 %v1715_v18, %v1673_v36  ;;  %v1617_v60 = vadd.f32 %v1509_v3, %v6171_v57 }
 0x276   :  { %4495 = vtanh.f32 %v1716_v13 }
 0x279   :  { %v1510_v56 = vpop.f32.mrf.mxu2 }
 0x27c   :  { %v4496_v58 = vpop.eup %4495 }
 0x27d   :  { %v1718_v34 = vsub.f32 %v6159_v25, %v4496_v58 }
 0x27f   :  { %v1719_v23 = vmul.f32 %v1718_v34, %v1712_v4 }
 0x281   :  { %v6394_v15 = vadd.f32 %v4496_v58, %v1719_v23  ;;  %v8123_v58 = vld [vmem:[#allocation112_spill] sm:$0xff] }
 0x283   :  { %v6398_v20 = vpack.c.bf16 %v6394_v15, %v6394_v15 }
 0x285   :  { %1731 = vmatmul.bf16.vlgmr.msrb.gmra.mxu3 %v6398_v20  ;;  %1757 = vmatmul.bf16.vlgmr.msra.gmra.mxu1 %v6398_v20 }
 0x286   :  { %1827 = vmatpush.bf16.msrb.mxu3 %v5523_v40  ;;  %1853 = vmatpush.bf16.msra.mxu1 %v5525_v16 }
 0x28a   :  { %1828 = vmatpush.bf16.msrb.mxu3 %v5566_v41  ;;  %1854 = vmatpush.bf16.msra.mxu1 %v8007_v55 }
 0x28b   :  { %v1586_v18 = vpop.f32.mrf.mxu0 }
 0x28c   :  { %v1587_v25 = vadd.f32 %v1586_v18, %v6371_v43 }
 0x28e   :  { %v1620_v14 = vadd.f32 %v1617_v60, %v1587_v25  ;;  %1829 = vmatpush.bf16.msrb.mxu3 %v8008_v12  ;;  %1855 = vmatpush.bf16.msra.mxu1 %v8009_v33 }
 0x290   :  { %v4271_v48 = vmul.f32 -1.442695, %v1620_v14  ;;  %v8125_v14 = vld [vmem:[#allocation115_spill] sm:$0xff] }
 0x291   :  { %v1560_v36 = vpop.f32.mrf.mxu2 }
 0x292   :  { %v1561_v51 = vadd.f32 %v1560_v36, %v6367_v35  ;;  %1830 = vmatpush.bf16.msrb.mxu3 %v8010_v38  ;;  %1856 = vmatpush.bf16.msra.mxu1 %v8011_v45  ;;  %4497 = vpow2.f32 %v4271_v48 }
 0x293   :  { %v1588_v43 = vpop.f32.mrf.mxu0 }
 0x294   :  { %v1619_v49 = vadd.f32 %v1616_v39, %v1561_v51 }
 0x295   :  { %1783 = vmatmul.bf16.vlgmr.msra.gmra.mxu3 %v6398_v20  ;;  %1809 = vmatmul.bf16.vlgmr.msrb.gmra.mxu1 %v6398_v20 }
 0x296   :  { %v4270_v27 = vmul.f32 -1.442695, %v1619_v49  ;;  %1831 = vmatpush.bf16.msrb.mxu3 %v8012_v0  ;;  %1857 = vmatpush.bf16.msra.mxu1 %v8013_v24 }
 0x298   :  { %4499 = vpow2.f32 %v4270_v27  ;;  %v4498_v53 = vpop.eup %4497  ;;  %v1618_v27 = vadd.f32 %v6382_v19, %v6216_v52 }
 0x299   :  { %v1562_v32 = vpop.f32.mrf.mxu2  ;;  %v1628_v13 = vadd.f32 1.0, %v4498_v53 }
 0x29a   :  { %1832 = vmatpush.bf16.msrb.mxu3 %v8014_v11  ;;  %1858 = vmatpush.bf16.msra.mxu1 %v8015_v7 }
 0x29b   :  { %vm1649_vm5 = vweird.f32 %v1628_v13 }
 0x29e   :  { %v4500_v35 = vpop.eup %4499  ;;  %1833 = vmatpush.bf16.msrb.mxu3 %v5752_v22  ;;  %1859 = vmatpush.bf16.msra.mxu1 %v5754_v63 }
 0x29f   :  { %v1627_v30 = vadd.f32 1.0, %v4500_v35 }
 0x2a1   :  { %4501 = vrcp.f32 %v1627_v30  ;;  %v1640_v4 = vand.u32 2147483648, %v1627_v30  ;;  %v1638_v18 = vand.u32 2147483647, %v1627_v30  ;;  %vm1634_vm1 = vweird.f32 %v1627_v30 }
 0x2a2   :  { %4503 = vrcp.f32 %v1628_v13  ;;  %1834 = vmatpush.bf16.msrb.mxu3 %v5792_v21  ;;  %1860 = vmatpush.bf16.msra.mxu1 %v5794_v8 }
 0x2a3   :  { %v1641_v39 = vor.u32 1.1754944e-38, %v1640_v4  ;;  %vm1639_vm3 = vcmp.eq.f32.partialorder %v1638_v18, 8.507059e+37 }
 0x2a5   :  { %1835 = vmatmul.bf16.vlgmr.msrb.gmra.mxu3 %v6398_v20  ;;  %1861 = vmatmul.bf16.vlgmr.msra.gmra.mxu1 %v6398_v20 }
 0x2a6   :  { %1879 = vmatpush.bf16.msra.mxu3 %v5796_v9  ;;  %1905 = vmatpush.bf16.msrb.mxu1 %v5798_v37 }
 0x2a7   :  { %v4502_v59 = vpop.eup %4501 }
 0x2a8   :  { %v1630_v10 = vmul.f32 %v4502_v59, %v1627_v30  ;;  %v4504_v56 = vpop.eup %4503  ;;  %vm1635_vm0 = vweird.f32 %v4502_v59 }
 0x2a9   :  { %v1645_v23 = vmul.f32 %v4504_v56, %v1628_v13  ;;  %vm1636_vm2 = vmor %vm1634_vm1, %vm1635_vm0  ;;  %vm1650_vm4 = vweird.f32 %v4504_v56 }
 0x2aa   :  { %1880 = vmatpush.bf16.msra.mxu3 %v8122_v5  ;;  %1906 = vmatpush.bf16.msrb.mxu1 %v8123_v58  ;;  %v1631_v34 = vsub.f32 1.0, %v1630_v10  ;;  %vm1651_vm6 = vmor %vm1649_vm5, %vm1650_vm4 }
 0x2ab   :  { %v1646_v48 = vsub.f32 1.0, %v1645_v23 }
 0x2ac   :  { %v1632_v3 = vmul.f32 %v4502_v59, %v1631_v34 }
 0x2ad   :  { %v1647_v53 = vmul.f32 %v4504_v56, %v1646_v48  ;;  %v8132_v48 = vld [vmem:[#allocation6_spill] sm:$0xff] }
 0x2ae   :  { %v1633_v25 = vadd.f32 %v4502_v59, %v1632_v3  ;;  %1881 = vmatpush.bf16.msra.mxu3 %v8124_v50  ;;  %1907 = vmatpush.bf16.msrb.mxu1 %v8125_v14 }
 0x2b0   :  { %v1637_v51 = vsel %vm1636_vm2, %v4502_v59, %v1633_v25  ;;  %v1655_v59 = vand.u32 2147483648, %v1628_v13  ;;  %v8129_v25 = vld [vmem:[#allocation68_spill] sm:$0xff] }
 0x2b1   :  { %v1612_v60 = vpop.f32.mrf.mxu2  ;;  %v1642_v49 = vsel %vm1639_vm3, %v1641_v39, %v1637_v51  ;;  %v8131_v39 = vld [vmem:[#allocation131_spill] sm:$0xff] }
 0x2b2   :  { %v1613_v36 = vadd.f32 %v1612_v60, %v6379_v1  ;;  %1882 = vmatpush.bf16.msra.mxu3 %v5887_v62  ;;  %1908 = vmatpush.bf16.msrb.mxu1 %v8017_v46  ;;  %v1648_v1 = vadd.f32 %v4504_v56, %v1647_v53  ;;  %v1656_v34 = vor.u32 1.1754944e-38, %v1655_v59  ;;  %v8133_v51 = vld [vmem:[#allocation71_spill] sm:$0xff]  ;;  %v8138_v53 = vld [vmem:[#allocation72_spill] sm:$0xff]  ;;  %v8142_v59 = vld [vmem:[#allocation74_spill] sm:$0xff] }
 0x2b4   :  { %v1659_v43 = vadd.f32 %v6211_v47, %v1613_v36  ;;  %v1653_v47 = vand.u32 2147483647, %v1628_v13  ;;  %v1652_v19 = vsel %vm1651_vm6, %v4504_v56, %v1648_v1  ;;  %v8127_v13 = vld [vmem:[#allocation130_spill] sm:$0xff]  ;;  %v8128_v56 = vld [vmem:[#allocation4_spill] sm:$0xff]  ;;  %v8130_v36 = vld [vmem:[#allocation65_spill] sm:$0xff] }
 0x2b5   :  { %v8141_v1 = vld [vmem:[#allocation75_spill] sm:$0xff] }
 0x2b6   :  { %v1660_v32 = vmul.f32 %v1659_v43, %v1642_v49  ;;  %1883 = vmatpush.bf16.msra.mxu3 %v8018_v31  ;;  %1909 = vmatpush.bf16.msrb.mxu1 %v8019_v6  ;;  %vm1654_vm7 = vcmp.eq.f32.partialorder %v1653_v47, 8.507059e+37  ;;  %v8134_v49 = vld [vmem:[#allocation69_spill] sm:$0xff]  ;;  %v8135_v43 = vld [vmem:[#allocation132_spill] sm:$0xff]  ;;  %v8143_v47 = vld [vmem:[#allocation134_spill] sm:$0xff] }
 0x2b7   :  { %v1657_v23 = vsel %vm1654_vm7, %v1656_v34, %v1652_v19  ;;  %v8144_v19 = vld [vmem:[#allocation15_spill] sm:$0xff]  ;;  %v8146_v34 = vld [vmem:[#allocation76_spill] sm:$0xff] }
 0x2b8   :  { %v1661_v35 = vadd.f32 %v1660_v32, %v1618_v27  ;;  %v8136_v27 = vld [vmem:[#allocation9_spill] sm:$0xff] }
 0x2b9   :  { %v1614_v30 = vpop.f32.mrf.mxu2  ;;  %v8137_v32 = vld [vmem:[#allocation73_spill] sm:$0xff] }
 0x2ba   :  { %4505 = vtanh.f32 %v1661_v35  ;;  %1884 = vmatpush.bf16.msra.mxu3 %v8020_v2  ;;  %1910 = vmatpush.bf16.msrb.mxu1 %v8021_v29  ;;  %v8139_v35 = vld [vmem:[#allocation133_spill] sm:$0xff]  ;;  %v8140_v30 = vld [vmem:[#allocation12_spill] sm:$0xff] }
 0x2be   :  { %1885 = vmatpush.bf16.msra.mxu3 %v5971_v44  ;;  %1911 = vmatpush.bf16.msrb.mxu1 %v5973_v54 }
 0x2c0   :  { %v4506_v10 = vpop.eup %4505 }
 0x2c1   :  { %v1663_v4 = vsub.f32 %v6232_v28, %v4506_v10  ;;  %v8150_v28 = vld [vmem:[#allocation78_spill] sm:$0xff] }
 0x2c2   :  { %1886 = vmatpush.bf16.msra.mxu3 %v6006_v17  ;;  %1912 = vmatpush.bf16.msrb.mxu1 %v6008_v42 }
 0x2c3   :  { %v1664_v3 = vmul.f32 %v1663_v4, %v1657_v23  ;;  %v8147_v4 = vld [vmem:[#allocation135_spill] sm:$0xff]  ;;  %v8148_v23 = vld [vmem:[#allocation18_spill] sm:$0xff] }
 0x2c5   :  { %v6448_v18 = vadd.f32 %v4506_v10, %v1664_v3  ;;  %1887 = vmatmul.bf16.vlgmr.msra.gmra.mxu3 %v6398_v20  ;;  %1913 = vmatmul.bf16.vlgmr.msrb.gmra.mxu1 %v6398_v20  ;;  %v8145_v10 = vld [vmem:[#allocation77_spill] sm:$0xff]  ;;  %v8149_v3 = vld [vmem:[#allocation79_spill] sm:$0xff] }
 0x2c6   :  { %1931 = vmatpush.bf16.msrb.mxu3 %v8127_v13  ;;  %2064 = vmatpush.bf16.msra.mxu1 %v8128_v56  ;;  %v8236_v56 = vld [vmem:[#allocation58_spill] sm:$0xff] }
 0x2c7   :  { %8126 = vst [vmem:[#allocation93_spill] sm:$0xff] %v6448_v18  ;;  %v6456_v60 = vpack.c.bf16 %v6448_v18, %v6448_v18 }
 0x2c9   :  { %1744 = vmatmul.bf16.vlgmr.msra.gmra.mxu0 %v6456_v60  ;;  %1770 = vmatmul.bf16.vlgmr.msra.gmra.mxu2 %v6456_v60 }
 0x2ca   :  { %1840 = vmatpush.bf16.msra.mxu0 %v8129_v25  ;;  %1866 = vmatpush.bf16.msra.mxu2 %v8130_v36 }
 0x2cb   :  { %1932 = vmatpush.bf16.msrb.mxu3 %v8131_v39  ;;  %2065 = vmatpush.bf16.msra.mxu1 %v8132_v48  ;;  %v8235_v39 = vld [vmem:[#allocation55_spill] sm:$0xff] }
 0x2ce   :  { %1841 = vmatpush.bf16.msra.mxu0 %v8133_v51  ;;  %1867 = vmatpush.bf16.msra.mxu2 %v8134_v49 }
 0x2cf   :  { %1933 = vmatpush.bf16.msrb.mxu3 %v8135_v43  ;;  %2066 = vmatpush.bf16.msra.mxu1 %v8136_v27  ;;  %v8227_v27 = vld [vmem:[#allocation40_spill] sm:$0xff]  ;;  %v8231_v43 = vld [vmem:[#allocation67_spill] sm:$0xff] }
 0x2d2   :  { %1842 = vmatpush.bf16.msra.mxu0 %v8137_v32  ;;  %1868 = vmatpush.bf16.msra.mxu2 %v8138_v53  ;;  %v8209_v53 = vld [vmem:[#allocation39_spill] sm:$0xff] }
 0x2d3   :  { %1934 = vmatpush.bf16.msrb.mxu3 %v8139_v35  ;;  %2067 = vmatpush.bf16.msra.mxu1 %v8140_v30  ;;  %v8155_v30 = vld [vmem:[#allocation137_spill] sm:$0xff]  ;;  %v8205_v35 = vld [vmem:[#allocation62_spill] sm:$0xff]  ;;  %v8220_v32 = vld [vmem:[#allocation51_spill] sm:$0xff] }
 0x2d6   :  { %1843 = vmatpush.bf16.msra.mxu0 %v8141_v1  ;;  %1869 = vmatpush.bf16.msra.mxu2 %v8142_v59  ;;  %v8151_v59 = vld [vmem:[#allocation136_spill] sm:$0xff] }
 0x2d7   :  { %1935 = vmatpush.bf16.msrb.mxu3 %v8143_v47  ;;  %2068 = vmatpush.bf16.msra.mxu1 %v8144_v19  ;;  %v8152_v47 = vld [vmem:[#allocation21_spill] sm:$0xff]  ;;  %v8154_v1 = vld [vmem:[#allocation80_spill] sm:$0xff] }
 0x2d8   :  { %v8153_v19 = vld [vmem:[#allocation81_spill] sm:$0xff] }
 0x2d9   :  { %1796 = vmatmul.bf16.vlgmr.msrb.gmra.mxu0 %v6456_v60  ;;  %1822 = vmatmul.bf16.vlgmr.msrb.gmra.mxu2 %v6456_v60 }
 0x2da   :  { %1844 = vmatpush.bf16.msra.mxu0 %v8145_v10  ;;  %1870 = vmatpush.bf16.msra.mxu2 %v8146_v34  ;;  %v8156_v10 = vld [vmem:[#allocation24_spill] sm:$0xff]  ;;  %v8157_v34 = vld [vmem:[#allocation5_spill] sm:$0xff] }
 0x2db   :  { %1936 = vmatpush.bf16.msrb.mxu3 %v8147_v4  ;;  %2069 = vmatpush.bf16.msra.mxu1 %v8148_v23  ;;  %v8158_v4 = vld [vmem:[#allocation8_spill] sm:$0xff] }
 0x2dc   :  { %v8159_v23 = vld [vmem:[#allocation84_spill] sm:$0xff] }
 0x2de   :  { %1845 = vmatpush.bf16.msra.mxu0 %v8149_v3  ;;  %1871 = vmatpush.bf16.msra.mxu2 %v8150_v28  ;;  %v8160_v3 = vld [vmem:[#allocation82_spill] sm:$0xff]  ;;  %v8203_v28 = vld [vmem:[#allocation35_spill] sm:$0xff] }
 0x2df   :  { %1937 = vmatpush.bf16.msrb.mxu3 %v8151_v59  ;;  %2070 = vmatpush.bf16.msra.mxu1 %v8152_v47  ;;  %v8161_v59 = vld [vmem:[#allocation85_spill] sm:$0xff]  ;;  %v8162_v47 = vld [vmem:[#allocation83_spill] sm:$0xff] }
 0x2e2   :  { %1846 = vmatpush.bf16.msra.mxu0 %v8153_v19  ;;  %1872 = vmatpush.bf16.msra.mxu2 %v8154_v1  ;;  %v8163_v19 = vld [vmem:[#allocation7_spill] sm:$0xff] }
 0x2e3   :  { %1938 = vmatpush.bf16.msrb.mxu3 %v8155_v30  ;;  %2071 = vmatpush.bf16.msra.mxu1 %v8156_v10  ;;  %v8164_v10 = vld [vmem:[#allocation11_spill] sm:$0xff]  ;;  %v8173_v30 = vld [vmem:[#allocation94_spill] sm:$0xff] }
 0x2e4   :  { %v8174_v1 = vld [vmem:[#allocation91_spill] sm:$0xff] }
 0x2e6   :  { %1847 = vmatpush.bf16.msra.mxu0 %v8159_v23  ;;  %1873 = vmatpush.bf16.msra.mxu2 %v8160_v3  ;;  %v8167_v23 = vld [vmem:[#allocation10_spill] sm:$0xff] }
 0x2e7   :  { %2090 = vmatpush.bf16.msra.mxu3 %v8157_v34  ;;  %2116 = vmatpush.bf16.msrb.mxu1 %v8158_v4  ;;  %v8165_v34 = vld [vmem:[#allocation87_spill] sm:$0xff]  ;;  %v8166_v4 = vld [vmem:[#allocation86_spill] sm:$0xff] }
 0x2e8   :  { %1939 = vmatmul.bf16.vlgmr.msrb.gmra.mxu3 %v6398_v20  ;;  %v8168_v3 = vld [vmem:[#allocation14_spill] sm:$0xff] }
 0x2e9   :  { %1848 = vmatmul.bf16.vlgmr.msra.gmra.mxu0 %v6456_v60  ;;  %1874 = vmatmul.bf16.vlgmr.msra.gmra.mxu2 %v6456_v60  ;;  %v8169_v20 = vld [vmem:[#allocation90_spill] sm:$0xff] }
 0x2ea   :  { %1892 = vmatpush.bf16.msrb.mxu0 %v8161_v59  ;;  %1918 = vmatpush.bf16.msrb.mxu2 %v8162_v47  ;;  %v8170_v59 = vld [vmem:[#allocation88_spill] sm:$0xff]  ;;  %v8171_v47 = vld [vmem:[#allocation13_spill] sm:$0xff] }
 0x2eb   :  { %2091 = vmatpush.bf16.msra.mxu3 %v8163_v19  ;;  %2117 = vmatpush.bf16.msrb.mxu1 %v8164_v10  ;;  %v8172_v19 = vld [vmem:[#allocation17_spill] sm:$0xff]  ;;  %v8175_v10 = vld [vmem:[#allocation16_spill] sm:$0xff] }
 0x2ee   :  { %1893 = vmatpush.bf16.msrb.mxu0 %v8165_v34  ;;  %1919 = vmatpush.bf16.msrb.mxu2 %v8166_v4  ;;  %v8176_v34 = vld [vmem:[#allocation20_spill] sm:$0xff]  ;;  %v8177_v4 = vld [vmem:[#allocation98_spill] sm:$0xff] }
 0x2ef   :  { %2092 = vmatpush.bf16.msra.mxu3 %v8167_v23  ;;  %2118 = vmatpush.bf16.msrb.mxu1 %v8168_v3  ;;  %v8178_v23 = vld [vmem:[#allocation95_spill] sm:$0xff] }
 0x2f0   :  { %v8179_v3 = vld [vmem:[#allocation19_spill] sm:$0xff] }
 0x2f2   :  { %1894 = vmatpush.bf16.msrb.mxu0 %v8169_v20  ;;  %1920 = vmatpush.bf16.msrb.mxu2 %v8170_v59  ;;  %v8180_v20 = vld [vmem:[#allocation23_spill] sm:$0xff]  ;;  %v8181_v59 = vld [vmem:[#allocation102_spill] sm:$0xff] }
 0x2f3   :  { %2093 = vmatpush.bf16.msra.mxu3 %v8171_v47  ;;  %2119 = vmatpush.bf16.msrb.mxu1 %v8172_v19  ;;  %v8182_v47 = vld [vmem:[#allocation99_spill] sm:$0xff]  ;;  %v8183_v19 = vld [vmem:[#allocation22_spill] sm:$0xff] }
 0x2f6   :  { %1895 = vmatpush.bf16.msrb.mxu0 %v8173_v30  ;;  %1921 = vmatpush.bf16.msrb.mxu2 %v8174_v1  ;;  %v8184_v30 = vld [vmem:[#allocation26_spill] sm:$0xff] }
 0x2f7   :  { %2094 = vmatpush.bf16.msra.mxu3 %v8175_v10  ;;  %2120 = vmatpush.bf16.msrb.mxu1 %v8176_v34  ;;  %v8185_v1 = vld [vmem:[#allocation106_spill] sm:$0xff]  ;;  %v8186_v10 = vld [vmem:[#allocation103_spill] sm:$0xff]  ;;  %v8187_v34 = vld [vmem:[#allocation25_spill] sm:$0xff] }
 0x2fa   :  { %1896 = vmatpush.bf16.msrb.mxu0 %v8177_v4  ;;  %1922 = vmatpush.bf16.msrb.mxu2 %v8178_v23  ;;  %v8188_v4 = vld [vmem:[#allocation47_spill] sm:$0xff]  ;;  %v8189_v23 = vld [vmem:[#allocation28_spill] sm:$0xff] }
 0x2fb   :  { %2095 = vmatpush.bf16.msra.mxu3 %v8179_v3  ;;  %2121 = vmatpush.bf16.msrb.mxu1 %v8180_v20  ;;  %v8190_v3 = vld [vmem:[#allocation108_spill] sm:$0xff]  ;;  %v8191_v20 = vld [vmem:[#allocation107_spill] sm:$0xff] }
 0x2fe   :  { %1897 = vmatpush.bf16.msrb.mxu0 %v8181_v59  ;;  %1923 = vmatpush.bf16.msrb.mxu2 %v8182_v47  ;;  %v8192_v59 = vld [vmem:[#allocation109_spill] sm:$0xff]  ;;  %v8193_v47 = vld [vmem:[#allocation50_spill] sm:$0xff] }
 0x2ff   :  { %2096 = vmatpush.bf16.msra.mxu3 %v8183_v19  ;;  %2122 = vmatpush.bf16.msrb.mxu1 %v8184_v30  ;;  %v8194_v19 = vld [vmem:[#allocation27_spill] sm:$0xff] }
 0x300   :  { %v8202_v30 = vld [vmem:[#allocation59_spill] sm:$0xff] }
 0x302   :  { %1898 = vmatpush.bf16.msrb.mxu0 %v8185_v1  ;;  %1924 = vmatpush.bf16.msrb.mxu2 %v8186_v10  ;;  %v8195_v10 = vld [vmem:[#allocation110_spill] sm:$0xff] }
 0x303   :  { %2097 = vmatpush.bf16.msra.mxu3 %v8187_v34  ;;  %2123 = vmatpush.bf16.msrb.mxu1 %v8189_v23  ;;  %v6536_v34 = vpop.f32.mrf.mxu1  ;;  %v8197_v23 = vld [vmem:[#allocation30_spill] sm:$0xff] }
 0x306   :  { %1899 = vmatpush.bf16.msrb.mxu0 %v8190_v3  ;;  %1925 = vmatpush.bf16.msrb.mxu2 %v8191_v20  ;;  %v8198_v3 = vld [vmem:[#allocation113_spill] sm:$0xff]  ;;  %v8199_v20 = vld [vmem:[#allocation56_spill] sm:$0xff] }
 0x307   :  { %2142 = vmatpush.bf16.msrb.mxu3 %v8188_v4  ;;  %v8196_v4 = vld [vmem:[#allocation53_spill] sm:$0xff] }
 0x309   :  { %1900 = vmatmul.bf16.vlgmr.msrb.gmra.mxu0 %v6456_v60  ;;  %1926 = vmatmul.bf16.vlgmr.msrb.gmra.mxu2 %v6456_v60 }
 0x30a   :  { %1944 = vmatpush.bf16.msra.mxu0 %v8192_v59  ;;  %2077 = vmatpush.bf16.msra.mxu2 %v8194_v19  ;;  %v8200_v59 = vld [vmem:[#allocation32_spill] sm:$0xff] }
 0x30b   :  { %2143 = vmatpush.bf16.msrb.mxu3 %v8193_v47  ;;  %v1732_v47 = vpop.f32.mrf.mxu3  ;;  %v8201_v19 = vld [vmem:[#allocation116_spill] sm:$0xff]  ;;  %v1760_v1 = vpop.f32.mrf.mxu1 }
 0x30c   :  { %v8210_v1 = vld [vmem:[#allocation124_spill] sm:$0xff] }
 0x30e   :  { %1945 = vmatpush.bf16.msra.mxu0 %v8195_v10  ;;  %2078 = vmatpush.bf16.msra.mxu2 %v8197_v23  ;;  %v8204_v10 = vld [vmem:[#allocation118_spill] sm:$0xff] }
 0x30f   :  { %2144 = vmatpush.bf16.msrb.mxu3 %v8196_v4  ;;  %v8206_v4 = vld [vmem:[#allocation37_spill] sm:$0xff] }
 0x312   :  { %1946 = vmatpush.bf16.msra.mxu0 %v8198_v3  ;;  %2079 = vmatpush.bf16.msra.mxu2 %v8200_v59  ;;  %v8207_v3 = vld [vmem:[#allocation121_spill] sm:$0xff]  ;;  %v8208_v59 = vld [vmem:[#allocation66_spill] sm:$0xff] }
 0x313   :  { %2145 = vmatpush.bf16.msrb.mxu3 %v8199_v20  ;;  %v1734_v23 = vpop.f32.mrf.mxu3  ;;  %v6550_v20 = vpop.f32.mrf.mxu1 }
 0x314   :  { %v8214_v23 = vld [vmem:[#allocation29_spill] sm:$0xff] }
 0x316   :  { %1947 = vmatpush.bf16.msra.mxu0 %v8201_v19  ;;  %2080 = vmatpush.bf16.msra.mxu2 %v8203_v28  ;;  %v8212_v28 = vld [vmem:[#allocation41_spill] sm:$0xff] }
 0x317   :  { %2146 = vmatpush.bf16.msrb.mxu3 %v8202_v30  ;;  %v8211_v30 = vld [vmem:[#allocation70_spill] sm:$0xff]  ;;  %v8216_v19 = vld [vmem:[#allocation45_spill] sm:$0xff] }
 0x31a   :  { %1948 = vmatpush.bf16.msra.mxu0 %v8204_v10  ;;  %2081 = vmatpush.bf16.msra.mxu2 %v8206_v4 }
 0x31b   :  { %2147 = vmatpush.bf16.msrb.mxu3 %v8205_v35  ;;  %v6557_v10 = vpop.f32.mrf.mxu3  ;;  %v8213_v35 = vld [vmem:[#allocation127_spill] sm:$0xff]  ;;  %v1812_v4 = vpop.f32.mrf.mxu1 }
 0x31c   :  { %v8221_v4 = vld [vmem:[#allocation34_spill] sm:$0xff] }
 0x31e   :  { %1949 = vmatpush.bf16.msra.mxu0 %v8207_v3  ;;  %2082 = vmatpush.bf16.msra.mxu2 %v8209_v53  ;;  %v8215_v3 = vld [vmem:[#allocation44_spill] sm:$0xff]  ;;  %v8217_v53 = vld [vmem:[#allocation31_spill] sm:$0xff] }
 0x31f   :  { %2148 = vmatpush.bf16.msrb.mxu3 %v8208_v59  ;;  %v8218_v59 = vld [vmem:[#allocation48_spill] sm:$0xff] }
 0x322   :  { %1950 = vmatpush.bf16.msra.mxu0 %v8210_v1  ;;  %2083 = vmatpush.bf16.msra.mxu2 %v8212_v28  ;;  %v8219_v28 = vld [vmem:[#allocation33_spill] sm:$0xff] }
 0x323   :  { %2149 = vmatpush.bf16.msrb.mxu3 %v8211_v30  ;;  %v1786_v1 = vpop.f32.mrf.mxu3  ;;  %v6566_v30 = vpop.f32.mrf.mxu1 }
 0x324   :  { %v8225_v1 = vld [vmem:[#allocation38_spill] sm:$0xff] }
 0x326   :  { %1951 = vmatpush.bf16.msra.mxu0 %v8213_v35  ;;  %2084 = vmatpush.bf16.msra.mxu2 %v8215_v3  ;;  %v8222_v3 = vld [vmem:[#allocation54_spill] sm:$0xff]  ;;  %v8223_v35 = vld [vmem:[#allocation36_spill] sm:$0xff] }
 0x329   :  { %1952 = vmatmul.bf16.vlgmr.msra.gmra.mxu0 %v6456_v60  ;;  %v8224_v60 = vld [vmem:[#allocation57_spill] sm:$0xff] }
 0x32a   :  { %2103 = vmatpush.bf16.msrb.mxu0 %v8214_v23  ;;  %2129 = vmatpush.bf16.msrb.mxu2 %v8216_v19 }
 0x32b   :  { %v6571_v23 = vpop.f32.mrf.mxu3  ;;  %v1864_v19 = vpop.f32.mrf.mxu1 }
 0x32c   :  { %v4278_v19 = vld [vmem:[%s7561_s0 + $0x24] sm:$0xff] }
 0x32e   :  { %2104 = vmatpush.bf16.msrb.mxu0 %v8217_v53  ;;  %2130 = vmatpush.bf16.msrb.mxu2 %v8218_v59  ;;  %v8226_v53 = vld [vmem:[#allocation60_spill] sm:$0xff] }
 0x332   :  { %2105 = vmatpush.bf16.msrb.mxu0 %v8219_v28  ;;  %2131 = vmatpush.bf16.msrb.mxu2 %v8220_v32  ;;  %v8228_v28 = vld [vmem:[#allocation63_spill] sm:$0xff]  ;;  %v8229_v32 = vld [vmem:[#allocation42_spill] sm:$0xff] }
 0x333   :  { %v1838_v59 = vpop.f32.mrf.mxu3 }
 0x334   :  { %v2012_v59 = vunpack.c.l.bf16 %v4278_v19 }
 0x336   :  { %2106 = vmatpush.bf16.msrb.mxu0 %v8221_v4  ;;  %2132 = vmatpush.bf16.msrb.mxu2 %v8222_v3  ;;  %v8230_v4 = vld [vmem:[#allocation43_spill] sm:$0xff]  ;;  %v8234_v3 = vld [vmem:[#allocation52_spill] sm:$0xff] }
 0x33a   :  { %2107 = vmatpush.bf16.msrb.mxu0 %v8223_v35  ;;  %2133 = vmatpush.bf16.msrb.mxu2 %v8224_v60  ;;  %v8232_v60 = vld [vmem:[#allocation46_spill] sm:$0xff]  ;;  %v8233_v35 = vld [vmem:[#allocation49_spill] sm:$0xff] }
 0x33e   :  { %2108 = vmatpush.bf16.msrb.mxu0 %v8225_v1  ;;  %2134 = vmatpush.bf16.msrb.mxu2 %v8226_v53 }
 0x342   :  { %2109 = vmatpush.bf16.msrb.mxu0 %v8227_v27  ;;  %2135 = vmatpush.bf16.msrb.mxu2 %v8228_v28  ;;  %v6587_v1 = vpop.f32.mrf.mxu1 }
 0x346   :  { %2110 = vmatpush.bf16.msrb.mxu0 %v8229_v32  ;;  %2136 = vmatpush.bf16.msrb.mxu2 %v8231_v43  ;;  %v1745_v53 = vpop.f32.mrf.mxu0  ;;  %v2013_v43 = vunpack.c.h.bf16 %v4278_v19  ;;  %v8237_v19 = vld [vmem:[#allocation61_spill] sm:$0xff] }
 0x347   :  { %v1746_v27 = vadd.f32 %v1745_v53, %v1732_v47 }
 0x349   :  { %v2015_v28 = vadd.f32 %v2012_v59, %v1746_v27 }
 0x34a   :  { %2155 = vmatpush.bf16.msra.mxu0 %v8230_v4  ;;  %v6591_v4 = vpop.f32.mrf.mxu3  ;;  %v1916_v48 = vpop.f32.mrf.mxu1 }
 0x34b   :  { %v4280_v32 = vmul.f32 -1.442695, %v2015_v28 }
 0x34c   :  { %v1771_v49 = vpop.f32.mrf.mxu2 }
 0x34d   :  { %4507 = vpow2.f32 %v4280_v32  ;;  %v1772_v51 = vadd.f32 %v1771_v49, %v6536_v34  ;;  %v8238_v49 = vld [vmem:[#allocation64_spill] sm:$0xff] }
 0x34e   :  { %2156 = vmatpush.bf16.msra.mxu0 %v8232_v60  ;;  %v1747_v60 = vpop.f32.mrf.mxu0 }
 0x34f   :  { %v2016_v36 = vadd.f32 %v2013_v43, %v1772_v51 }
 0x351   :  { %v4281_v25 = vmul.f32 -1.442695, %v2016_v36 }
 0x352   :  { %2157 = vmatpush.bf16.msra.mxu0 %v8233_v35  ;;  %v1890_v27 = vpop.f32.mrf.mxu3 }
 0x353   :  { %v4508_v53 = vpop.eup %4507  ;;  %4509 = vpow2.f32 %v4281_v25 }
 0x354   :  { %v2023_v47 = vadd.f32 1.0, %v4508_v53  ;;  %v1773_v28 = vpop.f32.mrf.mxu2  ;;  %v4279_v53 = vld [vmem:[%s7561_s0 + $0x2c] sm:$0xf] }
 0x356   :  { %2158 = vmatpush.bf16.msra.mxu0 %v8234_v3  ;;  %4511 = vrcp.f32 %v2023_v47  ;;  %v1797_v59 = vpop.f32.mrf.mxu0  ;;  %v2036_v60 = vand.u32 2147483648, %v2023_v47  ;;  %v2034_v28 = vand.u32 2147483647, %v2023_v47  ;;  %vm2030_vm9 = vweird.f32 %v2023_v47 }
 0x357   :  { %v1798_v25 = vadd.f32 %v1797_v59, %v6557_v10 }
 0x358   :  { %vm2035_vm11 = vcmp.eq.f32.partialorder %v2034_v28, 8.507059e+37 }
 0x359   :  { %v4510_v32 = vpop.eup %4509  ;;  %v2055_v10 = vadd.f32 %v6390_v26, %v1798_v25 }
 0x35a   :  { %2159 = vmatpush.bf16.msra.mxu0 %v8235_v39  ;;  %v2024_v3 = vadd.f32 1.0, %v4510_v32  ;;  %v2037_v39 = vor.u32 1.1754944e-38, %v2036_v60 }
 0x35c   :  { %v4512_v48 = vpop.eup %4511  ;;  %4513 = vrcp.f32 %v2024_v3  ;;  %v1823_v34 = vpop.f32.mrf.mxu2  ;;  %vm2045_vm13 = vweird.f32 %v2024_v3 }
 0x35d   :  { %v2026_v51 = vmul.f32 %v4512_v48, %v2023_v47  ;;  %vm2031_vm8 = vweird.f32 %v4512_v48 }
 0x35e   :  { %2160 = vmatpush.bf16.msra.mxu0 %v8236_v56  ;;  %v1799_v36 = vpop.f32.mrf.mxu0  ;;  %vm2032_vm10 = vmor %vm2030_vm9, %vm2031_vm8 }
 0x35f   :  { %v2027_v43 = vsub.f32 1.0, %v2026_v51 }
 0x361   :  { %v2028_v27 = vmul.f32 %v4512_v48, %v2027_v43 }
 0x362   :  { %2161 = vmatpush.bf16.msra.mxu0 %v8237_v19  ;;  %v4514_v19 = vpop.eup %4513 }
 0x363   :  { %v2041_v32 = vmul.f32 %v4514_v19, %v2024_v3  ;;  %v2029_v56 = vadd.f32 %v4512_v48, %v2028_v27  ;;  %vm2046_vm12 = vweird.f32 %v4514_v19 }
 0x364   :  { %v1825_v35 = vpop.f32.mrf.mxu2  ;;  %vm2047_vm14 = vmor %vm2045_vm13, %vm2046_vm12 }
 0x365   :  { %v2042_v36 = vsub.f32 1.0, %v2041_v32  ;;  %v2033_v51 = vsel %vm2032_vm10, %v4512_v48, %v2029_v56  ;;  %v2049_v35 = vand.u32 2147483647, %v2024_v3 }
 0x366   :  { %2162 = vmatpush.bf16.msra.mxu0 %v8238_v49  ;;  %v2014_v49 = vunpack.c.l.bf16 %v4279_v53  ;;  %v2038_v59 = vsel %vm2035_vm11, %v2037_v39, %v2033_v51  ;;  %v1849_v13 = vpop.f32.mrf.mxu0  ;;  %v2051_v53 = vand.u32 2147483648, %v2024_v3 }
 0x367   :  { %v2056_v42 = vmul.f32 %v2055_v10, %v2038_v59  ;;  %v2043_v17 = vmul.f32 %v4514_v19, %v2042_v36  ;;  %vm2050_vm15 = vcmp.eq.f32.partialorder %v2049_v35, 8.507059e+37  ;;  %v1850_v36 = vadd.f32 %v1849_v13, %v6571_v23 }
 0x368   :  { %v2052_v26 = vor.u32 1.1754944e-38, %v2051_v53 }
 0x369   :  { %v2057_v43 = vadd.f32 %v2056_v42, %v2014_v49  ;;  %v2044_v44 = vadd.f32 %v4514_v19, %v2043_v17 }
 0x36b   :  { %v6603_v54 = vpop.f32.mrf.mxu3  ;;  %4515 = vtanh.f32 %v2057_v43  ;;  %v2048_v56 = vsel %vm2047_vm14, %v4514_v19, %v2044_v44  ;;  %v1824_v44 = vadd.f32 %v1823_v34, %v6550_v20  ;;  %v1958_v20 = vadd.f32 %v1850_v36, %v6171_v57 }
 0x36c   :  { %v6605_v47 = vpop.f32.mrf.mxu2  ;;  %v2053_v42 = vsel %vm2050_vm15, %v2052_v26, %v2048_v56 }
 0x36d   :  { %v1957_v3 = vadd.f32 %v1824_v44, %v6182_v61 }
 0x36e   :  { %v1851_v60 = vpop.f32.mrf.mxu0 }
 0x371   :  { %v4516_v48 = vpop.eup %4515 }
 0x372   :  { %v2059_v39 = vsub.f32 %v6394_v15, %v4516_v48 }
 0x373   :  { %v1942_v25 = vpop.f32.mrf.mxu3 }
 0x374   :  { %v2060_v49 = vmul.f32 %v2059_v39, %v2053_v42  ;;  %v1877_v27 = vpop.f32.mrf.mxu2 }
 0x376   :  { %v6608_v28 = vadd.f32 %v4516_v48, %v2060_v49  ;;  %v1876_v49 = vadd.f32 %v6605_v47, %v6566_v30 }
 0x378   :  { %v6612_v17 = vpack.c.bf16 %v6608_v28, %v6608_v28 }
 0x37a   :  { %2072 = vmatmul.bf16.vlgmr.msra.gmra.mxu1 %v6612_v17  ;;  %2098 = vmatmul.bf16.vlgmr.msra.gmra.mxu3 %v6612_v17 }
 0x37b   :  { %2168 = vmatpush.bf16.msra.mxu1 %v5523_v40  ;;  %2194 = vmatpush.bf16.msra.mxu3 %v5525_v16 }
 0x37f   :  { %2169 = vmatpush.bf16.msra.mxu1 %v5566_v41  ;;  %2195 = vmatpush.bf16.msra.mxu3 %v8007_v55 }
 0x383   :  { %2170 = vmatpush.bf16.msra.mxu1 %v8008_v12  ;;  %2196 = vmatpush.bf16.msra.mxu3 %v8009_v33 }
 0x386   :  { %v1901_v15 = vpop.f32.mrf.mxu0 }
 0x387   :  { %v1902_v19 = vadd.f32 %v1901_v15, %v6591_v4  ;;  %2171 = vmatpush.bf16.msra.mxu1 %v8010_v38  ;;  %2197 = vmatpush.bf16.msra.mxu3 %v8011_v45 }
 0x389   :  { %v1960_v32 = vadd.f32 %v1957_v3, %v1902_v19 }
 0x38a   :  { %2124 = vmatmul.bf16.vlgmr.msrb.gmra.mxu1 %v6612_v17  ;;  %2150 = vmatmul.bf16.vlgmr.msrb.gmra.mxu3 %v6612_v17 }
 0x38b   :  { %v4276_v51 = vmul.f32 -1.442695, %v1960_v32  ;;  %2172 = vmatpush.bf16.msra.mxu1 %v8012_v0  ;;  %2198 = vmatpush.bf16.msra.mxu3 %v8013_v24 }
 0x38c   :  { %v1927_v10 = vpop.f32.mrf.mxu2 }
 0x38d   :  { %4517 = vpow2.f32 %v4276_v51  ;;  %v1928_v34 = vadd.f32 %v1927_v10, %v6587_v1  ;;  %v6654_v51 = vld [vmem:[%s7562_s5] ss:$0 sm:$0xff] }
 0x38e   :  { %v1903_v59 = vpop.f32.mrf.mxu0 }
 0x38f   :  { %v1961_v13 = vadd.f32 %v1958_v20, %v1928_v34  ;;  %2173 = vmatpush.bf16.msra.mxu1 %v8014_v11  ;;  %2199 = vmatpush.bf16.msra.mxu3 %v8015_v7 }
 0x391   :  { %v4277_v23 = vmul.f32 -1.442695, %v1961_v13 }
 0x393   :  { %v4518_v4 = vpop.eup %4517  ;;  %4519 = vpow2.f32 %v4277_v23  ;;  %2174 = vmatpush.bf16.msra.mxu1 %v5752_v22  ;;  %2200 = vmatpush.bf16.msra.mxu3 %v5754_v63 }
 0x394   :  { %v1968_v43 = vadd.f32 1.0, %v4518_v4  ;;  %v1929_v53 = vpop.f32.mrf.mxu2 }
 0x396   :  { %4521 = vrcp.f32 %v1968_v43  ;;  %v1981_v26 = vand.u32 2147483648, %v1968_v43  ;;  %v1979_v25 = vand.u32 2147483647, %v1968_v43  ;;  %vm1975_vm1 = vweird.f32 %v1968_v43 }
 0x397   :  { %2175 = vmatpush.bf16.msra.mxu1 %v5792_v21  ;;  %2201 = vmatpush.bf16.msra.mxu3 %v5794_v8 }
 0x398   :  { %v1982_v19 = vor.u32 1.1754944e-38, %v1981_v26  ;;  %vm1980_vm3 = vcmp.eq.f32.partialorder %v1979_v25, 8.507059e+37 }
 0x399   :  { %v4520_v1 = vpop.eup %4519 }
 0x39a   :  { %v1969_v35 = vadd.f32 1.0, %v4520_v1  ;;  %2176 = vmatmul.bf16.vlgmr.msra.gmra.mxu1 %v6612_v17  ;;  %2202 = vmatmul.bf16.vlgmr.msra.gmra.mxu3 %v6612_v17 }
 0x39b   :  { %2220 = vmatpush.bf16.msrb.mxu1 %v5796_v9  ;;  %2246 = vmatpush.bf16.msrb.mxu3 %v5798_v37 }
 0x39c   :  { %v4522_v60 = vpop.eup %4521  ;;  %4523 = vrcp.f32 %v1969_v35  ;;  %v1996_v23 = vand.u32 2147483648, %v1969_v35  ;;  %vm1990_vm5 = vweird.f32 %v1969_v35  ;;  %v1994_v4 = vand.u32 2147483647, %v1969_v35 }
 0x39d   :  { %v1971_v56 = vmul.f32 %v4522_v60, %v1968_v43  ;;  %vm1976_vm0 = vweird.f32 %v4522_v60 }
 0x39e   :  { %vm1977_vm2 = vmor %vm1975_vm1, %vm1976_vm0  ;;  %v1997_v1 = vor.u32 1.1754944e-38, %v1996_v23  ;;  %vm1995_vm7 = vcmp.eq.f32.partialorder %v1994_v4, 8.507059e+37  ;;  %v8259_v23 = vld [vmem:[#allocation74_spill] sm:$0xff] }
 0x39f   :  { %2221 = vmatpush.bf16.msrb.mxu1 %v8122_v5  ;;  %2247 = vmatpush.bf16.msrb.mxu3 %v8123_v58  ;;  %v1972_v48 = vsub.f32 1.0, %v1971_v56  ;;  %v8239_v56 = vld [vmem:[#allocation125_spill] sm:$0xff]  ;;  %v8260_v4 = vld [vmem:[#allocation134_spill] sm:$0xff] }
 0x3a1   :  { %v1973_v39 = vmul.f32 %v4522_v60, %v1972_v48  ;;  %v8240_v48 = vld [vmem:[#allocation126_spill] sm:$0xff] }
 0x3a2   :  { %v4524_v42 = vpop.eup %4523 }
 0x3a3   :  { %2222 = vmatpush.bf16.msrb.mxu1 %v8124_v50  ;;  %2248 = vmatpush.bf16.msrb.mxu3 %v8125_v14  ;;  %v1986_v44 = vmul.f32 %v4524_v42, %v1969_v35  ;;  %v1974_v3 = vadd.f32 %v4522_v60, %v1973_v39  ;;  %vm1991_vm4 = vweird.f32 %v4524_v42  ;;  %v8242_v35 = vld [vmem:[#allocation128_spill] sm:$0xff] }
 0x3a4   :  { %vm1992_vm6 = vmor %vm1990_vm5, %vm1991_vm4 }
 0x3a5   :  { %v1987_v32 = vsub.f32 1.0, %v1986_v44  ;;  %v1978_v36 = vsel %vm1977_vm2, %v4522_v60, %v1974_v3  ;;  %v8247_v3 = vld [vmem:[#allocation65_spill] sm:$0xff] }
 0x3a6   :  { %v1953_v27 = vpop.f32.mrf.mxu0  ;;  %v1983_v47 = vsel %vm1980_vm3, %v1982_v19, %v1978_v36  ;;  %v8248_v19 = vld [vmem:[#allocation131_spill] sm:$0xff] }
 0x3a7   :  { %v1954_v15 = vadd.f32 %v1953_v27, %v6603_v54  ;;  %2223 = vmatpush.bf16.msrb.mxu1 %v5887_v62  ;;  %2249 = vmatpush.bf16.msrb.mxu3 %v8017_v46  ;;  %v1959_v54 = vadd.f32 %v1876_v49, %v6216_v52  ;;  %v1988_v20 = vmul.f32 %v4524_v42, %v1987_v32  ;;  %v8243_v49 = vld [vmem:[#allocation129_spill] sm:$0xff]  ;;  %v8244_v27 = vld [vmem:[#allocation130_spill] sm:$0xff]  ;;  %v8250_v36 = vld [vmem:[#allocation71_spill] sm:$0xff] }
 0x3a8   :  { %v8249_v32 = vld [vmem:[#allocation6_spill] sm:$0xff] }
 0x3a9   :  { %v2000_v30 = vadd.f32 %v6654_v51, %v1954_v15  ;;  %v1989_v13 = vadd.f32 %v4524_v42, %v1988_v20  ;;  %v8246_v15 = vld [vmem:[#allocation68_spill] sm:$0xff] }
 0x3aa   :  { %v8255_v20 = vld [vmem:[#allocation72_spill] sm:$0xff] }
 0x3ab   :  { %v2001_v10 = vmul.f32 %v2000_v30, %v1983_v47  ;;  %2224 = vmatpush.bf16.msrb.mxu1 %v8018_v31  ;;  %2250 = vmatpush.bf16.msrb.mxu3 %v8019_v6  ;;  %v1993_v43 = vsel %vm1992_vm6, %v4524_v42, %v1989_v13  ;;  %v8245_v42 = vld [vmem:[#allocation4_spill] sm:$0xff]  ;;  %v8251_v30 = vld [vmem:[#allocation69_spill] sm:$0xff]  ;;  %v8258_v13 = vld [vmem:[#allocation75_spill] sm:$0xff] }
 0x3ac   :  { %v1998_v26 = vsel %vm1995_vm7, %v1997_v1, %v1993_v43  ;;  %v8252_v47 = vld [vmem:[#allocation132_spill] sm:$0xff]  ;;  %v8261_v43 = vld [vmem:[#allocation15_spill] sm:$0xff] }
 0x3ad   :  { %v2002_v34 = vadd.f32 %v2001_v10, %v1959_v54  ;;  %v8253_v54 = vld [vmem:[#allocation9_spill] sm:$0xff]  ;;  %v8263_v1 = vld [vmem:[#allocation76_spill] sm:$0xff] }
 0x3ae   :  { %v1955_v59 = vpop.f32.mrf.mxu0  ;;  %v8254_v10 = vld [vmem:[#allocation73_spill] sm:$0xff] }
 0x3af   :  { %4525 = vtanh.f32 %v2002_v34  ;;  %2225 = vmatpush.bf16.msrb.mxu1 %v8020_v2  ;;  %2251 = vmatpush.bf16.msrb.mxu3 %v8021_v29  ;;  %v8256_v34 = vld [vmem:[#allocation133_spill] sm:$0xff]  ;;  %v8257_v59 = vld [vmem:[#allocation12_spill] sm:$0xff] }
 0x3b3   :  { %2226 = vmatpush.bf16.msrb.mxu1 %v8239_v56  ;;  %2252 = vmatpush.bf16.msrb.mxu3 %v8240_v48 }
 0x3b5   :  { %v4526_v53 = vpop.eup %4525 }
 0x3b6   :  { %v2004_v60 = vsub.f32 %v6448_v18, %v4526_v53  ;;  %v8267_v18 = vld [vmem:[#allocation78_spill] sm:$0xff] }
 0x3b7   :  { %2227 = vmatpush.bf16.msrb.mxu1 %v8242_v35  ;;  %2253 = vmatpush.bf16.msrb.mxu3 %v8243_v49 }
 0x3b8   :  { %v2005_v39 = vmul.f32 %v2004_v60, %v1998_v26  ;;  %v8264_v60 = vld [vmem:[#allocation135_spill] sm:$0xff]  ;;  %v8265_v26 = vld [vmem:[#allocation18_spill] sm:$0xff] }
 0x3ba   :  { %v6667_v25 = vadd.f32 %v4526_v53, %v2005_v39  ;;  %2228 = vmatmul.bf16.vlgmr.msrb.gmra.mxu1 %v6612_v17  ;;  %2254 = vmatmul.bf16.vlgmr.msrb.gmra.mxu3 %v6612_v17  ;;  %v8262_v53 = vld [vmem:[#allocation77_spill] sm:$0xff]  ;;  %v8266_v39 = vld [vmem:[#allocation79_spill] sm:$0xff] }
 0x3bb   :  { %2272 = vmatpush.bf16.msra.mxu1 %v8244_v27  ;;  %2405 = vmatpush.bf16.msra.mxu3 %v8245_v42  ;;  %v8353_v42 = vld [vmem:[#allocation58_spill] sm:$0xff] }
 0x3bc   :  { %8241 = vst [vmem:[#allocation96_spill] sm:$0xff] %v6667_v25  ;;  %v6675_v44 = vpack.c.bf16 %v6667_v25, %v6667_v25 }
 0x3be   :  { %2085 = vmatmul.bf16.vlgmr.msra.gmra.mxu2 %v6675_v44  ;;  %2111 = vmatmul.bf16.vlgmr.msrb.gmra.mxu0 %v6675_v44 }
 0x3bf   :  { %2181 = vmatpush.bf16.msra.mxu2 %v8246_v15  ;;  %2207 = vmatpush.bf16.msrb.mxu0 %v8247_v3  ;;  %v8352_v3 = vld [vmem:[#allocation55_spill] sm:$0xff] }
 0x3c0   :  { %2273 = vmatpush.bf16.msra.mxu1 %v8248_v19  ;;  %2406 = vmatpush.bf16.msra.mxu3 %v8249_v32 }
 0x3c3   :  { %2182 = vmatpush.bf16.msra.mxu2 %v8250_v36  ;;  %2208 = vmatpush.bf16.msrb.mxu0 %v8251_v30 }
 0x3c4   :  { %2274 = vmatpush.bf16.msra.mxu1 %v8252_v47  ;;  %2407 = vmatpush.bf16.msra.mxu3 %v8253_v54  ;;  %v8344_v54 = vld [vmem:[#allocation40_spill] sm:$0xff]  ;;  %v8348_v47 = vld [vmem:[#allocation67_spill] sm:$0xff] }
 0x3c7   :  { %2183 = vmatpush.bf16.msra.mxu2 %v8254_v10  ;;  %2209 = vmatpush.bf16.msrb.mxu0 %v8255_v20  ;;  %v8326_v20 = vld [vmem:[#allocation39_spill] sm:$0xff] }
 0x3c8   :  { %2275 = vmatpush.bf16.msra.mxu1 %v8256_v34  ;;  %2408 = vmatpush.bf16.msra.mxu3 %v8257_v59  ;;  %v8272_v59 = vld [vmem:[#allocation137_spill] sm:$0xff]  ;;  %v8322_v34 = vld [vmem:[#allocation62_spill] sm:$0xff]  ;;  %v8337_v10 = vld [vmem:[#allocation51_spill] sm:$0xff] }
 0x3cb   :  { %2184 = vmatpush.bf16.msra.mxu2 %v8258_v13  ;;  %2210 = vmatpush.bf16.msrb.mxu0 %v8259_v23  ;;  %v8268_v23 = vld [vmem:[#allocation136_spill] sm:$0xff] }
 0x3cc   :  { %2276 = vmatpush.bf16.msra.mxu1 %v8260_v4  ;;  %2409 = vmatpush.bf16.msra.mxu3 %v8261_v43  ;;  %v8269_v4 = vld [vmem:[#allocation21_spill] sm:$0xff]  ;;  %v8271_v13 = vld [vmem:[#allocation80_spill] sm:$0xff] }
 0x3cd   :  { %v8270_v43 = vld [vmem:[#allocation81_spill] sm:$0xff] }
 0x3ce   :  { %2137 = vmatmul.bf16.vlgmr.msrb.gmra.mxu2 %v6675_v44  ;;  %2163 = vmatmul.bf16.vlgmr.msra.gmra.mxu0 %v6675_v44 }
 0x3cf   :  { %2185 = vmatpush.bf16.msra.mxu2 %v8262_v53  ;;  %2211 = vmatpush.bf16.msrb.mxu0 %v8263_v1  ;;  %v8273_v53 = vld [vmem:[#allocation24_spill] sm:$0xff]  ;;  %v8274_v1 = vld [vmem:[#allocation5_spill] sm:$0xff] }
 0x3d0   :  { %2277 = vmatpush.bf16.msra.mxu1 %v8264_v60  ;;  %2410 = vmatpush.bf16.msra.mxu3 %v8265_v26  ;;  %v8275_v60 = vld [vmem:[#allocation8_spill] sm:$0xff] }
 0x3d1   :  { %v8276_v26 = vld [vmem:[#allocation84_spill] sm:$0xff] }
 0x3d3   :  { %2186 = vmatpush.bf16.msra.mxu2 %v8266_v39  ;;  %2212 = vmatpush.bf16.msrb.mxu0 %v8267_v18  ;;  %v8277_v39 = vld [vmem:[#allocation82_spill] sm:$0xff]  ;;  %v8320_v18 = vld [vmem:[#allocation35_spill] sm:$0xff] }
 0x3d4   :  { %2278 = vmatpush.bf16.msra.mxu1 %v8268_v23  ;;  %2411 = vmatpush.bf16.msra.mxu3 %v8269_v4  ;;  %v8278_v23 = vld [vmem:[#allocation85_spill] sm:$0xff]  ;;  %v8279_v4 = vld [vmem:[#allocation83_spill] sm:$0xff] }
 0x3d7   :  { %2187 = vmatpush.bf16.msra.mxu2 %v8270_v43  ;;  %2213 = vmatpush.bf16.msrb.mxu0 %v8271_v13  ;;  %v8280_v43 = vld [vmem:[#allocation7_spill] sm:$0xff] }
 0x3d8   :  { %2279 = vmatpush.bf16.msra.mxu1 %v8272_v59  ;;  %2412 = vmatpush.bf16.msra.mxu3 %v8273_v53  ;;  %v8281_v53 = vld [vmem:[#allocation11_spill] sm:$0xff]  ;;  %v8290_v59 = vld [vmem:[#allocation94_spill] sm:$0xff] }
 0x3d9   :  { %v8291_v13 = vld [vmem:[#allocation91_spill] sm:$0xff] }
 0x3db   :  { %2188 = vmatpush.bf16.msra.mxu2 %v8276_v26  ;;  %2214 = vmatpush.bf16.msrb.mxu0 %v8277_v39  ;;  %v8284_v26 = vld [vmem:[#allocation10_spill] sm:$0xff] }
 0x3dc   :  { %2431 = vmatpush.bf16.msrb.mxu1 %v8274_v1  ;;  %2457 = vmatpush.bf16.msrb.mxu3 %v8275_v60  ;;  %v8282_v1 = vld [vmem:[#allocation87_spill] sm:$0xff]  ;;  %v8283_v60 = vld [vmem:[#allocation86_spill] sm:$0xff] }
 0x3dd   :  { %2280 = vmatmul.bf16.vlgmr.msra.gmra.mxu1 %v6612_v17  ;;  %v8285_v39 = vld [vmem:[#allocation14_spill] sm:$0xff] }
 0x3de   :  { %2189 = vmatmul.bf16.vlgmr.msra.gmra.mxu2 %v6675_v44  ;;  %2215 = vmatmul.bf16.vlgmr.msrb.gmra.mxu0 %v6675_v44  ;;  %v8286_v17 = vld [vmem:[#allocation90_spill] sm:$0xff] }
 0x3df   :  { %2233 = vmatpush.bf16.msrb.mxu2 %v8278_v23  ;;  %2259 = vmatpush.bf16.msra.mxu0 %v8279_v4  ;;  %v8287_v23 = vld [vmem:[#allocation88_spill] sm:$0xff]  ;;  %v8288_v4 = vld [vmem:[#allocation13_spill] sm:$0xff] }
 0x3e0   :  { %2432 = vmatpush.bf16.msrb.mxu1 %v8280_v43  ;;  %2458 = vmatpush.bf16.msrb.mxu3 %v8281_v53  ;;  %v8289_v43 = vld [vmem:[#allocation17_spill] sm:$0xff]  ;;  %v8292_v53 = vld [vmem:[#allocation16_spill] sm:$0xff] }
 0x3e3   :  { %2234 = vmatpush.bf16.msrb.mxu2 %v8282_v1  ;;  %2260 = vmatpush.bf16.msra.mxu0 %v8283_v60  ;;  %v8293_v1 = vld [vmem:[#allocation20_spill] sm:$0xff]  ;;  %v8294_v60 = vld [vmem:[#allocation98_spill] sm:$0xff] }
 0x3e4   :  { %2433 = vmatpush.bf16.msrb.mxu1 %v8284_v26  ;;  %2459 = vmatpush.bf16.msrb.mxu3 %v8285_v39  ;;  %v8295_v26 = vld [vmem:[#allocation95_spill] sm:$0xff] }
 0x3e5   :  { %v8296_v39 = vld [vmem:[#allocation19_spill] sm:$0xff] }
 0x3e7   :  { %2235 = vmatpush.bf16.msrb.mxu2 %v8286_v17  ;;  %2261 = vmatpush.bf16.msra.mxu0 %v8287_v23  ;;  %v8297_v17 = vld [vmem:[#allocation23_spill] sm:$0xff]  ;;  %v8298_v23 = vld [vmem:[#allocation102_spill] sm:$0xff] }
 0x3e8   :  { %2434 = vmatpush.bf16.msrb.mxu1 %v8288_v4  ;;  %2460 = vmatpush.bf16.msrb.mxu3 %v8289_v43  ;;  %v8299_v4 = vld [vmem:[#allocation99_spill] sm:$0xff]  ;;  %v8300_v43 = vld [vmem:[#allocation22_spill] sm:$0xff] }
 0x3eb   :  { %2236 = vmatpush.bf16.msrb.mxu2 %v8290_v59  ;;  %2262 = vmatpush.bf16.msra.mxu0 %v8291_v13  ;;  %v8301_v59 = vld [vmem:[#allocation26_spill] sm:$0xff] }
 0x3ec   :  { %2435 = vmatpush.bf16.msrb.mxu1 %v8292_v53  ;;  %2461 = vmatpush.bf16.msrb.mxu3 %v8293_v1  ;;  %v8302_v13 = vld [vmem:[#allocation106_spill] sm:$0xff]  ;;  %v8303_v53 = vld [vmem:[#allocation103_spill] sm:$0xff]  ;;  %v8304_v1 = vld [vmem:[#allocation25_spill] sm:$0xff] }
 0x3ef   :  { %2237 = vmatpush.bf16.msrb.mxu2 %v8294_v60  ;;  %2263 = vmatpush.bf16.msra.mxu0 %v8295_v26  ;;  %v8305_v60 = vld [vmem:[#allocation47_spill] sm:$0xff]  ;;  %v8306_v26 = vld [vmem:[#allocation28_spill] sm:$0xff] }
 0x3f0   :  { %2436 = vmatpush.bf16.msrb.mxu1 %v8296_v39  ;;  %2462 = vmatpush.bf16.msrb.mxu3 %v8297_v17  ;;  %v8307_v39 = vld [vmem:[#allocation108_spill] sm:$0xff]  ;;  %v8308_v17 = vld [vmem:[#allocation107_spill] sm:$0xff] }
 0x3f3   :  { %2238 = vmatpush.bf16.msrb.mxu2 %v8298_v23  ;;  %2264 = vmatpush.bf16.msra.mxu0 %v8299_v4  ;;  %v8309_v23 = vld [vmem:[#allocation109_spill] sm:$0xff]  ;;  %v8310_v4 = vld [vmem:[#allocation50_spill] sm:$0xff] }
 0x3f4   :  { %2437 = vmatpush.bf16.msrb.mxu1 %v8300_v43  ;;  %2463 = vmatpush.bf16.msrb.mxu3 %v8301_v59  ;;  %v8311_v43 = vld [vmem:[#allocation27_spill] sm:$0xff] }
 0x3f5   :  { %v8319_v59 = vld [vmem:[#allocation59_spill] sm:$0xff] }
 0x3f7   :  { %2239 = vmatpush.bf16.msrb.mxu2 %v8302_v13  ;;  %2265 = vmatpush.bf16.msra.mxu0 %v8303_v53  ;;  %v8312_v53 = vld [vmem:[#allocation110_spill] sm:$0xff]  ;;  %v8318_v13 = vld [vmem:[#allocation116_spill] sm:$0xff] }
 0x3f8   :  { %2438 = vmatpush.bf16.msrb.mxu1 %v8304_v1  ;;  %2464 = vmatpush.bf16.msrb.mxu3 %v8306_v26  ;;  %v2073_v1 = vpop.f32.mrf.mxu1  ;;  %v8314_v26 = vld [vmem:[#allocation30_spill] sm:$0xff] }
 0x3fb   :  { %2240 = vmatpush.bf16.msrb.mxu2 %v8307_v39  ;;  %2266 = vmatpush.bf16.msra.mxu0 %v8308_v17  ;;  %v8315_v39 = vld [vmem:[#allocation113_spill] sm:$0xff]  ;;  %v8316_v17 = vld [vmem:[#allocation56_spill] sm:$0xff] }
 0x3fc   :  { %2483 = vmatpush.bf16.msra.mxu1 %v8305_v60  ;;  %v8313_v60 = vld [vmem:[#allocation53_spill] sm:$0xff] }
 0x3fe   :  { %2241 = vmatmul.bf16.vlgmr.msrb.gmra.mxu2 %v6675_v44  ;;  %2267 = vmatmul.bf16.vlgmr.msra.gmra.mxu0 %v6675_v44 }
 0x3ff   :  { %2285 = vmatpush.bf16.msra.mxu2 %v8309_v23  ;;  %2418 = vmatpush.bf16.msrb.mxu0 %v8311_v43  ;;  %v8317_v23 = vld [vmem:[#allocation32_spill] sm:$0xff] }
 0x400   :  { %2484 = vmatpush.bf16.msra.mxu1 %v8310_v4  ;;  %v2099_v4 = vpop.f32.mrf.mxu3  ;;  %v2075_v43 = vpop.f32.mrf.mxu1 }
 0x401   :  { %v8327_v43 = vld [vmem:[#allocation124_spill] sm:$0xff] }
 0x403   :  { %2286 = vmatpush.bf16.msra.mxu2 %v8312_v53  ;;  %2419 = vmatpush.bf16.msrb.mxu0 %v8314_v26  ;;  %v8321_v53 = vld [vmem:[#allocation118_spill] sm:$0xff] }
 0x404   :  { %2485 = vmatpush.bf16.msra.mxu1 %v8313_v60  ;;  %v8323_v60 = vld [vmem:[#allocation37_spill] sm:$0xff] }
 0x407   :  { %2287 = vmatpush.bf16.msra.mxu2 %v8315_v39  ;;  %2420 = vmatpush.bf16.msrb.mxu0 %v8317_v23  ;;  %v8324_v39 = vld [vmem:[#allocation121_spill] sm:$0xff]  ;;  %v8325_v23 = vld [vmem:[#allocation66_spill] sm:$0xff] }
 0x408   :  { %2486 = vmatpush.bf16.msra.mxu1 %v8316_v17  ;;  %v2101_v26 = vpop.f32.mrf.mxu3  ;;  %v6767_v17 = vpop.f32.mrf.mxu1 }
 0x409   :  { %v8331_v26 = vld [vmem:[#allocation29_spill] sm:$0xff] }
 0x40b   :  { %2288 = vmatpush.bf16.msra.mxu2 %v8318_v13  ;;  %2421 = vmatpush.bf16.msrb.mxu0 %v8320_v18  ;;  %v8329_v18 = vld [vmem:[#allocation41_spill] sm:$0xff] }
 0x40c   :  { %2487 = vmatpush.bf16.msra.mxu1 %v8319_v59  ;;  %v8328_v59 = vld [vmem:[#allocation70_spill] sm:$0xff]  ;;  %v8333_v13 = vld [vmem:[#allocation45_spill] sm:$0xff] }
 0x40f   :  { %2289 = vmatpush.bf16.msra.mxu2 %v8321_v53  ;;  %2422 = vmatpush.bf16.msrb.mxu0 %v8323_v60 }
 0x410   :  { %2488 = vmatpush.bf16.msra.mxu1 %v8322_v34  ;;  %v6774_v53 = vpop.f32.mrf.mxu3  ;;  %v8330_v34 = vld [vmem:[#allocation127_spill] sm:$0xff]  ;;  %v2127_v60 = vpop.f32.mrf.mxu1 }
 0x411   :  { %v8338_v60 = vld [vmem:[#allocation34_spill] sm:$0xff] }
 0x413   :  { %2290 = vmatpush.bf16.msra.mxu2 %v8324_v39  ;;  %2423 = vmatpush.bf16.msrb.mxu0 %v8326_v20  ;;  %v8332_v39 = vld [vmem:[#allocation44_spill] sm:$0xff]  ;;  %v8334_v20 = vld [vmem:[#allocation31_spill] sm:$0xff] }
 0x414   :  { %2489 = vmatpush.bf16.msra.mxu1 %v8325_v23  ;;  %v8335_v23 = vld [vmem:[#allocation48_spill] sm:$0xff] }
 0x417   :  { %2291 = vmatpush.bf16.msra.mxu2 %v8327_v43  ;;  %2424 = vmatpush.bf16.msrb.mxu0 %v8329_v18  ;;  %v8336_v18 = vld [vmem:[#allocation33_spill] sm:$0xff] }
 0x418   :  { %2490 = vmatpush.bf16.msra.mxu1 %v8328_v59  ;;  %v2153_v43 = vpop.f32.mrf.mxu3  ;;  %v6783_v59 = vpop.f32.mrf.mxu1 }
 0x41b   :  { %2292 = vmatpush.bf16.msra.mxu2 %v8330_v34  ;;  %2425 = vmatpush.bf16.msrb.mxu0 %v8332_v39  ;;  %v8339_v34 = vld [vmem:[#allocation54_spill] sm:$0xff] }
 0x41e   :  { %2293 = vmatmul.bf16.vlgmr.msra.gmra.mxu2 %v6675_v44  ;;  %v8341_v44 = vld [vmem:[#allocation57_spill] sm:$0xff] }
 0x41f   :  { %2444 = vmatpush.bf16.msrb.mxu2 %v8331_v26  ;;  %2470 = vmatpush.bf16.msra.mxu0 %v8333_v13  ;;  %v8340_v13 = vld [vmem:[#allocation36_spill] sm:$0xff] }
 0x420   :  { %v2203_v26 = vpop.f32.mrf.mxu3  ;;  %v2179_v39 = vpop.f32.mrf.mxu1 }
 0x421   :  { %v4284_v39 = vld [vmem:[%s7561_s0 + $0x30] sm:$0xff] }
 0x423   :  { %2445 = vmatpush.bf16.msrb.mxu2 %v8334_v20  ;;  %2471 = vmatpush.bf16.msra.mxu0 %v8335_v23  ;;  %v8342_v20 = vld [vmem:[#allocation38_spill] sm:$0xff]  ;;  %v8343_v23 = vld [vmem:[#allocation60_spill] sm:$0xff] }
 0x427   :  { %2446 = vmatpush.bf16.msrb.mxu2 %v8336_v18  ;;  %2472 = vmatpush.bf16.msra.mxu0 %v8337_v10  ;;  %v8345_v18 = vld [vmem:[#allocation63_spill] sm:$0xff]  ;;  %v8346_v10 = vld [vmem:[#allocation42_spill] sm:$0xff] }
 0x428   :  { %v2205_v43 = vpop.f32.mrf.mxu3 }
 0x429   :  { %v2354_v43 = vunpack.c.h.bf16 %v4284_v39 }
 0x42b   :  { %2447 = vmatpush.bf16.msrb.mxu2 %v8338_v60  ;;  %2473 = vmatpush.bf16.msra.mxu0 %v8339_v34  ;;  %v8347_v60 = vld [vmem:[#allocation43_spill] sm:$0xff]  ;;  %v8351_v34 = vld [vmem:[#allocation52_spill] sm:$0xff] }
 0x42f   :  { %2448 = vmatpush.bf16.msrb.mxu2 %v8340_v13  ;;  %2474 = vmatpush.bf16.msra.mxu0 %v8341_v44  ;;  %v8349_v44 = vld [vmem:[#allocation46_spill] sm:$0xff]  ;;  %v8350_v13 = vld [vmem:[#allocation49_spill] sm:$0xff] }
 0x433   :  { %2449 = vmatpush.bf16.msrb.mxu2 %v8342_v20  ;;  %2475 = vmatpush.bf16.msra.mxu0 %v8343_v23 }
 0x437   :  { %2450 = vmatpush.bf16.msrb.mxu2 %v8344_v54  ;;  %2476 = vmatpush.bf16.msra.mxu0 %v8345_v18  ;;  %v6802_v20 = vpop.f32.mrf.mxu1 }
 0x43b   :  { %2451 = vmatpush.bf16.msrb.mxu2 %v8346_v10  ;;  %2477 = vmatpush.bf16.msra.mxu0 %v8348_v47  ;;  %v2112_v23 = vpop.f32.mrf.mxu0 }
 0x43c   :  { %v2113_v54 = vadd.f32 %v2112_v23, %v2099_v4 }
 0x43d   :  { %v6806_v10 = vpop.f32.mrf.mxu3 }
 0x43e   :  { %v2357_v18 = vadd.f32 %v2354_v43, %v2113_v54 }
 0x43f   :  { %2496 = vmatpush.bf16.msra.mxu2 %v8347_v60  ;;  %v2353_v60 = vunpack.c.l.bf16 %v4284_v39  ;;  %v2231_v32 = vpop.f32.mrf.mxu1 }
 0x440   :  { %v4287_v47 = vmul.f32 -1.442695, %v2357_v18  ;;  %v8355_v32 = vld [vmem:[#allocation64_spill] sm:$0xff] }
 0x441   :  { %v2086_v30 = vpop.f32.mrf.mxu2 }
 0x442   :  { %v2087_v36 = vadd.f32 %v2086_v30, %v2073_v1  ;;  %4527 = vpow2.f32 %v4287_v47 }
 0x443   :  { %2497 = vmatpush.bf16.msra.mxu2 %v8349_v44  ;;  %v2114_v19 = vpop.f32.mrf.mxu0 }
 0x444   :  { %v2356_v44 = vadd.f32 %v2353_v60, %v2087_v36 }
 0x445   :  { %v2257_v23 = vpop.f32.mrf.mxu3 }
 0x446   :  { %v4286_v15 = vmul.f32 -1.442695, %v2356_v44 }
 0x447   :  { %2498 = vmatpush.bf16.msra.mxu2 %v8350_v13 }
 0x448   :  { %4529 = vpow2.f32 %v4286_v15  ;;  %v4528_v4 = vpop.eup %4527 }
 0x449   :  { %v2088_v54 = vpop.f32.mrf.mxu2  ;;  %v2365_v39 = vadd.f32 1.0, %v4528_v4 }
 0x44b   :  { %2499 = vmatpush.bf16.msra.mxu2 %v8351_v34  ;;  %v6810_v43 = vpop.f32.mrf.mxu0  ;;  %v8354_v34 = vld [vmem:[#allocation61_spill] sm:$0xff]  ;;  %vm2386_vm13 = vweird.f32 %v2365_v39 }
 0x44e   :  { %v4530_v18 = vpop.eup %4529 }
 0x44f   :  { %2500 = vmatpush.bf16.msra.mxu2 %v8352_v3  ;;  %v2364_v30 = vadd.f32 1.0, %v4530_v18 }
 0x451   :  { %4531 = vrcp.f32 %v2364_v30  ;;  %v2138_v19 = vpop.f32.mrf.mxu2  ;;  %v2377_v3 = vand.u32 2147483648, %v2364_v30  ;;  %vm2371_vm9 = vweird.f32 %v2364_v30 }
 0x452   :  { %4533 = vrcp.f32 %v2365_v39  ;;  %v2139_v4 = vadd.f32 %v2138_v19, %v6767_v17  ;;  %v6825_v17 = vld [vmem:[%s7560_s3] ss:$0 sm:$0xff] }
 0x453   :  { %2501 = vmatpush.bf16.msra.mxu2 %v8353_v42  ;;  %v2166_v36 = vpop.f32.mrf.mxu0  ;;  %v2375_v42 = vand.u32 2147483647, %v2364_v30 }
 0x454   :  { %v4285_v36 = vld [vmem:[%s7561_s0 + $0x38] sm:$0xf] }
 0x455   :  { %vm2376_vm11 = vcmp.eq.f32.partialorder %v2375_v42, 8.507059e+37  ;;  %v2390_v42 = vand.u32 2147483647, %v2365_v39 }
 0x457   :  { %2502 = vmatpush.bf16.msra.mxu2 %v8354_v34  ;;  %v4532_v47 = vpop.eup %4531  ;;  %vm2391_vm15 = vcmp.eq.f32.partialorder %v2390_v42, 8.507059e+37 }
 0x458   :  { %v4534_v1 = vpop.eup %4533  ;;  %v2367_v60 = vmul.f32 %v4532_v47, %v2364_v30  ;;  %vm2372_vm8 = vweird.f32 %v4532_v47 }
 0x459   :  { %v2140_v44 = vpop.f32.mrf.mxu2  ;;  %v2382_v54 = vmul.f32 %v4534_v1, %v2365_v39  ;;  %vm2373_vm10 = vmor %vm2371_vm9, %vm2372_vm8  ;;  %vm2387_vm12 = vweird.f32 %v4534_v1 }
 0x45a   :  { %v6814_v15 = vpop.f32.mrf.mxu1  ;;  %v2368_v23 = vsub.f32 1.0, %v2367_v60  ;;  %v2378_v44 = vor.u32 1.1754944e-38, %v2377_v3  ;;  %v2355_v60 = vunpack.c.l.bf16 %v4285_v36  ;;  %v2392_v3 = vand.u32 2147483648, %v2365_v39  ;;  %vm2388_vm14 = vmor %vm2386_vm13, %vm2387_vm12 }
 0x45b   :  { %2503 = vmatpush.bf16.msra.mxu2 %v8355_v32  ;;  %v2216_v34 = vpop.f32.mrf.mxu0  ;;  %v2383_v27 = vsub.f32 1.0, %v2382_v54  ;;  %v2165_v39 = vadd.f32 %v6810_v43, %v6774_v53 }
 0x45c   :  { %v2369_v18 = vmul.f32 %v4532_v47, %v2368_v23  ;;  %v6817_v32 = vadd.f32 %v2216_v34, %v2203_v26  ;;  %v2396_v34 = vadd.f32 %v6825_v17, %v2139_v4  ;;  %v2393_v56 = vor.u32 1.1754944e-38, %v2392_v3 }
 0x45d   :  { %v2384_v48 = vmul.f32 %v4534_v1, %v2383_v27 }
 0x45e   :  { %v2370_v13 = vadd.f32 %v4532_v47, %v2369_v18 }
 0x45f   :  { %v2385_v54 = vadd.f32 %v4534_v1, %v2384_v48 }
 0x460   :  { %v2374_v49 = vsel %vm2373_vm10, %v4532_v47, %v2370_v13 }
 0x461   :  { %v2379_v26 = vsel %vm2376_vm11, %v2378_v44, %v2374_v49  ;;  %v2190_v23 = vpop.f32.mrf.mxu2  ;;  %v2389_v47 = vsel %vm2388_vm14, %v4534_v1, %v2385_v54 }
 0x462   :  { %v2283_v19 = vpop.f32.mrf.mxu1  ;;  %v2397_v35 = vmul.f32 %v2396_v34, %v2379_v26  ;;  %v2394_v4 = vsel %vm2391_vm15, %v2393_v56, %v2389_v47  ;;  %v2191_v48 = vadd.f32 %v2190_v23, %v6783_v59  ;;  %v2298_v59 = vadd.f32 %v2165_v39, %v6182_v61 }
 0x463   :  { %v2218_v18 = vpop.f32.mrf.mxu0 }
 0x464   :  { %v2398_v30 = vadd.f32 %v2397_v35, %v2355_v60 }
 0x466   :  { %4535 = vtanh.f32 %v2398_v30 }
 0x469   :  { %v2192_v13 = vpop.f32.mrf.mxu2 }
 0x46c   :  { %v4536_v36 = vpop.eup %4535 }
 0x46d   :  { %v2400_v49 = vsub.f32 %v6608_v28, %v4536_v36  ;;  %v2299_v28 = vadd.f32 %v2191_v48, %v6171_v57 }
 0x46f   :  { %v2401_v44 = vmul.f32 %v2400_v49, %v2394_v4 }
 0x471   :  { %v6829_v34 = vadd.f32 %v4536_v36, %v2401_v44 }
 0x473   :  { %v6833_v35 = vpack.c.bf16 %v6829_v34, %v6829_v34 }
 0x475   :  { %2413 = vmatmul.bf16.vlgmr.msra.gmra.mxu3 %v6833_v35  ;;  %2439 = vmatmul.bf16.vlgmr.msrb.gmra.mxu1 %v6833_v35 }
 0x476   :  { %2509 = vmatpush.bf16.msra.mxu3 %v5523_v40  ;;  %2535 = vmatpush.bf16.msrb.mxu1 %v5525_v16 }
 0x47a   :  { %2510 = vmatpush.bf16.msra.mxu3 %v5566_v41  ;;  %2536 = vmatpush.bf16.msrb.mxu1 %v8007_v55 }
 0x47b   :  { %v2268_v27 = vpop.f32.mrf.mxu0 }
 0x47c   :  { %v2269_v56 = vadd.f32 %v2268_v27, %v6806_v10 }
 0x47e   :  { %v2302_v1 = vadd.f32 %v2299_v28, %v2269_v56  ;;  %2511 = vmatpush.bf16.msra.mxu3 %v8008_v12  ;;  %2537 = vmatpush.bf16.msrb.mxu1 %v8009_v33 }
 0x480   :  { %v4283_v26 = vmul.f32 -1.442695, %v2302_v1 }
 0x481   :  { %v2242_v60 = vpop.f32.mrf.mxu2 }
 0x482   :  { %v2243_v19 = vadd.f32 %v2242_v60, %v6802_v20  ;;  %2512 = vmatpush.bf16.msra.mxu3 %v8010_v38  ;;  %2538 = vmatpush.bf16.msrb.mxu1 %v8011_v45  ;;  %4537 = vpow2.f32 %v4283_v26  ;;  %v2300_v26 = vadd.f32 %v6817_v32, %v6216_v52 }
 0x483   :  { %v2270_v10 = vpop.f32.mrf.mxu0 }
 0x484   :  { %v2301_v23 = vadd.f32 %v2298_v59, %v2243_v19 }
 0x485   :  { %2465 = vmatmul.bf16.vlgmr.msrb.gmra.mxu3 %v6833_v35  ;;  %2491 = vmatmul.bf16.vlgmr.msra.gmra.mxu1 %v6833_v35 }
 0x486   :  { %v4282_v18 = vmul.f32 -1.442695, %v2301_v23  ;;  %2513 = vmatpush.bf16.msra.mxu3 %v8012_v0  ;;  %2539 = vmatpush.bf16.msrb.mxu1 %v8013_v24 }
 0x488   :  { %4539 = vpow2.f32 %v4282_v18  ;;  %v4538_v43 = vpop.eup %4537 }
 0x489   :  { %v2244_v53 = vpop.f32.mrf.mxu2  ;;  %v2310_v30 = vadd.f32 1.0, %v4538_v43 }
 0x48a   :  { %2514 = vmatpush.bf16.msra.mxu3 %v8014_v11  ;;  %2540 = vmatpush.bf16.msrb.mxu1 %v8015_v7 }
 0x48b   :  { %v2337_v53 = vand.u32 2147483648, %v2310_v30  ;;  %vm2331_vm5 = vweird.f32 %v2310_v30 }
 0x48e   :  { %v4540_v20 = vpop.eup %4539  ;;  %2515 = vmatpush.bf16.msra.mxu3 %v5752_v22  ;;  %2541 = vmatpush.bf16.msrb.mxu1 %v5754_v63 }
 0x48f   :  { %v2309_v54 = vadd.f32 1.0, %v4540_v20  ;;  %v2338_v20 = vor.u32 1.1754944e-38, %v2337_v53  ;;  %v8376_v53 = vld [vmem:[#allocation74_spill] sm:$0xff] }
 0x491   :  { %4541 = vrcp.f32 %v2309_v54  ;;  %v2322_v36 = vand.u32 2147483648, %v2309_v54  ;;  %v2320_v44 = vand.u32 2147483647, %v2309_v54  ;;  %vm2316_vm1 = vweird.f32 %v2309_v54 }
 0x492   :  { %4543 = vrcp.f32 %v2310_v30  ;;  %2516 = vmatpush.bf16.msra.mxu3 %v5792_v21  ;;  %2542 = vmatpush.bf16.msrb.mxu1 %v5794_v8 }
 0x493   :  { %v2323_v56 = vor.u32 1.1754944e-38, %v2322_v36  ;;  %vm2321_vm3 = vcmp.eq.f32.partialorder %v2320_v44, 8.507059e+37  ;;  %v8361_v44 = vld [vmem:[#allocation130_spill] sm:$0xff] }
 0x495   :  { %2517 = vmatmul.bf16.vlgmr.msra.gmra.mxu3 %v6833_v35  ;;  %2543 = vmatmul.bf16.vlgmr.msrb.gmra.mxu1 %v6833_v35 }
 0x496   :  { %2561 = vmatpush.bf16.msrb.mxu3 %v5796_v9  ;;  %2587 = vmatpush.bf16.msra.mxu1 %v5798_v37 }
 0x497   :  { %v4542_v3 = vpop.eup %4541 }
 0x498   :  { %v2312_v42 = vmul.f32 %v4542_v3, %v2309_v54  ;;  %v4544_v13 = vpop.eup %4543  ;;  %vm2317_vm0 = vweird.f32 %v4542_v3 }
 0x499   :  { %v2327_v49 = vmul.f32 %v4544_v13, %v2310_v30  ;;  %vm2318_vm2 = vmor %vm2316_vm1, %vm2317_vm0  ;;  %vm2332_vm4 = vweird.f32 %v4544_v13 }
 0x49a   :  { %2562 = vmatpush.bf16.msrb.mxu3 %v8122_v5  ;;  %2588 = vmatpush.bf16.msra.mxu1 %v8123_v58  ;;  %v2313_v47 = vsub.f32 1.0, %v2312_v42  ;;  %vm2333_vm6 = vmor %vm2331_vm5, %vm2332_vm4  ;;  %v8357_v42 = vld [vmem:[#allocation126_spill] sm:$0xff] }
 0x49b   :  { %v2328_v39 = vsub.f32 1.0, %v2327_v49 }
 0x49c   :  { %v2314_v4 = vmul.f32 %v4542_v3, %v2313_v47 }
 0x49d   :  { %v2329_v23 = vmul.f32 %v4544_v13, %v2328_v39  ;;  %v8366_v39 = vld [vmem:[#allocation6_spill] sm:$0xff] }
 0x49e   :  { %v2315_v27 = vadd.f32 %v4542_v3, %v2314_v4  ;;  %2563 = vmatpush.bf16.msrb.mxu3 %v8124_v50  ;;  %2589 = vmatpush.bf16.msra.mxu1 %v8125_v14  ;;  %v8360_v4 = vld [vmem:[#allocation129_spill] sm:$0xff] }
 0x4a0   :  { %v2319_v1 = vsel %vm2318_vm2, %v4542_v3, %v2315_v27  ;;  %v8356_v3 = vld [vmem:[#allocation125_spill] sm:$0xff]  ;;  %v8363_v27 = vld [vmem:[#allocation68_spill] sm:$0xff] }
 0x4a1   :  { %v2294_v48 = vpop.f32.mrf.mxu2  ;;  %v2324_v60 = vsel %vm2321_vm3, %v2323_v56, %v2319_v1  ;;  %v8365_v56 = vld [vmem:[#allocation131_spill] sm:$0xff] }
 0x4a2   :  { %v2295_v28 = vadd.f32 %v2294_v48, %v6814_v15  ;;  %2564 = vmatpush.bf16.msrb.mxu3 %v5887_v62  ;;  %2590 = vmatpush.bf16.msra.mxu1 %v8017_v46  ;;  %v2330_v15 = vadd.f32 %v4544_v13, %v2329_v23  ;;  %v8367_v1 = vld [vmem:[#allocation71_spill] sm:$0xff]  ;;  %v8372_v23 = vld [vmem:[#allocation72_spill] sm:$0xff] }
 0x4a4   :  { %v2341_v59 = vadd.f32 %v6654_v51, %v2295_v28  ;;  %v2335_v51 = vand.u32 2147483647, %v2310_v30  ;;  %v2334_v32 = vsel %vm2333_vm6, %v4544_v13, %v2330_v15  ;;  %v8359_v30 = vld [vmem:[#allocation128_spill] sm:$0xff]  ;;  %v8364_v28 = vld [vmem:[#allocation65_spill] sm:$0xff]  ;;  %v8375_v15 = vld [vmem:[#allocation75_spill] sm:$0xff] }
 0x4a5   :  { %v8362_v13 = vld [vmem:[#allocation4_spill] sm:$0xff] }
 0x4a6   :  { %v2342_v19 = vmul.f32 %v2341_v59, %v2324_v60  ;;  %2565 = vmatpush.bf16.msrb.mxu3 %v8018_v31  ;;  %2591 = vmatpush.bf16.msra.mxu1 %v8019_v6  ;;  %vm2336_vm7 = vcmp.eq.f32.partialorder %v2335_v51, 8.507059e+37  ;;  %v8368_v60 = vld [vmem:[#allocation69_spill] sm:$0xff]  ;;  %v8369_v59 = vld [vmem:[#allocation132_spill] sm:$0xff]  ;;  %v8377_v51 = vld [vmem:[#allocation134_spill] sm:$0xff] }
 0x4a7   :  { %v2339_v47 = vsel %vm2336_vm7, %v2338_v20, %v2334_v32  ;;  %v8378_v32 = vld [vmem:[#allocation15_spill] sm:$0xff]  ;;  %v8380_v20 = vld [vmem:[#allocation76_spill] sm:$0xff] }
 0x4a8   :  { %v2343_v10 = vadd.f32 %v2342_v19, %v2300_v26  ;;  %v8370_v26 = vld [vmem:[#allocation9_spill] sm:$0xff] }
 0x4a9   :  { %v2296_v18 = vpop.f32.mrf.mxu2  ;;  %v8371_v19 = vld [vmem:[#allocation73_spill] sm:$0xff] }
 0x4aa   :  { %4545 = vtanh.f32 %v2343_v10  ;;  %2566 = vmatpush.bf16.msrb.mxu3 %v8020_v2  ;;  %2592 = vmatpush.bf16.msra.mxu1 %v8021_v29  ;;  %v8373_v10 = vld [vmem:[#allocation133_spill] sm:$0xff]  ;;  %v8374_v18 = vld [vmem:[#allocation12_spill] sm:$0xff] }
 0x4ae   :  { %2567 = vmatpush.bf16.msrb.mxu3 %v8356_v3  ;;  %2593 = vmatpush.bf16.msra.mxu1 %v8357_v42 }
 0x4b0   :  { %v4546_v43 = vpop.eup %4545 }
 0x4b1   :  { %v2345_v54 = vsub.f32 %v6667_v25, %v4546_v43  ;;  %v8384_v25 = vld [vmem:[#allocation78_spill] sm:$0xff] }
 0x4b2   :  { %2568 = vmatpush.bf16.msrb.mxu3 %v8359_v30  ;;  %2594 = vmatpush.bf16.msra.mxu1 %v8360_v4 }
 0x4b3   :  { %v2346_v36 = vmul.f32 %v2345_v54, %v2339_v47  ;;  %v8381_v54 = vld [vmem:[#allocation135_spill] sm:$0xff]  ;;  %v8382_v47 = vld [vmem:[#allocation18_spill] sm:$0xff] }
 0x4b5   :  { %v6883_v49 = vadd.f32 %v4546_v43, %v2346_v36  ;;  %2569 = vmatmul.bf16.vlgmr.msrb.gmra.mxu3 %v6833_v35  ;;  %2595 = vmatmul.bf16.vlgmr.msra.gmra.mxu1 %v6833_v35  ;;  %v8379_v43 = vld [vmem:[#allocation77_spill] sm:$0xff]  ;;  %v8383_v36 = vld [vmem:[#allocation79_spill] sm:$0xff] }
 0x4b6   :  { %2613 = vmatpush.bf16.msra.mxu3 %v8361_v44  ;;  %2746 = vmatpush.bf16.msrb.mxu1 %v8362_v13  ;;  %v8470_v13 = vld [vmem:[#allocation58_spill] sm:$0xff] }
 0x4b7   :  { %8358 = vst [vmem:[#allocation97_spill] sm:$0xff] %v6883_v49  ;;  %v6891_v48 = vpack.c.bf16 %v6883_v49, %v6883_v49 }
 0x4b9   :  { %2426 = vmatmul.bf16.vlgmr.msrb.gmra.mxu0 %v6891_v48  ;;  %2452 = vmatmul.bf16.vlgmr.msrb.gmra.mxu2 %v6891_v48 }
 0x4ba   :  { %2522 = vmatpush.bf16.msrb.mxu0 %v8363_v27  ;;  %2548 = vmatpush.bf16.msrb.mxu2 %v8364_v28 }
 0x4bb   :  { %2614 = vmatpush.bf16.msra.mxu3 %v8365_v56  ;;  %2747 = vmatpush.bf16.msrb.mxu1 %v8366_v39  ;;  %v8469_v56 = vld [vmem:[#allocation55_spill] sm:$0xff] }
 0x4be   :  { %2523 = vmatpush.bf16.msrb.mxu0 %v8367_v1  ;;  %2549 = vmatpush.bf16.msrb.mxu2 %v8368_v60 }
 0x4bf   :  { %2615 = vmatpush.bf16.msra.mxu3 %v8369_v59  ;;  %2748 = vmatpush.bf16.msrb.mxu1 %v8370_v26  ;;  %v8461_v26 = vld [vmem:[#allocation40_spill] sm:$0xff]  ;;  %v8465_v59 = vld [vmem:[#allocation67_spill] sm:$0xff] }
 0x4c2   :  { %2524 = vmatpush.bf16.msrb.mxu0 %v8371_v19  ;;  %2550 = vmatpush.bf16.msrb.mxu2 %v8372_v23  ;;  %v8443_v23 = vld [vmem:[#allocation39_spill] sm:$0xff] }
 0x4c3   :  { %2616 = vmatpush.bf16.msra.mxu3 %v8373_v10  ;;  %2749 = vmatpush.bf16.msrb.mxu1 %v8374_v18  ;;  %v8389_v18 = vld [vmem:[#allocation137_spill] sm:$0xff]  ;;  %v8439_v10 = vld [vmem:[#allocation62_spill] sm:$0xff]  ;;  %v8454_v19 = vld [vmem:[#allocation51_spill] sm:$0xff] }
 0x4c6   :  { %2525 = vmatpush.bf16.msrb.mxu0 %v8375_v15  ;;  %2551 = vmatpush.bf16.msrb.mxu2 %v8376_v53  ;;  %v8385_v53 = vld [vmem:[#allocation136_spill] sm:$0xff] }
 0x4c7   :  { %2617 = vmatpush.bf16.msra.mxu3 %v8377_v51  ;;  %2750 = vmatpush.bf16.msrb.mxu1 %v8378_v32  ;;  %v8386_v51 = vld [vmem:[#allocation21_spill] sm:$0xff]  ;;  %v8388_v15 = vld [vmem:[#allocation80_spill] sm:$0xff] }
 0x4c8   :  { %v8387_v32 = vld [vmem:[#allocation81_spill] sm:$0xff] }
 0x4c9   :  { %2478 = vmatmul.bf16.vlgmr.msra.gmra.mxu0 %v6891_v48  ;;  %2504 = vmatmul.bf16.vlgmr.msra.gmra.mxu2 %v6891_v48 }
 0x4ca   :  { %2526 = vmatpush.bf16.msrb.mxu0 %v8379_v43  ;;  %2552 = vmatpush.bf16.msrb.mxu2 %v8380_v20  ;;  %v8390_v43 = vld [vmem:[#allocation24_spill] sm:$0xff]  ;;  %v8391_v20 = vld [vmem:[#allocation5_spill] sm:$0xff] }
 0x4cb   :  { %2618 = vmatpush.bf16.msra.mxu3 %v8381_v54  ;;  %2751 = vmatpush.bf16.msrb.mxu1 %v8382_v47  ;;  %v8392_v54 = vld [vmem:[#allocation8_spill] sm:$0xff] }
 0x4cc   :  { %v8393_v47 = vld [vmem:[#allocation84_spill] sm:$0xff] }
 0x4ce   :  { %2527 = vmatpush.bf16.msrb.mxu0 %v8383_v36  ;;  %2553 = vmatpush.bf16.msrb.mxu2 %v8384_v25  ;;  %v8394_v36 = vld [vmem:[#allocation82_spill] sm:$0xff]  ;;  %v8437_v25 = vld [vmem:[#allocation35_spill] sm:$0xff] }
 0x4cf   :  { %2619 = vmatpush.bf16.msra.mxu3 %v8385_v53  ;;  %2752 = vmatpush.bf16.msrb.mxu1 %v8386_v51  ;;  %v8395_v53 = vld [vmem:[#allocation85_spill] sm:$0xff]  ;;  %v8396_v51 = vld [vmem:[#allocation83_spill] sm:$0xff] }
 0x4d2   :  { %2528 = vmatpush.bf16.msrb.mxu0 %v8387_v32  ;;  %2554 = vmatpush.bf16.msrb.mxu2 %v8388_v15  ;;  %v8397_v32 = vld [vmem:[#allocation7_spill] sm:$0xff] }
 0x4d3   :  { %2620 = vmatpush.bf16.msra.mxu3 %v8389_v18  ;;  %2753 = vmatpush.bf16.msrb.mxu1 %v8390_v43  ;;  %v8398_v43 = vld [vmem:[#allocation11_spill] sm:$0xff]  ;;  %v8407_v18 = vld [vmem:[#allocation94_spill] sm:$0xff] }
 0x4d4   :  { %v8408_v15 = vld [vmem:[#allocation91_spill] sm:$0xff] }
 0x4d6   :  { %2529 = vmatpush.bf16.msrb.mxu0 %v8393_v47  ;;  %2555 = vmatpush.bf16.msrb.mxu2 %v8394_v36  ;;  %v8401_v47 = vld [vmem:[#allocation10_spill] sm:$0xff] }
 0x4d7   :  { %2772 = vmatpush.bf16.msrb.mxu3 %v8391_v20  ;;  %2798 = vmatpush.bf16.msra.mxu1 %v8392_v54  ;;  %v8399_v20 = vld [vmem:[#allocation87_spill] sm:$0xff]  ;;  %v8400_v54 = vld [vmem:[#allocation86_spill] sm:$0xff] }
 0x4d8   :  { %2621 = vmatmul.bf16.vlgmr.msra.gmra.mxu3 %v6833_v35  ;;  %v8402_v36 = vld [vmem:[#allocation14_spill] sm:$0xff] }
 0x4d9   :  { %2530 = vmatmul.bf16.vlgmr.msrb.gmra.mxu0 %v6891_v48  ;;  %2556 = vmatmul.bf16.vlgmr.msrb.gmra.mxu2 %v6891_v48  ;;  %v8403_v35 = vld [vmem:[#allocation90_spill] sm:$0xff] }
 0x4da   :  { %2574 = vmatpush.bf16.msra.mxu0 %v8395_v53  ;;  %2600 = vmatpush.bf16.msra.mxu2 %v8396_v51  ;;  %v8404_v53 = vld [vmem:[#allocation88_spill] sm:$0xff]  ;;  %v8405_v51 = vld [vmem:[#allocation13_spill] sm:$0xff] }
 0x4db   :  { %2773 = vmatpush.bf16.msrb.mxu3 %v8397_v32  ;;  %2799 = vmatpush.bf16.msra.mxu1 %v8398_v43  ;;  %v8406_v32 = vld [vmem:[#allocation17_spill] sm:$0xff]  ;;  %v8409_v43 = vld [vmem:[#allocation16_spill] sm:$0xff] }
 0x4de   :  { %2575 = vmatpush.bf16.msra.mxu0 %v8399_v20  ;;  %2601 = vmatpush.bf16.msra.mxu2 %v8400_v54  ;;  %v8410_v20 = vld [vmem:[#allocation20_spill] sm:$0xff]  ;;  %v8411_v54 = vld [vmem:[#allocation98_spill] sm:$0xff] }
 0x4df   :  { %2774 = vmatpush.bf16.msrb.mxu3 %v8401_v47  ;;  %2800 = vmatpush.bf16.msra.mxu1 %v8402_v36  ;;  %v8412_v47 = vld [vmem:[#allocation95_spill] sm:$0xff] }
 0x4e0   :  { %v8413_v36 = vld [vmem:[#allocation19_spill] sm:$0xff] }
 0x4e2   :  { %2576 = vmatpush.bf16.msra.mxu0 %v8403_v35  ;;  %2602 = vmatpush.bf16.msra.mxu2 %v8404_v53  ;;  %v8414_v35 = vld [vmem:[#allocation23_spill] sm:$0xff]  ;;  %v8415_v53 = vld [vmem:[#allocation102_spill] sm:$0xff] }
 0x4e3   :  { %2775 = vmatpush.bf16.msrb.mxu3 %v8405_v51  ;;  %2801 = vmatpush.bf16.msra.mxu1 %v8406_v32  ;;  %v8416_v51 = vld [vmem:[#allocation99_spill] sm:$0xff]  ;;  %v8417_v32 = vld [vmem:[#allocation22_spill] sm:$0xff] }
 0x4e6   :  { %2577 = vmatpush.bf16.msra.mxu0 %v8407_v18  ;;  %2603 = vmatpush.bf16.msra.mxu2 %v8408_v15  ;;  %v8418_v18 = vld [vmem:[#allocation26_spill] sm:$0xff] }
 0x4e7   :  { %2776 = vmatpush.bf16.msrb.mxu3 %v8409_v43  ;;  %2802 = vmatpush.bf16.msra.mxu1 %v8410_v20  ;;  %v8419_v15 = vld [vmem:[#allocation106_spill] sm:$0xff]  ;;  %v8420_v43 = vld [vmem:[#allocation103_spill] sm:$0xff]  ;;  %v8421_v20 = vld [vmem:[#allocation25_spill] sm:$0xff] }
 0x4ea   :  { %2578 = vmatpush.bf16.msra.mxu0 %v8411_v54  ;;  %2604 = vmatpush.bf16.msra.mxu2 %v8412_v47  ;;  %v8422_v54 = vld [vmem:[#allocation47_spill] sm:$0xff]  ;;  %v8423_v47 = vld [vmem:[#allocation28_spill] sm:$0xff] }
 0x4eb   :  { %2777 = vmatpush.bf16.msrb.mxu3 %v8413_v36  ;;  %2803 = vmatpush.bf16.msra.mxu1 %v8414_v35  ;;  %v8424_v36 = vld [vmem:[#allocation108_spill] sm:$0xff]  ;;  %v8425_v35 = vld [vmem:[#allocation107_spill] sm:$0xff] }
 0x4ee   :  { %2579 = vmatpush.bf16.msra.mxu0 %v8415_v53  ;;  %2605 = vmatpush.bf16.msra.mxu2 %v8416_v51  ;;  %v8426_v53 = vld [vmem:[#allocation109_spill] sm:$0xff]  ;;  %v8427_v51 = vld [vmem:[#allocation50_spill] sm:$0xff] }
 0x4ef   :  { %2778 = vmatpush.bf16.msrb.mxu3 %v8417_v32  ;;  %2804 = vmatpush.bf16.msra.mxu1 %v8418_v18  ;;  %v8428_v32 = vld [vmem:[#allocation27_spill] sm:$0xff] }
 0x4f0   :  { %v8436_v18 = vld [vmem:[#allocation59_spill] sm:$0xff] }
 0x4f2   :  { %2580 = vmatpush.bf16.msra.mxu0 %v8419_v15  ;;  %2606 = vmatpush.bf16.msra.mxu2 %v8420_v43  ;;  %v8429_v43 = vld [vmem:[#allocation110_spill] sm:$0xff] }
 0x4f3   :  { %2779 = vmatpush.bf16.msrb.mxu3 %v8421_v20  ;;  %2805 = vmatpush.bf16.msra.mxu1 %v8423_v47  ;;  %v6971_v20 = vpop.f32.mrf.mxu1  ;;  %v8431_v47 = vld [vmem:[#allocation30_spill] sm:$0xff] }
 0x4f6   :  { %2581 = vmatpush.bf16.msra.mxu0 %v8424_v36  ;;  %2607 = vmatpush.bf16.msra.mxu2 %v8425_v35  ;;  %v8432_v36 = vld [vmem:[#allocation113_spill] sm:$0xff]  ;;  %v8433_v35 = vld [vmem:[#allocation56_spill] sm:$0xff] }
 0x4f7   :  { %2824 = vmatpush.bf16.msra.mxu3 %v8422_v54  ;;  %v8430_v54 = vld [vmem:[#allocation53_spill] sm:$0xff] }
 0x4f9   :  { %2582 = vmatmul.bf16.vlgmr.msra.gmra.mxu0 %v6891_v48  ;;  %2608 = vmatmul.bf16.vlgmr.msra.gmra.mxu2 %v6891_v48 }
 0x4fa   :  { %2626 = vmatpush.bf16.msrb.mxu0 %v8426_v53  ;;  %2759 = vmatpush.bf16.msrb.mxu2 %v8428_v32  ;;  %v8434_v53 = vld [vmem:[#allocation32_spill] sm:$0xff] }
 0x4fb   :  { %2825 = vmatpush.bf16.msra.mxu3 %v8427_v51  ;;  %v2414_v51 = vpop.f32.mrf.mxu3  ;;  %v8435_v32 = vld [vmem:[#allocation116_spill] sm:$0xff]  ;;  %v2442_v15 = vpop.f32.mrf.mxu1 }
 0x4fc   :  { %v8444_v15 = vld [vmem:[#allocation124_spill] sm:$0xff] }
 0x4fe   :  { %2627 = vmatpush.bf16.msrb.mxu0 %v8429_v43  ;;  %2760 = vmatpush.bf16.msrb.mxu2 %v8431_v47  ;;  %v8438_v43 = vld [vmem:[#allocation118_spill] sm:$0xff] }
 0x4ff   :  { %2826 = vmatpush.bf16.msra.mxu3 %v8430_v54  ;;  %v8440_v54 = vld [vmem:[#allocation37_spill] sm:$0xff] }
 0x502   :  { %2628 = vmatpush.bf16.msrb.mxu0 %v8432_v36  ;;  %2761 = vmatpush.bf16.msrb.mxu2 %v8434_v53  ;;  %v8441_v36 = vld [vmem:[#allocation121_spill] sm:$0xff]  ;;  %v8442_v53 = vld [vmem:[#allocation66_spill] sm:$0xff] }
 0x503   :  { %2827 = vmatpush.bf16.msra.mxu3 %v8433_v35  ;;  %v2416_v47 = vpop.f32.mrf.mxu3  ;;  %v6985_v35 = vpop.f32.mrf.mxu1 }
 0x504   :  { %v8448_v47 = vld [vmem:[#allocation29_spill] sm:$0xff] }
 0x506   :  { %2629 = vmatpush.bf16.msrb.mxu0 %v8435_v32  ;;  %2762 = vmatpush.bf16.msrb.mxu2 %v8437_v25  ;;  %v8446_v25 = vld [vmem:[#allocation41_spill] sm:$0xff] }
 0x507   :  { %2828 = vmatpush.bf16.msra.mxu3 %v8436_v18  ;;  %v8445_v18 = vld [vmem:[#allocation70_spill] sm:$0xff]  ;;  %v8450_v32 = vld [vmem:[#allocation45_spill] sm:$0xff] }
 0x50a   :  { %2630 = vmatpush.bf16.msrb.mxu0 %v8438_v43  ;;  %2763 = vmatpush.bf16.msrb.mxu2 %v8440_v54 }
 0x50b   :  { %2829 = vmatpush.bf16.msra.mxu3 %v8439_v10  ;;  %v6992_v43 = vpop.f32.mrf.mxu3  ;;  %v8447_v10 = vld [vmem:[#allocation127_spill] sm:$0xff]  ;;  %v2494_v54 = vpop.f32.mrf.mxu1 }
 0x50c   :  { %v8455_v54 = vld [vmem:[#allocation34_spill] sm:$0xff] }
 0x50e   :  { %2631 = vmatpush.bf16.msrb.mxu0 %v8441_v36  ;;  %2764 = vmatpush.bf16.msrb.mxu2 %v8443_v23  ;;  %v8449_v36 = vld [vmem:[#allocation44_spill] sm:$0xff]  ;;  %v8451_v23 = vld [vmem:[#allocation31_spill] sm:$0xff] }
 0x50f   :  { %2830 = vmatpush.bf16.msra.mxu3 %v8442_v53  ;;  %v8452_v53 = vld [vmem:[#allocation48_spill] sm:$0xff] }
 0x512   :  { %2632 = vmatpush.bf16.msrb.mxu0 %v8444_v15  ;;  %2765 = vmatpush.bf16.msrb.mxu2 %v8446_v25  ;;  %v8453_v25 = vld [vmem:[#allocation33_spill] sm:$0xff] }
 0x513   :  { %2831 = vmatpush.bf16.msra.mxu3 %v8445_v18  ;;  %v2468_v15 = vpop.f32.mrf.mxu3  ;;  %v7001_v18 = vpop.f32.mrf.mxu1 }
 0x514   :  { %v8459_v15 = vld [vmem:[#allocation38_spill] sm:$0xff] }
 0x516   :  { %2633 = vmatpush.bf16.msrb.mxu0 %v8447_v10  ;;  %2766 = vmatpush.bf16.msrb.mxu2 %v8449_v36  ;;  %v8456_v36 = vld [vmem:[#allocation54_spill] sm:$0xff]  ;;  %v8457_v10 = vld [vmem:[#allocation36_spill] sm:$0xff] }
 0x519   :  { %2634 = vmatmul.bf16.vlgmr.msrb.gmra.mxu0 %v6891_v48  ;;  %v8458_v48 = vld [vmem:[#allocation57_spill] sm:$0xff] }
 0x51a   :  { %2785 = vmatpush.bf16.msra.mxu0 %v8448_v47  ;;  %2811 = vmatpush.bf16.msra.mxu2 %v8450_v32 }
 0x51b   :  { %v7006_v47 = vpop.f32.mrf.mxu3  ;;  %v2546_v32 = vpop.f32.mrf.mxu1 }
 0x51c   :  { %v4290_v32 = vld [vmem:[%s7561_s0 + $0x3c] sm:$0xff] }
 0x51e   :  { %2786 = vmatpush.bf16.msra.mxu0 %v8451_v23  ;;  %2812 = vmatpush.bf16.msra.mxu2 %v8452_v53  ;;  %v8460_v23 = vld [vmem:[#allocation60_spill] sm:$0xff] }
 0x522   :  { %2787 = vmatpush.bf16.msra.mxu0 %v8453_v25  ;;  %2813 = vmatpush.bf16.msra.mxu2 %v8454_v19  ;;  %v8462_v25 = vld [vmem:[#allocation63_spill] sm:$0xff]  ;;  %v8463_v19 = vld [vmem:[#allocation42_spill] sm:$0xff] }
 0x523   :  { %v2520_v53 = vpop.f32.mrf.mxu3 }
 0x524   :  { %v2694_v53 = vunpack.c.l.bf16 %v4290_v32 }
 0x526   :  { %2788 = vmatpush.bf16.msra.mxu0 %v8455_v54  ;;  %2814 = vmatpush.bf16.msra.mxu2 %v8456_v36  ;;  %v8464_v54 = vld [vmem:[#allocation43_spill] sm:$0xff]  ;;  %v8468_v36 = vld [vmem:[#allocation52_spill] sm:$0xff] }
 0x52a   :  { %2789 = vmatpush.bf16.msra.mxu0 %v8457_v10  ;;  %2815 = vmatpush.bf16.msra.mxu2 %v8458_v48  ;;  %v8466_v48 = vld [vmem:[#allocation46_spill] sm:$0xff]  ;;  %v8467_v10 = vld [vmem:[#allocation49_spill] sm:$0xff] }
 0x52e   :  { %2790 = vmatpush.bf16.msra.mxu0 %v8459_v15  ;;  %2816 = vmatpush.bf16.msra.mxu2 %v8460_v23 }
 0x532   :  { %2791 = vmatpush.bf16.msra.mxu0 %v8461_v26  ;;  %2817 = vmatpush.bf16.msra.mxu2 %v8462_v25  ;;  %v7022_v15 = vpop.f32.mrf.mxu1 }
 0x536   :  { %2792 = vmatpush.bf16.msra.mxu0 %v8463_v19  ;;  %2818 = vmatpush.bf16.msra.mxu2 %v8465_v59  ;;  %v2427_v23 = vpop.f32.mrf.mxu0  ;;  %v2695_v59 = vunpack.c.h.bf16 %v4290_v32  ;;  %v8471_v32 = vld [vmem:[#allocation61_spill] sm:$0xff] }
 0x537   :  { %v2428_v26 = vadd.f32 %v2427_v23, %v2414_v51 }
 0x539   :  { %v2697_v25 = vadd.f32 %v2694_v53, %v2428_v26 }
 0x53a   :  { %2837 = vmatpush.bf16.msrb.mxu0 %v8464_v54  ;;  %v7026_v54 = vpop.f32.mrf.mxu3  ;;  %v2598_v39 = vpop.f32.mrf.mxu1 }
 0x53b   :  { %v4292_v19 = vmul.f32 -1.442695, %v2697_v25 }
 0x53c   :  { %v2453_v60 = vpop.f32.mrf.mxu2 }
 0x53d   :  { %4547 = vpow2.f32 %v4292_v19  ;;  %v2454_v1 = vadd.f32 %v2453_v60, %v6971_v20  ;;  %v8472_v60 = vld [vmem:[#allocation64_spill] sm:$0xff] }
 0x53e   :  { %2838 = vmatpush.bf16.msrb.mxu0 %v8466_v48  ;;  %v2429_v48 = vpop.f32.mrf.mxu0 }
 0x53f   :  { %v2698_v28 = vadd.f32 %v2695_v59, %v2454_v1 }
 0x541   :  { %v4293_v27 = vmul.f32 -1.442695, %v2698_v28 }
 0x542   :  { %2839 = vmatpush.bf16.msrb.mxu0 %v8467_v10  ;;  %v2572_v26 = vpop.f32.mrf.mxu3 }
 0x543   :  { %v4548_v23 = vpop.eup %4547  ;;  %4549 = vpow2.f32 %v4293_v27 }
 0x544   :  { %v2705_v51 = vadd.f32 1.0, %v4548_v23  ;;  %v2455_v25 = vpop.f32.mrf.mxu2  ;;  %v4291_v23 = vld [vmem:[%s7561_s0 + $0x44] sm:$0xf] }
 0x546   :  { %2840 = vmatpush.bf16.msrb.mxu0 %v8468_v36  ;;  %4551 = vrcp.f32 %v2705_v51  ;;  %v2479_v53 = vpop.f32.mrf.mxu0  ;;  %v2718_v48 = vand.u32 2147483648, %v2705_v51  ;;  %v2716_v25 = vand.u32 2147483647, %v2705_v51  ;;  %vm2712_vm9 = vweird.f32 %v2705_v51 }
 0x547   :  { %v2480_v27 = vadd.f32 %v2479_v53, %v6992_v43 }
 0x548   :  { %vm2717_vm11 = vcmp.eq.f32.partialorder %v2716_v25, 8.507059e+37 }
 0x549   :  { %v4550_v19 = vpop.eup %4549  ;;  %v2737_v43 = vadd.f32 %v6825_v17, %v2480_v27 }
 0x54a   :  { %2841 = vmatpush.bf16.msrb.mxu0 %v8469_v56  ;;  %v2706_v36 = vadd.f32 1.0, %v4550_v19  ;;  %v2719_v56 = vor.u32 1.1754944e-38, %v2718_v48 }
 0x54c   :  { %v4552_v39 = vpop.eup %4551  ;;  %4553 = vrcp.f32 %v2706_v36  ;;  %v2505_v20 = vpop.f32.mrf.mxu2  ;;  %vm2727_vm13 = vweird.f32 %v2706_v36 }
 0x54d   :  { %v2708_v1 = vmul.f32 %v4552_v39, %v2705_v51  ;;  %vm2713_vm8 = vweird.f32 %v4552_v39 }
 0x54e   :  { %2842 = vmatpush.bf16.msrb.mxu0 %v8470_v13  ;;  %v2481_v28 = vpop.f32.mrf.mxu0  ;;  %vm2714_vm10 = vmor %vm2712_vm9, %vm2713_vm8 }
 0x54f   :  { %v2709_v59 = vsub.f32 1.0, %v2708_v1 }
 0x551   :  { %v2710_v26 = vmul.f32 %v4552_v39, %v2709_v59 }
 0x552   :  { %2843 = vmatpush.bf16.msrb.mxu0 %v8471_v32  ;;  %v4554_v32 = vpop.eup %4553 }
 0x553   :  { %v2723_v19 = vmul.f32 %v4554_v32, %v2706_v36  ;;  %v2711_v13 = vadd.f32 %v4552_v39, %v2710_v26  ;;  %vm2728_vm12 = vweird.f32 %v4554_v32 }
 0x554   :  { %v2507_v10 = vpop.f32.mrf.mxu2  ;;  %vm2729_vm14 = vmor %vm2727_vm13, %vm2728_vm12 }
 0x555   :  { %v2724_v28 = vsub.f32 1.0, %v2723_v19  ;;  %v2715_v1 = vsel %vm2714_vm10, %v4552_v39, %v2711_v13  ;;  %v2731_v10 = vand.u32 2147483647, %v2706_v36 }
 0x556   :  { %2844 = vmatpush.bf16.msrb.mxu0 %v8472_v60  ;;  %v2696_v60 = vunpack.c.l.bf16 %v4291_v23  ;;  %v2720_v53 = vsel %vm2717_vm11, %v2719_v56, %v2715_v1  ;;  %v2531_v44 = vpop.f32.mrf.mxu0  ;;  %v2733_v23 = vand.u32 2147483648, %v2706_v36 }
 0x557   :  { %v2738_v4 = vmul.f32 %v2737_v43, %v2720_v53  ;;  %v2725_v30 = vmul.f32 %v4554_v32, %v2724_v28  ;;  %vm2732_vm15 = vcmp.eq.f32.partialorder %v2731_v10, 8.507059e+37  ;;  %v2532_v28 = vadd.f32 %v2531_v44, %v7006_v47 }
 0x558   :  { %v2734_v17 = vor.u32 1.1754944e-38, %v2733_v23 }
 0x559   :  { %v2739_v59 = vadd.f32 %v2738_v4, %v2696_v60  ;;  %v2726_v3 = vadd.f32 %v4554_v32, %v2725_v30 }
 0x55b   :  { %v7038_v42 = vpop.f32.mrf.mxu3  ;;  %4555 = vtanh.f32 %v2739_v59  ;;  %v2730_v13 = vsel %vm2729_vm14, %v4554_v32, %v2726_v3 }
 0x55c   :  { %v7040_v51 = vpop.f32.mrf.mxu2  ;;  %v2735_v4 = vsel %vm2732_vm15, %v2734_v17, %v2730_v13 }
 0x55e   :  { %v2533_v48 = vpop.f32.mrf.mxu0 }
 0x561   :  { %v4556_v39 = vpop.eup %4555 }
 0x562   :  { %v2741_v56 = vsub.f32 %v6829_v34, %v4556_v39  ;;  %v2506_v34 = vadd.f32 %v2505_v20, %v6985_v35  ;;  %v2640_v35 = vadd.f32 %v2532_v28, %v6171_v57 }
 0x563   :  { %v2624_v27 = vpop.f32.mrf.mxu3 }
 0x564   :  { %v2742_v60 = vmul.f32 %v2741_v56, %v2735_v4  ;;  %v2559_v26 = vpop.f32.mrf.mxu2  ;;  %v2639_v36 = vadd.f32 %v2506_v34, %v6182_v61 }
 0x566   :  { %v7043_v25 = vadd.f32 %v4556_v39, %v2742_v60  ;;  %v2558_v60 = vadd.f32 %v7040_v51, %v7001_v18 }
 0x568   :  { %v7047_v30 = vpack.c.bf16 %v7043_v25, %v7043_v25 }
 0x56a   :  { %2754 = vmatmul.bf16.vlgmr.msrb.gmra.mxu1 %v7047_v30  ;;  %2780 = vmatmul.bf16.vlgmr.msrb.gmra.mxu3 %v7047_v30 }
 0x56b   :  { %2850 = vmatpush.bf16.msrb.mxu1 %v5523_v40  ;;  %2876 = vmatpush.bf16.msrb.mxu3 %v5525_v16 }
 0x56f   :  { %2851 = vmatpush.bf16.msrb.mxu1 %v5566_v41  ;;  %2877 = vmatpush.bf16.msrb.mxu3 %v8007_v55 }
 0x573   :  { %2852 = vmatpush.bf16.msrb.mxu1 %v8008_v12  ;;  %2878 = vmatpush.bf16.msrb.mxu3 %v8009_v33 }
 0x576   :  { %v2583_v3 = vpop.f32.mrf.mxu0 }
 0x577   :  { %v2584_v32 = vadd.f32 %v2583_v3, %v7026_v54  ;;  %2853 = vmatpush.bf16.msrb.mxu1 %v8010_v38  ;;  %2879 = vmatpush.bf16.msrb.mxu3 %v8011_v45 }
 0x579   :  { %v2642_v19 = vadd.f32 %v2639_v36, %v2584_v32 }
 0x57a   :  { %2806 = vmatmul.bf16.vlgmr.msra.gmra.mxu1 %v7047_v30  ;;  %2832 = vmatmul.bf16.vlgmr.msra.gmra.mxu3 %v7047_v30 }
 0x57b   :  { %v4288_v1 = vmul.f32 -1.442695, %v2642_v19  ;;  %2854 = vmatpush.bf16.msrb.mxu1 %v8012_v0  ;;  %2880 = vmatpush.bf16.msrb.mxu3 %v8013_v24 }
 0x57c   :  { %v2609_v43 = vpop.f32.mrf.mxu2 }
 0x57d   :  { %4557 = vpow2.f32 %v4288_v1  ;;  %v2610_v20 = vadd.f32 %v2609_v43, %v7022_v15  ;;  %v7089_v1 = vld [vmem:[%s7562_s5] ss:$0 sm:$0xff] }
 0x57e   :  { %v2585_v53 = vpop.f32.mrf.mxu0 }
 0x57f   :  { %v2643_v44 = vadd.f32 %v2640_v35, %v2610_v20  ;;  %2855 = vmatpush.bf16.msrb.mxu1 %v8014_v11  ;;  %2881 = vmatpush.bf16.msrb.mxu3 %v8015_v7 }
 0x581   :  { %v4289_v47 = vmul.f32 -1.442695, %v2643_v44 }
 0x583   :  { %v4558_v54 = vpop.eup %4557  ;;  %4559 = vpow2.f32 %v4289_v47  ;;  %2856 = vmatpush.bf16.msrb.mxu1 %v5752_v22  ;;  %2882 = vmatpush.bf16.msrb.mxu3 %v5754_v63 }
 0x584   :  { %v2650_v59 = vadd.f32 1.0, %v4558_v54  ;;  %v2611_v23 = vpop.f32.mrf.mxu2 }
 0x586   :  { %4561 = vrcp.f32 %v2650_v59  ;;  %v2663_v17 = vand.u32 2147483648, %v2650_v59  ;;  %v2661_v27 = vand.u32 2147483647, %v2650_v59  ;;  %vm2657_vm1 = vweird.f32 %v2650_v59 }
 0x587   :  { %2857 = vmatpush.bf16.msrb.mxu1 %v5792_v21  ;;  %2883 = vmatpush.bf16.msrb.mxu3 %v5794_v8 }
 0x588   :  { %v2664_v32 = vor.u32 1.1754944e-38, %v2663_v17  ;;  %vm2662_vm3 = vcmp.eq.f32.partialorder %v2661_v27, 8.507059e+37 }
 0x589   :  { %v4560_v15 = vpop.eup %4559 }
 0x58a   :  { %v2651_v10 = vadd.f32 1.0, %v4560_v15  ;;  %2858 = vmatmul.bf16.vlgmr.msrb.gmra.mxu1 %v7047_v30  ;;  %2884 = vmatmul.bf16.vlgmr.msrb.gmra.mxu3 %v7047_v30 }
 0x58b   :  { %2902 = vmatpush.bf16.msra.mxu1 %v5796_v9  ;;  %2928 = vmatpush.bf16.msra.mxu3 %v5798_v37 }
 0x58c   :  { %v4562_v48 = vpop.eup %4561  ;;  %4563 = vrcp.f32 %v2651_v10  ;;  %v2678_v47 = vand.u32 2147483648, %v2651_v10  ;;  %vm2672_vm5 = vweird.f32 %v2651_v10  ;;  %v2676_v54 = vand.u32 2147483647, %v2651_v10 }
 0x58d   :  { %v2653_v13 = vmul.f32 %v4562_v48, %v2650_v59  ;;  %vm2658_vm0 = vweird.f32 %v4562_v48 }
 0x58e   :  { %vm2659_vm2 = vmor %vm2657_vm1, %vm2658_vm0  ;;  %v2679_v15 = vor.u32 1.1754944e-38, %v2678_v47  ;;  %vm2677_vm7 = vcmp.eq.f32.partialorder %v2676_v54, 8.507059e+37  ;;  %v8493_v47 = vld [vmem:[#allocation74_spill] sm:$0xff] }
 0x58f   :  { %2903 = vmatpush.bf16.msra.mxu1 %v8122_v5  ;;  %2929 = vmatpush.bf16.msra.mxu3 %v8123_v58  ;;  %v2654_v39 = vsub.f32 1.0, %v2653_v13  ;;  %v8473_v13 = vld [vmem:[#allocation125_spill] sm:$0xff]  ;;  %v8494_v54 = vld [vmem:[#allocation134_spill] sm:$0xff] }
 0x591   :  { %v2655_v56 = vmul.f32 %v4562_v48, %v2654_v39  ;;  %v8474_v39 = vld [vmem:[#allocation126_spill] sm:$0xff] }
 0x592   :  { %v4564_v4 = vpop.eup %4563 }
 0x593   :  { %2904 = vmatpush.bf16.msra.mxu1 %v8124_v50  ;;  %2930 = vmatpush.bf16.msra.mxu3 %v8125_v14  ;;  %v2668_v34 = vmul.f32 %v4564_v4, %v2651_v10  ;;  %v2656_v36 = vadd.f32 %v4562_v48, %v2655_v56  ;;  %vm2673_vm4 = vweird.f32 %v4564_v4  ;;  %v8476_v10 = vld [vmem:[#allocation128_spill] sm:$0xff] }
 0x594   :  { %vm2674_vm6 = vmor %vm2672_vm5, %vm2673_vm4 }
 0x595   :  { %v2669_v19 = vsub.f32 1.0, %v2668_v34  ;;  %v2660_v28 = vsel %vm2659_vm2, %v4562_v48, %v2656_v36  ;;  %v8481_v36 = vld [vmem:[#allocation65_spill] sm:$0xff] }
 0x596   :  { %v2635_v26 = vpop.f32.mrf.mxu0  ;;  %v2665_v51 = vsel %vm2662_vm3, %v2664_v32, %v2660_v28  ;;  %v8482_v32 = vld [vmem:[#allocation131_spill] sm:$0xff] }
 0x597   :  { %v2636_v3 = vadd.f32 %v2635_v26, %v7038_v42  ;;  %2905 = vmatpush.bf16.msra.mxu1 %v5887_v62  ;;  %2931 = vmatpush.bf16.msra.mxu3 %v8017_v46  ;;  %v2641_v42 = vadd.f32 %v2558_v60, %v6216_v52  ;;  %v2670_v35 = vmul.f32 %v4564_v4, %v2669_v19  ;;  %v8477_v60 = vld [vmem:[#allocation129_spill] sm:$0xff]  ;;  %v8478_v26 = vld [vmem:[#allocation130_spill] sm:$0xff]  ;;  %v8484_v28 = vld [vmem:[#allocation71_spill] sm:$0xff] }
 0x598   :  { %v8483_v19 = vld [vmem:[#allocation6_spill] sm:$0xff] }
 0x599   :  { %v2682_v18 = vadd.f32 %v7089_v1, %v2636_v3  ;;  %v2671_v44 = vadd.f32 %v4564_v4, %v2670_v35  ;;  %v8480_v3 = vld [vmem:[#allocation68_spill] sm:$0xff] }
 0x59a   :  { %v8489_v35 = vld [vmem:[#allocation72_spill] sm:$0xff] }
 0x59b   :  { %v2683_v43 = vmul.f32 %v2682_v18, %v2665_v51  ;;  %2906 = vmatpush.bf16.msra.mxu1 %v8018_v31  ;;  %2932 = vmatpush.bf16.msra.mxu3 %v8019_v6  ;;  %v2675_v59 = vsel %vm2674_vm6, %v4564_v4, %v2671_v44  ;;  %v8479_v4 = vld [vmem:[#allocation4_spill] sm:$0xff]  ;;  %v8485_v18 = vld [vmem:[#allocation69_spill] sm:$0xff]  ;;  %v8492_v44 = vld [vmem:[#allocation75_spill] sm:$0xff] }
 0x59c   :  { %v2680_v17 = vsel %vm2677_vm7, %v2679_v15, %v2675_v59  ;;  %v8486_v51 = vld [vmem:[#allocation132_spill] sm:$0xff]  ;;  %v8495_v59 = vld [vmem:[#allocation15_spill] sm:$0xff] }
 0x59d   :  { %v2684_v20 = vadd.f32 %v2683_v43, %v2641_v42  ;;  %v8487_v42 = vld [vmem:[#allocation9_spill] sm:$0xff]  ;;  %v8497_v15 = vld [vmem:[#allocation76_spill] sm:$0xff] }
 0x59e   :  { %v2637_v53 = vpop.f32.mrf.mxu0  ;;  %v8488_v43 = vld [vmem:[#allocation73_spill] sm:$0xff] }
 0x59f   :  { %4565 = vtanh.f32 %v2684_v20  ;;  %2907 = vmatpush.bf16.msra.mxu1 %v8020_v2  ;;  %2933 = vmatpush.bf16.msra.mxu3 %v8021_v29  ;;  %v8490_v20 = vld [vmem:[#allocation133_spill] sm:$0xff]  ;;  %v8491_v53 = vld [vmem:[#allocation12_spill] sm:$0xff] }
 0x5a3   :  { %2908 = vmatpush.bf16.msra.mxu1 %v8473_v13  ;;  %2934 = vmatpush.bf16.msra.mxu3 %v8474_v39 }
 0x5a5   :  { %v4566_v23 = vpop.eup %4565 }
 0x5a6   :  { %v2686_v48 = vsub.f32 %v6883_v49, %v4566_v23  ;;  %v8506_v49 = vld [vmem:[#allocation137_spill] sm:$0xff] }
 0x5a7   :  { %2909 = vmatpush.bf16.msra.mxu1 %v8476_v10  ;;  %2935 = vmatpush.bf16.msra.mxu3 %v8477_v60 }
 0x5a8   :  { %v2687_v56 = vmul.f32 %v2686_v48, %v2680_v17  ;;  %v8498_v48 = vld [vmem:[#allocation135_spill] sm:$0xff]  ;;  %v8499_v17 = vld [vmem:[#allocation18_spill] sm:$0xff] }
 0x5aa   :  { %v7102_v27 = vadd.f32 %v4566_v23, %v2687_v56  ;;  %2910 = vmatmul.bf16.vlgmr.msra.gmra.mxu1 %v7047_v30  ;;  %2936 = vmatmul.bf16.vlgmr.msra.gmra.mxu3 %v7047_v30  ;;  %v8496_v23 = vld [vmem:[#allocation77_spill] sm:$0xff]  ;;  %v8500_v56 = vld [vmem:[#allocation79_spill] sm:$0xff] }
 0x5ab   :  { %2954 = vmatpush.bf16.msrb.mxu1 %v8478_v26  ;;  %3087 = vmatpush.bf16.msrb.mxu3 %v8479_v4  ;;  %v8501_v4 = vld [vmem:[#allocation78_spill] sm:$0xff] }
 0x5ac   :  { %8475 = vst [vmem:[#allocation100_spill] sm:$0xff] %v7102_v27  ;;  %v7110_v34 = vpack.c.bf16 %v7102_v27, %v7102_v27 }
 0x5ae   :  { %2767 = vmatmul.bf16.vlgmr.msrb.gmra.mxu2 %v7110_v34  ;;  %2793 = vmatmul.bf16.vlgmr.msra.gmra.mxu0 %v7110_v34 }
 0x5af   :  { %2863 = vmatpush.bf16.msrb.mxu2 %v8480_v3  ;;  %2889 = vmatpush.bf16.msra.mxu0 %v8481_v36  ;;  %v8586_v36 = vld [vmem:[#allocation55_spill] sm:$0xff] }
 0x5b0   :  { %2955 = vmatpush.bf16.msrb.mxu1 %v8482_v32  ;;  %3088 = vmatpush.bf16.msrb.mxu3 %v8483_v19  ;;  %v8502_v19 = vld [vmem:[#allocation136_spill] sm:$0xff] }
 0x5b3   :  { %2864 = vmatpush.bf16.msrb.mxu2 %v8484_v28  ;;  %2890 = vmatpush.bf16.msra.mxu0 %v8485_v18 }
 0x5b4   :  { %2956 = vmatpush.bf16.msrb.mxu1 %v8486_v51  ;;  %3089 = vmatpush.bf16.msrb.mxu3 %v8487_v42  ;;  %v8503_v42 = vld [vmem:[#allocation21_spill] sm:$0xff]  ;;  %v8582_v51 = vld [vmem:[#allocation67_spill] sm:$0xff] }
 0x5b7   :  { %2865 = vmatpush.bf16.msrb.mxu2 %v8488_v43  ;;  %2891 = vmatpush.bf16.msra.mxu0 %v8489_v35  ;;  %v8560_v35 = vld [vmem:[#allocation39_spill] sm:$0xff] }
 0x5b8   :  { %2957 = vmatpush.bf16.msrb.mxu1 %v8490_v20  ;;  %3090 = vmatpush.bf16.msrb.mxu3 %v8491_v53  ;;  %v8504_v53 = vld [vmem:[#allocation81_spill] sm:$0xff]  ;;  %v8571_v43 = vld [vmem:[#allocation51_spill] sm:$0xff] }
 0x5b9   :  { %v8557_v20 = vld [vmem:[#allocation37_spill] sm:$0xff] }
 0x5bb   :  { %2866 = vmatpush.bf16.msrb.mxu2 %v8492_v44  ;;  %2892 = vmatpush.bf16.msra.mxu0 %v8493_v47  ;;  %v8554_v47 = vld [vmem:[#allocation35_spill] sm:$0xff]  ;;  %v8556_v44 = vld [vmem:[#allocation62_spill] sm:$0xff] }
 0x5bc   :  { %2958 = vmatpush.bf16.msrb.mxu1 %v8494_v54  ;;  %3091 = vmatpush.bf16.msrb.mxu3 %v8495_v59  ;;  %v8505_v59 = vld [vmem:[#allocation80_spill] sm:$0xff]  ;;  %v8553_v54 = vld [vmem:[#allocation59_spill] sm:$0xff] }
 0x5be   :  { %2819 = vmatmul.bf16.vlgmr.msra.gmra.mxu2 %v7110_v34  ;;  %2845 = vmatmul.bf16.vlgmr.msrb.gmra.mxu0 %v7110_v34 }
 0x5bf   :  { %2867 = vmatpush.bf16.msrb.mxu2 %v8496_v23  ;;  %2893 = vmatpush.bf16.msra.mxu0 %v8497_v15  ;;  %v8507_v23 = vld [vmem:[#allocation24_spill] sm:$0xff]  ;;  %v8508_v15 = vld [vmem:[#allocation5_spill] sm:$0xff] }
 0x5c0   :  { %2959 = vmatpush.bf16.msrb.mxu1 %v8498_v48  ;;  %3092 = vmatpush.bf16.msrb.mxu3 %v8499_v17  ;;  %v8509_v48 = vld [vmem:[#allocation8_spill] sm:$0xff] }
 0x5c1   :  { %v8510_v17 = vld [vmem:[#allocation84_spill] sm:$0xff] }
 0x5c3   :  { %2868 = vmatpush.bf16.msrb.mxu2 %v8500_v56  ;;  %2894 = vmatpush.bf16.msra.mxu0 %v8501_v4  ;;  %v8511_v56 = vld [vmem:[#allocation82_spill] sm:$0xff]  ;;  %v8552_v4 = vld [vmem:[#allocation116_spill] sm:$0xff] }
 0x5c4   :  { %2960 = vmatpush.bf16.msrb.mxu1 %v8502_v19  ;;  %3093 = vmatpush.bf16.msrb.mxu3 %v8503_v42  ;;  %v8512_v19 = vld [vmem:[#allocation85_spill] sm:$0xff]  ;;  %v8513_v42 = vld [vmem:[#allocation83_spill] sm:$0xff] }
 0x5c7   :  { %2869 = vmatpush.bf16.msrb.mxu2 %v8504_v53  ;;  %2895 = vmatpush.bf16.msra.mxu0 %v8505_v59  ;;  %v8514_v53 = vld [vmem:[#allocation7_spill] sm:$0xff] }
 0x5c8   :  { %2961 = vmatpush.bf16.msrb.mxu1 %v8506_v49  ;;  %3094 = vmatpush.bf16.msrb.mxu3 %v8507_v23  ;;  %v8515_v23 = vld [vmem:[#allocation11_spill] sm:$0xff]  ;;  %v8524_v49 = vld [vmem:[#allocation94_spill] sm:$0xff] }
 0x5c9   :  { %v8525_v59 = vld [vmem:[#allocation91_spill] sm:$0xff] }
 0x5cb   :  { %2870 = vmatpush.bf16.msrb.mxu2 %v8510_v17  ;;  %2896 = vmatpush.bf16.msra.mxu0 %v8511_v56  ;;  %v8518_v17 = vld [vmem:[#allocation10_spill] sm:$0xff] }
 0x5cc   :  { %3113 = vmatpush.bf16.msra.mxu1 %v8508_v15  ;;  %3139 = vmatpush.bf16.msra.mxu3 %v8509_v48  ;;  %v8516_v15 = vld [vmem:[#allocation87_spill] sm:$0xff]  ;;  %v8517_v48 = vld [vmem:[#allocation86_spill] sm:$0xff] }
 0x5cd   :  { %2962 = vmatmul.bf16.vlgmr.msrb.gmra.mxu1 %v7047_v30  ;;  %v8519_v56 = vld [vmem:[#allocation14_spill] sm:$0xff] }
 0x5ce   :  { %2871 = vmatmul.bf16.vlgmr.msrb.gmra.mxu2 %v7110_v34  ;;  %2897 = vmatmul.bf16.vlgmr.msra.gmra.mxu0 %v7110_v34  ;;  %v8520_v30 = vld [vmem:[#allocation90_spill] sm:$0xff] }
 0x5cf   :  { %2915 = vmatpush.bf16.msra.mxu2 %v8512_v19  ;;  %2941 = vmatpush.bf16.msrb.mxu0 %v8513_v42  ;;  %v8521_v19 = vld [vmem:[#allocation88_spill] sm:$0xff]  ;;  %v8522_v42 = vld [vmem:[#allocation13_spill] sm:$0xff] }
 0x5d0   :  { %3114 = vmatpush.bf16.msra.mxu1 %v8514_v53  ;;  %3140 = vmatpush.bf16.msra.mxu3 %v8515_v23  ;;  %v8523_v53 = vld [vmem:[#allocation17_spill] sm:$0xff]  ;;  %v8526_v23 = vld [vmem:[#allocation16_spill] sm:$0xff] }
 0x5d3   :  { %2916 = vmatpush.bf16.msra.mxu2 %v8516_v15  ;;  %2942 = vmatpush.bf16.msrb.mxu0 %v8517_v48  ;;  %v8527_v15 = vld [vmem:[#allocation20_spill] sm:$0xff]  ;;  %v8528_v48 = vld [vmem:[#allocation98_spill] sm:$0xff] }
 0x5d4   :  { %3115 = vmatpush.bf16.msra.mxu1 %v8518_v17  ;;  %3141 = vmatpush.bf16.msra.mxu3 %v8519_v56  ;;  %v8529_v17 = vld [vmem:[#allocation95_spill] sm:$0xff] }
 0x5d5   :  { %v8530_v56 = vld [vmem:[#allocation19_spill] sm:$0xff] }
 0x5d7   :  { %2917 = vmatpush.bf16.msra.mxu2 %v8520_v30  ;;  %2943 = vmatpush.bf16.msrb.mxu0 %v8521_v19  ;;  %v8531_v30 = vld [vmem:[#allocation23_spill] sm:$0xff]  ;;  %v8532_v19 = vld [vmem:[#allocation102_spill] sm:$0xff] }
 0x5d8   :  { %3116 = vmatpush.bf16.msra.mxu1 %v8522_v42  ;;  %3142 = vmatpush.bf16.msra.mxu3 %v8523_v53  ;;  %v8533_v42 = vld [vmem:[#allocation99_spill] sm:$0xff]  ;;  %v8534_v53 = vld [vmem:[#allocation22_spill] sm:$0xff] }
 0x5db   :  { %2918 = vmatpush.bf16.msra.mxu2 %v8524_v49  ;;  %2944 = vmatpush.bf16.msrb.mxu0 %v8525_v59  ;;  %v8535_v49 = vld [vmem:[#allocation26_spill] sm:$0xff] }
 0x5dc   :  { %3117 = vmatpush.bf16.msra.mxu1 %v8526_v23  ;;  %3143 = vmatpush.bf16.msra.mxu3 %v8527_v15  ;;  %v8536_v59 = vld [vmem:[#allocation106_spill] sm:$0xff]  ;;  %v8537_v23 = vld [vmem:[#allocation103_spill] sm:$0xff]  ;;  %v8538_v15 = vld [vmem:[#allocation25_spill] sm:$0xff] }
 0x5df   :  { %2919 = vmatpush.bf16.msra.mxu2 %v8528_v48  ;;  %2945 = vmatpush.bf16.msrb.mxu0 %v8529_v17  ;;  %v8539_v48 = vld [vmem:[#allocation47_spill] sm:$0xff]  ;;  %v8540_v17 = vld [vmem:[#allocation28_spill] sm:$0xff] }
 0x5e0   :  { %3118 = vmatpush.bf16.msra.mxu1 %v8530_v56  ;;  %3144 = vmatpush.bf16.msra.mxu3 %v8531_v30  ;;  %v8541_v56 = vld [vmem:[#allocation108_spill] sm:$0xff]  ;;  %v8542_v30 = vld [vmem:[#allocation107_spill] sm:$0xff] }
 0x5e3   :  { %2920 = vmatpush.bf16.msra.mxu2 %v8532_v19  ;;  %2946 = vmatpush.bf16.msrb.mxu0 %v8533_v42  ;;  %v8543_v19 = vld [vmem:[#allocation109_spill] sm:$0xff]  ;;  %v8544_v42 = vld [vmem:[#allocation50_spill] sm:$0xff] }
 0x5e4   :  { %3119 = vmatpush.bf16.msra.mxu1 %v8534_v53  ;;  %3145 = vmatpush.bf16.msra.mxu3 %v8535_v49  ;;  %v8545_v53 = vld [vmem:[#allocation27_spill] sm:$0xff]  ;;  %v8546_v49 = vld [vmem:[#allocation110_spill] sm:$0xff] }
 0x5e7   :  { %2921 = vmatpush.bf16.msra.mxu2 %v8536_v59  ;;  %2947 = vmatpush.bf16.msrb.mxu0 %v8537_v23  ;;  %v8547_v23 = vld [vmem:[#allocation53_spill] sm:$0xff] }
 0x5e8   :  { %3120 = vmatpush.bf16.msra.mxu1 %v8538_v15  ;;  %3146 = vmatpush.bf16.msra.mxu3 %v8540_v17  ;;  %v2755_v15 = vpop.f32.mrf.mxu1  ;;  %v8548_v17 = vld [vmem:[#allocation30_spill] sm:$0xff] }
 0x5eb   :  { %2922 = vmatpush.bf16.msra.mxu2 %v8541_v56  ;;  %2948 = vmatpush.bf16.msrb.mxu0 %v8542_v30  ;;  %v8549_v56 = vld [vmem:[#allocation113_spill] sm:$0xff]  ;;  %v8550_v30 = vld [vmem:[#allocation56_spill] sm:$0xff] }
 0x5ec   :  { %3165 = vmatpush.bf16.msrb.mxu1 %v8539_v48  ;;  %v8587_v48 = vld [vmem:[#allocation58_spill] sm:$0xff] }
 0x5ed   :  { %v2781_v59 = vpop.f32.mrf.mxu3 }
 0x5ee   :  { %2923 = vmatmul.bf16.vlgmr.msra.gmra.mxu2 %v7110_v34  ;;  %2949 = vmatmul.bf16.vlgmr.msrb.gmra.mxu0 %v7110_v34 }
 0x5ef   :  { %2967 = vmatpush.bf16.msrb.mxu2 %v8543_v19  ;;  %3100 = vmatpush.bf16.msra.mxu0 %v8545_v53  ;;  %v8551_v19 = vld [vmem:[#allocation32_spill] sm:$0xff] }
 0x5f0   :  { %3166 = vmatpush.bf16.msrb.mxu1 %v8544_v42  ;;  %v2757_v53 = vpop.f32.mrf.mxu1 }
 0x5f1   :  { %v8561_v53 = vld [vmem:[#allocation124_spill] sm:$0xff] }
 0x5f3   :  { %2968 = vmatpush.bf16.msrb.mxu2 %v8546_v49  ;;  %3101 = vmatpush.bf16.msra.mxu0 %v8548_v17  ;;  %v8555_v49 = vld [vmem:[#allocation118_spill] sm:$0xff] }
 0x5f4   :  { %3167 = vmatpush.bf16.msrb.mxu1 %v8547_v23  ;;  %v8578_v23 = vld [vmem:[#allocation40_spill] sm:$0xff] }
 0x5f5   :  { %v2783_v17 = vpop.f32.mrf.mxu3 }
 0x5f6   :  { %v8565_v17 = vld [vmem:[#allocation29_spill] sm:$0xff] }
 0x5f7   :  { %2969 = vmatpush.bf16.msrb.mxu2 %v8549_v56  ;;  %3102 = vmatpush.bf16.msra.mxu0 %v8551_v19  ;;  %v8558_v56 = vld [vmem:[#allocation121_spill] sm:$0xff]  ;;  %v8559_v19 = vld [vmem:[#allocation66_spill] sm:$0xff] }
 0x5f8   :  { %3168 = vmatpush.bf16.msrb.mxu1 %v8550_v30  ;;  %v7202_v30 = vpop.f32.mrf.mxu1 }
 0x5fb   :  { %2970 = vmatpush.bf16.msrb.mxu2 %v8552_v4  ;;  %3103 = vmatpush.bf16.msra.mxu0 %v8554_v47  ;;  %v8562_v4 = vld [vmem:[#allocation70_spill] sm:$0xff]  ;;  %v8563_v47 = vld [vmem:[#allocation41_spill] sm:$0xff] }
 0x5fc   :  { %3169 = vmatpush.bf16.msrb.mxu1 %v8553_v54  ;;  %v8567_v54 = vld [vmem:[#allocation45_spill] sm:$0xff] }
 0x5ff   :  { %2971 = vmatpush.bf16.msrb.mxu2 %v8555_v49  ;;  %3104 = vmatpush.bf16.msra.mxu0 %v8557_v20  ;;  %v7209_v49 = vpop.f32.mrf.mxu3 }
 0x600   :  { %3170 = vmatpush.bf16.msrb.mxu1 %v8556_v44  ;;  %v8564_v44 = vld [vmem:[#allocation127_spill] sm:$0xff]  ;;  %v2809_v20 = vpop.f32.mrf.mxu1 }
 0x601   :  { %v8572_v20 = vld [vmem:[#allocation34_spill] sm:$0xff] }
 0x603   :  { %2972 = vmatpush.bf16.msrb.mxu2 %v8558_v56  ;;  %3105 = vmatpush.bf16.msra.mxu0 %v8560_v35  ;;  %v8566_v56 = vld [vmem:[#allocation44_spill] sm:$0xff]  ;;  %v8568_v35 = vld [vmem:[#allocation31_spill] sm:$0xff] }
 0x604   :  { %3171 = vmatpush.bf16.msrb.mxu1 %v8559_v19  ;;  %v8569_v19 = vld [vmem:[#allocation48_spill] sm:$0xff] }
 0x607   :  { %2973 = vmatpush.bf16.msrb.mxu2 %v8561_v53  ;;  %3106 = vmatpush.bf16.msra.mxu0 %v8563_v47  ;;  %v2835_v53 = vpop.f32.mrf.mxu3  ;;  %v8570_v47 = vld [vmem:[#allocation33_spill] sm:$0xff] }
 0x608   :  { %3172 = vmatpush.bf16.msrb.mxu1 %v8562_v4  ;;  %v7218_v4 = vpop.f32.mrf.mxu1 }
 0x60b   :  { %2974 = vmatpush.bf16.msrb.mxu2 %v8564_v44  ;;  %3107 = vmatpush.bf16.msra.mxu0 %v8566_v56  ;;  %v8573_v44 = vld [vmem:[#allocation54_spill] sm:$0xff] }
 0x60e   :  { %2975 = vmatmul.bf16.vlgmr.msrb.gmra.mxu2 %v7110_v34  ;;  %v8575_v34 = vld [vmem:[#allocation57_spill] sm:$0xff] }
 0x60f   :  { %3126 = vmatpush.bf16.msra.mxu2 %v8565_v17  ;;  %3152 = vmatpush.bf16.msrb.mxu0 %v8567_v54  ;;  %v2885_v17 = vpop.f32.mrf.mxu3  ;;  %v8574_v54 = vld [vmem:[#allocation36_spill] sm:$0xff] }
 0x610   :  { %v2861_v56 = vpop.f32.mrf.mxu1 }
 0x611   :  { %v8583_v56 = vld [vmem:[#allocation46_spill] sm:$0xff] }
 0x613   :  { %3127 = vmatpush.bf16.msra.mxu2 %v8568_v35  ;;  %3153 = vmatpush.bf16.msrb.mxu0 %v8569_v19  ;;  %v8576_v35 = vld [vmem:[#allocation38_spill] sm:$0xff]  ;;  %v8577_v19 = vld [vmem:[#allocation60_spill] sm:$0xff] }
 0x617   :  { %3128 = vmatpush.bf16.msra.mxu2 %v8570_v47  ;;  %3154 = vmatpush.bf16.msrb.mxu0 %v8571_v43  ;;  %v2887_v53 = vpop.f32.mrf.mxu3  ;;  %v8579_v47 = vld [vmem:[#allocation63_spill] sm:$0xff]  ;;  %v8580_v43 = vld [vmem:[#allocation42_spill] sm:$0xff] }
 0x618   :  { %v8584_v53 = vld [vmem:[#allocation49_spill] sm:$0xff] }
 0x61b   :  { %3129 = vmatpush.bf16.msra.mxu2 %v8572_v20  ;;  %3155 = vmatpush.bf16.msrb.mxu0 %v8573_v44  ;;  %v8581_v20 = vld [vmem:[#allocation43_spill] sm:$0xff]  ;;  %v4296_v44 = vld [vmem:[%s7561_s0 + $0x48] sm:$0xff] }
 0x61f   :  { %3130 = vmatpush.bf16.msra.mxu2 %v8574_v54  ;;  %3156 = vmatpush.bf16.msrb.mxu0 %v8575_v34  ;;  %v3036_v34 = vunpack.c.h.bf16 %v4296_v44 }
 0x623   :  { %3131 = vmatpush.bf16.msra.mxu2 %v8576_v35  ;;  %3157 = vmatpush.bf16.msrb.mxu0 %v8577_v19 }
 0x627   :  { %3132 = vmatpush.bf16.msra.mxu2 %v8578_v23  ;;  %3158 = vmatpush.bf16.msrb.mxu0 %v8579_v47  ;;  %v7237_v54 = vpop.f32.mrf.mxu1  ;;  %v8585_v47 = vld [vmem:[#allocation52_spill] sm:$0xff] }
 0x62b   :  { %3133 = vmatpush.bf16.msra.mxu2 %v8580_v43  ;;  %3159 = vmatpush.bf16.msrb.mxu0 %v8582_v51  ;;  %v2794_v35 = vpop.f32.mrf.mxu0 }
 0x62c   :  { %v2795_v23 = vadd.f32 %v2794_v35, %v2781_v59 }
 0x62d   :  { %v7241_v43 = vpop.f32.mrf.mxu3 }
 0x62e   :  { %v3039_v19 = vadd.f32 %v3036_v34, %v2795_v23 }
 0x62f   :  { %3178 = vmatpush.bf16.msrb.mxu2 %v8581_v20  ;;  %v3035_v20 = vunpack.c.l.bf16 %v4296_v44  ;;  %v2913_v42 = vpop.f32.mrf.mxu1 }
 0x630   :  { %v4299_v51 = vmul.f32 -1.442695, %v3039_v19  ;;  %v8589_v42 = vld [vmem:[#allocation64_spill] sm:$0xff] }
 0x631   :  { %v2768_v18 = vpop.f32.mrf.mxu2 }
 0x632   :  { %v2769_v28 = vadd.f32 %v2768_v18, %v2755_v15  ;;  %4567 = vpow2.f32 %v4299_v51 }
 0x633   :  { %3179 = vmatpush.bf16.msrb.mxu2 %v8583_v56  ;;  %v2796_v32 = vpop.f32.mrf.mxu0 }
 0x634   :  { %v3038_v56 = vadd.f32 %v3035_v20, %v2769_v28 }
 0x635   :  { %v2939_v59 = vpop.f32.mrf.mxu3 }
 0x636   :  { %v4298_v3 = vmul.f32 -1.442695, %v3038_v56 }
 0x637   :  { %3180 = vmatpush.bf16.msrb.mxu2 %v8584_v53 }
 0x638   :  { %4569 = vpow2.f32 %v4298_v3  ;;  %v4568_v35 = vpop.eup %4567 }
 0x639   :  { %v2770_v34 = vpop.f32.mrf.mxu2  ;;  %v3047_v19 = vadd.f32 1.0, %v4568_v35 }
 0x63b   :  { %3181 = vmatpush.bf16.msrb.mxu2 %v8585_v47  ;;  %v7245_v23 = vpop.f32.mrf.mxu0  ;;  %v8588_v47 = vld [vmem:[#allocation61_spill] sm:$0xff]  ;;  %vm3068_vm13 = vweird.f32 %v3047_v19 }
 0x63e   :  { %v4570_v44 = vpop.eup %4569 }
 0x63f   :  { %3182 = vmatpush.bf16.msrb.mxu2 %v8586_v36  ;;  %v3046_v18 = vadd.f32 1.0, %v4570_v44 }
 0x641   :  { %4571 = vrcp.f32 %v3046_v18  ;;  %v2820_v32 = vpop.f32.mrf.mxu2  ;;  %v3059_v36 = vand.u32 2147483648, %v3046_v18  ;;  %vm3053_vm9 = vweird.f32 %v3046_v18 }
 0x642   :  { %4573 = vrcp.f32 %v3047_v19  ;;  %v2821_v35 = vadd.f32 %v2820_v32, %v7202_v30  ;;  %v7260_v30 = vld [vmem:[%s7560_s3] ss:$0 sm:$0xff] }
 0x643   :  { %3183 = vmatpush.bf16.msrb.mxu2 %v8587_v48  ;;  %v2848_v28 = vpop.f32.mrf.mxu0  ;;  %v3057_v48 = vand.u32 2147483647, %v3046_v18 }
 0x644   :  { %v4297_v28 = vld [vmem:[%s7561_s0 + $0x50] sm:$0xf] }
 0x645   :  { %vm3058_vm11 = vcmp.eq.f32.partialorder %v3057_v48, 8.507059e+37  ;;  %v3072_v48 = vand.u32 2147483647, %v3047_v19 }
 0x647   :  { %3184 = vmatpush.bf16.msrb.mxu2 %v8588_v47  ;;  %v4572_v15 = vpop.eup %4571  ;;  %vm3073_vm15 = vcmp.eq.f32.partialorder %v3072_v48, 8.507059e+37 }
 0x648   :  { %v4574_v20 = vpop.eup %4573  ;;  %v3049_v56 = vmul.f32 %v4572_v15, %v3046_v18  ;;  %vm3054_vm8 = vweird.f32 %v4572_v15 }
 0x649   :  { %v2822_v51 = vpop.f32.mrf.mxu2  ;;  %v3064_v34 = vmul.f32 %v4574_v20, %v3047_v19  ;;  %vm3055_vm10 = vmor %vm3053_vm9, %vm3054_vm8  ;;  %vm3069_vm12 = vweird.f32 %v4574_v20 }
 0x64a   :  { %v7249_v3 = vpop.f32.mrf.mxu1  ;;  %v3050_v59 = vsub.f32 1.0, %v3049_v56  ;;  %v3060_v51 = vor.u32 1.1754944e-38, %v3059_v36  ;;  %v3037_v56 = vunpack.c.l.bf16 %v4297_v28  ;;  %v3074_v36 = vand.u32 2147483648, %v3047_v19  ;;  %vm3070_vm14 = vmor %vm3068_vm13, %vm3069_vm12 }
 0x64b   :  { %3185 = vmatpush.bf16.msrb.mxu2 %v8589_v42  ;;  %v2898_v47 = vpop.f32.mrf.mxu0  ;;  %v3065_v26 = vsub.f32 1.0, %v3064_v34  ;;  %v2847_v19 = vadd.f32 %v7245_v23, %v7209_v49 }
 0x64c   :  { %v3051_v44 = vmul.f32 %v4572_v15, %v3050_v59  ;;  %v7252_v42 = vadd.f32 %v2898_v47, %v2885_v17  ;;  %v3078_v17 = vadd.f32 %v7260_v30, %v2821_v35  ;;  %v3075_v13 = vor.u32 1.1754944e-38, %v3074_v36 }
 0x64d   :  { %v3066_v39 = vmul.f32 %v4574_v20, %v3065_v26 }
 0x64e   :  { %v3052_v53 = vadd.f32 %v4572_v15, %v3051_v44 }
 0x64f   :  { %v3067_v34 = vadd.f32 %v4574_v20, %v3066_v39 }
 0x650   :  { %v3056_v60 = vsel %vm3055_vm10, %v4572_v15, %v3052_v53 }
 0x651   :  { %v3061_v47 = vsel %vm3058_vm11, %v3060_v51, %v3056_v60  ;;  %v2872_v59 = vpop.f32.mrf.mxu2  ;;  %v3071_v15 = vsel %vm3070_vm14, %v4574_v20, %v3067_v34 }
 0x652   :  { %v2965_v32 = vpop.f32.mrf.mxu1  ;;  %v3079_v10 = vmul.f32 %v3078_v17, %v3061_v47  ;;  %v3076_v35 = vsel %vm3073_vm15, %v3075_v13, %v3071_v15  ;;  %v2873_v39 = vadd.f32 %v2872_v59, %v7218_v4  ;;  %v2980_v4 = vadd.f32 %v2847_v19, %v6182_v61 }
 0x653   :  { %v2900_v44 = vpop.f32.mrf.mxu0 }
 0x654   :  { %v3080_v18 = vadd.f32 %v3079_v10, %v3037_v56 }
 0x656   :  { %4575 = vtanh.f32 %v3080_v18 }
 0x659   :  { %v2874_v53 = vpop.f32.mrf.mxu2 }
 0x65c   :  { %v4576_v28 = vpop.eup %4575 }
 0x65d   :  { %v3082_v60 = vsub.f32 %v7043_v25, %v4576_v28  ;;  %v2981_v25 = vadd.f32 %v2873_v39, %v6171_v57 }
 0x65f   :  { %v3083_v51 = vmul.f32 %v3082_v60, %v3076_v35 }
 0x661   :  { %v7264_v17 = vadd.f32 %v4576_v28, %v3083_v51 }
 0x663   :  { %v7268_v10 = vpack.c.bf16 %v7264_v17, %v7264_v17 }
 0x665   :  { %3095 = vmatmul.bf16.vlgmr.msrb.gmra.mxu3 %v7268_v10  ;;  %3121 = vmatmul.bf16.vlgmr.msra.gmra.mxu1 %v7268_v10 }
 0x666   :  { %3191 = vmatpush.bf16.msrb.mxu3 %v5523_v40  ;;  %3217 = vmatpush.bf16.msra.mxu1 %v5525_v16 }
 0x66a   :  { %3192 = vmatpush.bf16.msrb.mxu3 %v5566_v41  ;;  %3218 = vmatpush.bf16.msra.mxu1 %v8007_v55 }
 0x66b   :  { %v2950_v26 = vpop.f32.mrf.mxu0 }
 0x66c   :  { %v2951_v13 = vadd.f32 %v2950_v26, %v7241_v43 }
 0x66e   :  { %v2984_v20 = vadd.f32 %v2981_v25, %v2951_v13  ;;  %3193 = vmatpush.bf16.msrb.mxu3 %v8008_v12  ;;  %3219 = vmatpush.bf16.msra.mxu1 %v8009_v33 }
 0x670   :  { %v4295_v47 = vmul.f32 -1.442695, %v2984_v20 }
 0x671   :  { %v2924_v56 = vpop.f32.mrf.mxu2 }
 0x672   :  { %v2925_v32 = vadd.f32 %v2924_v56, %v7237_v54  ;;  %3194 = vmatpush.bf16.msrb.mxu3 %v8010_v38  ;;  %3220 = vmatpush.bf16.msra.mxu1 %v8011_v45  ;;  %4577 = vpow2.f32 %v4295_v47  ;;  %v2982_v47 = vadd.f32 %v7252_v42, %v6216_v52  ;;  %v8626_v52 = vld [vmem:[#allocation82_spill] sm:$0xff] }
 0x673   :  { %v2952_v43 = vpop.f32.mrf.mxu0 }
 0x674   :  { %v2983_v59 = vadd.f32 %v2980_v4, %v2925_v32 }
 0x675   :  { %3147 = vmatmul.bf16.vlgmr.msra.gmra.mxu3 %v7268_v10  ;;  %3173 = vmatmul.bf16.vlgmr.msrb.gmra.mxu1 %v7268_v10 }
 0x676   :  { %v4294_v44 = vmul.f32 -1.442695, %v2983_v59  ;;  %3195 = vmatpush.bf16.msrb.mxu3 %v8012_v0  ;;  %3221 = vmatpush.bf16.msra.mxu1 %v8013_v24 }
 0x678   :  { %4579 = vpow2.f32 %v4294_v44  ;;  %v4578_v23 = vpop.eup %4577 }
 0x679   :  { %v2926_v49 = vpop.f32.mrf.mxu2  ;;  %v2992_v18 = vadd.f32 1.0, %v4578_v23 }
 0x67a   :  { %3196 = vmatpush.bf16.msrb.mxu3 %v8014_v11  ;;  %3222 = vmatpush.bf16.msra.mxu1 %v8015_v7 }
 0x67b   :  { %v3019_v49 = vand.u32 2147483648, %v2992_v18  ;;  %vm3013_vm5 = vweird.f32 %v2992_v18 }
 0x67e   :  { %v4580_v54 = vpop.eup %4579  ;;  %3197 = vmatpush.bf16.msrb.mxu3 %v5752_v22  ;;  %3223 = vmatpush.bf16.msra.mxu1 %v5754_v63 }
 0x67f   :  { %v2991_v34 = vadd.f32 1.0, %v4580_v54  ;;  %v3020_v54 = vor.u32 1.1754944e-38, %v3019_v49  ;;  %v8610_v49 = vld [vmem:[#allocation74_spill] sm:$0xff] }
 0x681   :  { %4581 = vrcp.f32 %v2991_v34  ;;  %v3004_v28 = vand.u32 2147483648, %v2991_v34  ;;  %v3002_v51 = vand.u32 2147483647, %v2991_v34  ;;  %vm2998_vm1 = vweird.f32 %v2991_v34 }
 0x682   :  { %4583 = vrcp.f32 %v2992_v18  ;;  %3198 = vmatpush.bf16.msrb.mxu3 %v5792_v21  ;;  %3224 = vmatpush.bf16.msra.mxu1 %v5794_v8 }
 0x683   :  { %v3005_v13 = vor.u32 1.1754944e-38, %v3004_v28  ;;  %vm3003_vm3 = vcmp.eq.f32.partialorder %v3002_v51, 8.507059e+37  ;;  %v8595_v51 = vld [vmem:[#allocation130_spill] sm:$0xff] }
 0x685   :  { %3199 = vmatmul.bf16.vlgmr.msrb.gmra.mxu3 %v7268_v10  ;;  %3225 = vmatmul.bf16.vlgmr.msra.gmra.mxu1 %v7268_v10 }
 0x686   :  { %3243 = vmatpush.bf16.msra.mxu3 %v5796_v9  ;;  %3269 = vmatpush.bf16.msrb.mxu1 %v5798_v37 }
 0x687   :  { %v4582_v36 = vpop.eup %4581 }
 0x688   :  { %v2994_v48 = vmul.f32 %v4582_v36, %v2991_v34  ;;  %v4584_v53 = vpop.eup %4583  ;;  %vm2999_vm0 = vweird.f32 %v4582_v36 }
 0x689   :  { %v3009_v60 = vmul.f32 %v4584_v53, %v2992_v18  ;;  %vm3000_vm2 = vmor %vm2998_vm1, %vm2999_vm0  ;;  %vm3014_vm4 = vweird.f32 %v4584_v53 }
 0x68a   :  { %3244 = vmatpush.bf16.msra.mxu3 %v8122_v5  ;;  %3270 = vmatpush.bf16.msrb.mxu1 %v8123_v58  ;;  %v2995_v15 = vsub.f32 1.0, %v2994_v48  ;;  %vm3015_vm6 = vmor %vm3013_vm5, %vm3014_vm4  ;;  %v8591_v48 = vld [vmem:[#allocation126_spill] sm:$0xff] }
 0x68b   :  { %v3010_v19 = vsub.f32 1.0, %v3009_v60 }
 0x68c   :  { %v2996_v35 = vmul.f32 %v4582_v36, %v2995_v15 }
 0x68d   :  { %v3011_v59 = vmul.f32 %v4584_v53, %v3010_v19  ;;  %v8600_v19 = vld [vmem:[#allocation50_spill] sm:$0xff] }
 0x68e   :  { %v2997_v26 = vadd.f32 %v4582_v36, %v2996_v35  ;;  %3245 = vmatpush.bf16.msra.mxu3 %v8124_v50  ;;  %3271 = vmatpush.bf16.msrb.mxu1 %v8125_v14  ;;  %v8594_v35 = vld [vmem:[#allocation129_spill] sm:$0xff] }
 0x690   :  { %v3001_v20 = vsel %vm3000_vm2, %v4582_v36, %v2997_v26  ;;  %v8590_v36 = vld [vmem:[#allocation125_spill] sm:$0xff]  ;;  %v8597_v26 = vld [vmem:[#allocation68_spill] sm:$0xff] }
 0x691   :  { %v2976_v39 = vpop.f32.mrf.mxu2  ;;  %v3006_v56 = vsel %vm3003_vm3, %v3005_v13, %v3001_v20  ;;  %v8599_v13 = vld [vmem:[#allocation131_spill] sm:$0xff] }
 0x692   :  { %v2977_v25 = vadd.f32 %v2976_v39, %v7249_v3  ;;  %3246 = vmatpush.bf16.msra.mxu3 %v5887_v62  ;;  %3272 = vmatpush.bf16.msrb.mxu1 %v8017_v46  ;;  %v3012_v3 = vadd.f32 %v4584_v53, %v3011_v59  ;;  %v8601_v20 = vld [vmem:[#allocation71_spill] sm:$0xff]  ;;  %v8606_v59 = vld [vmem:[#allocation72_spill] sm:$0xff] }
 0x694   :  { %v3023_v4 = vadd.f32 %v7089_v1, %v2977_v25  ;;  %v3017_v1 = vand.u32 2147483647, %v2992_v18  ;;  %v3016_v42 = vsel %vm3015_vm6, %v4584_v53, %v3012_v3  ;;  %v8593_v18 = vld [vmem:[#allocation128_spill] sm:$0xff]  ;;  %v8596_v53 = vld [vmem:[#allocation47_spill] sm:$0xff]  ;;  %v8598_v25 = vld [vmem:[#allocation65_spill] sm:$0xff] }
 0x695   :  { %v8609_v3 = vld [vmem:[#allocation75_spill] sm:$0xff] }
 0x696   :  { %v3024_v32 = vmul.f32 %v3023_v4, %v3006_v56  ;;  %3247 = vmatpush.bf16.msra.mxu3 %v8018_v31  ;;  %3273 = vmatpush.bf16.msrb.mxu1 %v8019_v6  ;;  %vm3018_vm7 = vcmp.eq.f32.partialorder %v3017_v1, 8.507059e+37  ;;  %v8602_v56 = vld [vmem:[#allocation69_spill] sm:$0xff]  ;;  %v8603_v4 = vld [vmem:[#allocation132_spill] sm:$0xff]  ;;  %v8611_v1 = vld [vmem:[#allocation134_spill] sm:$0xff] }
 0x697   :  { %v3021_v15 = vsel %vm3018_vm7, %v3020_v54, %v3016_v42  ;;  %v8612_v42 = vld [vmem:[#allocation59_spill] sm:$0xff]  ;;  %v8614_v54 = vld [vmem:[#allocation76_spill] sm:$0xff] }
 0x698   :  { %v3025_v43 = vadd.f32 %v3024_v32, %v2982_v47  ;;  %v8604_v47 = vld [vmem:[#allocation53_spill] sm:$0xff] }
 0x699   :  { %v2978_v44 = vpop.f32.mrf.mxu2  ;;  %v8605_v32 = vld [vmem:[#allocation73_spill] sm:$0xff] }
 0x69a   :  { %4585 = vtanh.f32 %v3025_v43  ;;  %3248 = vmatpush.bf16.msra.mxu3 %v8020_v2  ;;  %3274 = vmatpush.bf16.msrb.mxu1 %v8021_v29  ;;  %v8607_v43 = vld [vmem:[#allocation133_spill] sm:$0xff]  ;;  %v8608_v44 = vld [vmem:[#allocation56_spill] sm:$0xff] }
 0x69e   :  { %3249 = vmatpush.bf16.msra.mxu3 %v8590_v36  ;;  %3275 = vmatpush.bf16.msrb.mxu1 %v8591_v48 }
 0x6a0   :  { %v4586_v23 = vpop.eup %4585 }
 0x6a1   :  { %v3027_v34 = vsub.f32 %v7102_v27, %v4586_v23  ;;  %v8623_v27 = vld [vmem:[#allocation137_spill] sm:$0xff] }
 0x6a2   :  { %3250 = vmatpush.bf16.msra.mxu3 %v8593_v18  ;;  %3276 = vmatpush.bf16.msrb.mxu1 %v8594_v35  ;;  %v8627_v35 = vld [vmem:[#allocation85_spill] sm:$0xff] }
 0x6a3   :  { %v3028_v28 = vmul.f32 %v3027_v34, %v3021_v15  ;;  %v8615_v34 = vld [vmem:[#allocation135_spill] sm:$0xff]  ;;  %v8616_v15 = vld [vmem:[#allocation62_spill] sm:$0xff] }
 0x6a5   :  { %v7318_v60 = vadd.f32 %v4586_v23, %v3028_v28  ;;  %3251 = vmatmul.bf16.vlgmr.msra.gmra.mxu3 %v7268_v10  ;;  %3277 = vmatmul.bf16.vlgmr.msrb.gmra.mxu1 %v7268_v10  ;;  %v8613_v23 = vld [vmem:[#allocation77_spill] sm:$0xff]  ;;  %v8617_v28 = vld [vmem:[#allocation79_spill] sm:$0xff] }
 0x6a6   :  { %3295 = vmatpush.bf16.msrb.mxu3 %v8595_v51  ;;  %3428 = vmatpush.bf16.msra.mxu1 %v8596_v53  ;;  %v8618_v53 = vld [vmem:[#allocation78_spill] sm:$0xff] }
 0x6a7   :  { %8592 = vst [vmem:[#allocation101_spill] sm:$0xff] %v7318_v60  ;;  %v7326_v39 = vpack.c.bf16 %v7318_v60, %v7318_v60  ;;  %v8624_v60 = vld [vmem:[#allocation70_spill] sm:$0xff] }
 0x6a9   :  { %3108 = vmatmul.bf16.vlgmr.msra.gmra.mxu0 %v7326_v39  ;;  %3134 = vmatmul.bf16.vlgmr.msra.gmra.mxu2 %v7326_v39 }
 0x6aa   :  { %3204 = vmatpush.bf16.msra.mxu0 %v8597_v26  ;;  %3230 = vmatpush.bf16.msra.mxu2 %v8598_v25 }
 0x6ab   :  { %3296 = vmatpush.bf16.msrb.mxu3 %v8599_v13  ;;  %3429 = vmatpush.bf16.msra.mxu1 %v8600_v19  ;;  %v8619_v19 = vld [vmem:[#allocation136_spill] sm:$0xff] }
 0x6ae   :  { %3205 = vmatpush.bf16.msra.mxu0 %v8601_v20  ;;  %3231 = vmatpush.bf16.msra.mxu2 %v8602_v56 }
 0x6af   :  { %3297 = vmatpush.bf16.msrb.mxu3 %v8603_v4  ;;  %3430 = vmatpush.bf16.msra.mxu1 %v8604_v47  ;;  %v8620_v47 = vld [vmem:[#allocation66_spill] sm:$0xff] }
 0x6b2   :  { %3206 = vmatpush.bf16.msra.mxu0 %v8605_v32  ;;  %3232 = vmatpush.bf16.msra.mxu2 %v8606_v59 }
 0x6b3   :  { %3298 = vmatpush.bf16.msrb.mxu3 %v8607_v43  ;;  %3431 = vmatpush.bf16.msra.mxu1 %v8608_v44  ;;  %v8621_v44 = vld [vmem:[#allocation81_spill] sm:$0xff] }
 0x6b6   :  { %3207 = vmatpush.bf16.msra.mxu0 %v8609_v3  ;;  %3233 = vmatpush.bf16.msra.mxu2 %v8610_v49 }
 0x6b7   :  { %3299 = vmatpush.bf16.msrb.mxu3 %v8611_v1  ;;  %3432 = vmatpush.bf16.msra.mxu1 %v8612_v42  ;;  %v8622_v42 = vld [vmem:[#allocation80_spill] sm:$0xff] }
 0x6b9   :  { %3160 = vmatmul.bf16.vlgmr.msrb.gmra.mxu0 %v7326_v39  ;;  %3186 = vmatmul.bf16.vlgmr.msrb.gmra.mxu2 %v7326_v39 }
 0x6ba   :  { %3208 = vmatpush.bf16.msra.mxu0 %v8613_v23  ;;  %3234 = vmatpush.bf16.msra.mxu2 %v8614_v54 }
 0x6bb   :  { %3300 = vmatpush.bf16.msrb.mxu3 %v8615_v34  ;;  %3433 = vmatpush.bf16.msra.mxu1 %v8616_v15  ;;  %v8625_v15 = vld [vmem:[#allocation84_spill] sm:$0xff] }
 0x6be   :  { %3209 = vmatpush.bf16.msra.mxu0 %v8617_v28  ;;  %3235 = vmatpush.bf16.msra.mxu2 %v8618_v53 }
 0x6bf   :  { %3301 = vmatpush.bf16.msrb.mxu3 %v8619_v19  ;;  %3434 = vmatpush.bf16.msra.mxu1 %v8620_v47  ;;  %v8628_v47 = vld [vmem:[#allocation83_spill] sm:$0xff] }
 0x6c2   :  { %3210 = vmatpush.bf16.msra.mxu0 %v8621_v44  ;;  %3236 = vmatpush.bf16.msra.mxu2 %v8622_v42 }
 0x6c3   :  { %3302 = vmatpush.bf16.msrb.mxu3 %v8623_v27  ;;  %3435 = vmatpush.bf16.msra.mxu1 %v8624_v60  ;;  %v8632_v60 = vld [vmem:[#allocation88_spill] sm:$0xff] }
 0x6c6   :  { %3211 = vmatpush.bf16.msra.mxu0 %v8625_v15  ;;  %3237 = vmatpush.bf16.msra.mxu2 %v8626_v52 }
 0x6c7   :  { %3454 = vmatpush.bf16.msra.mxu3 %v5523_v40  ;;  %3480 = vmatpush.bf16.msrb.mxu1 %v5525_v16  ;;  %v8629_v40 = vld [vmem:[#allocation87_spill] sm:$0xff]  ;;  %v8630_v16 = vld [vmem:[#allocation86_spill] sm:$0xff] }
 0x6c8   :  { %3303 = vmatmul.bf16.vlgmr.msrb.gmra.mxu3 %v7268_v10  ;;  %v8631_v10 = vld [vmem:[#allocation90_spill] sm:$0xff] }
 0x6c9   :  { %3212 = vmatmul.bf16.vlgmr.msra.gmra.mxu0 %v7326_v39  ;;  %3238 = vmatmul.bf16.vlgmr.msra.gmra.mxu2 %v7326_v39 }
 0x6ca   :  { %3256 = vmatpush.bf16.msrb.mxu0 %v8627_v35  ;;  %3282 = vmatpush.bf16.msrb.mxu2 %v8628_v47  ;;  %v8634_v47 = vld [vmem:[#allocation91_spill] sm:$0xff] }
 0x6cb   :  { %3455 = vmatpush.bf16.msra.mxu3 %v5566_v41  ;;  %3481 = vmatpush.bf16.msrb.mxu1 %v8007_v55  ;;  %v8633_v41 = vld [vmem:[#allocation94_spill] sm:$0xff] }
 0x6cc   :  { %v8635_v55 = vld [vmem:[#allocation98_spill] sm:$0xff] }
 0x6ce   :  { %3257 = vmatpush.bf16.msrb.mxu0 %v8629_v40  ;;  %3283 = vmatpush.bf16.msrb.mxu2 %v8630_v16 }
 0x6cf   :  { %3456 = vmatpush.bf16.msra.mxu3 %v8008_v12  ;;  %3482 = vmatpush.bf16.msrb.mxu1 %v8009_v33  ;;  %v8636_v12 = vld [vmem:[#allocation95_spill] sm:$0xff]  ;;  %v8637_v33 = vld [vmem:[#allocation102_spill] sm:$0xff] }
 0x6d2   :  { %3258 = vmatpush.bf16.msrb.mxu0 %v8631_v10  ;;  %3284 = vmatpush.bf16.msrb.mxu2 %v8632_v60 }
 0x6d3   :  { %3457 = vmatpush.bf16.msra.mxu3 %v8010_v38  ;;  %3483 = vmatpush.bf16.msrb.mxu1 %v8011_v45  ;;  %v8638_v38 = vld [vmem:[#allocation99_spill] sm:$0xff]  ;;  %v8639_v45 = vld [vmem:[#allocation106_spill] sm:$0xff] }
 0x6d6   :  { %3259 = vmatpush.bf16.msrb.mxu0 %v8633_v41  ;;  %3285 = vmatpush.bf16.msrb.mxu2 %v8634_v47  ;;  %v8653_v47 = vld [vmem:[#allocation121_spill] sm:$0xff] }
 0x6d7   :  { %3458 = vmatpush.bf16.msra.mxu3 %v8012_v0  ;;  %3484 = vmatpush.bf16.msrb.mxu1 %v8013_v24  ;;  %v8640_v0 = vld [vmem:[#allocation103_spill] sm:$0xff]  ;;  %v8641_v24 = vld [vmem:[#allocation108_spill] sm:$0xff] }
 0x6da   :  { %3260 = vmatpush.bf16.msrb.mxu0 %v8635_v55  ;;  %3286 = vmatpush.bf16.msrb.mxu2 %v8636_v12  ;;  %v8651_v12 = vld [vmem:[#allocation118_spill] sm:$0xff] }
 0x6db   :  { %3459 = vmatpush.bf16.msra.mxu3 %v8014_v11  ;;  %3485 = vmatpush.bf16.msrb.mxu1 %v8015_v7  ;;  %v8642_v11 = vld [vmem:[#allocation107_spill] sm:$0xff]  ;;  %v8643_v7 = vld [vmem:[#allocation109_spill] sm:$0xff] }
 0x6de   :  { %3261 = vmatpush.bf16.msrb.mxu0 %v8637_v33  ;;  %3287 = vmatpush.bf16.msrb.mxu2 %v8638_v38  ;;  %v8650_v38 = vld [vmem:[#allocation52_spill] sm:$0xff] }
 0x6df   :  { %3460 = vmatpush.bf16.msra.mxu3 %v5752_v22  ;;  %3486 = vmatpush.bf16.msrb.mxu1 %v5754_v63  ;;  %v8644_v22 = vld [vmem:[#allocation43_spill] sm:$0xff]  ;;  %v8645_v63 = vld [vmem:[#allocation110_spill] sm:$0xff] }
 0x6e2   :  { %3262 = vmatpush.bf16.msrb.mxu0 %v8639_v45  ;;  %3288 = vmatpush.bf16.msrb.mxu2 %v8640_v0 }
 0x6e3   :  { %3461 = vmatpush.bf16.msra.mxu3 %v5792_v21  ;;  %3487 = vmatpush.bf16.msrb.mxu1 %v5794_v8  ;;  %v7406_v21 = vpop.f32.mrf.mxu1  ;;  %v8647_v8 = vld [vmem:[#allocation113_spill] sm:$0xff] }
 0x6e6   :  { %3263 = vmatpush.bf16.msrb.mxu0 %v8641_v24  ;;  %3289 = vmatpush.bf16.msrb.mxu2 %v8642_v11  ;;  %v8648_v11 = vld [vmem:[#allocation49_spill] sm:$0xff] }
 0x6e7   :  { %3506 = vmatpush.bf16.msrb.mxu3 %v5796_v9  ;;  %v8646_v9 = vld [vmem:[#allocation46_spill] sm:$0xff] }
 0x6e9   :  { %3264 = vmatmul.bf16.vlgmr.msrb.gmra.mxu0 %v7326_v39  ;;  %3290 = vmatmul.bf16.vlgmr.msrb.gmra.mxu2 %v7326_v39 }
 0x6ea   :  { %3308 = vmatpush.bf16.msra.mxu0 %v8643_v7  ;;  %3441 = vmatpush.bf16.msra.mxu2 %v8644_v22  ;;  %v8649_v22 = vld [vmem:[#allocation116_spill] sm:$0xff] }
 0x6eb   :  { %3507 = vmatpush.bf16.msrb.mxu3 %v8122_v5  ;;  %v3096_v5 = vpop.f32.mrf.mxu3  ;;  %v3124_v0 = vpop.f32.mrf.mxu1 }
 0x6ec   :  { %v8655_v0 = vld [vmem:[#allocation124_spill] sm:$0xff] }
 0x6ee   :  { %3309 = vmatpush.bf16.msra.mxu0 %v8645_v63  ;;  %3442 = vmatpush.bf16.msra.mxu2 %v8646_v9 }
 0x6ef   :  { %3508 = vmatpush.bf16.msrb.mxu3 %v8124_v50  ;;  %v8652_v50 = vld [vmem:[#allocation55_spill] sm:$0xff] }
 0x6f2   :  { %3310 = vmatpush.bf16.msra.mxu0 %v8647_v8  ;;  %3443 = vmatpush.bf16.msra.mxu2 %v8648_v11  ;;  %v8654_v11 = vld [vmem:[#allocation58_spill] sm:$0xff] }
 0x6f3   :  { %3509 = vmatpush.bf16.msrb.mxu3 %v5887_v62  ;;  %v3098_v9 = vpop.f32.mrf.mxu3  ;;  %v7420_v62 = vpop.f32.mrf.mxu1 }
 0x6f4   :  { %v8658_v9 = vld [vmem:[#allocation64_spill] sm:$0xff] }
 0x6f6   :  { %3311 = vmatpush.bf16.msra.mxu0 %v8649_v22  ;;  %3444 = vmatpush.bf16.msra.mxu2 %v8650_v38 }
 0x6f7   :  { %3510 = vmatpush.bf16.msrb.mxu3 %v8018_v31  ;;  %v8656_v31 = vld [vmem:[#allocation61_spill] sm:$0xff] }
 0x6fa   :  { %3312 = vmatpush.bf16.msra.mxu0 %v8651_v12  ;;  %3445 = vmatpush.bf16.msra.mxu2 %v8652_v50 }
 0x6fb   :  { %3511 = vmatpush.bf16.msrb.mxu3 %v8020_v2  ;;  %v7427_v38 = vpop.f32.mrf.mxu3  ;;  %v8657_v2 = vld [vmem:[#allocation127_spill] sm:$0xff]  ;;  %v3176_v50 = vpop.f32.mrf.mxu1 }
 0x6fe   :  { %3313 = vmatpush.bf16.msra.mxu0 %v8653_v47  ;;  %3446 = vmatpush.bf16.msra.mxu2 %v8654_v11 }
 0x6ff   :  { %3512 = vmatpush.bf16.msrb.mxu3 %v8590_v36 }
 0x702   :  { %3314 = vmatpush.bf16.msra.mxu0 %v8655_v0  ;;  %3447 = vmatpush.bf16.msra.mxu2 %v8656_v31 }
 0x703   :  { %3513 = vmatpush.bf16.msrb.mxu3 %v8593_v18  ;;  %v3150_v36 = vpop.f32.mrf.mxu3  ;;  %v7436_v18 = vpop.f32.mrf.mxu1 }
 0x706   :  { %3315 = vmatpush.bf16.msra.mxu0 %v8657_v2  ;;  %3448 = vmatpush.bf16.msra.mxu2 %v8658_v9 }
 0x709   :  { %3316 = vmatmul.bf16.vlgmr.msra.gmra.mxu0 %v7326_v39 }
 0x70a   :  { %3467 = vmatpush.bf16.msrb.mxu0 %v8597_v26  ;;  %3493 = vmatpush.bf16.msrb.mxu2 %v8598_v25 }
 0x70b   :  { %v7441_v26 = vpop.f32.mrf.mxu3  ;;  %v3228_v25 = vpop.f32.mrf.mxu1 }
 0x70e   :  { %3468 = vmatpush.bf16.msrb.mxu0 %v8601_v20  ;;  %3494 = vmatpush.bf16.msrb.mxu2 %v8602_v56  ;;  %v4302_v20 = vld [vmem:[%s7561_s0 + $0x54] sm:$0xff] }
 0x712   :  { %3469 = vmatpush.bf16.msrb.mxu0 %v8605_v32  ;;  %3495 = vmatpush.bf16.msrb.mxu2 %v8606_v59  ;;  %v3376_v32 = vunpack.c.l.bf16 %v4302_v20 }
 0x713   :  { %v3202_v39 = vpop.f32.mrf.mxu3 }
 0x716   :  { %3470 = vmatpush.bf16.msrb.mxu0 %v8609_v3  ;;  %3496 = vmatpush.bf16.msrb.mxu2 %v8610_v49 }
 0x71a   :  { %3471 = vmatpush.bf16.msrb.mxu0 %v8613_v23  ;;  %3497 = vmatpush.bf16.msrb.mxu2 %v8614_v54 }
 0x71e   :  { %3472 = vmatpush.bf16.msrb.mxu0 %v8617_v28  ;;  %3498 = vmatpush.bf16.msrb.mxu2 %v8618_v53 }
 0x722   :  { %3473 = vmatpush.bf16.msrb.mxu0 %v8621_v44  ;;  %3499 = vmatpush.bf16.msrb.mxu2 %v8622_v42  ;;  %v7457_v56 = vpop.f32.mrf.mxu1 }
 0x726   :  { %3474 = vmatpush.bf16.msrb.mxu0 %v8625_v15  ;;  %3500 = vmatpush.bf16.msrb.mxu2 %v8626_v52  ;;  %v3109_v59 = vpop.f32.mrf.mxu0  ;;  %v3377_v52 = vunpack.c.h.bf16 %v4302_v20  ;;  %v4303_v20 = vld [vmem:[%s7561_s0 + $0x5c] sm:$0xf] }
 0x727   :  { %v3110_v3 = vadd.f32 %v3109_v59, %v3096_v5 }
 0x729   :  { %v3379_v49 = vadd.f32 %v3376_v32, %v3110_v3 }
 0x72a   :  { %3519 = vmatpush.bf16.msra.mxu0 %v8627_v35  ;;  %v7461_v35 = vpop.f32.mrf.mxu3  ;;  %v3280_v53 = vpop.f32.mrf.mxu1 }
 0x72b   :  { %v4304_v23 = vmul.f32 -1.442695, %v3379_v49 }
 0x72c   :  { %v3135_v54 = vpop.f32.mrf.mxu2 }
 0x72d   :  { %4587 = vpow2.f32 %v4304_v23  ;;  %v3136_v28 = vadd.f32 %v3135_v54, %v7406_v21 }
 0x72e   :  { %3520 = vmatpush.bf16.msra.mxu0 %v8629_v40  ;;  %v3111_v44 = vpop.f32.mrf.mxu0 }
 0x72f   :  { %v3380_v42 = vadd.f32 %v3377_v52, %v3136_v28 }
 0x731   :  { %v4305_v15 = vmul.f32 -1.442695, %v3380_v42 }
 0x732   :  { %3521 = vmatpush.bf16.msra.mxu0 %v8631_v10  ;;  %v3254_v10 = vpop.f32.mrf.mxu3 }
 0x733   :  { %v4588_v40 = vpop.eup %4587  ;;  %4589 = vpow2.f32 %v4305_v15 }
 0x734   :  { %v3137_v5 = vpop.f32.mrf.mxu2 }
 0x736   :  { %3522 = vmatpush.bf16.msra.mxu0 %v8633_v41  ;;  %v3387_v41 = vadd.f32 1.0, %v4588_v40  ;;  %v3161_v11 = vpop.f32.mrf.mxu0 }
 0x737   :  { %v3162_v39 = vadd.f32 %v3161_v11, %v7427_v38 }
 0x738   :  { %4591 = vrcp.f32 %v3387_v41  ;;  %vm3394_vm9 = vweird.f32 %v3387_v41 }
 0x739   :  { %v4590_v31 = vpop.eup %4589  ;;  %v3419_v38 = vadd.f32 %v7260_v30, %v3162_v39 }
 0x73a   :  { %3523 = vmatpush.bf16.msra.mxu0 %v8635_v55  ;;  %v3388_v50 = vadd.f32 1.0, %v4590_v31 }
 0x73c   :  { %4593 = vrcp.f32 %v3388_v50  ;;  %v3187_v55 = vpop.f32.mrf.mxu2  ;;  %v3415_v11 = vand.u32 2147483648, %v3388_v50  ;;  %vm3409_vm13 = vweird.f32 %v3388_v50  ;;  %v3413_v31 = vand.u32 2147483647, %v3388_v50 }
 0x73e   :  { %3524 = vmatpush.bf16.msra.mxu0 %v8637_v33  ;;  %v4592_v21 = vpop.eup %4591  ;;  %v3163_v36 = vpop.f32.mrf.mxu0  ;;  %v3400_v33 = vand.u32 2147483648, %v3387_v41  ;;  %v3416_v30 = vor.u32 1.1754944e-38, %v3415_v11  ;;  %vm3414_vm15 = vcmp.eq.f32.partialorder %v3413_v31, 8.507059e+37 }
 0x73f   :  { %v3390_v9 = vmul.f32 %v4592_v21, %v3387_v41  ;;  %vm3395_vm8 = vweird.f32 %v4592_v21 }
 0x740   :  { %vm3396_vm10 = vmor %vm3394_vm9, %vm3395_vm8  ;;  %v3401_v23 = vor.u32 1.1754944e-38, %v3400_v33 }
 0x741   :  { %v3391_v25 = vsub.f32 1.0, %v3390_v9 }
 0x742   :  { %3525 = vmatpush.bf16.msra.mxu0 %v8639_v45  ;;  %v3398_v45 = vand.u32 2147483647, %v3387_v41  ;;  %v4594_v59 = vpop.eup %4593 }
 0x743   :  { %v3392_v32 = vmul.f32 %v4592_v21, %v3391_v25  ;;  %v3405_v3 = vmul.f32 %v4594_v59, %v3388_v50  ;;  %vm3410_vm12 = vweird.f32 %v4594_v59 }
 0x744   :  { %v3189_v52 = vpop.f32.mrf.mxu2  ;;  %vm3399_vm11 = vcmp.eq.f32.partialorder %v3398_v45, 8.507059e+37  ;;  %vm3411_vm14 = vmor %vm3409_vm13, %vm3410_vm12 }
 0x745   :  { %v3393_v49 = vadd.f32 %v4592_v21, %v3392_v32  ;;  %v3406_v54 = vsub.f32 1.0, %v3405_v3 }
 0x746   :  { %3526 = vmatpush.bf16.msra.mxu0 %v8641_v24  ;;  %v3378_v24 = vunpack.c.l.bf16 %v4303_v20  ;;  %v3213_v44 = vpop.f32.mrf.mxu0 }
 0x747   :  { %v3397_v28 = vsel %vm3396_vm10, %v4592_v21, %v3393_v49  ;;  %v3407_v15 = vmul.f32 %v4594_v59, %v3406_v54 }
 0x748   :  { %v3402_v53 = vsel %vm3399_vm11, %v3401_v23, %v3397_v28 }
 0x749   :  { %v3420_v42 = vmul.f32 %v3419_v38, %v3402_v53  ;;  %v3408_v5 = vadd.f32 %v4594_v59, %v3407_v15 }
 0x74b   :  { %v3421_v40 = vadd.f32 %v3420_v42, %v3378_v24  ;;  %v7473_v10 = vpop.f32.mrf.mxu3  ;;  %v3412_v21 = vsel %vm3411_vm14, %v4594_v59, %v3408_v5 }
 0x74c   :  { %v7475_v41 = vpop.f32.mrf.mxu2  ;;  %v3417_v39 = vsel %vm3414_vm15, %v3416_v30, %v3412_v21 }
 0x74d   :  { %4595 = vtanh.f32 %v3421_v40  ;;  %v7509_v40 = vld [vmem:[%s7562_s5] ss:$0 sm:$0xff] }
 0x74e   :  { %v3215_v9 = vpop.f32.mrf.mxu0 }
 0x753   :  { %v4596_v36 = vpop.eup %4595  ;;  %v3306_v33 = vpop.f32.mrf.mxu3 }
 0x754   :  { %v3423_v25 = vsub.f32 %v7264_v17, %v4596_v36  ;;  %v3241_v32 = vpop.f32.mrf.mxu2  ;;  %v3188_v17 = vadd.f32 %v3187_v55, %v7420_v62  ;;  %v8659_v55 = vld [vmem:[#allocation129_spill] sm:$0xff] }
 0x755   :  { %v8661_v32 = vld [vmem:[#allocation101_spill] sm:$0xff] }
 0x756   :  { %v3424_v20 = vmul.f32 %v3423_v25, %v3417_v39  ;;  %v3321_v59 = vadd.f32 %v3188_v17, %v6182_v61 }
 0x758   :  { %v3425_v45 = vadd.f32 %v4596_v36, %v3424_v20 }
 0x75a   :  { %v3426_v3 = vpack.c.bf16 %v3425_v45, %v3425_v45  ;;  %3636 = vst [vmem:[%s7564_s9] sm:$0xff] %v3425_v45 }
 0x75c   :  { %3436 = vmatmul.bf16.vlgmr.msra.gmra.mxu1 %v3426_v3  ;;  %3462 = vmatmul.bf16.vlgmr.msra.gmra.mxu3 %v3426_v3 }
 0x75d   :  { %3532 = vmatpush.bf16.msra.mxu1 %v5798_v37  ;;  %3558 = vmatpush.bf16.msra.mxu3 %v8595_v51  ;;  %v3214_v37 = vadd.f32 %v3213_v44, %v7441_v26 }
 0x761   :  { %3533 = vmatpush.bf16.msra.mxu1 %v8123_v58  ;;  %3559 = vmatpush.bf16.msra.mxu3 %v8599_v13 }
 0x765   :  { %3534 = vmatpush.bf16.msra.mxu1 %v8125_v14  ;;  %3560 = vmatpush.bf16.msra.mxu3 %v8603_v4  ;;  %v3322_v14 = vadd.f32 %v3214_v37, %v6171_v57  ;;  %v8664_v37 = vld [vmem:[#allocation95_spill] sm:$0xff] }
 0x766   :  { %v3265_v50 = vpop.f32.mrf.mxu0 }
 0x767   :  { %v3266_v49 = vadd.f32 %v3265_v50, %v7461_v35 }
 0x769   :  { %v3324_v24 = vadd.f32 %v3321_v59, %v3266_v49  ;;  %3535 = vmatpush.bf16.msra.mxu1 %v8017_v46  ;;  %3561 = vmatpush.bf16.msra.mxu3 %v8607_v43  ;;  %v8662_v49 = vld [vmem:[#allocation83_spill] sm:$0xff] }
 0x76b   :  { %v4300_v58 = vmul.f32 -1.442695, %v3324_v24  ;;  %v8663_v24 = vld [vmem:[#allocation91_spill] sm:$0xff] }
 0x76c   :  { %v3291_v51 = vpop.f32.mrf.mxu2  ;;  %3488 = vmatmul.bf16.vlgmr.msrb.gmra.mxu1 %v3426_v3  ;;  %3514 = vmatmul.bf16.vlgmr.msrb.gmra.mxu3 %v3426_v3 }
 0x76d   :  { %4597 = vpow2.f32 %v4300_v58  ;;  %v3292_v13 = vadd.f32 %v3291_v51, %v7457_v56  ;;  %3536 = vmatpush.bf16.msra.mxu1 %v8019_v6  ;;  %3562 = vmatpush.bf16.msra.mxu3 %v8611_v1  ;;  %v8665_v58 = vld [vmem:[#allocation99_spill] sm:$0xff] }
 0x76e   :  { %v3267_v4 = vpop.f32.mrf.mxu0 }
 0x76f   :  { %v3325_v62 = vadd.f32 %v3322_v14, %v3292_v13 }
 0x771   :  { %v4301_v26 = vmul.f32 -1.442695, %v3325_v62  ;;  %3537 = vmatpush.bf16.msra.mxu1 %v8021_v29  ;;  %3563 = vmatpush.bf16.msra.mxu3 %v8615_v34 }
 0x773   :  { %v4598_v46 = vpop.eup %4597  ;;  %4599 = vpow2.f32 %v4301_v26 }
 0x774   :  { %v3332_v43 = vadd.f32 1.0, %v4598_v46  ;;  %v3293_v35 = vpop.f32.mrf.mxu2 }
 0x775   :  { %3538 = vmatpush.bf16.msra.mxu1 %v8591_v48  ;;  %3564 = vmatpush.bf16.msra.mxu3 %v8619_v19  ;;  %v3240_v48 = vadd.f32 %v7475_v41, %v7436_v18  ;;  %v8660_v18 = vld [vmem:[#allocation89_spill] sm:$0xff] }
 0x776   :  { %4601 = vrcp.f32 %v3332_v43  ;;  %v3345_v23 = vand.u32 2147483648, %v3332_v43  ;;  %v3343_v54 = vand.u32 2147483647, %v3332_v43  ;;  %vm3339_vm1 = vweird.f32 %v3332_v43 }
 0x777   :  { %v3323_v41 = vadd.f32 %v3240_v48, %v8660_v18 }
 0x778   :  { %v3346_v44 = vor.u32 1.1754944e-38, %v3345_v23  ;;  %vm3344_vm3 = vcmp.eq.f32.partialorder %v3343_v54, 8.507059e+37 }
 0x779   :  { %v4600_v56 = vpop.eup %4599  ;;  %3539 = vmatpush.bf16.msra.mxu1 %v8659_v55  ;;  %3565 = vmatpush.bf16.msra.mxu3 %v8623_v27 }
 0x77a   :  { %v3333_v6 = vadd.f32 1.0, %v4600_v56 }
 0x77c   :  { %v4602_v1 = vpop.eup %4601  ;;  %4603 = vrcp.f32 %v3333_v6  ;;  %3540 = vmatmul.bf16.vlgmr.msra.gmra.mxu1 %v3426_v3  ;;  %3566 = vmatmul.bf16.vlgmr.msra.gmra.mxu3 %v3426_v3  ;;  %v3360_v30 = vand.u32 2147483648, %v3333_v6  ;;  %vm3354_vm5 = vweird.f32 %v3333_v6  ;;  %v3358_v25 = vand.u32 2147483647, %v3333_v6 }
 0x77d   :  { %v3335_v29 = vmul.f32 %v4602_v1, %v3332_v43  ;;  %vm3340_vm0 = vweird.f32 %v4602_v1 }
 0x77e   :  { %vm3341_vm2 = vmor %vm3339_vm1, %vm3340_vm0  ;;  %v3361_v20 = vor.u32 1.1754944e-38, %v3360_v30  ;;  %vm3359_vm7 = vcmp.eq.f32.partialorder %v3358_v25, 8.507059e+37  ;;  %vm3675_vm0 = vcmask 516096  }
 0x77f   :  { %v3336_v34 = vsub.f32 1.0, %v3335_v29 }
 0x781   :  { %v3337_v52 = vmul.f32 %v4602_v1, %v3336_v34 }
 0x782   :  { %v4604_v28 = vpop.eup %4603 }
 0x783   :  { %v3350_v38 = vmul.f32 %v4604_v28, %v3333_v6  ;;  %v3338_v27 = vadd.f32 %v4602_v1, %v3337_v52  ;;  %vm3355_vm4 = vweird.f32 %v4604_v28 }
 0x784   :  { %vm3356_vm6 = vmor %vm3354_vm5, %vm3355_vm4 }
 0x785   :  { %v3351_v42 = vsub.f32 1.0, %v3350_v38  ;;  %v3342_v15 = vsel %vm3341_vm2, %v4602_v1, %v3338_v27 }
 0x786   :  { %v3317_v19 = vpop.f32.mrf.mxu0  ;;  %v3347_v11 = vsel %vm3344_vm3, %v3346_v44, %v3342_v15 }
 0x787   :  { %v3318_v53 = vadd.f32 %v3317_v19, %v7473_v10  ;;  %v3352_v9 = vmul.f32 %v4604_v28, %v3351_v42 }
 0x789   :  { %v3364_v5 = vadd.f32 %v7509_v40, %v3318_v53  ;;  %v3353_v36 = vadd.f32 %v4604_v28, %v3352_v9 }
 0x78b   :  { %v3365_v31 = vmul.f32 %v3364_v5, %v3347_v11  ;;  %v3357_v33 = vsel %vm3356_vm6, %v4604_v28, %v3353_v36 }
 0x78c   :  { %v3362_v3 = vsel %vm3359_vm7, %v3361_v20, %v3357_v33 }
 0x78d   :  { %v3366_v10 = vadd.f32 %v3365_v31, %v3323_v41 }
 0x78e   :  { %v3319_v21 = vpop.f32.mrf.mxu0 }
 0x78f   :  { %4605 = vtanh.f32 %v3366_v10 }
 0x795   :  { %v4606_v39 = vpop.eup %4605 }
 0x796   :  { %v3368_v45 = vsub.f32 %v8661_v32, %v4606_v39 }
 0x798   :  { %v3369_v17 = vmul.f32 %v3368_v45, %v3362_v3 }
 0x79a   :  { %v7514_v50 = vadd.f32 %v4606_v39, %v3369_v17 }
 0x79c   :  { %v3427_v59 = vpack.c.bf16 %v7514_v50, %v7514_v50 }
 0x79e   :  { %3449 = vmatmul.bf16.vlgmr.msra.gmra.mxu2 %v3427_v59  ;;  %3475 = vmatmul.bf16.vlgmr.msrb.gmra.mxu0 %v3427_v59 }
 0x79f   :  { %3545 = vmatpush.bf16.msra.mxu2 %v8662_v49  ;;  %3571 = vmatpush.bf16.msrb.mxu0 %v8643_v7 }
 0x7a3   :  { %3546 = vmatpush.bf16.msra.mxu2 %v8630_v16  ;;  %3572 = vmatpush.bf16.msrb.mxu0 %v8645_v63  ;;  %v8666_v16 = vld [vmem:[#allocation103_spill] sm:$0xff] }
 0x7a7   :  { %3547 = vmatpush.bf16.msra.mxu2 %v8632_v60  ;;  %3573 = vmatpush.bf16.msrb.mxu0 %v8647_v8  ;;  %v8667_v60 = vld [vmem:[#allocation107_spill] sm:$0xff] }
 0x7ab   :  { %3548 = vmatpush.bf16.msra.mxu2 %v8663_v24  ;;  %3574 = vmatpush.bf16.msrb.mxu0 %v8649_v22 }
 0x7ae   :  { %3501 = vmatmul.bf16.vlgmr.msrb.gmra.mxu2 %v3427_v59  ;;  %3527 = vmatmul.bf16.vlgmr.msra.gmra.mxu0 %v3427_v59 }
 0x7af   :  { %3549 = vmatpush.bf16.msra.mxu2 %v8664_v37  ;;  %3575 = vmatpush.bf16.msrb.mxu0 %v8651_v12 }
 0x7b3   :  { %3550 = vmatpush.bf16.msra.mxu2 %v8665_v58  ;;  %3576 = vmatpush.bf16.msrb.mxu0 %v8653_v47 }
 0x7b7   :  { %3551 = vmatpush.bf16.msra.mxu2 %v8666_v16  ;;  %3577 = vmatpush.bf16.msrb.mxu0 %v8655_v0 }
 0x7bb   :  { %3552 = vmatpush.bf16.msra.mxu2 %v8667_v60  ;;  %3578 = vmatpush.bf16.msrb.mxu0 %v8657_v2 }
 0x7be   :  { %3553 = vmatmul.bf16.vlgmr.msra.gmra.mxu2 %v3427_v59  ;;  %3579 = vmatmul.bf16.vlgmr.msrb.gmra.mxu0 %v3427_v59 }
 0x7d9   :  { %v3437_v7 = vpop.f32.mrf.mxu1 }
 0x7df   :  { %v3463_v63 = vpop.f32.mrf.mxu3 }
 0x7e1   :  { %v3439_v8 = vpop.f32.mrf.mxu1 }
 0x7e7   :  { %v3465_v22 = vpop.f32.mrf.mxu3 }
 0x7e9   :  { %v3489_v51 = vpop.f32.mrf.mxu1 }
 0x7ef   :  { %v3515_v12 = vpop.f32.mrf.mxu3 }
 0x7f1   :  { %v3491_v14 = vpop.f32.mrf.mxu1 }
 0x7f2   :  { %v15_v14 = vstv %s7565_s7 }
 0x7f3   :  { %16 = vst [vmem:[#allocation3] sm:$0x1] %v15_v14 }
 0x7f7   :  { %v3517_v13 = vpop.f32.mrf.mxu3 }
 0x7f8   :  { %v4624_v13 = vmov 0  }
 0x7f9   :  { %v3541_v4 = vpop.f32.mrf.mxu1  ;;  %4454 = vset.pattern.permute.xlu0 %v4624_v13 }
 0x7ff   :  { %v3567_v47 = vpop.f32.mrf.mxu3 }
 0x801   :  { %v3543_v62 = vpop.f32.mrf.mxu1 }
 0x802   :  { %v8669_v62 = vld [vmem:[#allocation97_spill] sm:$0xff] }
 0x807   :  { %v3569_v26 = vpop.f32.mrf.mxu3 }
 0x808   :  { %v8670_v26 = vld [vmem:[#allocation96_spill] sm:$0xff] }
 0x81b   :  { %v3476_v46 = vpop.f32.mrf.mxu0 }
 0x81c   :  { %v3477_v19 = vadd.f32 %v3476_v46, %v3463_v63  ;;  %v8671_v46 = vld [vmem:[#allocation93_spill] sm:$0xff] }
 0x81e   :  { %v3585_v27 = vadd.f32 %v3477_v19, %v6171_v57 }
 0x821   :  { %v3450_v0 = vpop.f32.mrf.mxu2 }
 0x822   :  { %v3451_v35 = vadd.f32 %v3450_v0, %v3437_v7  ;;  %v8672_v0 = vld [vmem:[#allocation92_spill] sm:$0xff] }
 0x823   :  { %v3478_v43 = vpop.f32.mrf.mxu0 }
 0x824   :  { %v3584_v55 = vadd.f32 %v3451_v35, %v6182_v61  ;;  %v3647_v43 = vld [vmem:[%s7566_s6] sm:$0x1] }
 0x829   :  { %v3452_v56 = vpop.f32.mrf.mxu2 }
 0x82b   :  { %v3528_v2 = vpop.f32.mrf.mxu0 }
 0x82c   :  { %v3529_v6 = vadd.f32 %v3528_v2, %v3515_v12 }
 0x82e   :  { %v3587_v1 = vadd.f32 %v3584_v55, %v3529_v6 }
 0x830   :  { %v4306_v29 = vmul.f32 -1.442695, %v3587_v1 }
 0x831   :  { %v3502_v34 = vpop.f32.mrf.mxu2 }
 0x832   :  { %4607 = vpow2.f32 %v4306_v29  ;;  %v3503_v21 = vadd.f32 %v3502_v34, %v3489_v51 }
 0x833   :  { %v3530_v23 = vpop.f32.mrf.mxu0 }
 0x834   :  { %v3586_v20 = vadd.f32 %v3503_v21, %v8660_v18 }
 0x838   :  { %v4608_v52 = vpop.eup %4607 }
 0x839   :  { %v3595_v54 = vadd.f32 1.0, %v4608_v52  ;;  %v3504_v28 = vpop.f32.mrf.mxu2 }
 0x83b   :  { %4609 = vrcp.f32 %v3595_v54  ;;  %v3580_v48 = vpop.f32.mrf.mxu0  ;;  %v3606_v11 = vand.u32 2147483647, %v3595_v54  ;;  %v3608_v41 = vand.u32 2147483648, %v3595_v54  ;;  %vm3602_vm9 = vweird.f32 %v3595_v54 }
 0x83c   :  { %v3581_v31 = vadd.f32 %v3580_v48, %v3567_v47  ;;  %v8668_v47 = vld [vmem:[#allocation100_spill] sm:$0xff] }
 0x83d   :  { %v3609_v30 = vor.u32 1.1754944e-38, %v3608_v41  ;;  %vm3607_vm11 = vcmp.eq.f32.partialorder %v3606_v11, 8.507059e+37 }
 0x83e   :  { %v3627_v57 = vadd.f32 %v7509_v40, %v3581_v31 }
 0x841   :  { %v4610_v38 = vpop.eup %4609  ;;  %v3554_v53 = vpop.f32.mrf.mxu2 }
 0x842   :  { %v3598_v44 = vmul.f32 %v4610_v38, %v3595_v54  ;;  %v3555_v42 = vadd.f32 %v3554_v53, %v3541_v4  ;;  %vm3603_vm8 = vweird.f32 %v4610_v38  ;;  %v3648_v4 = vld [vmem:[#allocation3] sm:$0x1] }
 0x843   :  { %v3582_v15 = vpop.f32.mrf.mxu0  ;;  %vm3604_vm10 = vmor %vm3602_vm9, %vm3603_vm8  ;;  %3651 = vperm.xlu0 %4454, %v3648_v4  }
 0x844   :  { %v3599_v61 = vsub.f32 1.0, %v3598_v44  ;;  %v3588_v5 = vadd.f32 %v3585_v27, %v3555_v42 }
 0x846   :  { %v3600_v9 = vmul.f32 %v4610_v38, %v3599_v61  ;;  %v4307_v10 = vmul.f32 -1.442695, %v3588_v5 }
 0x848   :  { %v3601_v36 = vadd.f32 %v4610_v38, %v3600_v9  ;;  %4611 = vpow2.f32 %v4307_v10 }
 0x849   :  { %v3556_v25 = vpop.f32.mrf.mxu2 }
 0x84a   :  { %v3605_v33 = vsel %vm3604_vm10, %v4610_v38, %v3601_v36 }
 0x84b   :  { %v3610_v39 = vsel %vm3607_vm11, %v3609_v30, %v3605_v33 }
 0x84c   :  { %v3628_v45 = vmul.f32 %v3627_v57, %v3610_v39 }
 0x84e   :  { %v4612_v3 = vpop.eup %4611  ;;  %v3629_v17 = vadd.f32 %v3628_v45, %v3586_v20 }
 0x84f   :  { %v3596_v59 = vadd.f32 1.0, %v4612_v3 }
 0x851   :  { %4613 = vrcp.f32 %v3596_v59  ;;  %v3623_v58 = vand.u32 2147483648, %v3596_v59  ;;  %v3621_v60 = vand.u32 2147483647, %v3596_v59  ;;  %vm3617_vm13 = vweird.f32 %v3596_v59 }
 0x852   :  { %4615 = vtanh.f32 %v3629_v17 }
 0x853   :  { %v3624_v40 = vor.u32 1.1754944e-38, %v3623_v58  ;;  %vm3622_vm15 = vcmp.eq.f32.partialorder %v3621_v60, 8.507059e+37 }
 0x857   :  { %v4614_v49 = vpop.eup %4613 }
 0x858   :  { %v3613_v24 = vmul.f32 %v4614_v49, %v3596_v59  ;;  %vm3618_vm12 = vweird.f32 %v4614_v49  ;;  %v4616_v7 = vpop.eup %4615 }
 0x859   :  { %vm3619_vm14 = vmor %vm3617_vm13, %vm3618_vm12  ;;  %v3631_v18 = vsub.f32 %v7514_v50, %v4616_v7 }
 0x85a   :  { %v3614_v37 = vsub.f32 1.0, %v3613_v24 }
 0x85c   :  { %v3615_v16 = vmul.f32 %v4614_v49, %v3614_v37 }
 0x85e   :  { %v3616_v63 = vadd.f32 %v4614_v49, %v3615_v16 }
 0x860   :  { %v3620_v8 = vsel %vm3619_vm14, %v4614_v49, %v3616_v63 }
 0x861   :  { %v3625_v22 = vsel %vm3622_vm15, %v3624_v40, %v3620_v8 }
 0x862   :  { %v3632_v51 = vmul.f32 %v3631_v18, %v3625_v22 }
 0x864   :  { %v3633_v12 = vadd.f32 %v4616_v7, %v3632_v51 }
 0x866   :  { %4308 = vst [vmem:[%s7564_s9 + $0x8] sm:$0xff] %v3633_v12  ;;  %3663 = vmatpush.xpose.msrb.mxu1 %v3633_v12 }
 0x86a   :  { %3664 = vmatpush.xpose.msrb.mxu1 %v7514_v50 }
 0x86e   :  { %3665 = vmatpush.xpose.msrb.mxu1 %v8661_v32 }
 0x872   :  { %3666 = vmatpush.xpose.msrb.mxu1 %v8668_v47 }
 0x876   :  { %3667 = vmatpush.xpose.msrb.mxu1 %v8669_v62 }
 0x87a   :  { %3668 = vmatpush.xpose.msrb.mxu1 %v8670_v26 }
 0x87e   :  { %3669 = vmatpush.xpose.msrb.mxu1 %v8671_v46 }
 0x882   :  { %3670 = vmatpush.xpose.msrb.mxu1 %v8672_v0 }
 0x885   :  { %3671 = vmatmul.f32.vlgmr.msrb.gmra.mxu1 %v3647_v43 }
 0x8b5   :  { %v3652_v50 = vpop.permute.xlu0 %3651 }
 0x8b6   :  { %v3654_v35 = vperm.slane %v3652_v50, 0 }
 0x902   :  { %v3672_v32 = vpop.f32.mrf.mxu1 }
 0x903   :  { %v3673_v56 = vadd.f32 %v3672_v32, %v3654_v35 }
 0x905   :  { %3676 = vst.msk [vmem:[%s7567_s8] sm:$0x1] %vm3675_vm0, %v3673_v56 }

</bundles_post_ra>
